<compile_context>
chip_gen: v7x
topology: tpu7x:2x2x1
jax: 0.10.0
libtpu: 0.0.40
codegen_flags: <defaults>
</compile_context>

<pallas_src>
import jax
import jax.numpy as jnp
import numpy as np
from jax.experimental import pallas as pl
from jax.experimental.pallas import tpu as pltpu

# ---------------- config (the `args` dict analog) ----------------
EMB_DIM = 32          # arm['emb_dim']
Q_DIM   = 8           # arm['q_dim']
N_HEAD  = 4           # arm['n_head']
HIDDEN  = Q_DIM * N_HEAD      # 32
IAT_DIM = 4           # args['iat_use_name'] == False
WAT_DIM = 6
T_IAT   = 40
T_WAT   = 45
TPAD    = 48          # common padded sequence length (multiple of 16 for bf16)
B       = 16          # batch (matches the docstring shapes)
N_POOL  = 4           # att_iat_1, att_iat_2, att_wat_1, att_wat_2
N_SPLIT = 2           # batch split over the grid (one block per v7x TensorCore)
BB      = B // N_SPLIT
NVS     = HIDDEN + N_HEAD     # 36 lanes: 32 value lanes + 4 per-head score lanes

# packed bf16 parameter slab layout (row offsets, lane-dense 128 columns)
_P_ROWS, _P_COLS = 256, 128
_R_W1  = 0      # rows   0:16  layer-1 projector weights (+ bias row 14)
_R_W2F = 16     # rows  16:80  folded (layer-2 @ logit) weights (2 live lanes)
_R_ATT = 80     # rows  80:112 per-pool fused V+score weights, 8 rows / pool
_R_EXP = 112    # rows 112:120 head-expansion matrix E (4,32)
_R_WOF = 120    # rows 120:248 folded, gated (output-proj @ logit) weights
_R_BF  = 248    # row  248     folded final bias


# ---------------- Pallas kernel ----------------
def iat_fused_kernel(dmg_ref, wsel_ref, iat_ref, mneg_ref, wat_ref, p_ref, out_ref):
    f32  = jnp.float32
    bf16 = jnp.bfloat16

    # ---- fused StackedProjector layer 1 (dmg -> lanes 0:32, wat_select -> 32:64) ----
    w1d = p_ref[_R_W1:_R_W1 + 8, 0:64].astype(f32)          # (8,64), cols 32:64 zero
    w1w = p_ref[_R_W1 + 8:_R_W1 + 14, 0:64].astype(f32)     # (6,64), cols 0:32 zero
    b1  = p_ref[_R_W1 + 14:_R_W1 + 15, 0:64].astype(f32)    # (1,64)
    h = jnp.maximum(
        jnp.dot(dmg_ref[...], w1d, preferred_element_type=f32)
        + jnp.dot(wsel_ref[...], w1w, preferred_element_type=f32) + b1, 0.0)  # (BB,64)

    # ---- tail accumulator: folded (layer-2 @ logit) contribution ----
    acc = jnp.dot(h.astype(bf16), p_ref[_R_W2F:_R_W2F + 64, :],
                  preferred_element_type=f32)                # (BB,128), lanes 0:2 live

    # ---- 4 fused multi-head attention pools (statically unrolled) ----
    E = p_ref[_R_EXP:_R_EXP + N_HEAD, 0:HIDDEN]              # (4,32) bf16 head expansion
    t_idx = jax.lax.broadcasted_iota(jnp.int32, (BB, TPAD, N_HEAD), 1)
    wat_neg = jnp.where(t_idx < T_WAT, jnp.float32(0.0), jnp.float32(-1e9))  # (BB,48,4)

    for pidx in range(N_POOL):
        if pidx < 2:                                         # iat pools
            xf  = iat_ref[pidx]                              # (BB*TPAD, 4) bf16
            neg = mneg_ref[pidx]                             # (BB, TPAD, 1) f32 additive mask
            d   = IAT_DIM
        else:                                                # wat pools (no mask, only pad)
            xf  = wat_ref[pidx - 2]                          # (BB*TPAD, 6) bf16
            neg = wat_neg
            d   = WAT_DIM

        r  = _R_ATT + 8 * pidx
        Wp = p_ref[r:r + d, 0:NVS]                           # (d,36) bf16: [wv | wk@q*scale]
        bp = p_ref[r + 6:r + 7, 0:NVS].astype(f32)           # (1,36): [bv | bk@q*scale]

        vs = jnp.dot(xf, Wp, preferred_element_type=f32) + bp        # (BB*TPAD, 36) f32
        v  = vs[:, 0:HIDDEN]                                          # (BB*TPAD, 32)
        s  = vs[:, HIDDEN:NVS].reshape(BB, TPAD, N_HEAD) + neg        # (BB,48,4)

        m  = jnp.max(s, axis=1, keepdims=True)                        # f32 softmax
        e  = jnp.exp(s - m)
        a  = e / jnp.sum(e, axis=1, keepdims=True)                    # exact division

        a_exp  = jnp.dot(a.reshape(BB * TPAD, N_HEAD).astype(bf16), E,
                         preferred_element_type=f32)                  # (BB*TPAD, 32)
        pooled = jnp.sum((a_exp * v).reshape(BB, TPAD, HIDDEN), axis=1)  # (BB,32)

        wo_f = p_ref[_R_WOF + HIDDEN * pidx:_R_WOF + HIDDEN * (pidx + 1), :]  # (32,128)
        acc = acc + jnp.dot(pooled.astype(bf16), wo_f, preferred_element_type=f32)

    out_ref[...] = acc + p_ref[_R_BF:_R_BF + 1, :].astype(f32)


# ---------------- wrapper-side input prep (pad/transpose/cast only, no scatter) ---
def prepare_inputs(dmg, wsel, iat_emb, iat_mask, wat_emb):
    iat_flat = (jnp.pad(iat_emb, ((0, 0), (0, 0), (0, TPAD - T_IAT), (0, 0)))
                .transpose(1, 0, 2, 3).reshape(2, B * TPAD, IAT_DIM)
                .astype(jnp.bfloat16))                         # (2, B*48, 4)
    wat_flat = (jnp.pad(wat_emb, ((0, 0), (0, 0), (0, TPAD - T_WAT), (0, 0)))
                .transpose(1, 0, 2, 3).reshape(2, B * TPAD, WAT_DIM)
                .astype(jnp.bfloat16))                         # (2, B*48, 6)
    mpad = jnp.pad(iat_mask, ((0, 0), (0, 0), (0, TPAD - T_IAT)))
    mneg = (jnp.where(mpad != 0, 0.0, -1e9).astype(jnp.float32)
            .transpose(1, 0, 2)[..., None])                    # (2, B, 48, 1) additive mask
    return (dmg.astype(jnp.float32), wsel.astype(jnp.float32),
            iat_flat, mneg, wat_flat)


# ---------------- wrapper-side parameter packing (one bf16 slab, one DMA) ----------
def pack_params(params):
    ps = [np.asarray(p, dtype=np.float32) for p in params]
    (pd_w1, pd_b1, pd_w2, pd_b2, pw_w1, pw_b1, pw_w2, pw_b2, *rest) = ps
    att = [rest[i * 7:(i + 1) * 7] for i in range(N_POOL)]   # wk,bk,wv,bv,q,wo,bo
    scal = rest[28]
    lg_w, lg_b = rest[29], rest[30]
    gates, w_s = scal[0, 0:4], scal[0, 4]
    scale = 1.0 / np.sqrt(float(Q_DIM))

    P = np.zeros((_P_ROWS, _P_COLS), np.float32)

    # layer-1 projectors (block-diag) + shared bias row
    P[0:8, 0:32] = pd_w1
    P[8:14, 32:64] = pw_w1
    P[14, 0:32] = pd_b1[0]
    P[14, 32:64] = pw_b1[0]

    # folded layer-2 -> logit weights (w_wat_s gate folded in)
    P[_R_W2F:_R_W2F + 32, 0:2] = pd_w2 @ lg_w
    P[_R_W2F + 32:_R_W2F + 64, 0:2] = w_s * (pw_w2 @ lg_w)

    # per-pool fused V + per-head score weights; gated output proj folded with logit
    for p in range(N_POOL):
        wk, bk, wv, bv, q, wo, bo = att[p]
        d = wk.shape[0]
        r = _R_ATT + 8 * p
        P[r:r + d, 0:HIDDEN] = wv
        P[r + 6, 0:HIDDEN] = bv[0]
        for h in range(N_HEAD):
            P[r:r + d, HIDDEN + h] = (wk[:, Q_DIM * h:Q_DIM * (h + 1)] @ q[h]) * scale
            P[r + 6, HIDDEN + h] = (bk[0, Q_DIM * h:Q_DIM * (h + 1)] @ q[h]) * scale
        P[_R_WOF + 32 * p:_R_WOF + 32 * p + 32, 0:2] = gates[p] * (wo @ lg_w)

    # head-expansion matrix E[h, j] = 1 iff j // Q_DIM == h
    rows = np.arange(N_HEAD)[:, None]
    cols = np.arange(HIDDEN)[None, :]
    P[_R_EXP:_R_EXP + N_HEAD, 0:HIDDEN] = (cols // Q_DIM == rows).astype(np.float32)

    # folded final bias: lg_b + (pd_b2 + w_s*pw_b2 + sum_p gate_p*bo_p) @ lg_w
    c = pd_b2[0] + w_s * pw_b2[0] + sum(gates[p] * att[p][6][0] for p in range(N_POOL))
    P[_R_BF, 0:2] = lg_b[0] + c @ lg_w
    return jnp.asarray(P, dtype=jnp.bfloat16)


# ---------------- pallas_call wrapper ----------------
def iat_forward(dmg, wsel, iat_emb, iat_mask, wat_emb, packed):
    dmg32, wsel32, iat_flat, mneg, wat_flat = prepare_inputs(
        dmg, wsel, iat_emb, iat_mask, wat_emb)
    out = pl.pallas_call(
        iat_fused_kernel,
        out_shape=jax.ShapeDtypeStruct((B, 128), jnp.float32),
        grid=(N_SPLIT,),
        in_specs=[
            pl.BlockSpec((BB, 8), lambda i: (i, 0)),                       # demographics f32
            pl.BlockSpec((BB, WAT_DIM), lambda i: (i, 0)),                 # wat_select  f32
            pl.BlockSpec((2, BB * TPAD, IAT_DIM), lambda i: (0, i, 0)),    # iat seqs   bf16
            pl.BlockSpec((2, BB, TPAD, 1), lambda i: (0, i, 0, 0)),        # iat mask add f32
            pl.BlockSpec((2, BB * TPAD, WAT_DIM), lambda i: (0, i, 0)),    # wat seqs   bf16
            pl.BlockSpec((_P_ROWS, _P_COLS), lambda i: (0, 0)),            # param slab bf16
        ],
        out_specs=pl.BlockSpec((BB, 128), lambda i: (i, 0)),
        compiler_params=pltpu.CompilerParams(
            dimension_semantics=("parallel",)),    # batch split -> both TCs on v7x
    )(dmg32, wsel32, iat_flat, mneg, wat_flat, packed)
    return out[:, :2]


# ---------------- deterministic parameter init (unchanged model) -------------
def init_params(key):
    keys = iter(jax.random.split(key, 64))

    def w(shape, scale=0.1):
        return scale * jax.random.normal(next(keys), shape, dtype=jnp.float32)

    def b(shape):
        return jnp.zeros(shape, dtype=jnp.float32)

    params = []
    # proj_dmgs (in=8 -> EMB), proj_wat_select (in=6 -> EMB)
    params += [w((8, EMB_DIM)), b((1, EMB_DIM)), w((EMB_DIM, EMB_DIM)), b((1, EMB_DIM))]
    params += [w((WAT_DIM, EMB_DIM)), b((1, EMB_DIM)), w((EMB_DIM, EMB_DIM)), b((1, EMB_DIM))]
    # att_iat_1, att_iat_2 (D=4), att_wat_1, att_wat_2 (D=6)
    for d in (IAT_DIM, IAT_DIM, WAT_DIM, WAT_DIM):
        params += [w((d, HIDDEN)), b((1, HIDDEN)),      # key proj
                   w((d, HIDDEN)), b((1, HIDDEN)),      # value proj
                   w((N_HEAD, Q_DIM)),                  # learned per-head query
                   w((HIDDEN, EMB_DIM)), b((1, EMB_DIM))]  # output proj
    # scalar gates w_iat_1/2, w_wat_1/2, w_wat_s init to 1.0 (nn.Parameter(torch.tensor(1.0)))
    params.append(jnp.zeros((1, 8), jnp.float32).at[0, :5].set(1.0))
    # proj_logit
    params += [w((EMB_DIM, 2)), b((1, 2))]
    return params


# ---------------- pure-JAX reference (original per-module math, f32) ---------
def _linear(x, w, bb):
    return jnp.dot(x, w, preferred_element_type=jnp.float32) + bb


def _projector(x, w1, b1, w2, b2):
    return _linear(jnp.maximum(_linear(x, w1, b1), 0.0), w2, b2)


def _attn_pool(x, mask, wk, bk, wv, bv, q, wo, bo):
    bt, t, d = x.shape
    xf = x.reshape(bt * t, d)
    k = _linear(xf, wk, bk).reshape(bt, t, HIDDEN)
    v = _linear(xf, wv, bv).reshape(bt, t, HIDDEN)
    scale = 1.0 / np.sqrt(float(Q_DIM))
    heads = []
    for h in range(N_HEAD):
        kh = k[:, :, h * Q_DIM:(h + 1) * Q_DIM]
        vh = v[:, :, h * Q_DIM:(h + 1) * Q_DIM]
        s = jnp.sum(kh * q[h][None, None, :], axis=-1) * scale
        if mask is not None:
            s = jnp.where(mask != 0, s, -1e9)
        s = s - jnp.max(s, axis=1, keepdims=True)
        e = jnp.exp(s)
        a = e / jnp.sum(e, axis=1, keepdims=True)
        heads.append(jnp.sum(a[:, :, None] * vh, axis=1))
    return _linear(jnp.concatenate(heads, axis=-1), wo, bo)


def reference_forward(dmg, wsel, iat_emb, iat_mask, wat_emb, params):
    (pd_w1, pd_b1, pd_w2, pd_b2,
     pw_w1, pw_b1, pw_w2, pw_b2, *rest) = params
    att = [rest[i * 7:(i + 1) * 7] for i in range(4)]
    scal = rest[28]
    lg_w, lg_b = rest[29], rest[30]

    z_dmgs = _projector(dmg, pd_w1, pd_b1, pd_w2, pd_b2)
    z_wsel = _projector(wsel, pw_w1, pw_b1, pw_w2, pw_b2)
    z_iat_1 = _attn_pool(iat_emb[:, 0], iat_mask[:, 0], *att[0])
    z_iat_2 = _attn_pool(iat_emb[:, 1], iat_mask[:, 1], *att[1])
    z_wat_1 = _attn_pool(wat_emb[:, 0], None, *att[2])
    z_wat_2 = _attn_pool(wat_emb[:, 1], None, *att[3])
    z = (z_dmgs
         + scal[0, 4] * z_wsel
         + scal[0, 0] * z_iat_1 + scal[0, 1] * z_iat_2
         + scal[0, 2] * z_wat_1 + scal[0, 3] * z_wat_2)
    return _linear(z, lg_w, lg_b)


if __name__ == "__main__":
    key = jax.random.PRNGKey(0)
    k_dmg, k_wsel, k_iat, k_mask, k_wat, k_par = jax.random.split(key, 6)

    demographics = jax.random.normal(k_dmg, (B, 8), dtype=jnp.float32)
    wat_select   = jax.random.normal(k_wsel, (B, WAT_DIM), dtype=jnp.float32)
    iat_emb      = jax.random.normal(k_iat, (B, 2, T_IAT, IAT_DIM), dtype=jnp.float32)
    iat_mask     = jax.random.bernoulli(k_mask, 0.8, (B, 2, T_IAT)).astype(jnp.int32)
    iat_mask     = iat_mask.at[:, :, 0].set(1)   # guarantee >=1 valid position per row
    wat_emb      = jax.random.normal(k_wat, (B, 2, T_WAT, WAT_DIM), dtype=jnp.float32)

    params = init_params(k_par)
    packed = pack_params(params)

    fwd = jax.jit(iat_forward)
    logits = fwd(demographics, wat_select, iat_emb, iat_mask, wat_emb, packed)
    logits = jax.block_until_ready(logits)

    ref = reference_forward(demographics, wat_select, iat_emb, iat_mask, wat_emb, params)
    ref = jax.block_until_ready(ref)

    assert logits.shape == (B, 2)
    # bf16 input/parameter storage (perf-review item) loosens parity slightly vs f32 ref
    np.testing.assert_allclose(np.asarray(logits), np.asarray(ref), rtol=2e-2, atol=2e-2)
    print("KERNEL_OK")
</pallas_src>

<mosaic_0001>
module attributes {stable_mosaic.version = 11 : i64} {
  func.func @iat_fused_kernel(%arg0: i32, %arg1: memref<8x8xf32, #tpu.memory_space<vmem>>, %arg2: memref<8x6xf32, #tpu.memory_space<vmem>>, %arg3: memref<2x384x4xbf16, #tpu.memory_space<vmem>>, %arg4: memref<2x8x48x1xf32, #tpu.memory_space<vmem>>, %arg5: memref<2x384x6xbf16, #tpu.memory_space<vmem>>, %arg6: memref<256x128xbf16, #tpu.memory_space<vmem>>, %arg7: memref<8x128xf32, #tpu.memory_space<vmem>>) attributes {dimension_semantics = [#tpu.dimension_semantics<parallel>], iteration_bounds = array<i64: 2>, scalar_prefetch = 0 : i64, scratch_operands = 0 : i64, tpu.core_type = #tpu.core_type<tc>, window_params = [{transform_indices = @transform_0, window_bounds = array<i64: 8, 8>}, {transform_indices = @transform_1, window_bounds = array<i64: 8, 6>}, {transform_indices = @transform_2, window_bounds = array<i64: 2, 384, 4>}, {transform_indices = @transform_3, window_bounds = array<i64: 2, 8, 48, 1>}, {transform_indices = @transform_4, window_bounds = array<i64: 2, 384, 6>}, {pipeline_mode = #tpu.pipeline_mode<synchronous>, transform_indices = @transform_5, window_bounds = array<i64: 256, 128>}, {transform_indices = @transform_6, window_bounds = array<i64: 8, 128>}]} {
    %c0 = arith.constant 0 : index
    %c0_0 = arith.constant 0 : index
    %0 = vector.load %arg6[%c0, %c0_0] : memref<256x128xbf16, #tpu.memory_space<vmem>>, vector<8x64xbf16>
    %1 = arith.extf %0 : vector<8x64xbf16> to vector<8x64xf32>
    %c8 = arith.constant 8 : index
    %c0_1 = arith.constant 0 : index
    %2 = vector.load %arg6[%c8, %c0_1] : memref<256x128xbf16, #tpu.memory_space<vmem>>, vector<6x64xbf16>
    %3 = arith.extf %2 : vector<6x64xbf16> to vector<6x64xf32>
    %c14 = arith.constant 14 : index
    %c0_2 = arith.constant 0 : index
    %4 = vector.load %arg6[%c14, %c0_2] : memref<256x128xbf16, #tpu.memory_space<vmem>>, vector<1x64xbf16>
    %5 = arith.extf %4 : vector<1x64xbf16> to vector<1x64xf32>
    %c0_3 = arith.constant 0 : index
    %c0_4 = arith.constant 0 : index
    %6 = vector.load %arg1[%c0_3, %c0_4] : memref<8x8xf32, #tpu.memory_space<vmem>>, vector<8x8xf32>
    %cst = arith.constant dense<0.000000e+00> : vector<8x64xf32>
    %7 = tpu.matmul %6, %1, %cst {dimension_numbers = #tpu.dot_dimension_numbers<[1], [0], [0], [1], [0, 0, 1, 1], [], []>} : vector<8x8xf32>, vector<8x64xf32>, vector<8x64xf32> -> vector<8x64xf32>
    %c0_5 = arith.constant 0 : index
    %c0_6 = arith.constant 0 : index
    %8 = vector.load %arg2[%c0_5, %c0_6] : memref<8x6xf32, #tpu.memory_space<vmem>>, vector<8x6xf32>
    %cst_7 = arith.constant dense<0.000000e+00> : vector<8x64xf32>
    %9 = tpu.matmul %8, %3, %cst_7 {dimension_numbers = #tpu.dot_dimension_numbers<[1], [0], [0], [1], [0, 0, 1, 1], [], []>} : vector<8x6xf32>, vector<6x64xf32>, vector<8x64xf32> -> vector<8x64xf32>
    %10 = arith.addf %7, %9 : vector<8x64xf32>
    %11 = vector.broadcast %5 : vector<1x64xf32> to vector<8x64xf32>
    %12 = arith.addf %10, %11 : vector<8x64xf32>
    %cst_8 = arith.constant 0.000000e+00 : f32
    %13 = vector.broadcast %cst_8 : f32 to vector<8x64xf32>
    %14 = arith.maximumf %12, %13 : vector<8x64xf32>
    %15 = arith.truncf %14 : vector<8x64xf32> to vector<8x64xbf16>
    %c16 = arith.constant 16 : index
    %c0_9 = arith.constant 0 : index
    %16 = vector.load %arg6[%c16, %c0_9] : memref<256x128xbf16, #tpu.memory_space<vmem>>, vector<64x128xbf16>
    %cst_10 = arith.constant dense<0.000000e+00> : vector<8x128xf32>
    %17 = tpu.matmul %15, %16, %cst_10 {dimension_numbers = #tpu.dot_dimension_numbers<[1], [0], [0], [1], [0, 0, 1, 1], [], []>} : vector<8x64xbf16>, vector<64x128xbf16>, vector<8x128xf32> -> vector<8x128xf32>
    %c112 = arith.constant 112 : index
    %c0_11 = arith.constant 0 : index
    %18 = vector.load %arg6[%c112, %c0_11] : memref<256x128xbf16, #tpu.memory_space<vmem>>, vector<4x32xbf16>
    %19 = tpu.iota {dimensions = array<i32: 1>} : vector<8x48x4xi32>
    %c45_i32 = arith.constant 45 : i32
    %20 = vector.broadcast %c45_i32 : i32 to vector<8x48x4xi32>
    %21 = arith.cmpi slt, %19, %20 : vector<8x48x4xi32>
    %cst_12 = arith.constant 0.000000e+00 : f32
    %cst_13 = arith.constant -1.000000e+09 : f32
    %22 = vector.broadcast %cst_12 : f32 to vector<8x48x4xf32>
    %23 = vector.broadcast %cst_13 : f32 to vector<8x48x4xf32>
    %24 = arith.select %21, %22, %23 : vector<8x48x4xi1>, vector<8x48x4xf32>
    %c0_14 = arith.constant 0 : index
    %c0_15 = arith.constant 0 : index
    %c0_16 = arith.constant 0 : index
    %25 = vector.load %arg3[%c0_14, %c0_15, %c0_16] : memref<2x384x4xbf16, #tpu.memory_space<vmem>>, vector<1x384x4xbf16>
    %26 = vector.shape_cast %25 : vector<1x384x4xbf16> to vector<384x4xbf16>
    %c0_17 = arith.constant 0 : index
    %c0_18 = arith.constant 0 : index
    %c0_19 = arith.constant 0 : index
    %c0_20 = arith.constant 0 : index
    %27 = vector.load %arg4[%c0_17, %c0_18, %c0_19, %c0_20] : memref<2x8x48x1xf32, #tpu.memory_space<vmem>>, vector<1x8x48x1xf32>
    %28 = vector.shape_cast %27 : vector<1x8x48x1xf32> to vector<8x48x1xf32>
    %c80 = arith.constant 80 : index
    %c0_21 = arith.constant 0 : index
    %29 = vector.load %arg6[%c80, %c0_21] : memref<256x128xbf16, #tpu.memory_space<vmem>>, vector<4x36xbf16>
    %c86 = arith.constant 86 : index
    %c0_22 = arith.constant 0 : index
    %30 = vector.load %arg6[%c86, %c0_22] : memref<256x128xbf16, #tpu.memory_space<vmem>>, vector<1x36xbf16>
    %31 = arith.extf %30 : vector<1x36xbf16> to vector<1x36xf32>
    %cst_23 = arith.constant dense<0.000000e+00> : vector<384x36xf32>
    %32 = tpu.matmul %26, %29, %cst_23 {dimension_numbers = #tpu.dot_dimension_numbers<[1], [0], [0], [1], [0, 0, 1, 1], [], []>} : vector<384x4xbf16>, vector<4x36xbf16>, vector<384x36xf32> -> vector<384x36xf32>
    %33 = vector.broadcast %31 : vector<1x36xf32> to vector<384x36xf32>
    %34 = arith.addf %32, %33 : vector<384x36xf32>
    %35 = vector.extract_strided_slice %34 {offsets = [0, 0], sizes = [384, 32], strides = [1, 1]} : vector<384x36xf32> to vector<384x32xf32>
    %36 = vector.extract_strided_slice %34 {offsets = [0, 32], sizes = [384, 4], strides = [1, 1]} : vector<384x36xf32> to vector<384x4xf32>
    %37 = vector.shape_cast %36 : vector<384x4xf32> to vector<8x48x4xf32>
    %38 = vector.broadcast %28 : vector<8x48x1xf32> to vector<8x48x4xf32>
    %39 = arith.addf %37, %38 : vector<8x48x4xf32>
    %cst_24 = arith.constant dense<0xFF800000> : vector<8x4xf32>
    %40 = vector.multi_reduction <maximumf>, %39, %cst_24 [1] : vector<8x48x4xf32> to vector<8x4xf32>
    %41 = vector.shape_cast %40 : vector<8x4xf32> to vector<8x1x4xf32>
    %42 = vector.broadcast %41 : vector<8x1x4xf32> to vector<8x48x4xf32>
    %43 = arith.subf %39, %42 : vector<8x48x4xf32>
    %44 = math.exp %43 : vector<8x48x4xf32>
    %cst_25 = arith.constant dense<0.000000e+00> : vector<8x4xf32>
    %45 = vector.multi_reduction <add>, %44, %cst_25 [1] : vector<8x48x4xf32> to vector<8x4xf32>
    %46 = vector.shape_cast %45 : vector<8x4xf32> to vector<8x1x4xf32>
    %47 = vector.broadcast %46 : vector<8x1x4xf32> to vector<8x48x4xf32>
    %48 = arith.divf %44, %47 : vector<8x48x4xf32>
    %49 = vector.shape_cast %48 : vector<8x48x4xf32> to vector<384x4xf32>
    %50 = arith.truncf %49 : vector<384x4xf32> to vector<384x4xbf16>
    %cst_26 = arith.constant dense<0.000000e+00> : vector<384x32xf32>
    %51 = tpu.matmul %50, %18, %cst_26 {dimension_numbers = #tpu.dot_dimension_numbers<[1], [0], [0], [1], [0, 0, 1, 1], [], []>} : vector<384x4xbf16>, vector<4x32xbf16>, vector<384x32xf32> -> vector<384x32xf32>
    %52 = arith.mulf %51, %35 : vector<384x32xf32>
    %53 = vector.shape_cast %52 : vector<384x32xf32> to vector<8x48x32xf32>
    %cst_27 = arith.constant dense<0.000000e+00> : vector<8x32xf32>
    %54 = vector.multi_reduction <add>, %53, %cst_27 [1] : vector<8x48x32xf32> to vector<8x32xf32>
    %c120 = arith.constant 120 : index
    %c0_28 = arith.constant 0 : index
    %55 = vector.load %arg6[%c120, %c0_28] : memref<256x128xbf16, #tpu.memory_space<vmem>>, vector<32x128xbf16>
    %56 = arith.truncf %54 : vector<8x32xf32> to vector<8x32xbf16>
    %cst_29 = arith.constant dense<0.000000e+00> : vector<8x128xf32>
    %57 = tpu.matmul %56, %55, %cst_29 {dimension_numbers = #tpu.dot_dimension_numbers<[1], [0], [0], [1], [0, 0, 1, 1], [], []>} : vector<8x32xbf16>, vector<32x128xbf16>, vector<8x128xf32> -> vector<8x128xf32>
    %58 = arith.addf %17, %57 : vector<8x128xf32>
    %c1 = arith.constant 1 : index
    %c0_30 = arith.constant 0 : index
    %c0_31 = arith.constant 0 : index
    %59 = vector.load %arg3[%c1, %c0_30, %c0_31] : memref<2x384x4xbf16, #tpu.memory_space<vmem>>, vector<1x384x4xbf16>
    %60 = vector.shape_cast %59 : vector<1x384x4xbf16> to vector<384x4xbf16>
    %c1_32 = arith.constant 1 : index
    %c0_33 = arith.constant 0 : index
    %c0_34 = arith.constant 0 : index
    %c0_35 = arith.constant 0 : index
    %61 = vector.load %arg4[%c1_32, %c0_33, %c0_34, %c0_35] : memref<2x8x48x1xf32, #tpu.memory_space<vmem>>, vector<1x8x48x1xf32>
    %62 = vector.shape_cast %61 : vector<1x8x48x1xf32> to vector<8x48x1xf32>
    %c88 = arith.constant 88 : index
    %c0_36 = arith.constant 0 : index
    %63 = vector.load %arg6[%c88, %c0_36] : memref<256x128xbf16, #tpu.memory_space<vmem>>, vector<4x36xbf16>
    %c94 = arith.constant 94 : index
    %c0_37 = arith.constant 0 : index
    %64 = vector.load %arg6[%c94, %c0_37] : memref<256x128xbf16, #tpu.memory_space<vmem>>, vector<1x36xbf16>
    %65 = arith.extf %64 : vector<1x36xbf16> to vector<1x36xf32>
    %cst_38 = arith.constant dense<0.000000e+00> : vector<384x36xf32>
    %66 = tpu.matmul %60, %63, %cst_38 {dimension_numbers = #tpu.dot_dimension_numbers<[1], [0], [0], [1], [0, 0, 1, 1], [], []>} : vector<384x4xbf16>, vector<4x36xbf16>, vector<384x36xf32> -> vector<384x36xf32>
    %67 = vector.broadcast %65 : vector<1x36xf32> to vector<384x36xf32>
    %68 = arith.addf %66, %67 : vector<384x36xf32>
    %69 = vector.extract_strided_slice %68 {offsets = [0, 0], sizes = [384, 32], strides = [1, 1]} : vector<384x36xf32> to vector<384x32xf32>
    %70 = vector.extract_strided_slice %68 {offsets = [0, 32], sizes = [384, 4], strides = [1, 1]} : vector<384x36xf32> to vector<384x4xf32>
    %71 = vector.shape_cast %70 : vector<384x4xf32> to vector<8x48x4xf32>
    %72 = vector.broadcast %62 : vector<8x48x1xf32> to vector<8x48x4xf32>
    %73 = arith.addf %71, %72 : vector<8x48x4xf32>
    %cst_39 = arith.constant dense<0xFF800000> : vector<8x4xf32>
    %74 = vector.multi_reduction <maximumf>, %73, %cst_39 [1] : vector<8x48x4xf32> to vector<8x4xf32>
    %75 = vector.shape_cast %74 : vector<8x4xf32> to vector<8x1x4xf32>
    %76 = vector.broadcast %75 : vector<8x1x4xf32> to vector<8x48x4xf32>
    %77 = arith.subf %73, %76 : vector<8x48x4xf32>
    %78 = math.exp %77 : vector<8x48x4xf32>
    %cst_40 = arith.constant dense<0.000000e+00> : vector<8x4xf32>
    %79 = vector.multi_reduction <add>, %78, %cst_40 [1] : vector<8x48x4xf32> to vector<8x4xf32>
    %80 = vector.shape_cast %79 : vector<8x4xf32> to vector<8x1x4xf32>
    %81 = vector.broadcast %80 : vector<8x1x4xf32> to vector<8x48x4xf32>
    %82 = arith.divf %78, %81 : vector<8x48x4xf32>
    %83 = vector.shape_cast %82 : vector<8x48x4xf32> to vector<384x4xf32>
    %84 = arith.truncf %83 : vector<384x4xf32> to vector<384x4xbf16>
    %cst_41 = arith.constant dense<0.000000e+00> : vector<384x32xf32>
    %85 = tpu.matmul %84, %18, %cst_41 {dimension_numbers = #tpu.dot_dimension_numbers<[1], [0], [0], [1], [0, 0, 1, 1], [], []>} : vector<384x4xbf16>, vector<4x32xbf16>, vector<384x32xf32> -> vector<384x32xf32>
    %86 = arith.mulf %85, %69 : vector<384x32xf32>
    %87 = vector.shape_cast %86 : vector<384x32xf32> to vector<8x48x32xf32>
    %cst_42 = arith.constant dense<0.000000e+00> : vector<8x32xf32>
    %88 = vector.multi_reduction <add>, %87, %cst_42 [1] : vector<8x48x32xf32> to vector<8x32xf32>
    %c152 = arith.constant 152 : index
    %c0_43 = arith.constant 0 : index
    %89 = vector.load %arg6[%c152, %c0_43] : memref<256x128xbf16, #tpu.memory_space<vmem>>, vector<32x128xbf16>
    %90 = arith.truncf %88 : vector<8x32xf32> to vector<8x32xbf16>
    %cst_44 = arith.constant dense<0.000000e+00> : vector<8x128xf32>
    %91 = tpu.matmul %90, %89, %cst_44 {dimension_numbers = #tpu.dot_dimension_numbers<[1], [0], [0], [1], [0, 0, 1, 1], [], []>} : vector<8x32xbf16>, vector<32x128xbf16>, vector<8x128xf32> -> vector<8x128xf32>
    %92 = arith.addf %58, %91 : vector<8x128xf32>
    %c0_45 = arith.constant 0 : index
    %c0_46 = arith.constant 0 : index
    %c0_47 = arith.constant 0 : index
    %93 = vector.load %arg5[%c0_45, %c0_46, %c0_47] : memref<2x384x6xbf16, #tpu.memory_space<vmem>>, vector<1x384x6xbf16>
    %94 = vector.shape_cast %93 : vector<1x384x6xbf16> to vector<384x6xbf16>
    %c96 = arith.constant 96 : index
    %c0_48 = arith.constant 0 : index
    %95 = vector.load %arg6[%c96, %c0_48] : memref<256x128xbf16, #tpu.memory_space<vmem>>, vector<6x36xbf16>
    %c102 = arith.constant 102 : index
    %c0_49 = arith.constant 0 : index
    %96 = vector.load %arg6[%c102, %c0_49] : memref<256x128xbf16, #tpu.memory_space<vmem>>, vector<1x36xbf16>
    %97 = arith.extf %96 : vector<1x36xbf16> to vector<1x36xf32>
    %cst_50 = arith.constant dense<0.000000e+00> : vector<384x36xf32>
    %98 = tpu.matmul %94, %95, %cst_50 {dimension_numbers = #tpu.dot_dimension_numbers<[1], [0], [0], [1], [0, 0, 1, 1], [], []>} : vector<384x6xbf16>, vector<6x36xbf16>, vector<384x36xf32> -> vector<384x36xf32>
    %99 = vector.broadcast %97 : vector<1x36xf32> to vector<384x36xf32>
    %100 = arith.addf %98, %99 : vector<384x36xf32>
    %101 = vector.extract_strided_slice %100 {offsets = [0, 0], sizes = [384, 32], strides = [1, 1]} : vector<384x36xf32> to vector<384x32xf32>
    %102 = vector.extract_strided_slice %100 {offsets = [0, 32], sizes = [384, 4], strides = [1, 1]} : vector<384x36xf32> to vector<384x4xf32>
    %103 = vector.shape_cast %102 : vector<384x4xf32> to vector<8x48x4xf32>
    %104 = arith.addf %103, %24 : vector<8x48x4xf32>
    %cst_51 = arith.constant dense<0xFF800000> : vector<8x4xf32>
    %105 = vector.multi_reduction <maximumf>, %104, %cst_51 [1] : vector<8x48x4xf32> to vector<8x4xf32>
    %106 = vector.shape_cast %105 : vector<8x4xf32> to vector<8x1x4xf32>
    %107 = vector.broadcast %106 : vector<8x1x4xf32> to vector<8x48x4xf32>
    %108 = arith.subf %104, %107 : vector<8x48x4xf32>
    %109 = math.exp %108 : vector<8x48x4xf32>
    %cst_52 = arith.constant dense<0.000000e+00> : vector<8x4xf32>
    %110 = vector.multi_reduction <add>, %109, %cst_52 [1] : vector<8x48x4xf32> to vector<8x4xf32>
    %111 = vector.shape_cast %110 : vector<8x4xf32> to vector<8x1x4xf32>
    %112 = vector.broadcast %111 : vector<8x1x4xf32> to vector<8x48x4xf32>
    %113 = arith.divf %109, %112 : vector<8x48x4xf32>
    %114 = vector.shape_cast %113 : vector<8x48x4xf32> to vector<384x4xf32>
    %115 = arith.truncf %114 : vector<384x4xf32> to vector<384x4xbf16>
    %cst_53 = arith.constant dense<0.000000e+00> : vector<384x32xf32>
    %116 = tpu.matmul %115, %18, %cst_53 {dimension_numbers = #tpu.dot_dimension_numbers<[1], [0], [0], [1], [0, 0, 1, 1], [], []>} : vector<384x4xbf16>, vector<4x32xbf16>, vector<384x32xf32> -> vector<384x32xf32>
    %117 = arith.mulf %116, %101 : vector<384x32xf32>
    %118 = vector.shape_cast %117 : vector<384x32xf32> to vector<8x48x32xf32>
    %cst_54 = arith.constant dense<0.000000e+00> : vector<8x32xf32>
    %119 = vector.multi_reduction <add>, %118, %cst_54 [1] : vector<8x48x32xf32> to vector<8x32xf32>
    %c184 = arith.constant 184 : index
    %c0_55 = arith.constant 0 : index
    %120 = vector.load %arg6[%c184, %c0_55] : memref<256x128xbf16, #tpu.memory_space<vmem>>, vector<32x128xbf16>
    %121 = arith.truncf %119 : vector<8x32xf32> to vector<8x32xbf16>
    %cst_56 = arith.constant dense<0.000000e+00> : vector<8x128xf32>
    %122 = tpu.matmul %121, %120, %cst_56 {dimension_numbers = #tpu.dot_dimension_numbers<[1], [0], [0], [1], [0, 0, 1, 1], [], []>} : vector<8x32xbf16>, vector<32x128xbf16>, vector<8x128xf32> -> vector<8x128xf32>
    %123 = arith.addf %92, %122 : vector<8x128xf32>
    %c1_57 = arith.constant 1 : index
    %c0_58 = arith.constant 0 : index
    %c0_59 = arith.constant 0 : index
    %124 = vector.load %arg5[%c1_57, %c0_58, %c0_59] : memref<2x384x6xbf16, #tpu.memory_space<vmem>>, vector<1x384x6xbf16>
    %125 = vector.shape_cast %124 : vector<1x384x6xbf16> to vector<384x6xbf16>
    %c104 = arith.constant 104 : index
    %c0_60 = arith.constant 0 : index
    %126 = vector.load %arg6[%c104, %c0_60] : memref<256x128xbf16, #tpu.memory_space<vmem>>, vector<6x36xbf16>
    %c110 = arith.constant 110 : index
    %c0_61 = arith.constant 0 : index
    %127 = vector.load %arg6[%c110, %c0_61] : memref<256x128xbf16, #tpu.memory_space<vmem>>, vector<1x36xbf16>
    %128 = arith.extf %127 : vector<1x36xbf16> to vector<1x36xf32>
    %cst_62 = arith.constant dense<0.000000e+00> : vector<384x36xf32>
    %129 = tpu.matmul %125, %126, %cst_62 {dimension_numbers = #tpu.dot_dimension_numbers<[1], [0], [0], [1], [0, 0, 1, 1], [], []>} : vector<384x6xbf16>, vector<6x36xbf16>, vector<384x36xf32> -> vector<384x36xf32>
    %130 = vector.broadcast %128 : vector<1x36xf32> to vector<384x36xf32>
    %131 = arith.addf %129, %130 : vector<384x36xf32>
    %132 = vector.extract_strided_slice %131 {offsets = [0, 0], sizes = [384, 32], strides = [1, 1]} : vector<384x36xf32> to vector<384x32xf32>
    %133 = vector.extract_strided_slice %131 {offsets = [0, 32], sizes = [384, 4], strides = [1, 1]} : vector<384x36xf32> to vector<384x4xf32>
    %134 = vector.shape_cast %133 : vector<384x4xf32> to vector<8x48x4xf32>
    %135 = arith.addf %134, %24 : vector<8x48x4xf32>
    %cst_63 = arith.constant dense<0xFF800000> : vector<8x4xf32>
    %136 = vector.multi_reduction <maximumf>, %135, %cst_63 [1] : vector<8x48x4xf32> to vector<8x4xf32>
    %137 = vector.shape_cast %136 : vector<8x4xf32> to vector<8x1x4xf32>
    %138 = vector.broadcast %137 : vector<8x1x4xf32> to vector<8x48x4xf32>
    %139 = arith.subf %135, %138 : vector<8x48x4xf32>
    %140 = math.exp %139 : vector<8x48x4xf32>
    %cst_64 = arith.constant dense<0.000000e+00> : vector<8x4xf32>
    %141 = vector.multi_reduction <add>, %140, %cst_64 [1] : vector<8x48x4xf32> to vector<8x4xf32>
    %142 = vector.shape_cast %141 : vector<8x4xf32> to vector<8x1x4xf32>
    %143 = vector.broadcast %142 : vector<8x1x4xf32> to vector<8x48x4xf32>
    %144 = arith.divf %140, %143 : vector<8x48x4xf32>
    %145 = vector.shape_cast %144 : vector<8x48x4xf32> to vector<384x4xf32>
    %146 = arith.truncf %145 : vector<384x4xf32> to vector<384x4xbf16>
    %cst_65 = arith.constant dense<0.000000e+00> : vector<384x32xf32>
    %147 = tpu.matmul %146, %18, %cst_65 {dimension_numbers = #tpu.dot_dimension_numbers<[1], [0], [0], [1], [0, 0, 1, 1], [], []>} : vector<384x4xbf16>, vector<4x32xbf16>, vector<384x32xf32> -> vector<384x32xf32>
    %148 = arith.mulf %147, %132 : vector<384x32xf32>
    %149 = vector.shape_cast %148 : vector<384x32xf32> to vector<8x48x32xf32>
    %cst_66 = arith.constant dense<0.000000e+00> : vector<8x32xf32>
    %150 = vector.multi_reduction <add>, %149, %cst_66 [1] : vector<8x48x32xf32> to vector<8x32xf32>
    %c216 = arith.constant 216 : index
    %c0_67 = arith.constant 0 : index
    %151 = vector.load %arg6[%c216, %c0_67] : memref<256x128xbf16, #tpu.memory_space<vmem>>, vector<32x128xbf16>
    %152 = arith.truncf %150 : vector<8x32xf32> to vector<8x32xbf16>
    %cst_68 = arith.constant dense<0.000000e+00> : vector<8x128xf32>
    %153 = tpu.matmul %152, %151, %cst_68 {dimension_numbers = #tpu.dot_dimension_numbers<[1], [0], [0], [1], [0, 0, 1, 1], [], []>} : vector<8x32xbf16>, vector<32x128xbf16>, vector<8x128xf32> -> vector<8x128xf32>
    %154 = arith.addf %123, %153 : vector<8x128xf32>
    %c248 = arith.constant 248 : index
    %c0_69 = arith.constant 0 : index
    %155 = vector.load %arg6[%c248, %c0_69] : memref<256x128xbf16, #tpu.memory_space<vmem>>, vector<1x128xbf16>
    %156 = arith.extf %155 : vector<1x128xbf16> to vector<1x128xf32>
    %157 = vector.broadcast %156 : vector<1x128xf32> to vector<8x128xf32>
    %158 = arith.addf %154, %157 : vector<8x128xf32>
    %c0_70 = arith.constant 0 : index
    %c0_71 = arith.constant 0 : index
    %159 = vector.load %arg7[%c0_70, %c0_71] : memref<8x128xf32, #tpu.memory_space<vmem>>, vector<8x128xf32>
    tpu.vector_store %arg7[%c0_70, %c0_71], %158 {strides = array<i32>} : memref<8x128xf32, #tpu.memory_space<vmem>>, vector<8x128xf32>,
    return
  }
  func.func @transform_0(%arg0: i32) -> (i32, i32) {
    %c0_i32 = arith.constant 0 : i32
    %c0_i32_0 = arith.constant 0 : i32
    return %arg0, %c0_i32 : i32, i32
  }
  func.func @transform_1(%arg0: i32) -> (i32, i32) {
    %c0_i32 = arith.constant 0 : i32
    %c0_i32_0 = arith.constant 0 : i32
    return %arg0, %c0_i32 : i32, i32
  }
  func.func @transform_2(%arg0: i32) -> (i32, i32, i32) {
    %c0_i32 = arith.constant 0 : i32
    %c0_i32_0 = arith.constant 0 : i32
    %c0_i32_1 = arith.constant 0 : i32
    return %c0_i32, %arg0, %c0_i32_0 : i32, i32, i32
  }
  func.func @transform_3(%arg0: i32) -> (i32, i32, i32, i32) {
    %c0_i32 = arith.constant 0 : i32
    %c0_i32_0 = arith.constant 0 : i32
    %c0_i32_1 = arith.constant 0 : i32
    %c0_i32_2 = arith.constant 0 : i32
    return %c0_i32, %arg0, %c0_i32_0, %c0_i32_1 : i32, i32, i32, i32
  }
  func.func @transform_4(%arg0: i32) -> (i32, i32, i32) {
    %c0_i32 = arith.constant 0 : i32
    %c0_i32_0 = arith.constant 0 : i32
    %c0_i32_1 = arith.constant 0 : i32
    return %c0_i32, %arg0, %c0_i32_0 : i32, i32, i32
  }
  func.func @transform_5(%arg0: i32) -> (i32, i32) {
    %c0_i32 = arith.constant 0 : i32
    %c0_i32_0 = arith.constant 0 : i32
    %c0_i32_1 = arith.constant 0 : i32
    return %c0_i32, %c0_i32_0 : i32, i32
  }
  func.func @transform_6(%arg0: i32) -> (i32, i32) {
    %c0_i32 = arith.constant 0 : i32
    %c0_i32_0 = arith.constant 0 : i32
    return %arg0, %c0_i32 : i32, i32
  }
}

</mosaic_0001>

<bundles_post_ra>
// kernel: iat_forward.1
= control target key start
LH: loop header
LB: loop body
LE: loop exit
PB: predicated region body
PF: predicated region fallthrough
CT: control target
= control target key end

     0   :  { %s11038_s21 = smov 0   ;;  %s11040_s22 = smov 0   ;;  %s15432_s0 = inlined_call_operand.vmem [shape: f32[16,8], index: 0, kind: input, shape index: {}]   ;;  %s15433_s1 = inlined_call_operand.vmem [shape: f32[16,6], index: 1, kind: input, shape index: {}]   ;;  %s15434_s2 = inlined_call_operand.vmem [shape: bf16[2,768,4], index: 2, kind: input, shape index: {}]   ;;  %s15435_s3 = inlined_call_operand.vmem [shape: f32[2,16,48,1], index: 3, kind: input, shape index: {}]   ;;  %s15436_s4 = inlined_call_operand.vmem [shape: bf16[2,768,6], index: 4, kind: input, shape index: {}]   ;;  %s15437_s5 = inlined_call_operand.vmem [shape: bf16[256,128], index: 5, kind: input, shape index: {}]   ;;  %s15438_s6 = inlined_call_operand.vmem [shape: f32[16,128], index: 6, kind: output, shape index: {}]  }
   0x1   :  { %s11042_s23 = smov 0  }
   0x2 LB: > { %s9227_s24 = sadd.s32 4294967295, %s10996_s23   ;;  %s11055_s25 = sadd.s32 1, %s10996_s23   ;;  %s10996_s23 = sphi %s11042_s23, %s16035_s23   ;;  %s10992_s22 = sphi %s11040_s22, %s16034_s22   ;;  %s10988_s21 = sphi %s11038_s21, %s16033_s21  }
   0x3   : > { %s72_s26 = ssub.s32 %s10996_s23, %s11055_s25  ;;  %s75_s27 = sadd.s32 1, %s10992_s22 }
   0x4   : > { %p73_p0 = scmp.eq.s32.totalorder %s72_s26, 0  ;;  %p82_p1 = scmp.ne.s32.totalorder %s10992_s22, %s10988_s21 }
   0x5   : > { %p83_p2 = scmp.eq.s32.totalorder %s10996_s23, 0  ;;  %p9230_p4 = scmp.ge.s32.totalorder %s10996_s23, 2 }
   0x6   : > { %s11064_s28 = scalar_select %p73_p0, %s10992_s22, %s75_s27  }
   0x7   : > { %p11066_p3 = por %p83_p2, %p82_p1  ;;  %210 = sbr.rel (%p9230_p4) target bundleno = 125 (0x7d), region = 20 }
   0xe   : > { %227 = sbr.rel (!%p11066_p3) target bundleno = 43 (0x2b), region = 32  ;;  %s229_s30 = sand.u32 (%p11066_p3), 1, %s10992_s22  }
   0xf   : > { %s9694_s7 = smul.u32 (%p11066_p3), 192, %s10996_s23 }
  0x10   : > { %s10379_s8 = smul.u32 (%p11066_p3), 384, %s229_s30 }
  0x11   : > { %s11078_s11 = scalar_lea.vmem (%p11066_p3), %s15434_s2, %s9694_s7 }
  0x12   : > { %v250_v0 = vld [vmem:[%s11078_s11] sm:$0xff] (%p11066_p3)   ;;  %v254_v1 = vld [vmem:[%s11078_s11 + $0x8] sm:$0xff] (%p11066_p3)   ;;  %v258_v2 = vld [vmem:[%s11078_s11 + $0x10] sm:$0xff] (%p11066_p3)   ;;  %s11083_s12 = scalar_lea.vmem (%p11066_p3), [#allocation2], %s10379_s8 }
  0x13   : > { %251 = vst [vmem:[%s11083_s12] sm:$0xff] (%p11066_p3), %v250_v0   ;;  %255 = vst [vmem:[%s11083_s12 + $0x8] sm:$0xff] (%p11066_p3), %v254_v1   ;;  %v262_v3 = vld [vmem:[%s11078_s11 + $0x18] sm:$0xff] (%p11066_p3)   ;;  %v266_v4 = vld [vmem:[%s11078_s11 + $0x20] sm:$0xff] (%p11066_p3)  }
  0x14   : > { %259 = vst [vmem:[%s11083_s12 + $0x10] sm:$0xff] (%p11066_p3), %v258_v2   ;;  %v270_v5 = vld [vmem:[%s11078_s11 + $0x28] sm:$0xff] (%p11066_p3)   ;;  %263 = vst [vmem:[%s11083_s12 + $0x18] sm:$0xff] (%p11066_p3), %v262_v3   ;;  %v274_v6 = vld [vmem:[%s11078_s11 + $0x30] sm:$0xff] (%p11066_p3)  }
  0x15   : > { %267 = vst [vmem:[%s11083_s12 + $0x20] sm:$0xff] %v266_v4   ;;  %271 = vst [vmem:[%s11083_s12 + $0x28] sm:$0xff] %v270_v5   ;;  %v278_v7 = vld [vmem:[%s11078_s11 + $0x38] sm:$0xff]   ;;  %v282_v8 = vld [vmem:[%s11078_s11 + $0x40] sm:$0xff]  }
  0x16   : > { %275 = vst [vmem:[%s11083_s12 + $0x30] sm:$0xff] %v274_v6   ;;  %279 = vst [vmem:[%s11083_s12 + $0x38] sm:$0xff] %v278_v7   ;;  %v286_v9 = vld [vmem:[%s11078_s11 + $0x48] sm:$0xff]   ;;  %v290_v10 = vld [vmem:[%s11078_s11 + $0x50] sm:$0xff]  }
  0x17   : > { %283 = vst [vmem:[%s11083_s12 + $0x40] sm:$0xff] %v282_v8   ;;  %v294_v11 = vld [vmem:[%s11078_s11 + $0x58] sm:$0xff]   ;;  %287 = vst [vmem:[%s11083_s12 + $0x48] sm:$0xff] %v286_v9   ;;  %v298_v12 = vld [vmem:[%s11078_s11 + $0x60] sm:$0xff]  }
  0x18   : > { %291 = vst [vmem:[%s11083_s12 + $0x50] sm:$0xff] %v290_v10   ;;  %295 = vst [vmem:[%s11083_s12 + $0x58] sm:$0xff] %v294_v11   ;;  %v302_v13 = vld [vmem:[%s11078_s11 + $0x68] sm:$0xff]   ;;  %v306_v14 = vld [vmem:[%s11078_s11 + $0x70] sm:$0xff]  }
  0x19   : > { %299 = vst [vmem:[%s11083_s12 + $0x60] sm:$0xff] %v298_v12   ;;  %303 = vst [vmem:[%s11083_s12 + $0x68] sm:$0xff] %v302_v13   ;;  %v310_v15 = vld [vmem:[%s11078_s11 + $0x78] sm:$0xff]   ;;  %v314_v16 = vld [vmem:[%s11078_s11 + $0x80] sm:$0xff]  }
  0x1a   : > { %307 = vst [vmem:[%s11083_s12 + $0x70] sm:$0xff] %v306_v14   ;;  %v318_v17 = vld [vmem:[%s11078_s11 + $0x88] sm:$0xff]   ;;  %311 = vst [vmem:[%s11083_s12 + $0x78] sm:$0xff] %v310_v15   ;;  %v322_v18 = vld [vmem:[%s11078_s11 + $0x90] sm:$0xff]  }
  0x1b   : > { %315 = vst [vmem:[%s11083_s12 + $0x80] sm:$0xff] %v314_v16   ;;  %319 = vst [vmem:[%s11083_s12 + $0x88] sm:$0xff] %v318_v17   ;;  %v326_v19 = vld [vmem:[%s11078_s11 + $0x98] sm:$0xff]   ;;  %v330_v20 = vld [vmem:[%s11078_s11 + $0xa0] sm:$0xff]  }
  0x1c   : > { %323 = vst [vmem:[%s11083_s12 + $0x90] sm:$0xff] %v322_v18   ;;  %327 = vst [vmem:[%s11083_s12 + $0x98] sm:$0xff] %v326_v19   ;;  %v334_v21 = vld [vmem:[%s11078_s11 + $0xa8] sm:$0xff]   ;;  %v338_v22 = vld [vmem:[%s11078_s11 + $0xb0] sm:$0xff]  }
  0x1d   : > { %331 = vst [vmem:[%s11083_s12 + $0xa0] sm:$0xff] %v330_v20   ;;  %v342_v23 = vld [vmem:[%s11078_s11 + $0xb8] sm:$0xff]   ;;  %335 = vst [vmem:[%s11083_s12 + $0xa8] sm:$0xff] %v334_v21   ;;  %v346_v24 = vld [vmem:[%s11078_s11 + $0x180] sm:$0xff]  }
  0x1e   : > { %339 = vst [vmem:[%s11083_s12 + $0xb0] sm:$0xff] %v338_v22   ;;  %343 = vst [vmem:[%s11083_s12 + $0xb8] sm:$0xff] %v342_v23   ;;  %v350_v25 = vld [vmem:[%s11078_s11 + $0x188] sm:$0xff]   ;;  %v354_v26 = vld [vmem:[%s11078_s11 + $0x190] sm:$0xff]  }
  0x1f   : > { %347 = vst [vmem:[%s11083_s12 + $0xc0] sm:$0xff] %v346_v24   ;;  %351 = vst [vmem:[%s11083_s12 + $0xc8] sm:$0xff] %v350_v25   ;;  %v358_v27 = vld [vmem:[%s11078_s11 + $0x198] sm:$0xff]   ;;  %v362_v28 = vld [vmem:[%s11078_s11 + $0x1a0] sm:$0xff]  }
  0x20   : > { %355 = vst [vmem:[%s11083_s12 + $0xd0] sm:$0xff] %v354_v26   ;;  %v366_v29 = vld [vmem:[%s11078_s11 + $0x1a8] sm:$0xff]   ;;  %359 = vst [vmem:[%s11083_s12 + $0xd8] sm:$0xff] %v358_v27   ;;  %v370_v30 = vld [vmem:[%s11078_s11 + $0x1b0] sm:$0xff]  }
  0x21   : > { %363 = vst [vmem:[%s11083_s12 + $0xe0] sm:$0xff] %v362_v28   ;;  %367 = vst [vmem:[%s11083_s12 + $0xe8] sm:$0xff] %v366_v29   ;;  %v374_v31 = vld [vmem:[%s11078_s11 + $0x1b8] sm:$0xff]   ;;  %v378_v32 = vld [vmem:[%s11078_s11 + $0x1c0] sm:$0xff]  }
  0x22   : > { %371 = vst [vmem:[%s11083_s12 + $0xf0] sm:$0xff] %v370_v30   ;;  %375 = vst [vmem:[%s11083_s12 + $0xf8] sm:$0xff] %v374_v31   ;;  %v382_v33 = vld [vmem:[%s11078_s11 + $0x1c8] sm:$0xff]   ;;  %v386_v34 = vld [vmem:[%s11078_s11 + $0x1d0] sm:$0xff]  }
  0x23   : > { %379 = vst [vmem:[%s11083_s12 + $0x100] sm:$0xff] %v378_v32   ;;  %v390_v35 = vld [vmem:[%s11078_s11 + $0x1d8] sm:$0xff]   ;;  %383 = vst [vmem:[%s11083_s12 + $0x108] sm:$0xff] %v382_v33   ;;  %v394_v36 = vld [vmem:[%s11078_s11 + $0x1e0] sm:$0xff]  }
  0x24   : > { %387 = vst [vmem:[%s11083_s12 + $0x110] sm:$0xff] %v386_v34   ;;  %391 = vst [vmem:[%s11083_s12 + $0x118] sm:$0xff] %v390_v35   ;;  %v398_v37 = vld [vmem:[%s11078_s11 + $0x1e8] sm:$0xff]   ;;  %v402_v38 = vld [vmem:[%s11078_s11 + $0x1f0] sm:$0xff]  }
  0x25   : > { %395 = vst [vmem:[%s11083_s12 + $0x120] sm:$0xff] %v394_v36   ;;  %399 = vst [vmem:[%s11083_s12 + $0x128] sm:$0xff] %v398_v37   ;;  %v406_v39 = vld [vmem:[%s11078_s11 + $0x1f8] sm:$0xff]   ;;  %v410_v40 = vld [vmem:[%s11078_s11 + $0x200] sm:$0xff]  }
  0x26   : > { %403 = vst [vmem:[%s11083_s12 + $0x130] sm:$0xff] %v402_v38   ;;  %v414_v41 = vld [vmem:[%s11078_s11 + $0x208] sm:$0xff]   ;;  %407 = vst [vmem:[%s11083_s12 + $0x138] sm:$0xff] %v406_v39   ;;  %v418_v42 = vld [vmem:[%s11078_s11 + $0x210] sm:$0xff]  }
  0x27   : > { %411 = vst [vmem:[%s11083_s12 + $0x140] sm:$0xff] %v410_v40   ;;  %415 = vst [vmem:[%s11083_s12 + $0x148] sm:$0xff] %v414_v41   ;;  %v422_v43 = vld [vmem:[%s11078_s11 + $0x218] sm:$0xff]   ;;  %v426_v44 = vld [vmem:[%s11078_s11 + $0x220] sm:$0xff]  }
  0x28   : > { %419 = vst [vmem:[%s11083_s12 + $0x150] sm:$0xff] %v418_v42   ;;  %423 = vst [vmem:[%s11083_s12 + $0x158] sm:$0xff] %v422_v43   ;;  %v430_v45 = vld [vmem:[%s11078_s11 + $0x228] sm:$0xff]   ;;  %v434_v46 = vld [vmem:[%s11078_s11 + $0x230] sm:$0xff]  }
  0x29   : > { %427 = vst [vmem:[%s11083_s12 + $0x160] sm:$0xff] %v426_v44   ;;  %v438_v47 = vld [vmem:[%s11078_s11 + $0x238] sm:$0xff]   ;;  %431 = vst [vmem:[%s11083_s12 + $0x168] sm:$0xff] %v430_v45  }
  0x2a   : > { %435 = vst [vmem:[%s11083_s12 + $0x170] sm:$0xff] %v434_v46   ;;  %439 = vst [vmem:[%s11083_s12 + $0x178] sm:$0xff] %v438_v47  }
  0x2b PF: > { %656 = sbr.rel (!%p11066_p3) target bundleno = 96 (0x60), region = 73  ;;  %s658_s13 = sand.u32 (%p11066_p3), 1, %s10992_s22  }
  0x2c   : > { %s10381_s14 = smul.u32 (%p11066_p3), 384, %s10996_s23 }
  0x2d   : > { %s10380_s15 = smul.u32 (%p11066_p3), 768, %s658_s13 }
  0x2e   : > { %s11185_s18 = scalar_lea.vmem (%p11066_p3), %s15435_s3, %s10381_s14 }
  0x2f   : > { %v882_v48 = vld [vmem:[%s11185_s18] sm:$0xff] (%p11066_p3)  ;;  %v884_v49 = vld [vmem:[%s11185_s18 + $0x8] sm:$0xff] (%p11066_p3)  ;;  %v886_v50 = vld [vmem:[%s11185_s18 + $0x10] sm:$0xff] (%p11066_p3)  ;;  %s11190_s19 = scalar_lea.vmem (%p11066_p3), [#allocation3], %s10380_s15 }
  0x30   : > { %883 = vst [vmem:[%s11190_s19] sm:$0xff] (%p11066_p3), %v882_v48  ;;  %885 = vst [vmem:[%s11190_s19 + $0x8] sm:$0xff] (%p11066_p3), %v884_v49  ;;  %v888_v51 = vld [vmem:[%s11185_s18 + $0x18] sm:$0xff] (%p11066_p3)  ;;  %v890_v52 = vld [vmem:[%s11185_s18 + $0x20] sm:$0xff] (%p11066_p3) }
  0x31   : > { %887 = vst [vmem:[%s11190_s19 + $0x10] sm:$0xff] (%p11066_p3), %v886_v50  ;;  %v892_v53 = vld [vmem:[%s11185_s18 + $0x28] sm:$0xff] (%p11066_p3)  ;;  %889 = vst [vmem:[%s11190_s19 + $0x18] sm:$0xff] (%p11066_p3), %v888_v51  ;;  %v894_v54 = vld [vmem:[%s11185_s18 + $0x30] sm:$0xff] (%p11066_p3) }
  0x32   : > { %891 = vst [vmem:[%s11190_s19 + $0x20] sm:$0xff] %v890_v52  ;;  %893 = vst [vmem:[%s11190_s19 + $0x28] sm:$0xff] %v892_v53  ;;  %v896_v55 = vld [vmem:[%s11185_s18 + $0x38] sm:$0xff]  ;;  %v898_v56 = vld [vmem:[%s11185_s18 + $0x40] sm:$0xff] }
  0x33   : > { %895 = vst [vmem:[%s11190_s19 + $0x30] sm:$0xff] %v894_v54  ;;  %897 = vst [vmem:[%s11190_s19 + $0x38] sm:$0xff] %v896_v55  ;;  %v900_v57 = vld [vmem:[%s11185_s18 + $0x48] sm:$0xff]  ;;  %v902_v58 = vld [vmem:[%s11185_s18 + $0x50] sm:$0xff] }
  0x34   : > { %899 = vst [vmem:[%s11190_s19 + $0x40] sm:$0xff] %v898_v56  ;;  %v904_v59 = vld [vmem:[%s11185_s18 + $0x58] sm:$0xff]  ;;  %901 = vst [vmem:[%s11190_s19 + $0x48] sm:$0xff] %v900_v57  ;;  %v906_v60 = vld [vmem:[%s11185_s18 + $0x60] sm:$0xff] }
  0x35   : > { %903 = vst [vmem:[%s11190_s19 + $0x50] sm:$0xff] %v902_v58  ;;  %905 = vst [vmem:[%s11190_s19 + $0x58] sm:$0xff] %v904_v59  ;;  %v908_v61 = vld [vmem:[%s11185_s18 + $0x68] sm:$0xff]  ;;  %v910_v62 = vld [vmem:[%s11185_s18 + $0x70] sm:$0xff] }
  0x36   : > { %907 = vst [vmem:[%s11190_s19 + $0x60] sm:$0xff] %v906_v60  ;;  %909 = vst [vmem:[%s11190_s19 + $0x68] sm:$0xff] %v908_v61  ;;  %v912_v63 = vld [vmem:[%s11185_s18 + $0x78] sm:$0xff]  ;;  %v914_v0 = vld [vmem:[%s11185_s18 + $0x80] sm:$0xff] }
  0x37   : > { %911 = vst [vmem:[%s11190_s19 + $0x70] sm:$0xff] %v910_v62  ;;  %v916_v1 = vld [vmem:[%s11185_s18 + $0x88] sm:$0xff]  ;;  %913 = vst [vmem:[%s11190_s19 + $0x78] sm:$0xff] %v912_v63  ;;  %v918_v2 = vld [vmem:[%s11185_s18 + $0x90] sm:$0xff] }
  0x38   : > { %915 = vst [vmem:[%s11190_s19 + $0x80] sm:$0xff] %v914_v0  ;;  %917 = vst [vmem:[%s11190_s19 + $0x88] sm:$0xff] %v916_v1  ;;  %v920_v3 = vld [vmem:[%s11185_s18 + $0x98] sm:$0xff]  ;;  %v922_v4 = vld [vmem:[%s11185_s18 + $0xa0] sm:$0xff] }
  0x39   : > { %919 = vst [vmem:[%s11190_s19 + $0x90] sm:$0xff] %v918_v2  ;;  %921 = vst [vmem:[%s11190_s19 + $0x98] sm:$0xff] %v920_v3  ;;  %v924_v5 = vld [vmem:[%s11185_s18 + $0xa8] sm:$0xff]  ;;  %v926_v6 = vld [vmem:[%s11185_s18 + $0xb0] sm:$0xff] }
  0x3a   : > { %923 = vst [vmem:[%s11190_s19 + $0xa0] sm:$0xff] %v922_v4  ;;  %v928_v7 = vld [vmem:[%s11185_s18 + $0xb8] sm:$0xff]  ;;  %925 = vst [vmem:[%s11190_s19 + $0xa8] sm:$0xff] %v924_v5  ;;  %v930_v8 = vld [vmem:[%s11185_s18 + $0xc0] sm:$0xff] }
  0x3b   : > { %927 = vst [vmem:[%s11190_s19 + $0xb0] sm:$0xff] %v926_v6  ;;  %929 = vst [vmem:[%s11190_s19 + $0xb8] sm:$0xff] %v928_v7  ;;  %v932_v9 = vld [vmem:[%s11185_s18 + $0xc8] sm:$0xff]  ;;  %v934_v10 = vld [vmem:[%s11185_s18 + $0xd0] sm:$0xff] }
  0x3c   : > { %931 = vst [vmem:[%s11190_s19 + $0xc0] sm:$0xff] %v930_v8  ;;  %933 = vst [vmem:[%s11190_s19 + $0xc8] sm:$0xff] %v932_v9  ;;  %v936_v11 = vld [vmem:[%s11185_s18 + $0xd8] sm:$0xff]  ;;  %v938_v12 = vld [vmem:[%s11185_s18 + $0xe0] sm:$0xff] }
  0x3d   : > { %935 = vst [vmem:[%s11190_s19 + $0xd0] sm:$0xff] %v934_v10  ;;  %v940_v13 = vld [vmem:[%s11185_s18 + $0xe8] sm:$0xff]  ;;  %937 = vst [vmem:[%s11190_s19 + $0xd8] sm:$0xff] %v936_v11  ;;  %v942_v14 = vld [vmem:[%s11185_s18 + $0xf0] sm:$0xff] }
  0x3e   : > { %939 = vst [vmem:[%s11190_s19 + $0xe0] sm:$0xff] %v938_v12  ;;  %941 = vst [vmem:[%s11190_s19 + $0xe8] sm:$0xff] %v940_v13  ;;  %v944_v15 = vld [vmem:[%s11185_s18 + $0xf8] sm:$0xff]  ;;  %v946_v16 = vld [vmem:[%s11185_s18 + $0x100] sm:$0xff] }
  0x3f   : > { %943 = vst [vmem:[%s11190_s19 + $0xf0] sm:$0xff] %v942_v14  ;;  %945 = vst [vmem:[%s11190_s19 + $0xf8] sm:$0xff] %v944_v15  ;;  %v948_v17 = vld [vmem:[%s11185_s18 + $0x108] sm:$0xff]  ;;  %v950_v18 = vld [vmem:[%s11185_s18 + $0x110] sm:$0xff] }
  0x40   : > { %947 = vst [vmem:[%s11190_s19 + $0x100] sm:$0xff] %v946_v16  ;;  %v952_v19 = vld [vmem:[%s11185_s18 + $0x118] sm:$0xff]  ;;  %949 = vst [vmem:[%s11190_s19 + $0x108] sm:$0xff] %v948_v17  ;;  %v954_v20 = vld [vmem:[%s11185_s18 + $0x120] sm:$0xff] }
  0x41   : > { %951 = vst [vmem:[%s11190_s19 + $0x110] sm:$0xff] %v950_v18  ;;  %953 = vst [vmem:[%s11190_s19 + $0x118] sm:$0xff] %v952_v19  ;;  %v956_v21 = vld [vmem:[%s11185_s18 + $0x128] sm:$0xff]  ;;  %v958_v22 = vld [vmem:[%s11185_s18 + $0x130] sm:$0xff] }
  0x42   : > { %955 = vst [vmem:[%s11190_s19 + $0x120] sm:$0xff] %v954_v20  ;;  %957 = vst [vmem:[%s11190_s19 + $0x128] sm:$0xff] %v956_v21  ;;  %v960_v23 = vld [vmem:[%s11185_s18 + $0x138] sm:$0xff]  ;;  %v962_v24 = vld [vmem:[%s11185_s18 + $0x140] sm:$0xff] }
  0x43   : > { %959 = vst [vmem:[%s11190_s19 + $0x130] sm:$0xff] %v958_v22  ;;  %v964_v25 = vld [vmem:[%s11185_s18 + $0x148] sm:$0xff]  ;;  %961 = vst [vmem:[%s11190_s19 + $0x138] sm:$0xff] %v960_v23  ;;  %v966_v26 = vld [vmem:[%s11185_s18 + $0x150] sm:$0xff] }
  0x44   : > { %963 = vst [vmem:[%s11190_s19 + $0x140] sm:$0xff] %v962_v24  ;;  %965 = vst [vmem:[%s11190_s19 + $0x148] sm:$0xff] %v964_v25  ;;  %v968_v27 = vld [vmem:[%s11185_s18 + $0x158] sm:$0xff]  ;;  %v970_v28 = vld [vmem:[%s11185_s18 + $0x160] sm:$0xff] }
  0x45   : > { %967 = vst [vmem:[%s11190_s19 + $0x150] sm:$0xff] %v966_v26  ;;  %969 = vst [vmem:[%s11190_s19 + $0x158] sm:$0xff] %v968_v27  ;;  %v972_v29 = vld [vmem:[%s11185_s18 + $0x168] sm:$0xff]  ;;  %v974_v30 = vld [vmem:[%s11185_s18 + $0x170] sm:$0xff] }
  0x46   : > { %971 = vst [vmem:[%s11190_s19 + $0x160] sm:$0xff] %v970_v28  ;;  %v976_v31 = vld [vmem:[%s11185_s18 + $0x178] sm:$0xff]  ;;  %973 = vst [vmem:[%s11190_s19 + $0x168] sm:$0xff] %v972_v29  ;;  %v978_v32 = vld [vmem:[%s11185_s18 + $0x300] sm:$0xff] }
  0x47   : > { %975 = vst [vmem:[%s11190_s19 + $0x170] sm:$0xff] %v974_v30  ;;  %977 = vst [vmem:[%s11190_s19 + $0x178] sm:$0xff] %v976_v31  ;;  %v980_v33 = vld [vmem:[%s11185_s18 + $0x308] sm:$0xff]  ;;  %v982_v34 = vld [vmem:[%s11185_s18 + $0x310] sm:$0xff] }
  0x48   : > { %979 = vst [vmem:[%s11190_s19 + $0x180] sm:$0xff] %v978_v32  ;;  %981 = vst [vmem:[%s11190_s19 + $0x188] sm:$0xff] %v980_v33  ;;  %v984_v35 = vld [vmem:[%s11185_s18 + $0x318] sm:$0xff]  ;;  %v986_v36 = vld [vmem:[%s11185_s18 + $0x320] sm:$0xff] }
  0x49   : > { %983 = vst [vmem:[%s11190_s19 + $0x190] sm:$0xff] %v982_v34  ;;  %v988_v37 = vld [vmem:[%s11185_s18 + $0x328] sm:$0xff]  ;;  %985 = vst [vmem:[%s11190_s19 + $0x198] sm:$0xff] %v984_v35  ;;  %v990_v38 = vld [vmem:[%s11185_s18 + $0x330] sm:$0xff] }
  0x4a   : > { %987 = vst [vmem:[%s11190_s19 + $0x1a0] sm:$0xff] %v986_v36  ;;  %989 = vst [vmem:[%s11190_s19 + $0x1a8] sm:$0xff] %v988_v37  ;;  %v992_v39 = vld [vmem:[%s11185_s18 + $0x338] sm:$0xff]  ;;  %v994_v40 = vld [vmem:[%s11185_s18 + $0x340] sm:$0xff] }
  0x4b   : > { %991 = vst [vmem:[%s11190_s19 + $0x1b0] sm:$0xff] %v990_v38  ;;  %993 = vst [vmem:[%s11190_s19 + $0x1b8] sm:$0xff] %v992_v39  ;;  %v996_v41 = vld [vmem:[%s11185_s18 + $0x348] sm:$0xff]  ;;  %v998_v42 = vld [vmem:[%s11185_s18 + $0x350] sm:$0xff] }
  0x4c   : > { %995 = vst [vmem:[%s11190_s19 + $0x1c0] sm:$0xff] %v994_v40  ;;  %v1000_v43 = vld [vmem:[%s11185_s18 + $0x358] sm:$0xff]  ;;  %997 = vst [vmem:[%s11190_s19 + $0x1c8] sm:$0xff] %v996_v41  ;;  %v1002_v44 = vld [vmem:[%s11185_s18 + $0x360] sm:$0xff] }
  0x4d   : > { %999 = vst [vmem:[%s11190_s19 + $0x1d0] sm:$0xff] %v998_v42  ;;  %1001 = vst [vmem:[%s11190_s19 + $0x1d8] sm:$0xff] %v1000_v43  ;;  %v1004_v45 = vld [vmem:[%s11185_s18 + $0x368] sm:$0xff]  ;;  %v1006_v46 = vld [vmem:[%s11185_s18 + $0x370] sm:$0xff] }
  0x4e   : > { %1003 = vst [vmem:[%s11190_s19 + $0x1e0] sm:$0xff] %v1002_v44  ;;  %1005 = vst [vmem:[%s11190_s19 + $0x1e8] sm:$0xff] %v1004_v45  ;;  %v1008_v47 = vld [vmem:[%s11185_s18 + $0x378] sm:$0xff]  ;;  %v1010_v48 = vld [vmem:[%s11185_s18 + $0x380] sm:$0xff] }
  0x4f   : > { %1007 = vst [vmem:[%s11190_s19 + $0x1f0] sm:$0xff] %v1006_v46  ;;  %v1012_v49 = vld [vmem:[%s11185_s18 + $0x388] sm:$0xff]  ;;  %1009 = vst [vmem:[%s11190_s19 + $0x1f8] sm:$0xff] %v1008_v47  ;;  %v1014_v50 = vld [vmem:[%s11185_s18 + $0x390] sm:$0xff] }
  0x50   : > { %1011 = vst [vmem:[%s11190_s19 + $0x200] sm:$0xff] %v1010_v48  ;;  %1013 = vst [vmem:[%s11190_s19 + $0x208] sm:$0xff] %v1012_v49  ;;  %v1016_v51 = vld [vmem:[%s11185_s18 + $0x398] sm:$0xff]  ;;  %v1018_v52 = vld [vmem:[%s11185_s18 + $0x3a0] sm:$0xff] }
  0x51   : > { %1015 = vst [vmem:[%s11190_s19 + $0x210] sm:$0xff] %v1014_v50  ;;  %1017 = vst [vmem:[%s11190_s19 + $0x218] sm:$0xff] %v1016_v51  ;;  %v1020_v53 = vld [vmem:[%s11185_s18 + $0x3a8] sm:$0xff]  ;;  %v1022_v54 = vld [vmem:[%s11185_s18 + $0x3b0] sm:$0xff] }
  0x52   : > { %1019 = vst [vmem:[%s11190_s19 + $0x220] sm:$0xff] %v1018_v52  ;;  %v1024_v55 = vld [vmem:[%s11185_s18 + $0x3b8] sm:$0xff]  ;;  %1021 = vst [vmem:[%s11190_s19 + $0x228] sm:$0xff] %v1020_v53  ;;  %v1026_v56 = vld [vmem:[%s11185_s18 + $0x3c0] sm:$0xff] }
  0x53   : > { %1023 = vst [vmem:[%s11190_s19 + $0x230] sm:$0xff] %v1022_v54  ;;  %1025 = vst [vmem:[%s11190_s19 + $0x238] sm:$0xff] %v1024_v55  ;;  %v1028_v57 = vld [vmem:[%s11185_s18 + $0x3c8] sm:$0xff]  ;;  %v1030_v58 = vld [vmem:[%s11185_s18 + $0x3d0] sm:$0xff] }
  0x54   : > { %1027 = vst [vmem:[%s11190_s19 + $0x240] sm:$0xff] %v1026_v56  ;;  %1029 = vst [vmem:[%s11190_s19 + $0x248] sm:$0xff] %v1028_v57  ;;  %v1032_v59 = vld [vmem:[%s11185_s18 + $0x3d8] sm:$0xff]  ;;  %v1034_v60 = vld [vmem:[%s11185_s18 + $0x3e0] sm:$0xff] }
  0x55   : > { %1031 = vst [vmem:[%s11190_s19 + $0x250] sm:$0xff] %v1030_v58  ;;  %v1036_v61 = vld [vmem:[%s11185_s18 + $0x3e8] sm:$0xff]  ;;  %1033 = vst [vmem:[%s11190_s19 + $0x258] sm:$0xff] %v1032_v59  ;;  %v1038_v62 = vld [vmem:[%s11185_s18 + $0x3f0] sm:$0xff] }
  0x56   : > { %1035 = vst [vmem:[%s11190_s19 + $0x260] sm:$0xff] %v1034_v60  ;;  %1037 = vst [vmem:[%s11190_s19 + $0x268] sm:$0xff] %v1036_v61  ;;  %v1040_v63 = vld [vmem:[%s11185_s18 + $0x3f8] sm:$0xff]  ;;  %v1042_v0 = vld [vmem:[%s11185_s18 + $0x400] sm:$0xff] }
  0x57   : > { %1039 = vst [vmem:[%s11190_s19 + $0x270] sm:$0xff] %v1038_v62  ;;  %1041 = vst [vmem:[%s11190_s19 + $0x278] sm:$0xff] %v1040_v63  ;;  %v1044_v1 = vld [vmem:[%s11185_s18 + $0x408] sm:$0xff]  ;;  %v1046_v2 = vld [vmem:[%s11185_s18 + $0x410] sm:$0xff] }
  0x58   : > { %1043 = vst [vmem:[%s11190_s19 + $0x280] sm:$0xff] %v1042_v0  ;;  %v1048_v3 = vld [vmem:[%s11185_s18 + $0x418] sm:$0xff]  ;;  %1045 = vst [vmem:[%s11190_s19 + $0x288] sm:$0xff] %v1044_v1  ;;  %v1050_v4 = vld [vmem:[%s11185_s18 + $0x420] sm:$0xff] }
  0x59   : > { %1047 = vst [vmem:[%s11190_s19 + $0x290] sm:$0xff] %v1046_v2  ;;  %1049 = vst [vmem:[%s11190_s19 + $0x298] sm:$0xff] %v1048_v3  ;;  %v1052_v5 = vld [vmem:[%s11185_s18 + $0x428] sm:$0xff]  ;;  %v1054_v6 = vld [vmem:[%s11185_s18 + $0x430] sm:$0xff] }
  0x5a   : > { %1051 = vst [vmem:[%s11190_s19 + $0x2a0] sm:$0xff] %v1050_v4  ;;  %1053 = vst [vmem:[%s11190_s19 + $0x2a8] sm:$0xff] %v1052_v5  ;;  %v1056_v7 = vld [vmem:[%s11185_s18 + $0x438] sm:$0xff]  ;;  %v1058_v8 = vld [vmem:[%s11185_s18 + $0x440] sm:$0xff] }
  0x5b   : > { %1055 = vst [vmem:[%s11190_s19 + $0x2b0] sm:$0xff] %v1054_v6  ;;  %v1060_v9 = vld [vmem:[%s11185_s18 + $0x448] sm:$0xff]  ;;  %1057 = vst [vmem:[%s11190_s19 + $0x2b8] sm:$0xff] %v1056_v7  ;;  %v1062_v10 = vld [vmem:[%s11185_s18 + $0x450] sm:$0xff] }
  0x5c   : > { %1059 = vst [vmem:[%s11190_s19 + $0x2c0] sm:$0xff] %v1058_v8  ;;  %1061 = vst [vmem:[%s11190_s19 + $0x2c8] sm:$0xff] %v1060_v9  ;;  %v1064_v11 = vld [vmem:[%s11185_s18 + $0x458] sm:$0xff]  ;;  %v1066_v12 = vld [vmem:[%s11185_s18 + $0x460] sm:$0xff] }
  0x5d   : > { %1063 = vst [vmem:[%s11190_s19 + $0x2d0] sm:$0xff] %v1062_v10  ;;  %1065 = vst [vmem:[%s11190_s19 + $0x2d8] sm:$0xff] %v1064_v11  ;;  %v1068_v13 = vld [vmem:[%s11185_s18 + $0x468] sm:$0xff]  ;;  %v1070_v14 = vld [vmem:[%s11185_s18 + $0x470] sm:$0xff] }
  0x5e   : > { %1067 = vst [vmem:[%s11190_s19 + $0x2e0] sm:$0xff] %v1066_v12  ;;  %v1072_v15 = vld [vmem:[%s11185_s18 + $0x478] sm:$0xff]  ;;  %1069 = vst [vmem:[%s11190_s19 + $0x2e8] sm:$0xff] %v1068_v13 }
  0x5f   : > { %1071 = vst [vmem:[%s11190_s19 + $0x2f0] sm:$0xff] %v1070_v14  ;;  %1073 = vst [vmem:[%s11190_s19 + $0x2f8] sm:$0xff] %v1072_v15 }
  0x60 PF: > { %1079 = sbr.rel (!%p11066_p3) target bundleno = 125 (0x7d), region = 111  ;;  %s1081_s20 = sand.u32 (%p11066_p3), 1, %s10992_s22  }
  0x61   : > { %s9695_s26 = smul.u32 (%p11066_p3), 192, %s10996_s23 }
  0x62   : > { %s10382_s27 = smul.u32 (%p11066_p3), 384, %s1081_s20 }
  0x63   : > { %s11388_s8 = scalar_lea.vmem (%p11066_p3), %s15436_s4, %s9695_s26 }
  0x64   : > { %v1102_v16 = vld [vmem:[%s11388_s8] sm:$0xff] (%p11066_p3)   ;;  %v1106_v17 = vld [vmem:[%s11388_s8 + $0x8] sm:$0xff] (%p11066_p3)   ;;  %v1110_v18 = vld [vmem:[%s11388_s8 + $0x10] sm:$0xff] (%p11066_p3)   ;;  %s11393_s29 = scalar_lea.vmem (%p11066_p3), [#allocation4], %s10382_s27 }
  0x65   : > { %1103 = vst [vmem:[%s11393_s29] sm:$0xff] (%p11066_p3), %v1102_v16   ;;  %1107 = vst [vmem:[%s11393_s29 + $0x8] sm:$0xff] (%p11066_p3), %v1106_v17   ;;  %v1114_v19 = vld [vmem:[%s11388_s8 + $0x18] sm:$0xff] (%p11066_p3)   ;;  %v1118_v20 = vld [vmem:[%s11388_s8 + $0x20] sm:$0xff] (%p11066_p3)  }
  0x66   : > { %1111 = vst [vmem:[%s11393_s29 + $0x10] sm:$0xff] (%p11066_p3), %v1110_v18   ;;  %v1122_v21 = vld [vmem:[%s11388_s8 + $0x28] sm:$0xff] (%p11066_p3)   ;;  %1115 = vst [vmem:[%s11393_s29 + $0x18] sm:$0xff] (%p11066_p3), %v1114_v19   ;;  %v1126_v22 = vld [vmem:[%s11388_s8 + $0x30] sm:$0xff] (%p11066_p3)  }
  0x67   : > { %1119 = vst [vmem:[%s11393_s29 + $0x20] sm:$0xff] %v1118_v20   ;;  %1123 = vst [vmem:[%s11393_s29 + $0x28] sm:$0xff] %v1122_v21   ;;  %v1130_v23 = vld [vmem:[%s11388_s8 + $0x38] sm:$0xff]   ;;  %v1134_v24 = vld [vmem:[%s11388_s8 + $0x40] sm:$0xff]  }
  0x68   : > { %1127 = vst [vmem:[%s11393_s29 + $0x30] sm:$0xff] %v1126_v22   ;;  %1131 = vst [vmem:[%s11393_s29 + $0x38] sm:$0xff] %v1130_v23   ;;  %v1138_v25 = vld [vmem:[%s11388_s8 + $0x48] sm:$0xff]   ;;  %v1142_v26 = vld [vmem:[%s11388_s8 + $0x50] sm:$0xff]  }
  0x69   : > { %1135 = vst [vmem:[%s11393_s29 + $0x40] sm:$0xff] %v1134_v24   ;;  %v1146_v27 = vld [vmem:[%s11388_s8 + $0x58] sm:$0xff]   ;;  %1139 = vst [vmem:[%s11393_s29 + $0x48] sm:$0xff] %v1138_v25   ;;  %v1150_v28 = vld [vmem:[%s11388_s8 + $0x60] sm:$0xff]  }
  0x6a   : > { %1143 = vst [vmem:[%s11393_s29 + $0x50] sm:$0xff] %v1142_v26   ;;  %1147 = vst [vmem:[%s11393_s29 + $0x58] sm:$0xff] %v1146_v27   ;;  %v1154_v29 = vld [vmem:[%s11388_s8 + $0x68] sm:$0xff]   ;;  %v1158_v30 = vld [vmem:[%s11388_s8 + $0x70] sm:$0xff]  }
  0x6b   : > { %1151 = vst [vmem:[%s11393_s29 + $0x60] sm:$0xff] %v1150_v28   ;;  %1155 = vst [vmem:[%s11393_s29 + $0x68] sm:$0xff] %v1154_v29   ;;  %v1162_v31 = vld [vmem:[%s11388_s8 + $0x78] sm:$0xff]   ;;  %v1166_v32 = vld [vmem:[%s11388_s8 + $0x80] sm:$0xff]  }
  0x6c   : > { %1159 = vst [vmem:[%s11393_s29 + $0x70] sm:$0xff] %v1158_v30   ;;  %v1170_v33 = vld [vmem:[%s11388_s8 + $0x88] sm:$0xff]   ;;  %1163 = vst [vmem:[%s11393_s29 + $0x78] sm:$0xff] %v1162_v31   ;;  %v1174_v34 = vld [vmem:[%s11388_s8 + $0x90] sm:$0xff]  }
  0x6d   : > { %1167 = vst [vmem:[%s11393_s29 + $0x80] sm:$0xff] %v1166_v32   ;;  %1171 = vst [vmem:[%s11393_s29 + $0x88] sm:$0xff] %v1170_v33   ;;  %v1178_v35 = vld [vmem:[%s11388_s8 + $0x98] sm:$0xff]   ;;  %v1182_v36 = vld [vmem:[%s11388_s8 + $0xa0] sm:$0xff]  }
  0x6e   : > { %1175 = vst [vmem:[%s11393_s29 + $0x90] sm:$0xff] %v1174_v34   ;;  %1179 = vst [vmem:[%s11393_s29 + $0x98] sm:$0xff] %v1178_v35   ;;  %v1186_v37 = vld [vmem:[%s11388_s8 + $0xa8] sm:$0xff]   ;;  %v1190_v38 = vld [vmem:[%s11388_s8 + $0xb0] sm:$0xff]  }
  0x6f   : > { %1183 = vst [vmem:[%s11393_s29 + $0xa0] sm:$0xff] %v1182_v36   ;;  %v1194_v39 = vld [vmem:[%s11388_s8 + $0xb8] sm:$0xff]   ;;  %1187 = vst [vmem:[%s11393_s29 + $0xa8] sm:$0xff] %v1186_v37   ;;  %v1198_v40 = vld [vmem:[%s11388_s8 + $0x180] sm:$0xff]  }
  0x70   : > { %1191 = vst [vmem:[%s11393_s29 + $0xb0] sm:$0xff] %v1190_v38   ;;  %1195 = vst [vmem:[%s11393_s29 + $0xb8] sm:$0xff] %v1194_v39   ;;  %v1202_v41 = vld [vmem:[%s11388_s8 + $0x188] sm:$0xff]   ;;  %v1206_v42 = vld [vmem:[%s11388_s8 + $0x190] sm:$0xff]  }
  0x71   : > { %1199 = vst [vmem:[%s11393_s29 + $0xc0] sm:$0xff] %v1198_v40   ;;  %1203 = vst [vmem:[%s11393_s29 + $0xc8] sm:$0xff] %v1202_v41   ;;  %v1210_v43 = vld [vmem:[%s11388_s8 + $0x198] sm:$0xff]   ;;  %v1214_v44 = vld [vmem:[%s11388_s8 + $0x1a0] sm:$0xff]  }
  0x72   : > { %1207 = vst [vmem:[%s11393_s29 + $0xd0] sm:$0xff] %v1206_v42   ;;  %v1218_v45 = vld [vmem:[%s11388_s8 + $0x1a8] sm:$0xff]   ;;  %1211 = vst [vmem:[%s11393_s29 + $0xd8] sm:$0xff] %v1210_v43   ;;  %v1222_v46 = vld [vmem:[%s11388_s8 + $0x1b0] sm:$0xff]  }
  0x73   : > { %1215 = vst [vmem:[%s11393_s29 + $0xe0] sm:$0xff] %v1214_v44   ;;  %1219 = vst [vmem:[%s11393_s29 + $0xe8] sm:$0xff] %v1218_v45   ;;  %v1226_v47 = vld [vmem:[%s11388_s8 + $0x1b8] sm:$0xff]   ;;  %v1230_v48 = vld [vmem:[%s11388_s8 + $0x1c0] sm:$0xff]  }
  0x74   : > { %1223 = vst [vmem:[%s11393_s29 + $0xf0] sm:$0xff] %v1222_v46   ;;  %1227 = vst [vmem:[%s11393_s29 + $0xf8] sm:$0xff] %v1226_v47   ;;  %v1234_v49 = vld [vmem:[%s11388_s8 + $0x1c8] sm:$0xff]   ;;  %v1238_v50 = vld [vmem:[%s11388_s8 + $0x1d0] sm:$0xff]  }
  0x75   : > { %1231 = vst [vmem:[%s11393_s29 + $0x100] sm:$0xff] %v1230_v48   ;;  %v1242_v51 = vld [vmem:[%s11388_s8 + $0x1d8] sm:$0xff]   ;;  %1235 = vst [vmem:[%s11393_s29 + $0x108] sm:$0xff] %v1234_v49   ;;  %v1246_v52 = vld [vmem:[%s11388_s8 + $0x1e0] sm:$0xff]  }
  0x76   : > { %1239 = vst [vmem:[%s11393_s29 + $0x110] sm:$0xff] %v1238_v50   ;;  %1243 = vst [vmem:[%s11393_s29 + $0x118] sm:$0xff] %v1242_v51   ;;  %v1250_v53 = vld [vmem:[%s11388_s8 + $0x1e8] sm:$0xff]   ;;  %v1254_v54 = vld [vmem:[%s11388_s8 + $0x1f0] sm:$0xff]  }
  0x77   : > { %1247 = vst [vmem:[%s11393_s29 + $0x120] sm:$0xff] %v1246_v52   ;;  %1251 = vst [vmem:[%s11393_s29 + $0x128] sm:$0xff] %v1250_v53   ;;  %v1258_v55 = vld [vmem:[%s11388_s8 + $0x1f8] sm:$0xff]   ;;  %v1262_v56 = vld [vmem:[%s11388_s8 + $0x200] sm:$0xff]  }
  0x78   : > { %1255 = vst [vmem:[%s11393_s29 + $0x130] sm:$0xff] %v1254_v54   ;;  %v1266_v57 = vld [vmem:[%s11388_s8 + $0x208] sm:$0xff]   ;;  %1259 = vst [vmem:[%s11393_s29 + $0x138] sm:$0xff] %v1258_v55   ;;  %v1270_v58 = vld [vmem:[%s11388_s8 + $0x210] sm:$0xff]  }
  0x79   : > { %1263 = vst [vmem:[%s11393_s29 + $0x140] sm:$0xff] %v1262_v56   ;;  %1267 = vst [vmem:[%s11393_s29 + $0x148] sm:$0xff] %v1266_v57   ;;  %v1274_v59 = vld [vmem:[%s11388_s8 + $0x218] sm:$0xff]   ;;  %v1278_v60 = vld [vmem:[%s11388_s8 + $0x220] sm:$0xff]  }
  0x7a   : > { %1271 = vst [vmem:[%s11393_s29 + $0x150] sm:$0xff] %v1270_v58   ;;  %1275 = vst [vmem:[%s11393_s29 + $0x158] sm:$0xff] %v1274_v59   ;;  %v1282_v61 = vld [vmem:[%s11388_s8 + $0x228] sm:$0xff]   ;;  %v1286_v62 = vld [vmem:[%s11388_s8 + $0x230] sm:$0xff]  }
  0x7b   : > { %1279 = vst [vmem:[%s11393_s29 + $0x160] sm:$0xff] %v1278_v60   ;;  %v1290_v63 = vld [vmem:[%s11388_s8 + $0x238] sm:$0xff]   ;;  %1283 = vst [vmem:[%s11393_s29 + $0x168] sm:$0xff] %v1282_v61  }
  0x7c   : > { %1287 = vst [vmem:[%s11393_s29 + $0x170] sm:$0xff] %v1286_v62   ;;  %1291 = vst [vmem:[%s11393_s29 + $0x178] sm:$0xff] %v1290_v63  }
  0x7d PF: > { %p9236_p5 = scmp.ge.s32.totalorder %s10996_s23, 1  ;;  %p1507_p6 = scmp.lt.s32.totalorder %s10996_s23, 3 }
  0x7f   : > { %p1508_p7 = pnand %p9236_p5, %p1507_p6 }
  0x81   : > { %1511 = sbr.rel (%p1508_p7) target bundleno = 3011 (0xbc3), region = 152 }
  0x88   : > { %v1879_v0 = vld [vmem:[%s15437_s5 + $0x28] sm:$0x3]  ;;  %vm2079_vm0 = vcmask 1041408   ;;  %s1514_s11 = sand.u32 1, %s10988_s21   ;;  %v10998_v1 = vmov 0   ;;  %vm2006_vm1 = vcmask 31744  }
  0x89   : > { %10415 = vset.pattern.permute.xlu1 %v10998_v1  ;;  %10414 = vset.pattern.permute.xlu0 %v10998_v1  ;;  %v2081_v2 = vsel %vm2079_vm0, %v1879_v0, 0  ;;  %s10384_s12 = smul.u32 768, %s1514_s11  ;;  %vm2596_vm2 = vcmask 294144   ;;  %s10999_s18 = smov 96   ;;  %vm1600_vm3 = vcmask 1045504   ;;  %vm11001_vm4 = vmmov 0  }
  0x8a   : > { %10371 = vmatprep.subr.msk.bf16.mxu0 %vm2079_vm0, %v1879_v0  ;;  %s11496_s13 = smul.u32 384, %s1514_s11  ;;  %p12327_p8 = scmp.lt.s32.totalorder %s9227_s24, 1  ;;  %vm1596_vm5 = vcmask 48128   ;;  %vm1674_vm6 = vcmask 64512   ;;  %vm3772_vm7 = vcmask 523264   ;;  %vm3513_vm8 = vcmask 261120  }
  0x8b   : > { %9928 = vmatpush3.bf16.msra.mxu0 %v2081_v2  ;;  %s11498_s14 = scalar_lea.vmem [#allocation3], %s10384_s12  ;;  %vm3678_vm9 = vcmask 1041409   ;;  %vm3680_vm10 = vcmask 1042434   ;;  %vm3682_vm11 = vcmask 1043459   ;;  %vm3684_vm12 = vcmask 1044484  }
  0x8c   : > { %v1833_v3 = vld [vmem:[%s11498_s14 + $0x10] sm:$0xff]  ;;  %v1831_v4 = vld [vmem:[%s11498_s14] sm:$0xff]  ;;  %v1834_v5 = vld [vmem:[%s11498_s14 + $0x18] sm:$0xff]  ;;  %s11504_s21 = scalar_lea.vmem [#allocation2], %s11496_s13  ;;  %s11568_s15 = scalar_lea.vmem [#allocation4], %s11496_s13  ;;  %vm3686_vm13 = vcmask 1045509  }
  0x8d   : > { %2320 = vperm.xlu1 %10415, %v1833_v3   ;;  %2310 = vperm.xlu0 %10414, %v1831_v4   ;;  %v10416_v6 = vld [vmem:[%s11504_s21] sm:$0xff]   ;;  %v10417_v7 = vld [vmem:[%s11504_s21 + $0x8] sm:$0xff]   ;;  %v10418_v9 = vld [vmem:[%s11504_s21 + $0x10] sm:$0xff]   ;;  %s16037_s24 = smov (!%p12327_p8, %s9227_s24), 1  ;;  %vm3688_vm14 = vcmask 1046534   ;;  %vm3690_vm15 = vcmask 1047559  }
  0x8e   : > { %9929 = vmatprep.mubr.msk.bf16.mxu0 %vm2006_vm1, %v10416_v6  ;;  %v1832_v8 = vld [vmem:[%s11498_s14 + $0x8] sm:$0xff]  ;;  %v1835_v11 = vld [vmem:[%s11498_s14 + $0x20] sm:$0xff]  ;;  %v10419_v12 = vld [vmem:[%s11504_s21 + $0x18] sm:$0xff]   ;;  %s12375_s26 = sshll.u32 %s16037_s24, 3 }
  0x8f   : > { %9930 = vmatmul.mubr.msk.bf16.vlgmr.msra.gmra.mrb[0].mxu0 %vm2006_vm1, %v10417_v7  ;;  %v1836_v10 = vld [vmem:[%s11498_s14 + $0x28] sm:$0xff]  ;;  %v1838_v13 = vld [vmem:[%s11498_s14 + $0x38] sm:$0xff]  ;;  %v1837_v14 = vld [vmem:[%s11498_s14 + $0x30] sm:$0xff]  ;;  %s1579_s30 = scalar_lea.vmem %s15433_s1, %s12375_s26  ;;  %s1575_s10 = scalar_lea.vmem %s15432_s0, %s12375_s26 }
  0x90   : > { %9933 = vmatprep.mubr.msk.bf16.mxu0 %vm2006_vm1, %v10418_v9  ;;  %v10420_v15 = vld [vmem:[%s11504_s21 + $0x20] sm:$0xff]   ;;  %v1840_v16 = vld [vmem:[%s11498_s14 + $0x48] sm:$0xff]  ;;  %v1842_v19 = vld [vmem:[%s11498_s14 + $0x58] sm:$0xff]  ;;  %s1586_s27 = scalar_lea.vmem %s15438_s6, %s12375_s26 }
  0x91   : > { %2325 = vperm.xlu1 %10415, %v1834_v5   ;;  %2315 = vperm.xlu0 %10414, %v1832_v8   ;;  %v1839_v17 = vld [vmem:[%s11498_s14 + $0x40] sm:$0xff]  ;;  %v10421_v18 = vld [vmem:[%s11504_s21 + $0x28] sm:$0xff]   ;;  %v1841_v20 = vld [vmem:[%s11498_s14 + $0x50] sm:$0xff] }
  0x92   : > { %v10422_v21 = vld [vmem:[%s11504_s21 + $0x30] sm:$0xff]   ;;  %v1844_v22 = vld [vmem:[%s11498_s14 + $0x68] sm:$0xff]  ;;  %v1843_v23 = vld [vmem:[%s11498_s14 + $0x60] sm:$0xff] }
  0x93   : > { %v10423_v24 = vld [vmem:[%s11504_s21 + $0x38] sm:$0xff]   ;;  %v1845_v26 = vld [vmem:[%s11498_s14 + $0x70] sm:$0xff]  ;;  %v10424_v27 = vld [vmem:[%s11504_s21 + $0x40] sm:$0xff]  }
  0x94   : > { %v1846_v25 = vld [vmem:[%s11498_s14 + $0x78] sm:$0xff]  ;;  %v1848_v28 = vld [vmem:[%s11498_s14 + $0x88] sm:$0xff]  ;;  %v1847_v29 = vld [vmem:[%s11498_s14 + $0x80] sm:$0xff] }
  0x95   : > { %2335 = vperm.xlu1 %10415, %v1836_v10   ;;  %2330 = vperm.xlu0 %10414, %v1835_v11   ;;  %v10425_v30 = vld [vmem:[%s11504_s21 + $0x48] sm:$0xff]   ;;  %v1850_v31 = vld [vmem:[%s11498_s14 + $0x98] sm:$0xff]  ;;  %v1849_v32 = vld [vmem:[%s11498_s14 + $0x90] sm:$0xff] }
  0x96   : > { %v10426_v33 = vld [vmem:[%s11504_s21 + $0x50] sm:$0xff]   ;;  %v1852_v34 = vld [vmem:[%s11498_s14 + $0xa8] sm:$0xff]  ;;  %v1851_v35 = vld [vmem:[%s11498_s14 + $0xa0] sm:$0xff] }
  0x97   : > { %9934 = vmatmul.mubr.msk.bf16.gmra.mrb[4].mxu0 %vm2006_vm1, %v10419_v12  ;;  %v10427_v36 = vld [vmem:[%s11504_s21 + $0x58] sm:$0xff]   ;;  %v1853_v38 = vld [vmem:[%s11498_s14 + $0xb0] sm:$0xff]  ;;  %v10428_v39 = vld [vmem:[%s11504_s21 + $0x60] sm:$0xff]  }
  0x98   : > { %9937 = vmatprep.mubr.msk.bf16.mxu0 %vm2006_vm1, %v10420_v15  ;;  %v1854_v37 = vld [vmem:[%s11498_s14 + $0xb8] sm:$0xff]  ;;  %v1856_v40 = vld [vmem:[%s11498_s14 + $0xc8] sm:$0xff]  ;;  %v1855_v41 = vld [vmem:[%s11498_s14 + $0xc0] sm:$0xff] }
  0x99   : > { %2345 = vperm.xlu1 %10415, %v1838_v13   ;;  %2340 = vperm.xlu0 %10414, %v1837_v14   ;;  %v10429_v42 = vld [vmem:[%s11504_s21 + $0x68] sm:$0xff]   ;;  %v1858_v43 = vld [vmem:[%s11498_s14 + $0xd8] sm:$0xff]  ;;  %v1857_v44 = vld [vmem:[%s11498_s14 + $0xd0] sm:$0xff] }
  0x9a   : > { %v10430_v45 = vld [vmem:[%s11504_s21 + $0x70] sm:$0xff]   ;;  %v1860_v46 = vld [vmem:[%s11498_s14 + $0xe8] sm:$0xff]  ;;  %v1859_v47 = vld [vmem:[%s11498_s14 + $0xe0] sm:$0xff] }
  0x9b   : > { %v10431_v48 = vld [vmem:[%s11504_s21 + $0x78] sm:$0xff]   ;;  %v1861_v50 = vld [vmem:[%s11498_s14 + $0xf0] sm:$0xff]  ;;  %v10432_v51 = vld [vmem:[%s11504_s21 + $0x80] sm:$0xff]  }
  0x9c   : > { %v1862_v49 = vld [vmem:[%s11498_s14 + $0xf8] sm:$0xff]  ;;  %v1864_v52 = vld [vmem:[%s11498_s14 + $0x108] sm:$0xff]  ;;  %v1863_v53 = vld [vmem:[%s11498_s14 + $0x100] sm:$0xff] }
  0x9d   : > { %2355 = vperm.xlu1 %10415, %v1840_v16   ;;  %2350 = vperm.xlu0 %10414, %v1839_v17   ;;  %v10433_v54 = vld [vmem:[%s11504_s21 + $0x88] sm:$0xff]   ;;  %v1866_v55 = vld [vmem:[%s11498_s14 + $0x118] sm:$0xff]  ;;  %v1865_v56 = vld [vmem:[%s11498_s14 + $0x110] sm:$0xff] }
  0x9e   : > { %v10434_v57 = vld [vmem:[%s11504_s21 + $0x90] sm:$0xff]   ;;  %v1868_v58 = vld [vmem:[%s11498_s14 + $0x128] sm:$0xff]  ;;  %v1867_v59 = vld [vmem:[%s11498_s14 + $0x120] sm:$0xff] }
  0x9f   : > { %9938 = vmatmul.mubr.msk.bf16.gmra.mrb[8].mxu0 %vm2006_vm1, %v10421_v18  ;;  %v10435_v60 = vld [vmem:[%s11504_s21 + $0x98] sm:$0xff]   ;;  %v1869_v62 = vld [vmem:[%s11498_s14 + $0x130] sm:$0xff]  ;;  %v10436_v63 = vld [vmem:[%s11504_s21 + $0xa0] sm:$0xff]  }
  0xa0   : > { %9941 = vmatprep.mubr.msk.bf16.mxu0 %vm2006_vm1, %v10422_v21  ;;  %v1870_v61 = vld [vmem:[%s11498_s14 + $0x138] sm:$0xff]  ;;  %v1872_v0 = vld [vmem:[%s11498_s14 + $0x148] sm:$0xff]  ;;  %v1871_v1 = vld [vmem:[%s11498_s14 + $0x140] sm:$0xff] }
  0xa1   : > { %2365 = vperm.xlu1 %10415, %v1842_v19   ;;  %2360 = vperm.xlu0 %10414, %v1841_v20   ;;  %v10437_v2 = vld [vmem:[%s11504_s21 + $0xa8] sm:$0xff]   ;;  %v1874_v3 = vld [vmem:[%s11498_s14 + $0x158] sm:$0xff]  ;;  %v1873_v4 = vld [vmem:[%s11498_s14 + $0x150] sm:$0xff] }
  0xa2   : > { %v10438_v5 = vld [vmem:[%s11504_s21 + $0xb0] sm:$0xff]   ;;  %v1876_v6 = vld [vmem:[%s11498_s14 + $0x168] sm:$0xff]  ;;  %v1875_v7 = vld [vmem:[%s11498_s14 + $0x160] sm:$0xff] }
  0xa3   : > { %v10439_v8 = vld [vmem:[%s11504_s21 + $0xb8] sm:$0xff]   ;;  %v1877_v10 = vld [vmem:[%s11498_s14 + $0x170] sm:$0xff] }
  0xa4   : > { %v1878_v9 = vld [vmem:[%s11498_s14 + $0x178] sm:$0xff] }
  0xa5   : > { %2375 = vperm.xlu1 %10415, %v1844_v22   ;;  %2370 = vperm.xlu0 %10414, %v1843_v23   ;;  %v1748_v23 = vlaneseq }
  0xa7   : > { %9942 = vmatmul.mubr.msk.bf16.gmra.mrb[12].mxu0 %vm2006_vm1, %v10423_v24  ;;  %v11610_v24 = vshrl.u32 %v1748_v23, 7 }
  0xa8   : > { %9945 = vmatprep.mubr.msk.bf16.mxu0 %vm2006_vm1, %v10424_v27 }
  0xa9   : > { %2385 = vperm.xlu1 %10415, %v1846_v25   ;;  %2380 = vperm.xlu0 %10414, %v1845_v26   ;;  %15641 = vst [vmem:[#allocation5_spill] sm:$0xff] %v11610_v24  ;;  %v1880_v26 = vld [vmem:[%s15437_s5 + $0x28] sm:$0x8] }
  0xad   : > { %2395 = vperm.xlu1 %10415, %v1848_v28   ;;  %2390 = vperm.xlu0 %10414, %v1847_v29   ;;  %v11620_v28 = vsub.s32 6, %v11610_v24  ;;  %v1881_v29 = vunpack.c.l.bf16 %v1880_v26 }
  0xaf   : > { %9946 = vmatmul.mubr.msk.bf16.gmra.mrb[16].mxu0 %vm2006_vm1, %v10425_v30  ;;  %15642 = vst [vmem:[#allocation6_spill] sm:$0xff] %v11620_v28 }
  0xb0   : > { %9949 = vmatprep.mubr.msk.bf16.mxu0 %vm2006_vm1, %v10426_v33 }
  0xb1   : > { %2405 = vperm.xlu1 %10415, %v1850_v31   ;;  %2400 = vperm.xlu0 %10414, %v1849_v32   ;;  %v11627_v32 = vrot.slane %v1881_v29, %v11620_v28 }
  0xb5   : > { %2415 = vperm.xlu1 %10415, %v1852_v34   ;;  %2410 = vperm.xlu0 %10414, %v1851_v35  }
  0xb7   : > { %9950 = vmatmul.mubr.msk.bf16.gmra.mrb[20].mxu0 %vm2006_vm1, %v10427_v36 }
  0xb8   : > { %9953 = vmatprep.mubr.msk.bf16.mxu0 %vm2006_vm1, %v10428_v39 }
  0xb9   : > { %2425 = vperm.xlu1 %10415, %v1854_v37   ;;  %2420 = vperm.xlu0 %10414, %v1853_v38  }
  0xbd   : > { %2435 = vperm.xlu1 %10415, %v1856_v40   ;;  %2430 = vperm.xlu0 %10414, %v1855_v41  }
  0xbf   : > { %9954 = vmatmul.mubr.msk.bf16.gmra.mrb[24].mxu0 %vm2006_vm1, %v10429_v42 }
  0xc0   : > { %9957 = vmatprep.mubr.msk.bf16.mxu0 %vm2006_vm1, %v10430_v45 }
  0xc1   : > { %2445 = vperm.xlu1 %10415, %v1858_v43   ;;  %2440 = vperm.xlu0 %10414, %v1857_v44  }
  0xc5   : > { %2455 = vperm.xlu1 %10415, %v1860_v46   ;;  %2450 = vperm.xlu0 %10414, %v1859_v47  }
  0xc7   : > { %9958 = vmatmul.mubr.msk.bf16.gmra.mrb[28].mxu0 %vm2006_vm1, %v10431_v48 }
  0xc8   : > { %9961 = vmatprep.mubr.msk.bf16.mxu0 %vm2006_vm1, %v10432_v51 }
  0xc9   : > { %2465 = vperm.xlu1 %10415, %v1862_v49   ;;  %2460 = vperm.xlu0 %10414, %v1861_v50  }
  0xcd   : > { %2475 = vperm.xlu1 %10415, %v1864_v52   ;;  %2470 = vperm.xlu0 %10414, %v1863_v53  }
  0xcf   : > { %9962 = vmatmul.mubr.msk.bf16.gmra.mrb[32].mxu0 %vm2006_vm1, %v10433_v54 }
  0xd0   : > { %9965 = vmatprep.mubr.msk.bf16.mxu0 %vm2006_vm1, %v10434_v57 }
  0xd1   : > { %2485 = vperm.xlu1 %10415, %v1866_v55   ;;  %2480 = vperm.xlu0 %10414, %v1865_v56  }
  0xd5   : > { %2495 = vperm.xlu1 %10415, %v1868_v58   ;;  %2490 = vperm.xlu0 %10414, %v1867_v59  }
  0xd7   : > { %9966 = vmatmul.mubr.msk.bf16.gmra.mrb[36].mxu0 %vm2006_vm1, %v10435_v60 }
  0xd8   : > { %9969 = vmatprep.mubr.msk.bf16.mxu0 %vm2006_vm1, %v10436_v63 }
  0xd9   : > { %2505 = vperm.xlu1 %10415, %v1870_v61   ;;  %2500 = vperm.xlu0 %10414, %v1869_v62  }
  0xdd   : > { %2515 = vperm.xlu1 %10415, %v1872_v0   ;;  %2510 = vperm.xlu0 %10414, %v1871_v1  }
  0xdf   : > { %9970 = vmatmul.mubr.msk.bf16.gmra.mrb[40].mxu0 %vm2006_vm1, %v10437_v2 }
  0xe0   : > { %9973 = vmatprep.mubr.msk.bf16.mxu0 %vm2006_vm1, %v10438_v5 }
  0xe1   : > { %2525 = vperm.xlu1 %10415, %v1874_v3   ;;  %2520 = vperm.xlu0 %10414, %v1873_v4  }
  0xe5   : > { %2535 = vperm.xlu1 %10415, %v1876_v6   ;;  %2530 = vperm.xlu0 %10414, %v1875_v7  }
  0xe7   : > { %9974 = vmatmul.mubr.msk.bf16.gmra.mrb[44].mxu0 %vm2006_vm1, %v10439_v8 }
  0xe9   : > { %2545 = vperm.xlu1 %10415, %v1878_v9   ;;  %2540 = vperm.xlu0 %10414, %v1877_v10  }
 0x10c   : > { %v2311_v11 = vpop.permute.xlu0 %2310  ;;  %v2321_v12 = vpop.permute.xlu1 %2320 }
 0x110   : > { %v2316_v13 = vpop.permute.xlu0 %2315  ;;  %v2326_v14 = vpop.permute.xlu1 %2325 }
 0x114   : > { %v2331_v15 = vpop.permute.xlu0 %2330  ;;  %v2336_v16 = vpop.permute.xlu1 %2335 }
 0x118   : > { %v2341_v17 = vpop.permute.xlu0 %2340  ;;  %v2346_v18 = vpop.permute.xlu1 %2345 }
 0x11c   : > { %v11602_v19 = vpop.permute.xlu0 %2350  ;;  %v11604_v20 = vpop.permute.xlu1 %2355 }
 0x120   : > { %v11606_v21 = vpop.permute.xlu0 %2360  ;;  %v11608_v22 = vpop.permute.xlu1 %2365 }
 0x124   : > { %v11612_v25 = vpop.permute.xlu0 %2370  ;;  %v11617_v27 = vpop.permute.xlu1 %2375 }
 0x128   : > { %v11622_v30 = vpop.permute.xlu0 %2380  ;;  %v11624_v31 = vpop.permute.xlu1 %2385 }
 0x12c   : > { %v11635_v38 = vpop.permute.xlu0 %2390  ;;  %v11637_v40 = vpop.permute.xlu1 %2395 }
 0x130   : > { %v11661_v51 = vpop.permute.xlu0 %2400  ;;  %v11666_v55 = vpop.permute.xlu1 %2405 }
 0x134   : > { %v11695_v5 = vpop.permute.xlu0 %2410  ;;  %v11699_v9 = vpop.permute.xlu1 %2415 }
 0x162   : > { %v9931_v33 = vpop.f32.mrb[0].mxu0 }
 0x163   : > { %v2117_v34 = vpop.f32.mrb[1].mxu0  ;;  %v11630_v35 = vadd.f32 %v9931_v33, %v11627_v32 }
 0x164   : > { %v11633_v36 = vadd.f32 %v2117_v34, %v11627_v32  ;;  %v9932_v37 = vpop.f32.mrb[2].mxu0  ;;  %v11721_v34 = vpop.permute.xlu0 %2420 }
 0x165   : > { %15643 = vst [vmem:[#allocation7_spill] sm:$0xff] %v11630_v35  ;;  %v2120_v39 = vpop.f32.mrb[3].mxu0  ;;  %v11643_v42 = vadd.f32 %v9932_v37, %v11627_v32  ;;  %v11649_v44 = vadd.f32 %v2321_v12, %v11630_v35 }
 0x166   : > { %15644 = vst [vmem:[#allocation8_spill] sm:$0xff] %v11633_v36  ;;  %v11640_v41 = vadd.f32 %v2311_v11, %v11633_v36  ;;  %v11646_v43 = vadd.f32 %v2120_v39, %v11627_v32 }
 0x167   : > { %15645 = vst [vmem:[#allocation9_spill] sm:$0xff] %v11643_v42  ;;  %v11657_v48 = vadd.f32 %v2326_v14, %v11643_v42  ;;  %v2600_v56 = vsel %vm2596_vm2, %v11649_v44, -inf }
 0x168   : > { %15646 = vst [vmem:[#allocation10_spill] sm:$0xff] %v11646_v43  ;;  %v11652_v45 = vadd.f32 %v2316_v13, %v11646_v43  ;;  %v2597_v47 = vsel %vm2596_vm2, %v11640_v41, -inf }
 0x169   : > { %v2602_v63 = vsel %vm2596_vm2, %v11657_v48, -inf }
 0x16a   : > { %v9935_v46 = vpop.f32.mrb[4].mxu0  ;;  %v2598_v49 = vsel %vm2596_vm2, %v11652_v45, -inf }
 0x16b   : > { %v2133_v50 = vpop.f32.mrb[5].mxu0  ;;  %v2599_v52 = vmax.f32 %v2597_v47, %v2598_v49  ;;  %v11671_v57 = vadd.f32 %v9935_v46, %v11627_v32  ;;  %v11733_v47 = vpop.permute.xlu1 %2425 }
 0x16c   : > { %v11664_v53 = vadd.f32 %v2133_v50, %v11627_v32  ;;  %v9936_v54 = vpop.f32.mrb[6].mxu0 }
 0x16d   : > { %15648 = vst [vmem:[#allocation12_spill] sm:$0xff] %v11671_v57  ;;  %v11674_v58 = vadd.f32 %v9936_v54, %v11627_v32  ;;  %v2136_v59 = vpop.f32.mrb[7].mxu0  ;;  %v2601_v60 = vmax.f32 %v2599_v52, %v2600_v56  ;;  %v11693_v4 = vadd.f32 %v2341_v17, %v11671_v57 }
 0x16e   : > { %15647 = vst [vmem:[#allocation11_spill] sm:$0xff] %v11664_v53  ;;  %v11677_v61 = vadd.f32 %v2331_v15, %v11664_v53  ;;  %v11680_v62 = vadd.f32 %v2136_v59, %v11627_v32 }
 0x16f   : > { %15649 = vst [vmem:[#allocation13_spill] sm:$0xff] %v11674_v58  ;;  %v2603_v0 = vmax.f32 %v2601_v60, %v2602_v63  ;;  %v11687_v2 = vadd.f32 %v2346_v18, %v11674_v58 }
 0x170   : > { %15650 = vst [vmem:[#allocation14_spill] sm:$0xff] %v11680_v62  ;;  %v2604_v1 = vsel %vm2596_vm2, %v11677_v61, -inf  ;;  %v11690_v3 = vadd.f32 %v2336_v16, %v11680_v62  ;;  %v2614_v16 = vsel %vm2596_vm2, %v11693_v4, -inf }
 0x171   : > { %v2605_v6 = vmax.f32 %v2603_v0, %v2604_v1  ;;  %v2615_v11 = vsel %vm2596_vm2, %v11687_v2, -inf }
 0x172   : > { %v2606_v7 = vsel %vm2596_vm2, %v11690_v3, -inf  ;;  %v9939_v8 = vpop.f32.mrb[8].mxu0  ;;  %v2616_v33 = vmax.f32 %v2614_v16, %v2615_v11 }
 0x173   : > { %v2149_v10 = vpop.f32.mrb[9].mxu0  ;;  %v2607_v12 = vmax.f32 %v2605_v6, %v2606_v7  ;;  %v11704_v13 = vadd.f32 %v9939_v8, %v11627_v32  ;;  %v11749_v7 = vpop.permute.xlu0 %2430 }
 0x174   : > { %v11707_v14 = vadd.f32 %v2149_v10, %v11627_v32  ;;  %v9940_v15 = vpop.f32.mrb[10].mxu0 }
 0x175   : > { %15651 = vst [vmem:[#allocation15_spill] sm:$0xff] %v11704_v13  ;;  %v2152_v17 = vpop.f32.mrb[11].mxu0  ;;  %v2608_v18 = vrot.slane %v2607_v12, 4  ;;  %v11716_v26 = vadd.f32 %v9940_v15, %v11627_v32  ;;  %v11725_v39 = vadd.f32 %v11606_v21, %v11704_v13  ;;  %v11760_v15 = vpop.permute.xlu1 %2435 }
 0x176   : > { %15652 = vst [vmem:[#allocation16_spill] sm:$0xff] %v11707_v14  ;;  %v11713_v23 = vadd.f32 %v11602_v19, %v11707_v14  ;;  %v11719_v29 = vadd.f32 %v2152_v17, %v11627_v32 }
 0x177   : > { %15653 = vst [vmem:[#allocation17_spill] sm:$0xff] %v11716_v26  ;;  %v2609_v37 = vmax.f32 %v2607_v12, %v2608_v18  ;;  %v11737_v52 = vadd.f32 %v11608_v22, %v11716_v26 }
 0x178   : > { %15654 = vst [vmem:[#allocation18_spill] sm:$0xff] %v11719_v29  ;;  %v2617_v46 = vsel %vm2596_vm2, %v11713_v23, -inf  ;;  %v11731_v19 = vadd.f32 %v11604_v20, %v11719_v29  ;;  %v2621_v20 = vsel %vm2596_vm2, %v11725_v39, -inf }
 0x179   : > { %v2618_v49 = vmax.f32 %v2616_v33, %v2617_v46  ;;  %v2610_v50 = vrot.slane %v2609_v37, 2  ;;  %v2623_v10 = vsel %vm2596_vm2, %v11737_v52, -inf }
 0x17a   : > { %v2619_v54 = vsel %vm2596_vm2, %v11731_v19, -inf  ;;  %v9943_v21 = vpop.f32.mrb[12].mxu0 }
 0x17b   : > { %v2620_v56 = vmax.f32 %v2618_v49, %v2619_v54  ;;  %v11742_v59 = vadd.f32 %v9943_v21, %v11627_v32  ;;  %v2165_v60 = vpop.f32.mrb[13].mxu0  ;;  %v2611_v63 = vmax.f32 %v2609_v37, %v2610_v50 }
 0x17c   : > { %v11747_v0 = vadd.f32 %v2165_v60, %v11627_v32  ;;  %v9944_v1 = vpop.f32.mrb[14].mxu0 }
 0x17d   : > { %15655 = vst [vmem:[#allocation19_spill] sm:$0xff] %v11742_v59  ;;  %v2622_v6 = vmax.f32 %v2620_v56, %v2621_v20  ;;  %v2168_v22 = vpop.f32.mrb[15].mxu0  ;;  %v2612_v8 = vrot.slane %v2611_v63, 1  ;;  %v11755_v11 = vadd.f32 %v11622_v30, %v11742_v59  ;;  %v11767_v18 = vadd.f32 %v9944_v1, %v11627_v32 }
 0x17e   : > { %15656 = vst [vmem:[#allocation20_spill] sm:$0xff] %v11747_v0  ;;  %v11758_v12 = vadd.f32 %v2168_v22, %v11627_v32  ;;  %v11764_v17 = vadd.f32 %v11612_v25, %v11747_v0 }
 0x17f   : > { %v2624_v16 = vmax.f32 %v2622_v6, %v2623_v10  ;;  %15658 = vst [vmem:[#allocation22_spill] sm:$0xff] %v11767_v18  ;;  %v2613_v33 = vmax.f32 %v2611_v63, %v2612_v8  ;;  %v2634_v50 = vsel %vm2596_vm2, %v11755_v11, -inf  ;;  %v11781_v56 = vadd.f32 %v11624_v31, %v11767_v18  ;;  %v11785_v63 = vpop.permute.xlu0 %2440  ;;  %v11788_v6 = vpop.permute.xlu1 %2445 }
 0x180   : > { %15657 = vst [vmem:[#allocation21_spill] sm:$0xff] %v11758_v12  ;;  %v11771_v37 = vadd.f32 %v11617_v27, %v11758_v12  ;;  %v2631_v25 = vsel %vm2596_vm2, %v11764_v17, -inf }
 0x181   : > { %v2625_v30 = vrot.slane %v2624_v16, 4  ;;  %v2733_v46 = vsub.f32 %v11640_v41, %v2613_v33  ;;  %v2734_v49 = vsub.f32 %v11652_v45, %v2613_v33  ;;  %v2738_v41 = vsub.f32 %v11690_v3, %v2613_v33 }
 0x182   : > { %v9947_v54 = vpop.f32.mrb[16].mxu0  ;;  %v2632_v27 = vsel %vm2596_vm2, %v11771_v37, -inf }
 0x183   : > { %v2626_v21 = vmax.f32 %v2624_v16, %v2625_v30  ;;  %v2181_v60 = vpop.f32.mrb[17].mxu0  ;;  %v2781_v45 = vmul.f32 1.442695, %v2733_v46  ;;  %v2783_v20 = vmul.f32 1.442695, %v2734_v49  ;;  %v2633_v1 = vmax.f32 %v2631_v25, %v2632_v27 }
 0x184   : > { %v11791_v8 = vadd.f32 %v9947_v54, %v11627_v32  ;;  %v11794_v31 = vadd.f32 %v2181_v60, %v11627_v32  ;;  %v9948_v10 = vpop.f32.mrb[18].mxu0  ;;  %v2735_v16 = vsub.f32 %v11649_v44, %v2613_v33  ;;  %v2736_v46 = vsub.f32 %v11657_v48, %v2613_v33 }
 0x185   : > { %v2627_v22 = vrot.slane %v2626_v21, 2  ;;  %10524 = vpow2.f32 %v2781_v45  ;;  %v2635_v30 = vmax.f32 %v2633_v1, %v2634_v50  ;;  %v11798_v24 = vadd.f32 %v9948_v10, %v11627_v32  ;;  %v2184_v3 = vpop.f32.mrb[19].mxu0  ;;  %v11827_v10 = vpop.permute.xlu1 %2455 }
 0x186   : > { %15659 = vst [vmem:[#allocation23_spill] sm:$0xff] %v11791_v8  ;;  %15660 = vst [vmem:[#allocation24_spill] sm:$0xff] %v11794_v31  ;;  %10526 = vpow2.f32 %v2783_v20  ;;  %v2636_v54 = vsel %vm2596_vm2, %v11781_v56, -inf  ;;  %v11805_v25 = vadd.f32 %v11635_v38, %v11794_v31  ;;  %v2737_v27 = vsub.f32 %v11677_v61, %v2613_v33  ;;  %v11821_v20 = vpop.permute.xlu0 %2450 }
 0x187   : > { %15661 = vst [vmem:[#allocation25_spill] sm:$0xff] %v11798_v24  ;;  %v2628_v49 = vmax.f32 %v2626_v21, %v2627_v22  ;;  %v2637_v44 = vmax.f32 %v2635_v30, %v2636_v54  ;;  %v11810_v50 = vadd.f32 %v11666_v55, %v11798_v24  ;;  %v11813_v60 = vadd.f32 %v2184_v3, %v11627_v32 }
 0x188   : > { %v11817_v21 = vadd.f32 %v11661_v51, %v11791_v8  ;;  %v2638_v45 = vsel %vm2596_vm2, %v11805_v25, -inf  ;;  %v2785_v38 = vmul.f32 1.442695, %v2735_v16  ;;  %v2791_v61 = vmul.f32 1.442695, %v2738_v41 }
 0x189   : > { %15662 = vst [vmem:[#allocation26_spill] sm:$0xff] %v11813_v60  ;;  %v2629_v48 = vrot.slane %v2628_v49, 1  ;;  %v2639_v33 = vmax.f32 %v2637_v44, %v2638_v45  ;;  %v11825_v55 = vadd.f32 %v11637_v40, %v11813_v60  ;;  %v2787_v22 = vmul.f32 1.442695, %v2736_v46 }
 0x18a   : > { %v9951_v1 = vpop.f32.mrb[20].mxu0  ;;  %v2649_v51 = vsel %vm2596_vm2, %v11810_v50, -inf  ;;  %10528 = vpow2.f32 %v2785_v38  ;;  %v2789_v16 = vmul.f32 1.442695, %v2737_v27  ;;  %v2648_v46 = vsel %vm2596_vm2, %v11817_v21, -inf }
 0x18b   : > { %v11829_v30 = vmax.f32 %v2628_v49, %v2629_v48  ;;  %v2197_v3 = vpop.f32.mrb[21].mxu0  ;;  %v2640_v41 = vsel %vm2596_vm2, %v11825_v55, -inf  ;;  %10530 = vpow2.f32 %v2787_v22  ;;  %v11841_v49 = vadd.f32 %v9951_v1, %v11627_v32 }
 0x18c   : > { %v11836_v54 = vadd.f32 %v2197_v3, %v11627_v32  ;;  %v9952_v40 = vpop.f32.mrb[22].mxu0  ;;  %10532 = vpow2.f32 %v2791_v61  ;;  %v2650_v48 = vmax.f32 %v2648_v46, %v2649_v51  ;;  %v2641_v45 = vmax.f32 %v2639_v33, %v2640_v41  ;;  %v11859_v61 = vpop.permute.xlu0 %2460 }
 0x18d   : > { %15664 = vst [vmem:[#allocation28_spill] sm:$0xff] %v11841_v49  ;;  %v2200_v44 = vpop.f32.mrb[23].mxu0  ;;  %v2741_v38 = vsub.f32 %v11713_v23, %v11829_v30  ;;  %v2742_v22 = vsub.f32 %v11731_v19, %v11829_v30  ;;  %v11852_v3 = vadd.f32 %v9952_v40, %v11627_v32  ;;  %10534 = vpow2.f32 %v2789_v16  ;;  %v11867_v19 = vpop.permute.xlu1 %2465 }
 0x18e   : > { %15663 = vst [vmem:[#allocation27_spill] sm:$0xff] %v11836_v54  ;;  %v11845_v27 = vadd.f32 %v11695_v5, %v11836_v54  ;;  %v11855_v1 = vadd.f32 %v2200_v44, %v11627_v32  ;;  %v2743_v5 = vsub.f32 %v11725_v39, %v11829_v30  ;;  %v2642_v33 = vrot.slane %v2641_v45, 4 }
 0x18f   : > { %15665 = vst [vmem:[#allocation29_spill] sm:$0xff] %v11852_v3  ;;  %v11857_v60 = vpop.eup %10524  ;;  %v11871_v41 = vadd.f32 %v11721_v34, %v11841_v49  ;;  %v2744_v39 = vsub.f32 %v11737_v52, %v11829_v30  ;;  %v2797_v31 = vmul.f32 1.442695, %v2741_v38  ;;  %v2799_v8 = vmul.f32 1.442695, %v2742_v22 }
 0x190   : > { %15666 = vst [vmem:[#allocation30_spill] sm:$0xff] %v11855_v1  ;;  %v2651_v23 = vsel %vm2596_vm2, %v11845_v27, -inf  ;;  %v11865_v51 = vpop.eup %10526  ;;  %v11875_v46 = vadd.f32 %v11699_v9, %v11855_v1  ;;  %v2643_v16 = vmax.f32 %v2641_v45, %v2642_v33  ;;  %v2877_v54 = vsel %vm2596_vm2, %v11857_v60, 0.0 }
 0x191   : > { %v2652_v40 = vmax.f32 %v2650_v48, %v2651_v23  ;;  %v2878_v24 = vsel %vm2596_vm2, %v11865_v51, 0.0  ;;  %v11885_v34 = vadd.f32 %v11733_v47, %v11852_v3  ;;  %v2801_v23 = vmul.f32 1.442695, %v2743_v5  ;;  %v11911_v0 = vpop.permute.xlu1 %2475 }
 0x192   : > { %v9955_v44 = vpop.f32.mrb[24].mxu0  ;;  %v2653_v9 = vsel %vm2596_vm2, %v11875_v46, -inf  ;;  %v2644_v52 = vrot.slane %v2643_v16, 2  ;;  %v2655_v38 = vsel %vm2596_vm2, %v11871_v41, -inf  ;;  %v2879_v18 = vadd.f32 %v2878_v24, %v2877_v54 }
 0x193   : > { %v2213_v48 = vpop.f32.mrb[25].mxu0  ;;  %v2654_v45 = vmax.f32 %v2652_v40, %v2653_v9  ;;  %v11890_v33 = vadd.f32 %v9955_v44, %v11627_v32  ;;  %v11904_v40 = vpop.permute.xlu0 %2470  ;;  %10536 = vpow2.f32 %v2797_v31 }
 0x194   : > { %v9956_v1 = vpop.f32.mrb[26].mxu0  ;;  %v11892_v49 = vpop.eup %10528  ;;  %v11897_v22 = vadd.f32 %v2213_v48, %v11627_v32  ;;  %v2645_v44 = vmax.f32 %v2643_v16, %v2644_v52  ;;  %v2803_v48 = vmul.f32 1.442695, %v2744_v39  ;;  %10538 = vpow2.f32 %v2799_v8 }
 0x195   : > { %15667 = vst [vmem:[#allocation31_spill] sm:$0xff] %v11890_v33  ;;  %v11900_v47 = vadd.f32 %v9956_v1, %v11627_v32  ;;  %v2216_v3 = vpop.f32.mrb[27].mxu0  ;;  %v11902_v5 = vpop.eup %10530  ;;  %v2656_v9 = vmax.f32 %v2654_v45, %v2655_v38  ;;  %v2880_v59 = vsel %vm2596_vm2, %v11892_v49, 0.0  ;;  %v2657_v1 = vsel %vm2596_vm2, %v11885_v34, -inf }
 0x196   : > { %15668 = vst [vmem:[#allocation32_spill] sm:$0xff] %v11897_v22  ;;  %v11907_v12 = vadd.f32 %v2216_v3, %v11627_v32  ;;  %v11917_v24 = vadd.f32 %v11749_v7, %v11897_v22  ;;  %v2881_v54 = vadd.f32 %v2880_v59, %v2879_v18  ;;  %v11919_v26 = vpop.eup %10532  ;;  %v2646_v16 = vrot.slane %v2645_v44, 1  ;;  %v11952_v22 = vpop.permute.xlu1 %2485 }
 0x197   : > { %15669 = vst [vmem:[#allocation33_spill] sm:$0xff] %v11900_v47  ;;  %v2658_v52 = vmax.f32 %v2656_v9, %v2657_v1  ;;  %v11923_v3 = vadd.f32 %v11785_v63, %v11890_v33  ;;  %v11933_v7 = vadd.f32 %v11788_v6, %v11900_v47  ;;  %v2882_v59 = vsel %vm2596_vm2, %v11902_v5, 0.0  ;;  %v11937_v18 = vpop.eup %10534  ;;  %v11943_v33 = vpop.permute.xlu0 %2480 }
 0x198   : > { %15670 = vst [vmem:[#allocation34_spill] sm:$0xff] %v11907_v12  ;;  %v11927_v45 = vadd.f32 %v11760_v15, %v11907_v12  ;;  %v2665_v39 = vsel %vm2596_vm2, %v11917_v24, -inf  ;;  %v11939_v38 = vmax.f32 %v2645_v44, %v2646_v16  ;;  %v2883_v31 = vadd.f32 %v2882_v59, %v2881_v54 }
 0x199   : > { %v2659_v63 = vrot.slane %v2658_v52, 4  ;;  %v2886_v6 = vsel %vm2596_vm2, %v11919_v26, 0.0  ;;  %10540 = vpow2.f32 %v2801_v23  ;;  %v2668_v47 = vsel %vm2596_vm2, %v11923_v3, -inf }
 0x19a   : > { %v2666_v15 = vsel %vm2596_vm2, %v11927_v45, -inf  ;;  %v9959_v9 = vpop.f32.mrb[28].mxu0  ;;  %v2750_v8 = vsub.f32 %v11825_v55, %v11939_v38  ;;  %10542 = vpow2.f32 %v2803_v48  ;;  %v2670_v23 = vsel %vm2596_vm2, %v11933_v7, -inf }
 0x19b   : > { %v2667_v1 = vmax.f32 %v2665_v39, %v2666_v15  ;;  %v2229_v12 = vpop.f32.mrb[29].mxu0  ;;  %v11950_v44 = vadd.f32 %v9959_v9, %v11627_v32  ;;  %v2660_v54 = vmax.f32 %v2658_v52, %v2659_v63  ;;  %v2884_v15 = vsel %vm2596_vm2, %v11937_v18, 0.0 }
 0x19c   : > { %v9960_v16 = vpop.f32.mrb[30].mxu0  ;;  %v11961_v29 = vadd.f32 %v2229_v12, %v11627_v32  ;;  %v2885_v9 = vadd.f32 %v2884_v15, %v2883_v31  ;;  %v2745_v13 = vsub.f32 %v11764_v17, %v11939_v38  ;;  %v2746_v55 = vsub.f32 %v11771_v37, %v11939_v38 }
 0x19d   : > { %15671 = vst [vmem:[#allocation35_spill] sm:$0xff] %v11950_v44  ;;  %v2669_v39 = vmax.f32 %v2667_v1, %v2668_v47  ;;  %v2232_v59 = vpop.f32.mrb[31].mxu0  ;;  %v2661_v52 = vrot.slane %v2660_v54, 2  ;;  %v11969_v63 = vadd.f32 %v11859_v61, %v11950_v44  ;;  %v11976_v12 = vadd.f32 %v9960_v16, %v11627_v32  ;;  %v11985_v61 = vpop.permute.xlu0 %2490 }
 0x19e   : > { %15672 = vst [vmem:[#allocation36_spill] sm:$0xff] %v11961_v29  ;;  %v11973_v48 = vadd.f32 %v11821_v20, %v11961_v29  ;;  %v11979_v31 = vadd.f32 %v2232_v59, %v11627_v32  ;;  %v2749_v17 = vsub.f32 %v11805_v25, %v11939_v38  ;;  %v2815_v37 = vmul.f32 1.442695, %v2750_v8  ;;  %v11997_v8 = vpop.eup %10536 }
 0x19f   : > { %v2671_v47 = vmax.f32 %v2669_v39, %v2670_v23  ;;  %15673 = vst [vmem:[#allocation37_spill] sm:$0xff] %v11976_v12  ;;  %v2662_v1 = vmax.f32 %v2660_v54, %v2661_v52  ;;  %v2739_v39 = vsub.f32 %v11693_v4, %v11829_v30  ;;  %v11991_v16 = vadd.f32 %v11867_v19, %v11976_v12  ;;  %v11999_v54 = vpop.permute.xlu1 %2495 }
 0x1a0   : > { %15674 = vst [vmem:[#allocation38_spill] sm:$0xff] %v11979_v31  ;;  %v2672_v20 = vsel %vm2596_vm2, %v11973_v48, -inf  ;;  %v11995_v59 = vadd.f32 %v11827_v10, %v11979_v31  ;;  %v2887_v25 = vadd.f32 %v2886_v6, %v2885_v9  ;;  %15675 = vst [vmem:[#allocation39_spill] sm:$0xff] %v11997_v8  ;;  %v2805_v4 = vmul.f32 1.442695, %v2745_v13  ;;  %v12010_v31 = vpop.eup %10538 }
 0x1a1   : > { %v2807_v23 = vmul.f32 1.442695, %v2746_v55  ;;  %v2663_v52 = vrot.slane %v2662_v1, 1  ;;  %v2673_v29 = vmax.f32 %v2671_v47, %v2672_v20  ;;  %v2682_v14 = vsel %vm2596_vm2, %v11969_v63, -inf  ;;  %15677 = vst [vmem:[#allocation41_spill] sm:$0xff] %v12010_v31  ;;  %v2501_v53 = vpop.permute.xlu0 %2500 }
 0x1a2   : > { %v9963_v15 = vpop.f32.mrb[32].mxu0  ;;  %v2683_v19 = vsel %vm2596_vm2, %v11991_v16, -inf  ;;  %v2674_v10 = vsel %vm2596_vm2, %v11995_v59, -inf  ;;  %10544 = vpow2.f32 %v2815_v37  ;;  %v2888_v37 = vrot.slane %v2887_v25, 4 }
 0x1a3   : > { %v2245_v44 = vpop.f32.mrb[33].mxu0  ;;  %v12012_v13 = vmax.f32 %v2662_v1, %v2663_v52  ;;  %v2675_v55 = vmax.f32 %v2673_v29, %v2674_v10  ;;  %v12015_v47 = vadd.f32 %v9963_v15, %v11627_v32  ;;  %v12017_v12 = vpop.eup %10540  ;;  %v2813_v1 = vmul.f32 1.442695, %v2749_v17 }
 0x1a4   : > { %v12008_v6 = vadd.f32 %v2245_v44, %v11627_v32  ;;  %v9964_v9 = vpop.f32.mrb[34].mxu0  ;;  %15679 = vst [vmem:[#allocation43_spill] sm:$0xff] %v12017_v12  ;;  %v2684_v15 = vmax.f32 %v2682_v14, %v2683_v19  ;;  %v2740_v52 = vsub.f32 %v11687_v2, %v11829_v30  ;;  %v12033_v10 = vpop.eup %10542  ;;  %10546 = vpow2.f32 %v2805_v4 }
 0x1a5   : > { %15678 = vst [vmem:[#allocation42_spill] sm:$0xff] %v12015_v47  ;;  %v2248_v20 = vpop.f32.mrb[35].mxu0  ;;  %v12024_v44 = vadd.f32 %v9964_v9, %v11627_v32  ;;  %v2753_v29 = vsub.f32 %v11845_v27, %v12012_v13  ;;  %15682 = vst [vmem:[#allocation46_spill] sm:$0xff] %v12033_v10  ;;  %v2676_v9 = vrot.slane %v2675_v55, 4  ;;  %10548 = vpow2.f32 %v2807_v23 }
 0x1a6   : > { %15676 = vst [vmem:[#allocation40_spill] sm:$0xff] %v12008_v6  ;;  %v12021_v62 = vadd.f32 %v11904_v40, %v12008_v6  ;;  %v12027_v58 = vadd.f32 %v2248_v20, %v11627_v32  ;;  %v2754_v40 = vsub.f32 %v11875_v46, %v12012_v13  ;;  %v2506_v6 = vpop.permute.xlu1 %2505  ;;  %v2755_v27 = vsub.f32 %v11871_v41, %v12012_v13 }
 0x1a7   : > { %15680 = vst [vmem:[#allocation44_spill] sm:$0xff] %v12024_v44  ;;  %v12043_v14 = vadd.f32 %v11943_v33, %v12015_v47  ;;  %v2677_v30 = vmax.f32 %v2675_v55, %v2676_v9  ;;  %v12047_v17 = vadd.f32 %v11952_v22, %v12024_v44  ;;  %v2889_v19 = vadd.f32 %v2888_v37, %v2887_v25  ;;  %v2511_v44 = vpop.permute.xlu0 %2510 }
 0x1a8   : > { %15681 = vst [vmem:[#allocation45_spill] sm:$0xff] %v12027_v58  ;;  %v2685_v20 = vsel %vm2596_vm2, %v12021_v62, -inf  ;;  %v12051_v46 = vadd.f32 %v11911_v0, %v12027_v58  ;;  %v12055_v23 = vsel %vm2596_vm2, %v12010_v31, 0.0  ;;  %10550 = vpow2.f32 %v2813_v1 }
 0x1a9   : > { %v2686_v2 = vmax.f32 %v2684_v15, %v2685_v20  ;;  %v2821_v41 = vmul.f32 1.442695, %v2753_v29  ;;  %v2793_v47 = vmul.f32 1.442695, %v2739_v39  ;;  %v2823_v15 = vmul.f32 1.442695, %v2754_v40 }
 0x1aa   : > { %v9967_v4 = vpop.f32.mrb[36].mxu0  ;;  %v2678_v55 = vrot.slane %v2677_v30, 2  ;;  %v2687_v22 = vsel %vm2596_vm2, %v12051_v46, -inf  ;;  %v2756_v25 = vsub.f32 %v11885_v34, %v12012_v13  ;;  %v2825_v37 = vmul.f32 1.442695, %v2755_v27  ;;  %v12073_v42 = vpop.permute.xlu1 %2515 }
 0x1ab   : > { %v2261_v33 = vpop.f32.mrb[37].mxu0  ;;  %v2689_v20 = vsel %vm2596_vm2, %v12043_v14, -inf  ;;  %v2688_v1 = vmax.f32 %v2686_v2, %v2687_v22  ;;  %v2691_v40 = vsel %vm2596_vm2, %v12047_v17, -inf  ;;  %v12069_v58 = vadd.f32 %v9967_v4, %v11627_v32 }
 0x1ac   : > { %v12060_v9 = vadd.f32 %v2261_v33, %v11627_v32  ;;  %v9968_v0 = vpop.f32.mrb[38].mxu0  ;;  %v2679_v39 = vmax.f32 %v2677_v30, %v2678_v55  ;;  %v2890_v33 = vrot.slane %v2889_v19, 2  ;;  %v12071_v57 = vpop.eup %10544  ;;  %10552 = vpow2.f32 %v2821_v41 }
 0x1ad   : > { %v2264_v29 = vpop.f32.mrb[39].mxu0  ;;  %15684 = vst [vmem:[#allocation48_spill] sm:$0xff] %v12069_v58  ;;  %15685 = vst [vmem:[#allocation49_spill] sm:$0xff] %v12071_v57  ;;  %v2690_v34 = vmax.f32 %v2688_v1, %v2689_v20  ;;  %v2795_v2 = vmul.f32 1.442695, %v2740_v52  ;;  %10554 = vpow2.f32 %v2823_v15  ;;  %v12083_v4 = vadd.f32 %v9968_v0, %v11627_v32 }
 0x1ae   : > { %15683 = vst [vmem:[#allocation47_spill] sm:$0xff] %v12060_v9  ;;  %v12076_v27 = vadd.f32 %v2264_v29, %v11627_v32  ;;  %v2680_v22 = vrot.slane %v2679_v39, 1  ;;  %v12080_v30 = vadd.f32 %v11985_v61, %v12060_v9  ;;  %10556 = vpow2.f32 %v2825_v37  ;;  %v12089_v20 = vpop.eup %10546 }
 0x1af   : > { %15687 = vst [vmem:[#allocation51_spill] sm:$0xff] %v12083_v4  ;;  %v2827_v55 = vmul.f32 1.442695, %v2756_v25  ;;  %v2692_v43 = vmax.f32 %v2690_v34, %v2691_v40  ;;  %v12094_v52 = vadd.f32 %v2501_v53, %v12069_v58  ;;  %v2891_v61 = vadd.f32 %v2890_v33, %v2889_v19  ;;  %v12096_v29 = vpop.eup %10548 }
 0x1b0   : > { %15686 = vst [vmem:[#allocation50_spill] sm:$0xff] %v12076_v27  ;;  %v12087_v41 = vadd.f32 %v11999_v54, %v12076_v27  ;;  %v12091_v1 = vmax.f32 %v2679_v39, %v2680_v22  ;;  %10558 = vpow2.f32 %v2793_v47  ;;  %v12100_v0 = vsel %vm2596_vm2, %v12071_v57, 0.0  ;;  %v2521_v39 = vpop.permute.xlu0 %2520  ;;  %v2526_v22 = vpop.permute.xlu1 %2525 }
 0x1b1   : > { %v2693_v25 = vrot.slane %v2692_v43, 4  ;;  %10560 = vpow2.f32 %v2795_v2  ;;  %v2699_v19 = vsel %vm2596_vm2, %v12080_v30, -inf  ;;  %v12109_v47 = vadd.f32 %v2506_v6, %v12083_v4 }
 0x1b2   : > { %v9971_v15 = vpop.f32.mrb[40].mxu0  ;;  %v2700_v54 = vsel %vm2596_vm2, %v12087_v41, -inf  ;;  %v2757_v53 = vsub.f32 %v11917_v24, %v12091_v1  ;;  %v12114_v34 = vpop.eup %10550  ;;  %v2758_v2 = vsub.f32 %v11927_v45, %v12091_v1  ;;  %v2761_v6 = vsub.f32 %v11973_v48, %v12091_v1 }
 0x1b3   : > { %v2277_v37 = vpop.f32.mrb[41].mxu0  ;;  %v12112_v40 = vadd.f32 %v9971_v15, %v11627_v32  ;;  %v2694_v27 = vmax.f32 %v2692_v43, %v2693_v25  ;;  %v2701_v58 = vmax.f32 %v2699_v19, %v2700_v54  ;;  %v2702_v15 = vsel %vm2596_vm2, %v12094_v52, -inf }
 0x1b4   : > { %v9972_v33 = vpop.f32.mrb[42].mxu0  ;;  %v12119_v24 = vadd.f32 %v2277_v37, %v11627_v32  ;;  %v2892_v35 = vrot.slane %v2891_v61, 1  ;;  %v2762_v36 = vsub.f32 %v11995_v59, %v12091_v1  ;;  %v2829_v45 = vmul.f32 1.442695, %v2757_v53 }
 0x1b5   : > { %15688 = vst [vmem:[#allocation52_spill] sm:$0xff] %v12112_v40  ;;  %v2280_v9 = vpop.f32.mrb[43].mxu0  ;;  %v12126_v4 = vadd.f32 %v9972_v33, %v11627_v32  ;;  %v2695_v43 = vrot.slane %v2694_v27, 2  ;;  %v2703_v25 = vmax.f32 %v2701_v58, %v2702_v15  ;;  %v2704_v54 = vsel %vm2596_vm2, %v12109_v47, -inf  ;;  %v2531_v15 = vpop.permute.xlu0 %2530 }
 0x1b6   : > { %15689 = vst [vmem:[#allocation53_spill] sm:$0xff] %v12119_v24  ;;  %v12133_v37 = vadd.f32 %v2521_v39, %v12112_v40  ;;  %v12136_v48 = vadd.f32 %v2511_v44, %v12119_v24  ;;  %v12141_v33 = vpop.eup %10552  ;;  %v2831_v28 = vmul.f32 1.442695, %v2758_v2  ;;  %v12144_v53 = vadd.f32 %v2280_v9, %v11627_v32 }
 0x1b7   : > { %15690 = vst [vmem:[#allocation54_spill] sm:$0xff] %v12126_v4  ;;  %v12139_v19 = vadd.f32 %v2526_v22, %v12126_v4  ;;  %v2696_v57 = vmax.f32 %v2694_v27, %v2695_v43  ;;  %v2705_v59 = vmax.f32 %v2703_v25, %v2704_v54  ;;  %v12146_v58 = vpop.eup %10554  ;;  %10562 = vpow2.f32 %v2827_v55  ;;  %v2536_v4 = vpop.permute.xlu1 %2535 }
 0x1b8   : > { %15691 = vst [vmem:[#allocation55_spill] sm:$0xff] %v12133_v37  ;;  %15693 = vst [vmem:[#allocation57_spill] sm:$0xff] %v12144_v53  ;;  %v2837_v39 = vmul.f32 1.442695, %v2761_v6  ;;  %v2706_v44 = vsel %vm2596_vm2, %v12136_v48, -inf  ;;  %v2893_v24 = vadd.f32 %v2892_v35, %v2891_v61  ;;  %v12150_v22 = vpop.eup %10556  ;;  %10564 = vpow2.f32 %v2829_v45 }
 0x1b9   : > { %15692 = vst [vmem:[#allocation56_spill] sm:$0xff] %v12139_v19  ;;  %v2839_v2 = vmul.f32 1.442695, %v2762_v36  ;;  %v2697_v27 = vrot.slane %v2696_v57, 1  ;;  %v2717_v9 = vsel %vm2596_vm2, %v12139_v19, -inf  ;;  %v2707_v54 = vmax.f32 %v2705_v59, %v2706_v44 }
 0x1ba   : > { %v9975_v40 = vpop.f32.mrb[44].mxu0  ;;  %v12154_v25 = vpop.eup %10558  ;;  %v12158_v55 = vadd.f32 %v12073_v42, %v12144_v53  ;;  %10566 = vrcp.f32 %v2893_v24  ;;  %v2716_v45 = vsel %vm2596_vm2, %v12133_v37, -inf }
 0x1bb   : > { %v2293_v43 = vpop.f32.mrb[45].mxu0  ;;  %15694 = vst [vmem:[#allocation58_spill] sm:$0xff] %v12154_v25  ;;  %v12163_v6 = vpop.eup %10560  ;;  %10568 = vpow2.f32 %v2831_v28  ;;  %v12165_v36 = vmax.f32 %v2696_v57, %v2697_v27  ;;  %v12170_v31 = vadd.f32 %v9975_v40, %v11627_v32  ;;  %v2718_v57 = vmax.f32 %v2716_v45, %v2717_v9 }
 0x1bc   : > { %v12161_v35 = vadd.f32 %v2293_v43, %v11627_v32  ;;  %v9976_v61 = vpop.f32.mrb[46].mxu0  ;;  %15696 = vst [vmem:[#allocation60_spill] sm:$0xff] %v12163_v6  ;;  %v2708_v42 = vsel %vm2596_vm2, %v12158_v55, -inf  ;;  %10570 = vpow2.f32 %v2837_v39  ;;  %v2897_v27 = vsel %vm2596_vm2, %v11997_v8, 0.0  ;;  %v2541_v43 = vpop.permute.xlu0 %2540 }
 0x1bd   : > { %15697 = vst [vmem:[#allocation61_spill] sm:$0xff] %v12170_v31  ;;  %v2296_v59 = vpop.f32.mrb[47].mxu0  ;;  %v12178_v44 = vadd.f32 %v9976_v61, %v11627_v32  ;;  %v2901_v40 = vsel %vm2596_vm2, %v12017_v12, 0.0  ;;  %v2709_v53 = vmax.f32 %v2707_v54, %v2708_v42  ;;  %v2894_v61 = vsel %vm2596_vm2, %v12154_v25, 0.0 }
 0x1be   : > { %15695 = vst [vmem:[#allocation59_spill] sm:$0xff] %v12161_v35  ;;  %v12175_v24 = vadd.f32 %v2531_v15, %v12161_v35  ;;  %v12181_v28 = vadd.f32 %v2296_v59, %v11627_v32  ;;  %v2895_v32 = vsel %vm2596_vm2, %v12163_v6, 0.0  ;;  %v2546_v59 = vpop.permute.xlu1 %2545  ;;  %10572 = vpow2.f32 %v2839_v2 }
 0x1bf   : > { %15698 = vst [vmem:[#allocation62_spill] sm:$0xff] %v12178_v44  ;;  %v12194_v39 = vadd.f32 %v2541_v43, %v12170_v31  ;;  %v2903_v45 = vsel %vm2596_vm2, %v12033_v10, 0.0  ;;  %v2765_v54 = vsub.f32 %v12021_v62, %v12165_v36  ;;  %v2710_v42 = vrot.slane %v2709_v53, 4 }
 0x1c0   : > { %15699 = vst [vmem:[#allocation63_spill] sm:$0xff] %v12181_v28  ;;  %v2719_v15 = vsel %vm2596_vm2, %v12175_v24, -inf  ;;  %v12201_v35 = vadd.f32 %v2546_v59, %v12178_v44  ;;  %v12204_v12 = vadd.f32 %v2536_v4, %v12181_v28  ;;  %v2766_v2 = vsub.f32 %v12051_v46, %v12165_v36 }
 0x1c1   : > { %v2720_v9 = vmax.f32 %v2718_v57, %v2719_v15  ;;  %v2896_v8 = vadd.f32 %v2895_v32, %v2894_v61  ;;  %v2747_v57 = vsub.f32 %v11755_v11, %v11939_v38  ;;  %v2748_v43 = vsub.f32 %v11781_v56, %v11939_v38  ;;  %v12212_v15 = vpop.eup %10562 }
 0x1c2   : > { %v2767_v62 = vsub.f32 %v12043_v14, %v12165_v36  ;;  %v2768_v59 = vsub.f32 %v12047_v17, %v12165_v36  ;;  %v2711_v4 = vmax.f32 %v2709_v53, %v2710_v42  ;;  %v2721_v44 = vsel %vm2596_vm2, %v12204_v12, -inf  ;;  %v12220_v46 = vpop.eup %10564 }
 0x1c3   : > { %v2723_v11 = vsel %vm2596_vm2, %v12194_v39, -inf  ;;  %v2722_v61 = vmax.f32 %v2720_v9, %v2721_v44  ;;  %v2898_v32 = vadd.f32 %v2897_v27, %v2896_v8  ;;  %v2809_v56 = vmul.f32 1.442695, %v2747_v57 }
 0x1c4   : > { %v10567_v38 = vpop.eup %10566  ;;  %v2845_v28 = vmul.f32 1.442695, %v2765_v54  ;;  %v2712_v31 = vrot.slane %v2711_v4, 2  ;;  %v2725_v14 = vsel %vm2596_vm2, %v12201_v35, -inf  ;;  %v2811_v10 = vmul.f32 1.442695, %v2748_v43 }
 0x1c5   : > { %v12226_v17 = vpop.eup %10568  ;;  %v3016_v53 = vmul.f32 %v10567_v38, %v11892_v49  ;;  %v3017_v42 = vmul.f32 %v10567_v38, %v11902_v5  ;;  %v3014_v6 = vmul.f32 %v10567_v38, %v11857_v60  ;;  %v3015_v25 = vmul.f32 %v10567_v38, %v11865_v51 }
 0x1c6   : > { %v2713_v44 = vmax.f32 %v2711_v4, %v2712_v31  ;;  %v3018_v8 = vmul.f32 %v10567_v38, %v11937_v18  ;;  %v3019_v27 = vmul.f32 %v10567_v38, %v11919_v26  ;;  %v2724_v9 = vmax.f32 %v2722_v61, %v2723_v11  ;;  %v12234_v54 = vpop.eup %10570 }
 0x1c7   : > { %v3070_v57 = vpack.c.bf16 %v3017_v42, %v3016_v53  ;;  %v3069_v43 = vpack.c.bf16 %v3015_v25, %v3014_v6  ;;  %v2900_v19 = vadd.f32 %v12055_v23, %v2898_v32  ;;  %10574 = vpow2.f32 %v2809_v56 }
 0x1c8   : > { %v2847_v49 = vmul.f32 1.442695, %v2766_v2  ;;  %v2714_v37 = vrot.slane %v2713_v44, 1  ;;  %v2726_v5 = vmax.f32 %v2724_v9, %v2725_v14  ;;  %10576 = vpow2.f32 %v2811_v10  ;;  %v12237_v60 = vpop.eup %10572 }
 0x1c9   : > { %v2849_v51 = vmul.f32 1.442695, %v2767_v62  ;;  %v2851_v31 = vmul.f32 1.442695, %v2768_v59  ;;  %3119 = vrot.lane.b32.xlu1 %v3070_v57, %s10999_s18  ;;  %3117 = vrot.lane.b32.xlu0 %v3069_v43, %s10999_s18  ;;  %v2902_v26 = vadd.f32 %v2901_v40, %v2900_v19  ;;  %v2751_v18 = vsub.f32 %v11817_v21, %v12012_v13 }
 0x1ca   : > { %10578 = vpow2.f32 %v2845_v28  ;;  %v12243_v23 = vmax.f32 %v2713_v44, %v2714_v37  ;;  %v2727_v25 = vrot.slane %v2726_v5, 4  ;;  %v2911_v10 = vsel %vm2596_vm2, %v12089_v20, 0.0 }
 0x1cb   : > { %v3071_v6 = vpack.c.bf16 %v3019_v27, %v3018_v8  ;;  %v2904_v2 = vadd.f32 %v2903_v45, %v2902_v26  ;;  %v2912_v62 = vsel %vm2596_vm2, %v12096_v29, 0.0  ;;  %v2817_v59 = vmul.f32 1.442695, %v2751_v18 }
 0x1cc   : > { %10580 = vpow2.f32 %v2847_v49  ;;  %v2769_v19 = vsub.f32 %v12080_v30, %v12243_v23  ;;  %v2770_v21 = vsub.f32 %v12087_v41, %v12243_v23  ;;  %v2752_v37 = vsub.f32 %v11810_v50, %v12012_v13 }
 0x1cd   : > { %v12257_v28 = vsel %vm2596_vm2, %v12146_v58, 0.0  ;;  %10582 = vpow2.f32 %v2849_v51  ;;  %3121 = vrot.lane.b32.xlu0 %v3071_v6, %s10999_s18  ;;  %v2728_v40 = vmax.f32 %v2726_v5, %v2727_v25  ;;  %v2905_v45 = vrot.slane %v2904_v2, 4 }
 0x1ce   : > { %v2773_v4 = vsub.f32 %v12136_v48, %v12243_v23  ;;  %v2853_v11 = vmul.f32 1.442695, %v2769_v19  ;;  %v2913_v30 = vadd.f32 %v2912_v62, %v2911_v10  ;;  %v2759_v41 = vsub.f32 %v11923_v3, %v12091_v1 }
 0x1cf   : > { %v2855_v61 = vmul.f32 1.442695, %v2770_v21  ;;  %v2729_v32 = vrot.slane %v2728_v40, 2  ;;  %v2906_v50 = vadd.f32 %v2905_v45, %v2904_v2  ;;  %10584 = vpow2.f32 %v2817_v59 }
 0x1d0   : > { %v12266_v13 = vsel %vm2596_vm2, %v12237_v60, 0.0  ;;  %10586 = vpow2.f32 %v2851_v31  ;;  %v2819_v56 = vmul.f32 1.442695, %v2752_v37  ;;  %v2760_v38 = vsub.f32 %v11933_v7, %v12091_v1 }
 0x1d1   : > { %v12270_v14 = vpop.eup %10574  ;;  %10588 = vpow2.f32 %v2853_v11  ;;  %v2730_v48 = vmax.f32 %v2728_v40, %v2729_v32  ;;  %v2907_v53 = vrot.slane %v2906_v50, 2  ;;  %v2833_v42 = vmul.f32 1.442695, %v2759_v41 }
 0x1d2   : > { %v12272_v3 = vpop.eup %10576  ;;  %v2774_v44 = vsub.f32 %v12158_v55, %v12243_v23  ;;  %v2861_v8 = vmul.f32 1.442695, %v2773_v4  ;;  %v2914_v27 = vsel %vm2596_vm2, %v12270_v14, 0.0  ;;  %v2835_v9 = vmul.f32 1.442695, %v2760_v38 }
 0x1d3   : > { %10590 = vpow2.f32 %v2855_v61  ;;  %v2731_v57 = vrot.slane %v2730_v48, 1  ;;  %v2908_v43 = vadd.f32 %v2907_v53, %v2906_v50  ;;  %v2915_v7 = vadd.f32 %v2914_v27, %v2913_v30 }
 0x1d4   : > { %v12278_v1 = vpop.eup %10578  ;;  %v2916_v49 = vsel %vm2596_vm2, %v12272_v3, 0.0  ;;  %v2918_v5 = vsel %vm2596_vm2, %v12114_v34, 0.0  ;;  %10592 = vpow2.f32 %v2819_v56  ;;  %v12286_v55 = vsel %vm2596_vm2, %v12141_v33, 0.0 }
 0x1d5   : > { %v12288_v51 = vmax.f32 %v2730_v48, %v2731_v57  ;;  %v2909_v31 = vrot.slane %v2908_v43, 1  ;;  %v2917_v26 = vadd.f32 %v2916_v49, %v2915_v7  ;;  %10594 = vpow2.f32 %v2833_v42  ;;  %v15701_v57 = vld [vmem:[#allocation55_spill] sm:$0xff]  ;;  %v15702_v7 = vld [vmem:[#allocation56_spill] sm:$0xff] }
 0x1d6   : > { %v12290_v18 = vpop.eup %10580  ;;  %v2863_v25 = vmul.f32 1.442695, %v2774_v44  ;;  %v12294_v10 = vsel %vm2596_vm2, %v12150_v22, 0.0  ;;  %10596 = vpow2.f32 %v2835_v9  ;;  %v2945_v6 = vsel %vm2596_vm2, %v12220_v46, 0.0 }
 0x1d7   : > { %v12298_v2 = vpop.eup %10582  ;;  %10598 = vpow2.f32 %v2861_v8  ;;  %v2777_v62 = vsub.f32 %v12175_v24, %v12288_v51  ;;  %v2778_v59 = vsub.f32 %v12204_v12, %v12288_v51  ;;  %v2763_v19 = vsub.f32 %v11969_v63, %v12165_v36 }
 0x1d8   : > { %v2910_v21 = vadd.f32 %v2909_v31, %v2908_v43  ;;  %v2919_v37 = vadd.f32 %v2918_v5, %v2917_v26  ;;  %v2946_v40 = vsel %vm2596_vm2, %v12226_v17, 0.0  ;;  %v2764_v45 = vsub.f32 %v11991_v16, %v12165_v36 }
 0x1d9   : > { %v12310_v4 = vpop.eup %10584  ;;  %v2779_v24 = vsub.f32 %v12194_v39, %v12288_v51  ;;  %v2780_v12 = vsub.f32 %v12201_v35, %v12288_v51  ;;  %v2869_v11 = vmul.f32 1.442695, %v2777_v62  ;;  %v2771_v63 = vsub.f32 %v12094_v52, %v12243_v23 }
 0x1da   : > { %v12318_v30 = vpop.eup %10586  ;;  %v2871_v41 = vmul.f32 1.442695, %v2778_v59  ;;  %10600 = vrcp.f32 %v2910_v21  ;;  %v2921_v61 = vadd.f32 %v12100_v0, %v2919_v37  ;;  %v12323_v16 = vsel %vm2596_vm2, %v12212_v15, 0.0 }
 0x1db   : > { %v12331_v35 = vpop.eup %10588  ;;  %10602 = vpow2.f32 %v2863_v25  ;;  %v2947_v36 = vadd.f32 %v2946_v40, %v2945_v6  ;;  %v2841_v52 = vmul.f32 1.442695, %v2763_v19  ;;  %v2772_v39 = vsub.f32 %v12109_v47, %v12243_v23  ;;  %v1590_v6 = vld [vmem:[%s15437_s5 + $0x4] sm:$0x7] }
 0x1dc   : > { %v2922_v0 = vrot.slane %v2921_v61, 4  ;;  %v2928_v32 = vsel %vm2596_vm2, %v12310_v4, 0.0  ;;  %v2952_v50 = vsel %vm2596_vm2, %v12234_v54, 0.0  ;;  %v2843_v56 = vmul.f32 1.442695, %v2764_v45 }
 0x1dd   : > { %v12339_v38 = vpop.eup %10590  ;;  %10604 = vpow2.f32 %v2869_v11  ;;  %v12341_v48 = vmul.f32 1.442695, %v2779_v24  ;;  %v12343_v53 = vmul.f32 1.442695, %v2780_v12  ;;  %v2857_v42 = vmul.f32 1.442695, %v2771_v63 }
 0x1de   : > { %v12345_v44 = vpop.eup %10592  ;;  %10606 = vpow2.f32 %v2871_v41  ;;  %v2923_v47 = vadd.f32 %v2922_v0, %v2921_v61  ;;  %v2859_v23 = vmul.f32 1.442695, %v2772_v39  ;;  %v12349_v8 = vsel %vm2596_vm2, %v12331_v35, 0.0  ;;  %v15703_v61 = vld [vmem:[#allocation58_spill] sm:$0xff]  ;;  %v15705_v0 = vld [vmem:[#allocation39_spill] sm:$0xff] }
 0x1df   : > { %v12355_v27 = vpop.eup %10594  ;;  %v2929_v9 = vsel %vm2596_vm2, %v12345_v44, 0.0  ;;  %10608 = vpow2.f32 %v2841_v52  ;;  %v2775_v43 = vsub.f32 %v15701_v57, %v12288_v51  ;;  %v2776_v49 = vsub.f32 %v15702_v7, %v12288_v51  ;;  %v15704_v52 = vld [vmem:[#allocation60_spill] sm:$0xff] }
 0x1e0   : > { %v12363_v5 = vpop.eup %10596  ;;  %v2924_v31 = vrot.slane %v2923_v47, 2  ;;  %v2930_v26 = vadd.f32 %v2929_v9, %v2928_v32  ;;  %v2948_v25 = vsel %vm2596_vm2, %v12355_v27, 0.0  ;;  %10610 = vpow2.f32 %v2843_v56  ;;  %v15706_v56 = vld [vmem:[#allocation41_spill] sm:$0xff] }
 0x1e1   : > { %v12370_v62 = vpop.eup %10598  ;;  %v2949_v59 = vadd.f32 %v2948_v25, %v2947_v36  ;;  %v2950_v19 = vsel %vm2596_vm2, %v12363_v5, 0.0  ;;  %10612 = vpow2.f32 %v2857_v42  ;;  %v2865_v51 = vmul.f32 1.442695, %v2775_v43 }
 0x1e2   : > { %v2925_v21 = vadd.f32 %v2924_v31, %v2923_v47  ;;  %v2932_v37 = vadd.f32 %v12286_v55, %v2930_v26  ;;  %10614 = vpow2.f32 %v2859_v23  ;;  %v2867_v40 = vmul.f32 1.442695, %v2776_v49  ;;  %v15708_v31 = vld [vmem:[#allocation46_spill] sm:$0xff] }
 0x1e3   : > { %v2951_v45 = vadd.f32 %v2950_v19, %v2949_v59  ;;  %10616 = vpow2.f32 %v2865_v51  ;;  %v1591_v24 = vunpack.c.l.bf16 %v1590_v6  ;;  %v15500_v41 = vmov 0.0   ;;  %v1588_v6 = vld [vmem:[%s15437_s5] sm:$0xf] }
 0x1e4   : > { %v10601_v12 = vpop.eup %10600  ;;  %v2926_v11 = vrot.slane %v2925_v21, 1  ;;  %v2934_v63 = vadd.f32 %v12257_v28, %v2932_v37  ;;  %10618 = vpow2.f32 %v2867_v40  ;;  %9917 = vmatprep.subr.mxu1 %v15500_v41  ;;  %10027 = vmatprep.subr.bf16.mxu0 %v15500_v41  ;;  %v15707_v28 = vld [vmem:[#allocation43_spill] sm:$0xff]  ;;  %v2980_v57 = vsel %vm2596_vm2, %v12339_v38, 0.0 }
 0x1e5   : > { %v12380_v55 = vpop.eup %10602  ;;  %v3021_v36 = vmul.f32 %v10601_v12, %v15703_v61  ;;  %v3022_v39 = vmul.f32 %v10601_v12, %v15704_v52  ;;  %v3023_v32 = vmul.f32 %v10601_v12, %v15705_v0  ;;  %v3024_v42 = vmul.f32 %v10601_v12, %v15706_v56  ;;  %9918 = vmatpush3.msk.msra.mxu1 %vm1600_vm3, %v1591_v24  ;;  %v1594_v0 = vld [vmem:[%s1575_s10] sm:$0xff] }
 0x1e6   : > { %v3025_v47 = vmul.f32 %v10601_v12, %v15707_v28  ;;  %v2927_v23 = vadd.f32 %v2926_v11, %v2925_v21  ;;  %v2936_v9 = vadd.f32 %v12294_v10, %v2934_v63  ;;  %9922 = vmatprep.subr.mxu1 %v15500_v41  ;;  %v3026_v26 = vmul.f32 %v10601_v12, %v15708_v31  ;;  %v1595_v21 = vld [vmem:[%s1579_s30] sm:$0xff] }
 0x1e7   : > { %v12395_v43 = vpop.eup %10604  ;;  %v3072_v7 = vpack.c.bf16 %v3022_v39, %v3021_v36  ;;  %v3073_v49 = vpack.c.bf16 %v3024_v42, %v3023_v32  ;;  %v2953_v25 = vadd.f32 %v2952_v50, %v2951_v45  ;;  %v2967_v10 = vsel %vm2596_vm2, %v12290_v18, 0.0  ;;  %9919 = vmatprep.mubr.msk.f32.mxu1 %vm11001_vm4, %v15500_v41  ;;  %10031 = vmatprep.mubr.msk.bf16.mxu0 %vm11001_vm4, %v15500_v41 }
 0x1e8   : > { %v12401_v59 = vpop.eup %10606  ;;  %10620 = vrcp.f32 %v2927_v23  ;;  %v2938_v19 = vadd.f32 %v12323_v16, %v2936_v9  ;;  %v2965_v51 = vsel %vm2596_vm2, %v12278_v1, 0.0  ;;  %v2981_v40 = vadd.f32 %v2980_v57, %v12349_v8  ;;  %9920 = vmatmul.mubr.msk.f32.vlgmr.msra.gmra.mrb[0].mxu1 %vm1596_vm5, %v1595_v21 }
 0x1e9   : > { %v12408_v37 = vpop.eup %10608  ;;  %10622 = vpow2.f32 %v12341_v48  ;;  %3123 = vrot.lane.b32.xlu1 %v3072_v7, %s10999_s18  ;;  %3125 = vrot.lane.b32.xlu0 %v3073_v49, %s10999_s18  ;;  %v2955_v50 = vadd.f32 %v12266_v13, %v2953_v25  ;;  %v1589_v48 = vunpack.c.l.bf16 %v1588_v6  ;;  %v12428_v13 = vld [vmem:[%s15437_s5 + $0x38] sm:$0x3]  ;;  %v3074_v12 = vpack.c.bf16 %v3026_v26, %v3025_v47 }
 0x1ea   : > { %v12419_v16 = vpop.eup %10610  ;;  %v2939_v45 = vrot.slane %v2938_v19, 4  ;;  %v2962_v24 = vsel %vm2596_vm2, %v12408_v37, 0.0  ;;  %10624 = vpow2.f32 %v12343_v53  ;;  %9924 = vmatprep.mubr.msk.f32.mxu1 %vm11001_vm4, %v15500_v41  ;;  %v2969_v56 = vsel %vm2596_vm2, %v12298_v2, 0.0 }
 0x1eb   : > { %v12432_v8 = vpop.eup %10612  ;;  %v2956_v11 = vrot.slane %v2955_v50, 4  ;;  %v2963_v63 = vsel %vm2596_vm2, %v12419_v16, 0.0  ;;  %9923 = vmatpush3.msra.mxu1 %v1589_v48  ;;  %v12453_v28 = vsel %vm2079_vm0, %v12428_v13, 0  ;;  %v2971_v31 = vsel %vm2596_vm2, %v12318_v30, 0.0 }
 0x1ec   : > { %v12438_v61 = vpop.eup %10614  ;;  %v2940_v36 = vadd.f32 %v2939_v45, %v2938_v19  ;;  %v2964_v52 = vadd.f32 %v2963_v63, %v2962_v24  ;;  %v2982_v39 = vsel %vm2596_vm2, %v12432_v8, 0.0  ;;  %10372 = vmatprep.subr.msk.bf16.mxu1 %vm2079_vm0, %v12428_v13  ;;  %15709 = vst [vmem:[#allocation55_spill] sm:$0xff] %v12453_v28  ;;  %9925 = vmatmul.mubr.msk.f32.vlgmr.msra.gmra.mrb[2].mxu1 %vm1674_vm6, %v1594_v0  ;;  %v2999_v24 = vsel %vm2596_vm2, %v12395_v43, 0.0 }
 0x1ed   : > { %v12444_v53 = vpop.eup %10616  ;;  %3127 = vrot.lane.b32.xlu1 %v3074_v12, %s10999_s18  ;;  %v2957_v32 = vadd.f32 %v2956_v11, %v2955_v50  ;;  %v2983_v42 = vadd.f32 %v2982_v39, %v2981_v40  ;;  %v2984_v57 = vsel %vm2596_vm2, %v12438_v61, 0.0  ;;  %9978 = vmatpush3.bf16.msra.mxu1 %v12453_v28  ;;  %v2988_v50 = vsel %vm2596_vm2, %v12380_v55, 0.0 }
 0x1ee   : > { %v12455_v47 = vpop.eup %10618  ;;  %v2941_v23 = vrot.slane %v2940_v36, 2  ;;  %v2966_v9 = vadd.f32 %v2965_v51, %v2964_v52  ;;  %v2996_v7 = vsel %vm2596_vm2, %v12444_v53, 0.0  ;;  %v2986_v51 = vsel %vm2596_vm2, %v12370_v62, 0.0  ;;  %10035 = vmatprep.subr.bf16.mxu1 %v15500_v41 }
 0x1ef   : > { %v2958_v49 = vrot.slane %v2957_v32, 2  ;;  %v2985_v26 = vadd.f32 %v2984_v57, %v2983_v42  ;;  %v2997_v25 = vsel %vm2596_vm2, %v12455_v47, 0.0  ;;  %vm6017_vm3 = vcmask 1042432  }
 0x1f0   : > { %v2942_v6 = vadd.f32 %v2941_v23, %v2940_v36  ;;  %v2968_v19 = vadd.f32 %v2967_v10, %v2966_v9  ;;  %v2998_v21 = vadd.f32 %v2997_v25, %v2996_v7  ;;  %v3001_v10 = vsel %vm2596_vm2, %v12401_v59, 0.0  ;;  %v15710_v23 = vld [vmem:[#allocation49_spill] sm:$0xff] }
 0x1f1   : > { %v2959_v40 = vadd.f32 %v2958_v49, %v2957_v32  ;;  %v2987_v45 = vadd.f32 %v2986_v51, %v2985_v26 }
 0x1f2   : > { %v10621_v48 = vpop.eup %10620  ;;  %v2943_v12 = vrot.slane %v2942_v6, 1  ;;  %v2970_v11 = vadd.f32 %v2969_v56, %v2968_v19  ;;  %v3000_v63 = vadd.f32 %v2999_v24, %v2998_v21 }
 0x1f3   : > { %v12476_v36 = vpop.eup %10622  ;;  %v3030_v52 = vmul.f32 %v10621_v48, %v12270_v14  ;;  %v3031_v39 = vmul.f32 %v10621_v48, %v12272_v3  ;;  %v3028_v0 = vmul.f32 %v10621_v48, %v12089_v20  ;;  %v3029_v32 = vmul.f32 %v10621_v48, %v12096_v29 }
 0x1f4   : > { %v3032_v42 = vmul.f32 %v10621_v48, %v12114_v34  ;;  %v3033_v9 = vmul.f32 %v10621_v48, %v15710_v23  ;;  %v2944_v57 = vadd.f32 %v2943_v12, %v2942_v6  ;;  %v2960_v7 = vrot.slane %v2959_v40, 1  ;;  %v12484_v49 = vpop.eup %10624 }
 0x1f5   : > { %v3076_v56 = vpack.c.bf16 %v3031_v39, %v3030_v52  ;;  %v3075_v26 = vpack.c.bf16 %v3029_v32, %v3028_v0  ;;  %v2972_v25 = vadd.f32 %v2971_v31, %v2970_v11  ;;  %v2989_v19 = vadd.f32 %v2988_v50, %v2987_v45 }
 0x1f6   : > { %10626 = vrcp.f32 %v2944_v57  ;;  %v2961_v14 = vadd.f32 %v2960_v7, %v2959_v40  ;;  %v3002_v51 = vadd.f32 %v3001_v10, %v3000_v63  ;;  %v3003_v34 = vsel %vm2596_vm2, %v12476_v36, 0.0 }
 0x1f7   : > { %3131 = vrot.lane.b32.xlu1 %v3076_v56, %s10999_s18  ;;  %3129 = vrot.lane.b32.xlu0 %v3075_v26, %s10999_s18  ;;  %v2973_v20 = vrot.slane %v2972_v25, 4  ;;  %v2990_v29 = vrot.slane %v2989_v19, 4  ;;  %v3077_v6 = vpack.c.bf16 %v3033_v9, %v3032_v42  ;;  %v3005_v31 = vsel %vm2596_vm2, %v12484_v49, 0.0 }
 0x1f8   : > { %10628 = vrcp.f32 %v2961_v14  ;;  %v3004_v3 = vadd.f32 %v3003_v34, %v3002_v51 }
 0x1f9   : > { %v2974_v21 = vadd.f32 %v2973_v20, %v2972_v25  ;;  %v2991_v24 = vadd.f32 %v2990_v29, %v2989_v19 }
 0x1fa   : > { %v3006_v50 = vadd.f32 %v3005_v31, %v3004_v3 }
 0x1fb   : > { %3133 = vrot.lane.b32.xlu0 %v3077_v6, %s10999_s18  ;;  %v2975_v40 = vrot.slane %v2974_v21, 2  ;;  %v2992_v45 = vrot.slane %v2991_v24, 2 }
 0x1fc   : > { %v3007_v48 = vrot.slane %v3006_v50, 4 }
 0x1fd   : > { %v2976_v10 = vadd.f32 %v2975_v40, %v2974_v21  ;;  %v2993_v12 = vadd.f32 %v2992_v45, %v2991_v24 }
 0x1fe   : > { %v3008_v11 = vadd.f32 %v3007_v48, %v3006_v50 }
 0x1ff   : > { %v2977_v63 = vrot.slane %v2976_v10, 1  ;;  %v2994_v52 = vrot.slane %v2993_v12, 1 }
 0x200   : > { %v10627_v39 = vpop.eup %10626  ;;  %v3009_v0 = vrot.slane %v3008_v11, 2 }
 0x201   : > { %v3035_v32 = vmul.f32 %v10627_v39, %v12310_v4  ;;  %v3036_v42 = vmul.f32 %v10627_v39, %v12345_v44  ;;  %v3037_v23 = vmul.f32 %v10627_v39, %v12141_v33  ;;  %v3038_v9 = vmul.f32 %v10627_v39, %v12146_v58 }
 0x202   : > { %v10629_v57 = vpop.eup %10628  ;;  %v2978_v7 = vadd.f32 %v2977_v63, %v2976_v10  ;;  %v2995_v56 = vadd.f32 %v2994_v52, %v2993_v12  ;;  %v3039_v19 = vmul.f32 %v10627_v39, %v12150_v22  ;;  %v3040_v14 = vmul.f32 %v10627_v39, %v12212_v15  ;;  %v9372_v63 = vld [vmem:[%s11498_s14 + $0x188] sm:$0xff]  ;;  %v9373_v52 = vld [vmem:[%s11498_s14 + $0x190] sm:$0xff] }
 0x203   : > { %v3078_v26 = vpack.c.bf16 %v3036_v42, %v3035_v32  ;;  %v3079_v25 = vpack.c.bf16 %v3038_v9, %v3037_v23  ;;  %v3042_v51 = vmul.f32 %v10629_v57, %v12220_v46  ;;  %v3043_v20 = vmul.f32 %v10629_v57, %v12226_v17  ;;  %v9376_v39 = vld [vmem:[%s11498_s14 + $0x1a8] sm:$0xff]  ;;  %v9378_v32 = vld [vmem:[%s11498_s14 + $0x1b8] sm:$0xff]  ;;  %v9379_v42 = vld [vmem:[%s11498_s14 + $0x1c0] sm:$0xff] }
 0x204   : > { %v3044_v33 = vmul.f32 %v10629_v57, %v12355_v27  ;;  %v3045_v58 = vmul.f32 %v10629_v57, %v12363_v5  ;;  %10630 = vrcp.f32 %v2978_v7  ;;  %v3010_v4 = vadd.f32 %v3009_v0, %v3008_v11  ;;  %v9377_v0 = vld [vmem:[%s11498_s14 + $0x1b0] sm:$0xff]  ;;  %v9380_v23 = vld [vmem:[%s11498_s14 + $0x1c8] sm:$0xff]  ;;  %v9383_v7 = vld [vmem:[%s11498_s14 + $0x1e0] sm:$0xff] }
 0x205   : > { %3135 = vrot.lane.b32.xlu1 %v3078_v26, %s10999_s18  ;;  %3137 = vrot.lane.b32.xlu0 %v3079_v25, %s10999_s18  ;;  %v3081_v44 = vpack.c.bf16 %v3043_v20, %v3042_v51  ;;  %10632 = vrcp.f32 %v2995_v56  ;;  %v3080_v29 = vpack.c.bf16 %v3040_v14, %v3039_v19  ;;  %v3046_v22 = vmul.f32 %v10629_v57, %v12234_v54  ;;  %v9381_v9 = vld [vmem:[%s11498_s14 + $0x1d0] sm:$0xff]  ;;  %v9384_v25 = vld [vmem:[%s11498_s14 + $0x1e8] sm:$0xff] }
 0x206   : > { %v3047_v15 = vmul.f32 %v10629_v57, %v12237_v60  ;;  %v3011_v46 = vrot.slane %v3010_v4, 1  ;;  %v3082_v17 = vpack.c.bf16 %v3045_v58, %v3044_v33  ;;  %v9382_v57 = vld [vmem:[%s11498_s14 + $0x1d8] sm:$0xff]  ;;  %v9385_v19 = vld [vmem:[%s11498_s14 + $0x1f0] sm:$0xff]  ;;  %v9387_v20 = vld [vmem:[%s11498_s14 + $0x200] sm:$0xff] }
 0x207   : > { %v9386_v51 = vld [vmem:[%s11498_s14 + $0x1f8] sm:$0xff]  ;;  %v9388_v33 = vld [vmem:[%s11498_s14 + $0x208] sm:$0xff]  ;;  %v9389_v58 = vld [vmem:[%s11498_s14 + $0x210] sm:$0xff] }
 0x208   : > { %v3012_v34 = vadd.f32 %v3011_v46, %v3010_v4  ;;  %v3083_v3 = vpack.c.bf16 %v3047_v15, %v3046_v22  ;;  %v9390_v4 = vld [vmem:[%s11498_s14 + $0x218] sm:$0xff]  ;;  %v9393_v22 = vld [vmem:[%s11498_s14 + $0x230] sm:$0xff]  ;;  %v9395_v46 = vld [vmem:[%s11498_s14 + $0x240] sm:$0xff] }
 0x209   : > { %3139 = vrot.lane.b32.xlu1 %v3080_v29, %s10999_s18  ;;  %3141 = vrot.lane.b32.xlu0 %v3081_v44, %s10999_s18  ;;  %v9391_v44 = vld [vmem:[%s11498_s14 + $0x220] sm:$0xff]  ;;  %v9392_v29 = vld [vmem:[%s11498_s14 + $0x228] sm:$0xff] }
 0x20a   : > { %10634 = vrcp.f32 %v3012_v34  ;;  %v9394_v15 = vld [vmem:[%s11498_s14 + $0x238] sm:$0xff]  ;;  %v9397_v34 = vld [vmem:[%s11498_s14 + $0x250] sm:$0xff] }
 0x20d   : > { %3143 = vrot.lane.b32.xlu1 %v3082_v17, %s10999_s18  ;;  %3145 = vrot.lane.b32.xlu0 %v3083_v3, %s10999_s18  ;;  %v9396_v17 = vld [vmem:[%s11498_s14 + $0x248] sm:$0xff]  ;;  %v9398_v3 = vld [vmem:[%s11498_s14 + $0x258] sm:$0xff] }
 0x20e   : > { %v10631_v27 = vpop.eup %10630 }
 0x20f   : > { %v10633_v5 = vpop.eup %10632  ;;  %v3049_v6 = vmul.f32 %v10631_v27, %v12408_v37  ;;  %v3050_v54 = vmul.f32 %v10631_v27, %v12419_v16  ;;  %v3051_v60 = vmul.f32 %v10631_v27, %v12278_v1  ;;  %v3052_v21 = vmul.f32 %v10631_v27, %v12290_v18 }
 0x210   : > { %v3053_v24 = vmul.f32 %v10631_v27, %v12298_v2  ;;  %v3054_v31 = vmul.f32 %v10631_v27, %v12318_v30  ;;  %v3056_v45 = vmul.f32 %v10633_v5, %v12331_v35  ;;  %v3057_v48 = vmul.f32 %v10633_v5, %v12339_v38  ;;  %v9399_v27 = vld [vmem:[%s11498_s14 + $0x260] sm:$0xff] }
 0x211   : > { %v3084_v50 = vpack.c.bf16 %v3050_v54, %v3049_v6  ;;  %v3085_v40 = vpack.c.bf16 %v3052_v21, %v3051_v60  ;;  %v3058_v10 = vmul.f32 %v10633_v5, %v12432_v8  ;;  %v3059_v37 = vmul.f32 %v10633_v5, %v12438_v61  ;;  %v9400_v54 = vld [vmem:[%s11498_s14 + $0x268] sm:$0xff]  ;;  %v9401_v60 = vld [vmem:[%s11498_s14 + $0x270] sm:$0xff]  ;;  %v9402_v21 = vld [vmem:[%s11498_s14 + $0x278] sm:$0xff] }
 0x212   : > { %v3087_v1 = vpack.c.bf16 %v3057_v48, %v3056_v45  ;;  %v3086_v16 = vpack.c.bf16 %v3054_v31, %v3053_v24  ;;  %v3060_v2 = vmul.f32 %v10633_v5, %v12370_v62  ;;  %v3061_v30 = vmul.f32 %v10633_v5, %v12380_v55  ;;  %v9403_v24 = vld [vmem:[%s11498_s14 + $0x280] sm:$0xff]  ;;  %v9406_v48 = vld [vmem:[%s11498_s14 + $0x298] sm:$0xff] }
 0x213   : > { %3147 = vrot.lane.b32.xlu1 %v3084_v50, %s10999_s18  ;;  %3149 = vrot.lane.b32.xlu0 %v3085_v40, %s10999_s18  ;;  %v3088_v12 = vpack.c.bf16 %v3059_v37, %v3058_v10  ;;  %v9404_v50 = vld [vmem:[%s11498_s14 + $0x288] sm:$0xff]  ;;  %v9405_v40 = vld [vmem:[%s11498_s14 + $0x290] sm:$0xff] }
 0x214   : > { %v10635_v18 = vpop.eup %10634  ;;  %v3089_v11 = vpack.c.bf16 %v3061_v30, %v3060_v2  ;;  %v9407_v10 = vld [vmem:[%s11498_s14 + $0x2a0] sm:$0xff]  ;;  %v9410_v2 = vld [vmem:[%s11498_s14 + $0x2b8] sm:$0xff] }
 0x215   : > { %v3063_v35 = vmul.f32 %v10635_v18, %v12444_v53  ;;  %v3064_v38 = vmul.f32 %v10635_v18, %v12455_v47  ;;  %v3065_v8 = vmul.f32 %v10635_v18, %v12395_v43  ;;  %v3066_v61 = vmul.f32 %v10635_v18, %v12401_v59  ;;  %v9371_v43 = vld [vmem:[%s11498_s14 + $0x180] sm:$0xff] }
 0x216   : > { %v3067_v53 = vmul.f32 %v10635_v18, %v12476_v36  ;;  %v3068_v47 = vmul.f32 %v10635_v18, %v12484_v49  ;;  %v9374_v36 = vld [vmem:[%s11498_s14 + $0x198] sm:$0xff]  ;;  %v9375_v49 = vld [vmem:[%s11498_s14 + $0x1a0] sm:$0xff]  ;;  %v9408_v18 = vld [vmem:[%s11498_s14 + $0x2a8] sm:$0xff] }
 0x217   : > { %3151 = vrot.lane.b32.xlu1 %v3086_v16, %s10999_s18  ;;  %3153 = vrot.lane.b32.xlu0 %v3087_v1, %s10999_s18  ;;  %v3090_v62 = vpack.c.bf16 %v3064_v38, %v3063_v35  ;;  %v3091_v55 = vpack.c.bf16 %v3066_v61, %v3065_v8  ;;  %v9409_v16 = vld [vmem:[%s11498_s14 + $0x2b0] sm:$0xff]  ;;  %v9411_v30 = vld [vmem:[%s11498_s14 + $0x2c0] sm:$0xff] }
 0x218   : > { %v3092_v59 = vpack.c.bf16 %v3068_v47, %v3067_v53  ;;  %v9413_v35 = vld [vmem:[%s11498_s14 + $0x2d0] sm:$0xff]  ;;  %v9414_v61 = vld [vmem:[%s11498_s14 + $0x2d8] sm:$0xff] }
 0x219   : > { %v9417_v53 = vld [vmem:[%s11498_s14 + $0x2f0] sm:$0xff] }
 0x21b   : > { %3155 = vrot.lane.b32.xlu1 %v3088_v12, %s10999_s18  ;;  %3157 = vrot.lane.b32.xlu0 %v3089_v11, %s10999_s18  ;;  %v9412_v12 = vld [vmem:[%s11498_s14 + $0x2c8] sm:$0xff]  ;;  %v9415_v11 = vld [vmem:[%s11498_s14 + $0x2e0] sm:$0xff] }
 0x21f   : > { %3159 = vrot.lane.b32.xlu1 %v3090_v62, %s10999_s18  ;;  %3161 = vrot.lane.b32.xlu0 %v3091_v55, %s10999_s18  ;;  %v9416_v62 = vld [vmem:[%s11498_s14 + $0x2e8] sm:$0xff] }
 0x223   : > { %3163 = vrot.lane.b32.xlu1 %v3092_v59, %s10999_s18  ;;  %4343 = vperm.xlu0 %10414, %v9371_v43   ;;  %v9418_v43 = vld [vmem:[%s11498_s14 + $0x2f8] sm:$0xff]  ;;  %v10440_v59 = vld [vmem:[%s15437_s5 + $0x8] sm:$0xff]  }
 0x227   : > { %4348 = vperm.xlu1 %10415, %v9372_v63   ;;  %4353 = vperm.xlu0 %10414, %v9373_v52   ;;  %v10441_v63 = vld [vmem:[%s15437_s5 + $0x10] sm:$0xff]  }
 0x22b   : > { %4358 = vperm.xlu1 %10415, %v9374_v36   ;;  %4363 = vperm.xlu0 %10414, %v9375_v49   ;;  %v10442_v49 = vld [vmem:[%s15437_s5 + $0x18] sm:$0xff]  }
 0x22f   : > { %4368 = vperm.xlu1 %10415, %v9376_v39   ;;  %4373 = vperm.xlu0 %10414, %v9377_v0   ;;  %v10443_v0 = vld [vmem:[%s15437_s5 + $0x20] sm:$0xff]  }
 0x233   : > { %4378 = vperm.xlu1 %10415, %v9378_v32   ;;  %4383 = vperm.xlu0 %10414, %v9379_v42  }
 0x237   : > { %4388 = vperm.xlu1 %10415, %v9380_v23   ;;  %4393 = vperm.xlu0 %10414, %v9381_v9  }
 0x23b   : > { %v3120_v56 = vpop.permute.xlu1 %3119  ;;  %v3118_v26 = vpop.permute.xlu0 %3117  ;;  %4398 = vperm.xlu1 %10415, %v9382_v57   ;;  %4403 = vperm.xlu0 %10414, %v9383_v7  }
 0x23c   : > { %9979 = vmatprep.mubr.msk.bf16.mxu1 %vm2006_vm1, %v3118_v26 }
 0x23d   : > { %9980 = vmatmul.mubr.msk.bf16.vlgmr.msra.gmra.mrb[4].mxu1 %vm2006_vm1, %v3120_v56 }
 0x23e   : > { %10036 = vmatpush3.bf16.msra.mxu1 %v10440_v59 }
 0x23f   : > { %v3122_v14 = vpop.permute.xlu0 %3121  ;;  %4408 = vperm.xlu1 %10415, %v9384_v25   ;;  %4413 = vperm.xlu0 %10414, %v9385_v19  }
 0x240   : > { %9983 = vmatprep.mubr.msk.bf16.mxu1 %vm2006_vm1, %v3122_v14  ;;  %10037 = vmatprep.subr.bf16.mxu1 %v15500_v41 }
 0x242   : > { %10038 = vmatpush3.bf16.msra.mxu1 %v10441_v63 }
 0x243   : > { %4418 = vperm.xlu1 %10415, %v9386_v51   ;;  %4423 = vperm.xlu0 %10414, %v9387_v20   ;;  %v15711_v51 = vld [vmem:[#allocation6_spill] sm:$0xff] }
 0x244   : > { %10039 = vmatprep.subr.bf16.mxu1 %v15500_v41 }
 0x246   : > { %10040 = vmatpush3.bf16.msra.mxu1 %v10442_v49 }
 0x247   : > { %4428 = vperm.xlu1 %10415, %v9388_v33   ;;  %4433 = vperm.xlu0 %10414, %v9389_v58  }
 0x248   : > { %10041 = vmatprep.subr.bf16.mxu1 %v15500_v41 }
 0x24a   : > { %10042 = vmatpush3.bf16.msra.mxu1 %v10443_v0 }
 0x24b   : > { %4438 = vperm.xlu1 %10415, %v9390_v4   ;;  %4443 = vperm.xlu0 %10414, %v9391_v44  }
 0x24c   : > { %10374 = vmatprep.subr.msk.bf16.mxu1 %vm2079_vm0, %v12428_v13  ;;  %v1592_v13 = vld [vmem:[%s15437_s5 + $0x4] sm:$0x8] }
 0x24d   : > { %v1593_v25 = vunpack.c.l.bf16 %v1592_v13 }
 0x24f   : > { %4448 = vperm.xlu1 %10415, %v9392_v29   ;;  %4453 = vperm.xlu0 %10414, %v9393_v22   ;;  %v1751_v20 = vrot.slane %v1593_v25, %v15711_v51 }
 0x253   : > { %4458 = vperm.xlu1 %10415, %v9394_v15   ;;  %4463 = vperm.xlu0 %10414, %v9395_v46   ;;  %v10444_v15 = vld [vmem:[%s15437_s5 + $0x3c] sm:$0xff]   ;;  %v10445_v46 = vld [vmem:[%s15437_s5 + $0x44] sm:$0xff]  }
 0x254   : > { %10028 = vmatpush3.bf16.msra.mxu0 %v10444_v15 }
 0x255   : > { %10029 = vmatprep.subr.bf16.mxu0 %v15500_v41 }
 0x257   : > { %4468 = vperm.xlu1 %10415, %v9396_v17   ;;  %4473 = vperm.xlu0 %10414, %v9397_v34  }
 0x258   : > { %10030 = vmatpush3.bf16.msra.mxu0 %v10445_v46 }
 0x25b   : > { %v3124_v5 = vpop.permute.xlu1 %3123  ;;  %v3126_v6 = vpop.permute.xlu0 %3125  ;;  %4478 = vperm.xlu1 %10415, %v9398_v3   ;;  %4483 = vperm.xlu0 %10414, %v9399_v27   ;;  %v15712_v3 = vld [vmem:[#allocation8_spill] sm:$0xff] }
 0x25c   : > { %9984 = vmatmul.mubr.msk.bf16.gmra.mrb[8].mxu1 %vm2006_vm1, %v3124_v5 }
 0x25d   : > { %9987 = vmatprep.mubr.msk.bf16.mxu1 %vm2006_vm1, %v3126_v6 }
 0x25f   : > { %4488 = vperm.xlu1 %10415, %v9400_v54   ;;  %4493 = vperm.xlu0 %10414, %v9401_v60   ;;  %v3128_v31 = vpop.permute.xlu1 %3127  ;;  %v15713_v54 = vld [vmem:[#allocation7_spill] sm:$0xff] }
 0x263   : > { %4498 = vperm.xlu1 %10415, %v9402_v21   ;;  %4503 = vperm.xlu0 %10414, %v9403_v24   ;;  %v15714_v21 = vld [vmem:[#allocation10_spill] sm:$0xff] }
 0x264   : > { %9988 = vmatmul.mubr.msk.bf16.gmra.mrb[12].mxu1 %vm2006_vm1, %v3128_v31 }
 0x267   : > { %4508 = vperm.xlu1 %10415, %v9404_v50   ;;  %4513 = vperm.xlu0 %10414, %v9405_v40   ;;  %v15715_v50 = vld [vmem:[#allocation9_spill] sm:$0xff] }
 0x269   : > { %v3130_v45 = vpop.permute.xlu0 %3129  ;;  %v3132_v37 = vpop.permute.xlu1 %3131 }
 0x26a   : > { %9991 = vmatprep.mubr.msk.bf16.mxu1 %vm2006_vm1, %v3130_v45 }
 0x26b   : > { %4518 = vperm.xlu1 %10415, %v9406_v48   ;;  %4523 = vperm.xlu0 %10414, %v9407_v10  }
 0x26c   : > { %9992 = vmatmul.mubr.msk.bf16.gmra.mrb[16].mxu1 %vm2006_vm1, %v3132_v37 }
 0x26d   : > { %v3134_v1 = vpop.permute.xlu0 %3133 }
 0x26e   : > { %9995 = vmatprep.mubr.msk.bf16.mxu1 %vm2006_vm1, %v3134_v1 }
 0x26f   : > { %4528 = vperm.xlu1 %10415, %v9408_v18   ;;  %4533 = vperm.xlu0 %10414, %v9409_v16   ;;  %v12652_v16 = vld [vmem:[%s15437_s5 + $0x2c] sm:$0x3] }
 0x270   : > { %10373 = vmatprep.subr.msk.bf16.mxu0 %vm2079_vm0, %v12652_v16 }
 0x273   : > { %4538 = vperm.xlu1 %10415, %v9410_v2   ;;  %4543 = vperm.xlu0 %10414, %v9411_v30   ;;  %v15716_v30 = vld [vmem:[#allocation12_spill] sm:$0xff] }
 0x277   : > { %v3136_v38 = vpop.permute.xlu1 %3135  ;;  %v3138_v8 = vpop.permute.xlu0 %3137  ;;  %4548 = vperm.xlu1 %10415, %v9412_v12   ;;  %4553 = vperm.xlu0 %10414, %v9413_v35  }
 0x278   : > { %9996 = vmatmul.mubr.msk.bf16.gmra.mrb[20].mxu1 %vm2006_vm1, %v3136_v38  ;;  %v15717_v38 = vld [vmem:[#allocation11_spill] sm:$0xff] }
 0x279   : > { %9999 = vmatprep.mubr.msk.bf16.mxu1 %vm2006_vm1, %v3138_v8 }
 0x27b   : > { %4558 = vperm.xlu1 %10415, %v9414_v61   ;;  %4563 = vperm.xlu0 %10414, %v9415_v11   ;;  %v3142_v55 = vpop.permute.xlu0 %3141  ;;  %v3140_v47 = vpop.permute.xlu1 %3139  ;;  %v15718_v11 = vld [vmem:[#allocation13_spill] sm:$0xff] }
 0x27f   : > { %4568 = vperm.xlu1 %10415, %v9416_v62   ;;  %4573 = vperm.xlu0 %10414, %v9417_v53   ;;  %v3146_v52 = vpop.permute.xlu0 %3145  ;;  %v3144_v36 = vpop.permute.xlu1 %3143 }
 0x280   : > { %10000 = vmatmul.mubr.msk.bf16.gmra.mrb[24].mxu1 %vm2006_vm1, %v3140_v47  ;;  %v15719_v47 = vld [vmem:[#allocation14_spill] sm:$0xff] }
 0x281   : > { %10003 = vmatprep.mubr.msk.bf16.mxu1 %vm2006_vm1, %v3142_v55 }
 0x283   : > { %4578 = vperm.xlu1 %10415, %v9418_v43  }
 0x285   : > { %v3148_v39 = vpop.permute.xlu1 %3147  ;;  %v3150_v32 = vpop.permute.xlu0 %3149 }
 0x288   : > { %10004 = vmatmul.mubr.msk.bf16.gmra.mrb[28].mxu1 %vm2006_vm1, %v3144_v36 }
 0x289   : > { %10007 = vmatprep.mubr.msk.bf16.mxu1 %vm2006_vm1, %v3146_v52  ;;  %v3154_v42 = vpop.permute.xlu0 %3153  ;;  %v3152_v23 = vpop.permute.xlu1 %3151 }
 0x28d   : > { %v3158_v9 = vpop.permute.xlu0 %3157  ;;  %v3156_v57 = vpop.permute.xlu1 %3155 }
 0x290   : > { %10008 = vmatmul.mubr.msk.bf16.gmra.mrb[32].mxu1 %vm2006_vm1, %v3148_v39 }
 0x291   : > { %10011 = vmatprep.mubr.msk.bf16.mxu1 %vm2006_vm1, %v3150_v32  ;;  %v3160_v7 = vpop.permute.xlu1 %3159  ;;  %v3162_v56 = vpop.permute.xlu0 %3161 }
 0x295   : > { %v3164_v26 = vpop.permute.xlu1 %3163 }
 0x298   : > { %10012 = vmatmul.mubr.msk.bf16.gmra.mrb[36].mxu1 %vm2006_vm1, %v3152_v23  ;;  %v15720_v23 = vld [vmem:[#allocation16_spill] sm:$0xff] }
 0x299   : > { %10015 = vmatprep.mubr.msk.bf16.mxu1 %vm2006_vm1, %v3154_v42 }
 0x2a0   : > { %10016 = vmatmul.mubr.msk.bf16.gmra.mrb[40].mxu1 %vm2006_vm1, %v3156_v57 }
 0x2a1   : > { %10019 = vmatprep.mubr.msk.bf16.mxu1 %vm2006_vm1, %v3158_v9 }
 0x2a8   : > { %10020 = vmatmul.mubr.msk.bf16.gmra.mrb[44].mxu1 %vm2006_vm1, %v3160_v7 }
 0x2a9   : > { %10023 = vmatprep.mubr.msk.bf16.mxu1 %vm2006_vm1, %v3162_v56 }
 0x2b0   : > { %10024 = vmatmul.mubr.msk.bf16.gmra.mrb[48].mxu1 %vm2006_vm1, %v3164_v26  ;;  %v15721_v26 = vld [vmem:[#allocation15_spill] sm:$0xff] }
 0x2b1   : > { %10043 = vmatprep.mubr.msk.bf16.mxu1 %vm11001_vm4, %v15500_v41 }
 0x2bb   : > { %v1670_v19 = vpop.f32.mrb[0].mxu1 }
 0x2bc   : > { %v9921_v14 = vpop.f32.mrb[1].mxu1 }
 0x2bf   : > { %v1744_v33 = vpop.f32.mrb[2].mxu1 }
 0x2c0   : > { %v1745_v58 = vadd.f32 %v1744_v33, %v1670_v19  ;;  %v9926_v4 = vpop.f32.mrb[3].mxu1  ;;  %v15722_v19 = vld [vmem:[#allocation18_spill] sm:$0xff]  ;;  %v15723_v33 = vld [vmem:[#allocation17_spill] sm:$0xff] }
 0x2c2   : > { %v1752_v44 = vadd.f32 %v1751_v20, %v1745_v58 }
 0x2c4   : > { %v1753_v29 = vmax.f32 %v1752_v44, 0.0 }
 0x2c6   : > { %v1754_v22 = vpack.c.bf16 %v1753_v29, %v1753_v29 }
 0x2c8   : > { %10044 = vmatmul.mubr.msk.bf16.vlgmr.msra.gmra.mrb[52].mxu1 %vm3772_vm7, %v1754_v22 }
 0x2c9   : > { %10098 = vmatpush3.bf16.msra.mxu1 %v12453_v28 }
 0x310   : > { %v9981_v17 = vpop.f32.mrb[4].mxu1 }
 0x311   : > { %v3274_v34 = vpop.f32.mrb[5].mxu1  ;;  %v3467_v60 = vmul.f32 %v9981_v17, %v15713_v54 }
 0x312   : > { %v3465_v27 = vmul.f32 %v3274_v34, %v15712_v3  ;;  %v9982_v5 = vpop.f32.mrb[6].mxu1  ;;  %v15724_v3 = vld [vmem:[#allocation20_spill] sm:$0xff] }
 0x313   : > { %v3277_v6 = vpop.f32.mrb[7].mxu1  ;;  %v3468_v40 = vmul.f32 %v9982_v5, %v15715_v50  ;;  %v3517_v10 = vsel %vm3513_vm8, %v3467_v60, 0.0 }
 0x314   : > { %v3466_v24 = vmul.f32 %v3277_v6, %v15714_v21  ;;  %v3514_v31 = vsel %vm3513_vm8, %v3465_v27, 0.0  ;;  %v15725_v21 = vld [vmem:[#allocation19_spill] sm:$0xff] }
 0x315   : > { %v3519_v1 = vsel %vm3513_vm8, %v3468_v40, 0.0 }
 0x316   : > { %v3515_v45 = vsel %vm3513_vm8, %v3466_v24, 0.0 }
 0x317   : > { %v3516_v48 = vadd.f32 %v3515_v45, %v3514_v31  ;;  %v15726_v31 = vld [vmem:[#allocation21_spill] sm:$0xff] }
 0x319   : > { %v3518_v37 = vadd.f32 %v3517_v10, %v3516_v48  ;;  %v15727_v48 = vld [vmem:[#allocation22_spill] sm:$0xff] }
 0x31b   : > { %v3520_v18 = vadd.f32 %v3519_v1, %v3518_v37 }
 0x32f   : > { %v9985_v2 = vpop.f32.mrb[8].mxu1 }
 0x330   : > { %v3471_v12 = vmul.f32 %v9985_v2, %v15716_v30  ;;  %v3290_v35 = vpop.f32.mrb[9].mxu1 }
 0x331   : > { %v3469_v8 = vmul.f32 %v3290_v35, %v15717_v38  ;;  %v9986_v61 = vpop.f32.mrb[10].mxu1 }
 0x332   : > { %v3472_v62 = vmul.f32 %v9986_v61, %v15718_v11  ;;  %v3293_v55 = vpop.f32.mrb[11].mxu1  ;;  %v3531_v59 = vsel %vm3513_vm8, %v3471_v12, 0.0 }
 0x333   : > { %v3521_v53 = vsel %vm3513_vm8, %v3469_v8, 0.0  ;;  %v3470_v43 = vmul.f32 %v3293_v55, %v15719_v47 }
 0x334   : > { %v3522_v63 = vadd.f32 %v3521_v53, %v3520_v18  ;;  %v3532_v52 = vsel %vm3513_vm8, %v3472_v62, 0.0  ;;  %v15728_v53 = vld [vmem:[#allocation23_spill] sm:$0xff] }
 0x335   : > { %v3533_v36 = vadd.f32 %v3532_v52, %v3531_v59  ;;  %v3523_v49 = vsel %vm3513_vm8, %v3470_v43, 0.0  ;;  %v15729_v59 = vld [vmem:[#allocation24_spill] sm:$0xff] }
 0x336   : > { %v3524_v39 = vadd.f32 %v3523_v49, %v3522_v63 }
 0x337   : > { %v9989_v0 = vpop.f32.mrb[12].mxu1 }
 0x338   : > { %v3525_v32 = vrot.slane %v3524_v39, 4  ;;  %v3306_v42 = vpop.f32.mrb[13].mxu1  ;;  %v3475_v13 = vmul.f32 %v9989_v0, %v15721_v26 }
 0x339   : > { %v3473_v9 = vmul.f32 %v3306_v42, %v15720_v23  ;;  %v9990_v57 = vpop.f32.mrb[14].mxu1  ;;  %v15731_v23 = vld [vmem:[#allocation26_spill] sm:$0xff] }
 0x33a   : > { %v3526_v7 = vadd.f32 %v3525_v32, %v3524_v39  ;;  %v3309_v56 = vpop.f32.mrb[15].mxu1  ;;  %v3476_v58 = vmul.f32 %v9990_v57, %v15723_v33  ;;  %v3538_v22 = vsel %vm3513_vm8, %v3475_v13, 0.0  ;;  %v15730_v39 = vld [vmem:[#allocation25_spill] sm:$0xff] }
 0x33b   : > { %v3534_v25 = vsel %vm3513_vm8, %v3473_v9, 0.0  ;;  %v3474_v14 = vmul.f32 %v3309_v56, %v15722_v19 }
 0x33c   : > { %v3535_v20 = vadd.f32 %v3534_v25, %v3533_v36  ;;  %v3527_v44 = vrot.slane %v3526_v7, 2  ;;  %v3540_v34 = vsel %vm3513_vm8, %v3476_v58, 0.0 }
 0x33d   : > { %v3536_v4 = vsel %vm3513_vm8, %v3474_v14, 0.0 }
 0x33e   : > { %v3537_v29 = vadd.f32 %v3536_v4, %v3535_v20  ;;  %v3528_v6 = vadd.f32 %v3527_v44, %v3526_v7 }
 0x33f   : > { %v9993_v15 = vpop.f32.mrb[16].mxu1 }
 0x340   : > { %v3539_v46 = vadd.f32 %v3538_v22, %v3537_v29  ;;  %v3322_v17 = vpop.f32.mrb[17].mxu1  ;;  %v3479_v24 = vmul.f32 %v9993_v15, %v15725_v21  ;;  %v3529_v1 = vrot.slane %v3528_v6, 1  ;;  %v15732_v29 = vld [vmem:[#allocation27_spill] sm:$0xff]  ;;  %v15735_v21 = vld [vmem:[#allocation29_spill] sm:$0xff] }
 0x341   : > { %v3477_v27 = vmul.f32 %v3322_v17, %v15724_v3  ;;  %v9994_v5 = vpop.f32.mrb[18].mxu1 }
 0x342   : > { %v3541_v54 = vadd.f32 %v3540_v34, %v3539_v46  ;;  %v3325_v60 = vpop.f32.mrb[19].mxu1  ;;  %v3480_v10 = vmul.f32 %v9994_v5, %v15727_v48  ;;  %v3551_v30 = vsel %vm3513_vm8, %v3479_v24, 0.0  ;;  %v3530_v8 = vadd.f32 %v3529_v1, %v3528_v6  ;;  %v15733_v34 = vld [vmem:[#allocation28_spill] sm:$0xff]  ;;  %v15734_v5 = vld [vmem:[#allocation30_spill] sm:$0xff] }
 0x343   : > { %v3478_v50 = vmul.f32 %v3325_v60, %v15726_v31  ;;  %v3548_v45 = vsel %vm3513_vm8, %v3477_v27, 0.0 }
 0x344   : > { %v3542_v40 = vrot.slane %v3541_v54, 4  ;;  %v3553_v38 = vsel %vm3513_vm8, %v3480_v10, 0.0  ;;  %v3654_v36 = vpack.c.bf16 %v3530_v8, %v3530_v8 }
 0x345   : > { %v3549_v37 = vsel %vm3513_vm8, %v3478_v50, 0.0 }
 0x346   : > { %v3543_v18 = vadd.f32 %v3542_v40, %v3541_v54  ;;  %v3550_v2 = vadd.f32 %v3549_v37, %v3548_v45  ;;  %v3670_v19 = vunpack.c.l.b16 %v3654_v36 }
 0x348   : > { %v3544_v12 = vrot.slane %v3543_v18, 2  ;;  %v3552_v35 = vadd.f32 %v3551_v30, %v3550_v2  ;;  %v15736_v2 = vld [vmem:[#allocation32_spill] sm:$0xff] }
 0x34a   : > { %v3545_v61 = vadd.f32 %v3544_v12, %v3543_v18  ;;  %v3554_v11 = vadd.f32 %v3553_v38, %v3552_v35 }
 0x34b   : > { %v9997_v62 = vpop.f32.mrb[20].mxu1 }
 0x34c   : > { %v3546_v55 = vrot.slane %v3545_v61, 1  ;;  %v3483_v47 = vmul.f32 %v9997_v62, %v15728_v53  ;;  %v3338_v43 = vpop.f32.mrb[21].mxu1  ;;  %v15738_v62 = vld [vmem:[#allocation34_spill] sm:$0xff] }
 0x34d   : > { %v3481_v63 = vmul.f32 %v3338_v43, %v15729_v59  ;;  %v9998_v52 = vpop.f32.mrb[22].mxu1  ;;  %v15739_v59 = vld [vmem:[#allocation33_spill] sm:$0xff] }
 0x34e   : > { %v3547_v49 = vadd.f32 %v3546_v55, %v3545_v61  ;;  %v3484_v0 = vmul.f32 %v9998_v52, %v15730_v39  ;;  %v3341_v32 = vpop.f32.mrb[23].mxu1  ;;  %v3565_v7 = vsel %vm3513_vm8, %v3483_v47, 0.0  ;;  %v15737_v61 = vld [vmem:[#allocation31_spill] sm:$0xff] }
 0x34f   : > { %v3555_v42 = vsel %vm3513_vm8, %v3481_v63, 0.0  ;;  %v3482_v9 = vmul.f32 %v3341_v32, %v15731_v23 }
 0x350   : > { %v3655_v57 = vpack.c.bf16 %v3547_v49, %v3547_v49  ;;  %v3556_v56 = vadd.f32 %v3555_v42, %v3554_v11  ;;  %v3566_v26 = vsel %vm3513_vm8, %v3484_v0, 0.0 }
 0x351   : > { %v3567_v13 = vadd.f32 %v3566_v26, %v3565_v7  ;;  %v3557_v25 = vsel %vm3513_vm8, %v3482_v9, 0.0 }
 0x352   : > { %v3671_v14 = vunpack.c.l.b16 %v3655_v57  ;;  %v3558_v20 = vadd.f32 %v3557_v25, %v3556_v56  ;;  %v15740_v57 = vld [vmem:[#allocation35_spill] sm:$0xff] }
 0x353   : > { %v10001_v33 = vpop.f32.mrb[24].mxu1 }
 0x354   : > { %v3559_v58 = vrot.slane %v3558_v20, 4  ;;  %v3679_v4 = vsel %vm3678_vm9, %v3671_v14, %v3670_v19  ;;  %v3354_v44 = vpop.f32.mrb[25].mxu1  ;;  %v3487_v3 = vmul.f32 %v10001_v33, %v15733_v34  ;;  %v15742_v33 = vld [vmem:[#allocation37_spill] sm:$0xff] }
 0x355   : > { %v3485_v22 = vmul.f32 %v3354_v44, %v15732_v29  ;;  %v10002_v15 = vpop.f32.mrb[26].mxu1 }
 0x356   : > { %v3560_v46 = vadd.f32 %v3559_v58, %v3558_v20  ;;  %v3357_v17 = vpop.f32.mrb[27].mxu1  ;;  %v3488_v24 = vmul.f32 %v10002_v15, %v15735_v21  ;;  %v3572_v45 = vsel %vm3513_vm8, %v3487_v3, 0.0 }
 0x357   : > { %v3568_v27 = vsel %vm3513_vm8, %v3485_v22, 0.0  ;;  %v3486_v6 = vmul.f32 %v3357_v17, %v15734_v5  ;;  %v15743_v22 = vld [vmem:[#allocation38_spill] sm:$0xff] }
 0x358   : > { %v3561_v54 = vrot.slane %v3560_v46, 2  ;;  %v3569_v60 = vadd.f32 %v3568_v27, %v3567_v13  ;;  %v3574_v18 = vsel %vm3513_vm8, %v3488_v24, 0.0  ;;  %v15741_v13 = vld [vmem:[#allocation36_spill] sm:$0xff] }
 0x359   : > { %v3570_v31 = vsel %vm3513_vm8, %v3486_v6, 0.0 }
 0x35a   : > { %v3562_v50 = vadd.f32 %v3561_v54, %v3560_v46  ;;  %v3571_v40 = vadd.f32 %v3570_v31, %v3569_v60  ;;  %v15744_v31 = vld [vmem:[#allocation40_spill] sm:$0xff] }
 0x35b   : > { %v10005_v48 = vpop.f32.mrb[28].mxu1 }
 0x35c   : > { %v3563_v10 = vrot.slane %v3562_v50, 1  ;;  %v3573_v37 = vadd.f32 %v3572_v45, %v3571_v40  ;;  %v3370_v1 = vpop.f32.mrb[29].mxu1  ;;  %v3491_v11 = vmul.f32 %v10005_v48, %v15737_v61 }
 0x35d   : > { %v3489_v30 = vmul.f32 %v3370_v1, %v15736_v2  ;;  %v10006_v12 = vpop.f32.mrb[30].mxu1  ;;  %v15746_v2 = vld [vmem:[#allocation45_spill] sm:$0xff] }
 0x35e   : > { %v3564_v35 = vadd.f32 %v3563_v10, %v3562_v50  ;;  %v3575_v38 = vadd.f32 %v3574_v18, %v3573_v37  ;;  %v3373_v8 = vpop.f32.mrb[31].mxu1  ;;  %v3492_v63 = vmul.f32 %v10006_v12, %v15739_v59  ;;  %v3585_v0 = vsel %vm3513_vm8, %v3491_v11, 0.0  ;;  %v15745_v37 = vld [vmem:[#allocation42_spill] sm:$0xff] }
 0x35f   : > { %v3490_v55 = vmul.f32 %v3373_v8, %v15738_v62  ;;  %v3582_v43 = vsel %vm3513_vm8, %v3489_v30, 0.0  ;;  %v15747_v8 = vld [vmem:[#allocation44_spill] sm:$0xff] }
 0x360   : > { %v3656_v53 = vpack.c.bf16 %v3564_v35, %v3564_v35  ;;  %v3576_v47 = vrot.slane %v3575_v38, 4  ;;  %v3587_v26 = vsel %vm3513_vm8, %v3492_v63, 0.0 }
 0x361   : > { %v3583_v52 = vsel %vm3513_vm8, %v3490_v55, 0.0 }
 0x362   : > { %v3672_v36 = vunpack.c.l.b16 %v3656_v53  ;;  %v3577_v49 = vadd.f32 %v3576_v47, %v3575_v38  ;;  %v3584_v39 = vadd.f32 %v3583_v52, %v3582_v43 }
 0x363   : > { %v10009_v32 = vpop.f32.mrb[32].mxu1 }
 0x364   : > { %v3681_v42 = vsel %vm3680_vm10, %v3672_v36, %v3679_v4  ;;  %v3578_v23 = vrot.slane %v3577_v49, 2  ;;  %v3586_v9 = vadd.f32 %v3585_v0, %v3584_v39  ;;  %v3495_v7 = vmul.f32 %v10009_v32, %v15740_v57  ;;  %v3386_v56 = vpop.f32.mrb[33].mxu1  ;;  %v15748_v36 = vld [vmem:[#allocation47_spill] sm:$0xff]  ;;  %v15750_v57 = vld [vmem:[#allocation50_spill] sm:$0xff] }
 0x365   : > { %v3493_v25 = vmul.f32 %v3386_v56, %v15741_v13  ;;  %v10010_v19 = vpop.f32.mrb[34].mxu1 }
 0x366   : > { %v3579_v14 = vadd.f32 %v3578_v23, %v3577_v49  ;;  %v3588_v20 = vadd.f32 %v3587_v26, %v3586_v9  ;;  %v3496_v58 = vmul.f32 %v10010_v19, %v15742_v33  ;;  %v3389_v44 = vpop.f32.mrb[35].mxu1  ;;  %v3599_v46 = vsel %vm3513_vm8, %v3495_v7, 0.0  ;;  %v15749_v23 = vld [vmem:[#allocation48_spill] sm:$0xff] }
 0x367   : > { %v3589_v29 = vsel %vm3513_vm8, %v3493_v25, 0.0  ;;  %v3494_v15 = vmul.f32 %v3389_v44, %v15743_v22  ;;  %v15751_v25 = vld [vmem:[#allocation51_spill] sm:$0xff] }
 0x368   : > { %v3580_v4 = vrot.slane %v3579_v14, 1  ;;  %v3590_v17 = vadd.f32 %v3589_v29, %v3588_v20  ;;  %v3600_v34 = vsel %vm3513_vm8, %v3496_v58, 0.0 }
 0x369   : > { %v3601_v3 = vadd.f32 %v3600_v34, %v3599_v46  ;;  %v3591_v27 = vsel %vm3513_vm8, %v3494_v15, 0.0  ;;  %v15752_v46 = vld [vmem:[#allocation52_spill] sm:$0xff] }
 0x36a   : > { %v3581_v5 = vadd.f32 %v3580_v4, %v3579_v14  ;;  %v3592_v6 = vadd.f32 %v3591_v27, %v3590_v17  ;;  %v15753_v27 = vld [vmem:[#allocation53_spill] sm:$0xff] }
 0x36b   : > { %v10013_v54 = vpop.f32.mrb[36].mxu1 }
 0x36c   : > { %v3657_v60 = vpack.c.bf16 %v3581_v5, %v3581_v5  ;;  %v3593_v21 = vrot.slane %v3592_v6, 4  ;;  %v3402_v24 = vpop.f32.mrb[37].mxu1  ;;  %v3499_v1 = vmul.f32 %v10013_v54, %v15745_v37 }
 0x36d   : > { %v3497_v50 = vmul.f32 %v3402_v24, %v15744_v31  ;;  %v10014_v40 = vpop.f32.mrb[38].mxu1 }
 0x36e   : > { %v3673_v45 = vunpack.c.l.b16 %v3657_v60  ;;  %v3594_v48 = vadd.f32 %v3593_v21, %v3592_v6  ;;  %v3405_v10 = vpop.f32.mrb[39].mxu1  ;;  %v3500_v61 = vmul.f32 %v10014_v40, %v15747_v8  ;;  %v3606_v53 = vsel %vm3513_vm8, %v3499_v1, 0.0  ;;  %v15754_v21 = vld [vmem:[#allocation54_spill] sm:$0xff]  ;;  %v15755_v40 = vld [vmem:[#allocation57_spill] sm:$0xff] }
 0x36f   : > { %v3602_v18 = vsel %vm3513_vm8, %v3497_v50, 0.0  ;;  %v3498_v30 = vmul.f32 %v3405_v10, %v15746_v2 }
 0x370   : > { %v3595_v12 = vrot.slane %v3594_v48, 2  ;;  %v3683_v35 = vsel %vm3682_vm11, %v3673_v45, %v3681_v42  ;;  %v3603_v38 = vadd.f32 %v3602_v18, %v3601_v3  ;;  %v3608_v52 = vsel %vm3513_vm8, %v3500_v61, 0.0 }
 0x371   : > { %v3604_v11 = vsel %vm3513_vm8, %v3498_v30, 0.0 }
 0x372   : > { %v3596_v62 = vadd.f32 %v3595_v12, %v3594_v48  ;;  %v3605_v55 = vadd.f32 %v3604_v11, %v3603_v38  ;;  %v15756_v11 = vld [vmem:[#allocation59_spill] sm:$0xff] }
 0x373   : > { %v10017_v47 = vpop.f32.mrb[40].mxu1 }
 0x374   : > { %v3597_v43 = vrot.slane %v3596_v62, 1  ;;  %v3607_v59 = vadd.f32 %v3606_v53, %v3605_v55  ;;  %v3418_v63 = vpop.f32.mrb[41].mxu1  ;;  %v3503_v9 = vmul.f32 %v10017_v47, %v15749_v23 }
 0x375   : > { %v3501_v49 = vmul.f32 %v3418_v63, %v15748_v36  ;;  %v10018_v39 = vpop.f32.mrb[42].mxu1  ;;  %v15758_v36 = vld [vmem:[#allocation63_spill] sm:$0xff] }
 0x376   : > { %v3598_v0 = vadd.f32 %v3597_v43, %v3596_v62  ;;  %v3609_v32 = vadd.f32 %v3608_v52, %v3607_v59  ;;  %v3421_v42 = vpop.f32.mrb[43].mxu1  ;;  %v3504_v19 = vmul.f32 %v10018_v39, %v15751_v25  ;;  %v3619_v44 = vsel %vm3513_vm8, %v3503_v9, 0.0  ;;  %v15757_v59 = vld [vmem:[#allocation61_spill] sm:$0xff] }
 0x377   : > { %v3502_v7 = vmul.f32 %v3421_v42, %v15750_v57  ;;  %v3616_v13 = vsel %vm3513_vm8, %v3501_v49, 0.0  ;;  %v15759_v42 = vld [vmem:[#allocation62_spill] sm:$0xff] }
 0x378   : > { %v3658_v56 = vpack.c.bf16 %v3598_v0, %v3598_v0  ;;  %v3610_v26 = vrot.slane %v3609_v32, 4  ;;  %v3621_v3 = vsel %vm3513_vm8, %v3504_v19, 0.0 }
 0x379   : > { %v3617_v14 = vsel %vm3513_vm8, %v3502_v7, 0.0 }
 0x37a   : > { %v3674_v20 = vunpack.c.l.b16 %v3658_v56  ;;  %v3611_v33 = vadd.f32 %v3610_v26, %v3609_v32  ;;  %v3618_v58 = vadd.f32 %v3617_v14, %v3616_v13 }
 0x37b   : > { %v10021_v29 = vpop.f32.mrb[44].mxu1 }
 0x37c   : > { %v3685_v22 = vsel %vm3684_vm12, %v3674_v20, %v3683_v35  ;;  %v3612_v15 = vrot.slane %v3611_v33, 2  ;;  %v3620_v4 = vadd.f32 %v3619_v44, %v3618_v58  ;;  %v3507_v17 = vmul.f32 %v10021_v29, %v15752_v46  ;;  %v3434_v34 = vpop.f32.mrb[45].mxu1 }
 0x37d   : > { %v3505_v5 = vmul.f32 %v3434_v34, %v15753_v27  ;;  %v10022_v6 = vpop.f32.mrb[46].mxu1 }
 0x37e   : > { %v3613_v54 = vadd.f32 %v3612_v15, %v3611_v33  ;;  %v3622_v60 = vadd.f32 %v3621_v3, %v3620_v4  ;;  %v3508_v24 = vmul.f32 %v10022_v6, %v15754_v21  ;;  %v3437_v31 = vpop.f32.mrb[47].mxu1  ;;  %v3633_v10 = vsel %vm3513_vm8, %v3507_v17, 0.0  ;;  %v10446_v6 = vld [vmem:[%s11504_s21 + $0xc0] sm:$0xff]  }
 0x37f   : > { %v3623_v50 = vsel %vm3513_vm8, %v3505_v5, 0.0  ;;  %v3506_v45 = vmul.f32 %v3437_v31, %v15755_v40  ;;  %v4114_v21 = vsel %vm2079_vm0, %v12652_v16, 0  ;;  %v10447_v31 = vld [vmem:[%s11504_s21 + $0xc8] sm:$0xff]   ;;  %v10449_v40 = vld [vmem:[%s11504_s21 + $0xd8] sm:$0xff]   ;;  %v10450_v16 = vld [vmem:[%s11504_s21 + $0xe0] sm:$0xff]  }
 0x380   : > { %v3614_v48 = vrot.slane %v3613_v54, 1  ;;  %v3624_v37 = vadd.f32 %v3623_v50, %v3622_v60  ;;  %v3634_v1 = vsel %vm3513_vm8, %v3508_v24, 0.0  ;;  %v10448_v50 = vld [vmem:[%s11504_s21 + $0xd0] sm:$0xff]  }
 0x381   : > { %v3635_v18 = vadd.f32 %v3634_v1, %v3633_v10  ;;  %v3625_v2 = vsel %vm3513_vm8, %v3506_v45, 0.0  ;;  %v10451_v45 = vld [vmem:[%s11504_s21 + $0xe8] sm:$0xff]   ;;  %v10453_v10 = vld [vmem:[%s11504_s21 + $0xf8] sm:$0xff]  }
 0x382   : > { %v3615_v30 = vadd.f32 %v3614_v48, %v3613_v54  ;;  %v3626_v12 = vadd.f32 %v3625_v2, %v3624_v37  ;;  %v10452_v48 = vld [vmem:[%s11504_s21 + $0xf0] sm:$0xff]   ;;  %v10454_v37 = vld [vmem:[%s11504_s21 + $0x100] sm:$0xff]   ;;  %v10455_v1 = vld [vmem:[%s11504_s21 + $0x108] sm:$0xff]  }
 0x383   : > { %v10025_v35 = vpop.f32.mrb[48].mxu1  ;;  %v10457_v2 = vld [vmem:[%s11504_s21 + $0x118] sm:$0xff]  }
 0x384   : > { %v3659_v38 = vpack.c.bf16 %v3615_v30, %v3615_v30  ;;  %v3627_v8 = vrot.slane %v3626_v12, 4  ;;  %v3450_v61 = vpop.f32.mrb[49].mxu1  ;;  %v3511_v63 = vmul.f32 %v10025_v35, %v15757_v59  ;;  %v10458_v30 = vld [vmem:[%s11504_s21 + $0x120] sm:$0xff]   ;;  %v10460_v35 = vld [vmem:[%s11504_s21 + $0x130] sm:$0xff]   ;;  %v4344_v59 = vpop.permute.xlu0 %4343 }
 0x385   : > { %v3509_v62 = vmul.f32 %v3450_v61, %v15756_v11  ;;  %v10026_v55 = vpop.f32.mrb[50].mxu1  ;;  %v10463_v61 = vld [vmem:[%s11504_s21 + $0x148] sm:$0xff]   ;;  %v10464_v11 = vld [vmem:[%s11504_s21 + $0x150] sm:$0xff]  }
 0x386   : > { %v3675_v53 = vunpack.c.l.b16 %v3659_v38  ;;  %v3628_v47 = vadd.f32 %v3627_v8, %v3626_v12  ;;  %v3453_v43 = vpop.f32.mrb[51].mxu1  ;;  %v3512_v23 = vmul.f32 %v10026_v55, %v15759_v42  ;;  %v3640_v56 = vsel %vm3513_vm8, %v3511_v63, 0.0  ;;  %v10459_v12 = vld [vmem:[%s11504_s21 + $0x128] sm:$0xff]   ;;  %v10461_v38 = vld [vmem:[%s11504_s21 + $0x138] sm:$0xff]   ;;  %v10462_v8 = vld [vmem:[%s11504_s21 + $0x140] sm:$0xff]   ;;  %v4349_v63 = vpop.permute.xlu1 %4348 }
 0x387   : > { %v3636_v52 = vsel %vm3513_vm8, %v3509_v62, 0.0  ;;  %v3510_v49 = vmul.f32 %v3453_v43, %v15758_v36  ;;  %v10465_v62 = vld [vmem:[%s11504_s21 + $0x158] sm:$0xff]   ;;  %v10466_v55 = vld [vmem:[%s11504_s21 + $0x160] sm:$0xff]  }
 0x388   : > { %v3629_v39 = vrot.slane %v3628_v47, 2  ;;  %v3687_v0 = vsel %vm3686_vm13, %v3675_v53, %v3685_v22  ;;  %v3637_v32 = vadd.f32 %v3636_v52, %v3635_v18  ;;  %v3642_v25 = vsel %vm3513_vm8, %v3512_v23, 0.0  ;;  %v10456_v18 = vld [vmem:[%s11504_s21 + $0x110] sm:$0xff]   ;;  %v10467_v53 = vld [vmem:[%s11504_s21 + $0x168] sm:$0xff]   ;;  %v10469_v43 = vld [vmem:[%s11504_s21 + $0x178] sm:$0xff]   ;;  %v4354_v52 = vpop.permute.xlu0 %4353 }
 0x389   : > { %v3638_v9 = vsel %vm3513_vm8, %v3510_v49, 0.0 }
 0x38a   : > { %v3630_v57 = vadd.f32 %v3629_v39, %v3628_v47  ;;  %v3639_v7 = vadd.f32 %v3638_v9, %v3637_v32  ;;  %v10468_v47 = vld [vmem:[%s11504_s21 + $0x170] sm:$0xff]   ;;  %v4359_v36 = vpop.permute.xlu1 %4358  ;;  %v3915_v32 = vld [vmem:[%s15437_s5 + $0x2c] sm:$0x8] }
 0x38c   : > { %v3631_v26 = vrot.slane %v3630_v57, 1  ;;  %v3641_v13 = vadd.f32 %v3640_v56, %v3639_v7  ;;  %v4364_v49 = vpop.permute.xlu0 %4363 }
 0x38e   : > { %v3632_v19 = vadd.f32 %v3631_v26, %v3630_v57  ;;  %v3643_v14 = vadd.f32 %v3642_v25, %v3641_v13  ;;  %v4369_v39 = vpop.permute.xlu1 %4368  ;;  %v3916_v26 = vunpack.c.l.bf16 %v3915_v32 }
 0x390   : > { %v3660_v20 = vpack.c.bf16 %v3632_v19, %v3632_v19  ;;  %v3644_v33 = vrot.slane %v3643_v14, 4  ;;  %v12814_v19 = vrot.slane %v3916_v26, %v15711_v51 }
 0x392   : > { %v3676_v58 = vunpack.c.l.b16 %v3660_v20  ;;  %v3645_v44 = vadd.f32 %v3644_v33, %v3643_v14  ;;  %v4379_v42 = vpop.permute.xlu1 %4378 }
 0x394   : > { %v3689_v29 = vsel %vm3688_vm14, %v3676_v58, %v3687_v0  ;;  %v3646_v22 = vrot.slane %v3645_v44, 2  ;;  %v4374_v0 = vpop.permute.xlu0 %4373 }
 0x396   : > { %v3647_v15 = vadd.f32 %v3646_v22, %v3645_v44  ;;  %v4389_v25 = vpop.permute.xlu1 %4388 }
 0x398   : > { %v3648_v4 = vrot.slane %v3647_v15, 1  ;;  %v4384_v9 = vpop.permute.xlu0 %4383 }
 0x39a   : > { %v3649_v46 = vadd.f32 %v3648_v4, %v3647_v15  ;;  %v4399_v15 = vpop.permute.xlu1 %4398 }
 0x39b   : > { %v12750_v3 = vpop.f32.mrb[52].mxu1 }
 0x39c   : > { %v3661_v17 = vpack.c.bf16 %v3649_v46, %v3649_v46  ;;  %v10045_v27 = vpop.f32.mrb[53].mxu1  ;;  %v4394_v14 = vpop.permute.xlu0 %4393 }
 0x39d   : > { %v3813_v54 = vpop.f32.mrb[54].mxu1 }
 0x39e   : > { %v3677_v34 = vunpack.c.l.b16 %v3661_v17  ;;  %v10046_v24 = vpop.f32.mrb[55].mxu1 }
 0x3a0   : > { %v3691_v5 = vsel %vm3690_vm15, %v3677_v34, %v3689_v29  ;;  %v12831_v34 = vpop.permute.xlu0 %4403 }
 0x3a1   : > { %v3692_v60 = vpack.c.b16 %v3691_v5, %v3691_v5 }
 0x3a3   : > { %10032 = vmatmul.mubr.msk.bf16.vlgmr.msra.gmra.mrb[48].mxu0 %vm3513_vm8, %v3692_v60 }
 0x3a4   : > { %10048 = vmatpush3.bf16.msra.mxu0 %v4114_v21  ;;  %10049 = vmatprep.mubr.msk.bf16.mxu0 %vm2006_vm1, %v10446_v6 }
 0x3a5   : > { %10147 = vmatprep.subr.bf16.mxu0 %v15500_v41 }
 0x3ab   : > { %10050 = vmatmul.mubr.msk.bf16.vlgmr.msra.gmra.mrb[52].mxu0 %vm2006_vm1, %v10447_v31  ;;  %v12846_v31 = vpop.permute.xlu1 %4408 }
 0x3ac   : > { %10053 = vmatprep.mubr.msk.bf16.mxu0 %vm2006_vm1, %v10448_v50 }
 0x3b3   : > { %10054 = vmatmul.mubr.msk.bf16.gmra.mrb[56].mxu0 %vm2006_vm1, %v10449_v40 }
 0x3b4   : > { %10057 = vmatprep.mubr.msk.bf16.mxu0 %vm2006_vm1, %v10450_v16 }
 0x3bb   : > { %10058 = vmatmul.mubr.msk.bf16.gmra.mrb[60].mxu0 %vm2006_vm1, %v10451_v45  ;;  %v12853_v45 = vpop.permute.xlu0 %4413 }
 0x3bc   : > { %10061 = vmatprep.mubr.msk.bf16.mxu0 %vm2006_vm1, %v10452_v48 }
 0x3c3   : > { %10062 = vmatmul.mubr.msk.bf16.gmra.mrb[64].mxu0 %vm2006_vm1, %v10453_v10 }
 0x3c4   : > { %10065 = vmatprep.mubr.msk.bf16.mxu0 %vm2006_vm1, %v10454_v37 }
 0x3cb   : > { %10066 = vmatmul.mubr.msk.bf16.gmra.mrb[68].mxu0 %vm2006_vm1, %v10455_v1 }
 0x3cc   : > { %10069 = vmatprep.mubr.msk.bf16.mxu0 %vm2006_vm1, %v10456_v18 }
 0x3d3   : > { %10070 = vmatmul.mubr.msk.bf16.gmra.mrb[72].mxu0 %vm2006_vm1, %v10457_v2 }
 0x3d4   : > { %10073 = vmatprep.mubr.msk.bf16.mxu0 %vm2006_vm1, %v10458_v30 }
 0x3db   : > { %10074 = vmatmul.mubr.msk.bf16.gmra.mrb[76].mxu0 %vm2006_vm1, %v10459_v12 }
 0x3dc   : > { %10077 = vmatprep.mubr.msk.bf16.mxu0 %vm2006_vm1, %v10460_v35 }
 0x3e3   : > { %10078 = vmatmul.mubr.msk.bf16.gmra.mrb[80].mxu0 %vm2006_vm1, %v10461_v38 }
 0x3e4   : > { %10081 = vmatprep.mubr.msk.bf16.mxu0 %vm2006_vm1, %v10462_v8 }
 0x3eb   : > { %10082 = vmatmul.mubr.msk.bf16.gmra.mrb[84].mxu0 %vm2006_vm1, %v10463_v61 }
 0x3ec   : > { %10085 = vmatprep.mubr.msk.bf16.mxu0 %vm2006_vm1, %v10464_v11  ;;  %v12877_v11 = vpop.permute.xlu1 %4418 }
 0x3f3   : > { %10086 = vmatmul.mubr.msk.bf16.gmra.mrb[88].mxu0 %vm2006_vm1, %v10465_v62 }
 0x3f4   : > { %10089 = vmatprep.mubr.msk.bf16.mxu0 %vm2006_vm1, %v10466_v55 }
 0x3fb   : > { %10090 = vmatmul.mubr.msk.bf16.gmra.mrb[92].mxu0 %vm2006_vm1, %v10467_v53 }
 0x3fc   : > { %10093 = vmatprep.mubr.msk.bf16.mxu0 %vm2006_vm1, %v10468_v47  ;;  %v12884_v47 = vpop.permute.xlu0 %4423 }
 0x403   : > { %10094 = vmatmul.mubr.msk.bf16.gmra.mrb[96].mxu0 %vm2006_vm1, %v10469_v43 }
 0x404   : > { %10151 = vmatprep.mubr.msk.bf16.mxu0 %vm11001_vm4, %v15500_v41 }
 0x476   : > { %v3742_v23 = vpop.f32.mrb[48].mxu0 }
 0x477   : > { %v12811_v57 = vadd.f32 %v12750_v3, %v3742_v23  ;;  %v10033_v7 = vpop.f32.mrb[49].mxu0 }
 0x478   : > { %v3745_v56 = vpop.f32.mrb[50].mxu0 }
 0x479   : > { %15760 = vst [vmem:[#allocation56_spill] sm:$0xff] %v12811_v57  ;;  %v10034_v13 = vpop.f32.mrb[51].mxu0 }
 0x47a   : > { %v12905_v13 = vpop.permute.xlu1 %4428 }
 0x47e   : > { %v10051_v20 = vpop.f32.mrb[52].mxu0 }
 0x47f   : > { %v4150_v33 = vpop.f32.mrb[53].mxu0  ;;  %v12817_v58 = vadd.f32 %v10051_v20, %v12814_v19 }
 0x480   : > { %v12820_v44 = vadd.f32 %v4150_v33, %v12814_v19  ;;  %v10052_v29 = vpop.f32.mrb[54].mxu0 }
 0x481   : > { %15761 = vst [vmem:[#allocation58_spill] sm:$0xff] %v12817_v58  ;;  %v4153_v22 = vpop.f32.mrb[55].mxu0  ;;  %v12826_v46 = vadd.f32 %v10052_v29, %v12814_v19  ;;  %v12834_v3 = vadd.f32 %v4354_v52, %v12817_v58 }
 0x482   : > { %15762 = vst [vmem:[#allocation60_spill] sm:$0xff] %v12820_v44  ;;  %v12823_v4 = vadd.f32 %v4344_v59, %v12820_v44  ;;  %v12829_v17 = vadd.f32 %v4153_v22, %v12814_v19 }
 0x483   : > { %15763 = vst [vmem:[#allocation39_spill] sm:$0xff] %v12826_v46  ;;  %v12842_v6 = vadd.f32 %v4359_v36, %v12826_v46  ;;  %v4632_v50 = vsel %vm2596_vm2, %v12834_v3, -inf }
 0x484   : > { %15764 = vst [vmem:[#allocation41_spill] sm:$0xff] %v12829_v17  ;;  %v12837_v27 = vadd.f32 %v4349_v63, %v12829_v17  ;;  %v4629_v5 = vsel %vm2596_vm2, %v12823_v4, -inf }
 0x485   : > { %v4634_v1 = vsel %vm2596_vm2, %v12842_v6, -inf }
 0x486   : > { %v4630_v54 = vsel %vm2596_vm2, %v12837_v27, -inf  ;;  %v10055_v60 = vpop.f32.mrb[56].mxu0 }
 0x487   : > { %v4631_v21 = vmax.f32 %v4629_v5, %v4630_v54  ;;  %v4166_v24 = vpop.f32.mrb[57].mxu0  ;;  %v12861_v18 = vadd.f32 %v10055_v60, %v12814_v19 }
 0x488   : > { %v12851_v40 = vadd.f32 %v4166_v24, %v12814_v19  ;;  %v10056_v16 = vpop.f32.mrb[58].mxu0 }
 0x489   : > { %v4633_v48 = vmax.f32 %v4631_v21, %v4632_v50  ;;  %v12856_v10 = vadd.f32 %v10056_v16, %v12814_v19  ;;  %v4169_v37 = vpop.f32.mrb[59].mxu0  ;;  %15767 = vst [vmem:[#allocation49_spill] sm:$0xff] %v12861_v18  ;;  %v12880_v62 = vadd.f32 %v4374_v0, %v12861_v18 }
 0x48a   : > { %15765 = vst [vmem:[#allocation43_spill] sm:$0xff] %v12851_v40  ;;  %v12864_v2 = vadd.f32 %v4364_v49, %v12851_v40  ;;  %v12867_v30 = vadd.f32 %v4169_v37, %v12814_v19 }
 0x48b   : > { %15766 = vst [vmem:[#allocation46_spill] sm:$0xff] %v12856_v10  ;;  %v4635_v12 = vmax.f32 %v4633_v48, %v4634_v1  ;;  %v12872_v38 = vadd.f32 %v4379_v42, %v12856_v10  ;;  %v4646_v32 = vsel %vm2596_vm2, %v12880_v62, -inf }
 0x48c   : > { %15768 = vst [vmem:[#allocation8_spill] sm:$0xff] %v12867_v30  ;;  %v4636_v35 = vsel %vm2596_vm2, %v12864_v2, -inf  ;;  %v12875_v8 = vadd.f32 %v4369_v39, %v12867_v30 }
 0x48d   : > { %v4637_v61 = vmax.f32 %v4635_v12, %v4636_v35  ;;  %v4647_v63 = vsel %vm2596_vm2, %v12872_v38, -inf  ;;  %v4439_v35 = vpop.permute.xlu1 %4438 }
 0x48e   : > { %v4638_v55 = vsel %vm2596_vm2, %v12875_v8, -inf  ;;  %v10059_v53 = vpop.f32.mrb[60].mxu0  ;;  %v4648_v56 = vmax.f32 %v4646_v32, %v4647_v63 }
 0x48f   : > { %v4639_v43 = vmax.f32 %v4637_v61, %v4638_v55  ;;  %v4182_v59 = vpop.f32.mrb[61].mxu0  ;;  %v12889_v52 = vadd.f32 %v10059_v53, %v12814_v19 }
 0x490   : > { %v12892_v36 = vadd.f32 %v4182_v59, %v12814_v19  ;;  %v10060_v49 = vpop.f32.mrb[62].mxu0 }
 0x491   : > { %15769 = vst [vmem:[#allocation7_spill] sm:$0xff] %v12889_v52  ;;  %v4640_v39 = vrot.slane %v4639_v43, 4  ;;  %v4185_v0 = vpop.f32.mrb[63].mxu0  ;;  %v12900_v23 = vadd.f32 %v10060_v49, %v12814_v19  ;;  %v12908_v20 = vadd.f32 %v4394_v14, %v12889_v52 }
 0x492   : > { %15770 = vst [vmem:[#allocation10_spill] sm:$0xff] %v12892_v36  ;;  %v12897_v42 = vadd.f32 %v4384_v9, %v12892_v36  ;;  %v12903_v7 = vadd.f32 %v4185_v0, %v12814_v19  ;;  %v4434_v9 = vpop.permute.xlu0 %4433 }
 0x493   : > { %15771 = vst [vmem:[#allocation9_spill] sm:$0xff] %v12900_v23  ;;  %v4641_v26 = vmax.f32 %v4639_v43, %v4640_v39  ;;  %v12916_v54 = vadd.f32 %v4399_v15, %v12900_v23  ;;  %v4653_v16 = vsel %vm2596_vm2, %v12908_v20, -inf }
 0x494   : > { %15772 = vst [vmem:[#allocation12_spill] sm:$0xff] %v12903_v7  ;;  %v4649_v33 = vsel %vm2596_vm2, %v12897_v42, -inf  ;;  %v12913_v29 = vadd.f32 %v4389_v25, %v12903_v7 }
 0x495   : > { %v4642_v22 = vrot.slane %v4641_v26, 2  ;;  %v4650_v5 = vmax.f32 %v4648_v56, %v4649_v33  ;;  %v4655_v15 = vsel %vm2596_vm2, %v12916_v54, -inf }
 0x496   : > { %v4651_v60 = vsel %vm2596_vm2, %v12913_v29, -inf  ;;  %v10063_v21 = vpop.f32.mrb[64].mxu0  ;;  %v12933_v53 = vpop.permute.xlu0 %4443 }
 0x497   : > { %v4643_v24 = vmax.f32 %v4641_v26, %v4642_v22  ;;  %v4652_v50 = vmax.f32 %v4650_v5, %v4651_v60  ;;  %v4198_v14 = vpop.f32.mrb[65].mxu0  ;;  %v12928_v61 = vadd.f32 %v10063_v21, %v12814_v19 }
 0x498   : > { %v12923_v48 = vadd.f32 %v4198_v14, %v12814_v19  ;;  %v10064_v25 = vpop.f32.mrb[66].mxu0 }
 0x499   : > { %v4644_v37 = vrot.slane %v4643_v24, 1  ;;  %v4654_v1 = vmax.f32 %v4652_v50, %v4653_v16  ;;  %v4201_v12 = vpop.f32.mrb[67].mxu0  ;;  %15774 = vst [vmem:[#allocation13_spill] sm:$0xff] %v12928_v61  ;;  %v12940_v49 = vadd.f32 %v10064_v25, %v12814_v19  ;;  %v12954_v5 = vadd.f32 %v12853_v45, %v12928_v61 }
 0x49a   : > { %15773 = vst [vmem:[#allocation11_spill] sm:$0xff] %v12923_v48  ;;  %v12931_v55 = vadd.f32 %v4201_v12, %v12814_v19  ;;  %v12937_v63 = vadd.f32 %v12831_v34, %v12923_v48  ;;  %v4454_v45 = vpop.permute.xlu0 %4453 }
 0x49b   : > { %v4645_v43 = vmax.f32 %v4643_v24, %v4644_v37  ;;  %v4656_v59 = vmax.f32 %v4654_v1, %v4655_v15  ;;  %15776 = vst [vmem:[#allocation16_spill] sm:$0xff] %v12940_v49 }
 0x49c   : > { %15775 = vst [vmem:[#allocation14_spill] sm:$0xff] %v12931_v55  ;;  %v12944_v39 = vadd.f32 %v12846_v31, %v12931_v55 }
 0x49d   : > { %v4765_v0 = vsub.f32 %v12823_v4, %v4645_v43  ;;  %v4766_v32 = vsub.f32 %v12837_v27, %v4645_v43  ;;  %v4767_v56 = vsub.f32 %v12834_v3, %v4645_v43  ;;  %v4768_v26 = vsub.f32 %v12842_v6, %v4645_v43  ;;  %v12959_v27 = vpop.permute.xlu1 %4448 }
 0x49e   : > { %v4769_v33 = vsub.f32 %v12864_v2, %v4645_v43  ;;  %v4770_v34 = vsub.f32 %v12875_v8, %v4645_v43  ;;  %v4657_v22 = vrot.slane %v4656_v59, 4  ;;  %v10067_v60 = vpop.f32.mrb[68].mxu0  ;;  %v4663_v2 = vsel %vm2596_vm2, %v12937_v63, -inf }
 0x49f   : > { %v4813_v31 = vmul.f32 1.442695, %v4765_v0  ;;  %v4815_v21 = vmul.f32 1.442695, %v4766_v32  ;;  %v4817_v24 = vmul.f32 1.442695, %v4767_v56  ;;  %v12957_v4 = vadd.f32 %v10067_v60, %v12814_v19 }
 0x4a0   : > { %v4819_v3 = vmul.f32 1.442695, %v4768_v26  ;;  %v4658_v6 = vmax.f32 %v4656_v59, %v4657_v22  ;;  %v12965_v8 = vadd.f32 %v12877_v11, %v12940_v49  ;;  %v4821_v50 = vmul.f32 1.442695, %v4769_v33  ;;  %v4214_v25 = vpop.f32.mrb[69].mxu0 }
 0x4a1   : > { %15777 = vst [vmem:[#allocation15_spill] sm:$0xff] %v12957_v4  ;;  %10636 = vpow2.f32 %v4813_v31  ;;  %v4823_v14 = vmul.f32 1.442695, %v4770_v34  ;;  %v4664_v16 = vsel %vm2596_vm2, %v12944_v39, -inf  ;;  %v12970_v12 = vadd.f32 %v4214_v25, %v12814_v19  ;;  %v10068_v15 = vpop.f32.mrb[70].mxu0  ;;  %v12992_v22 = vpop.permute.xlu1 %4458 }
 0x4a2   : > { %10638 = vpow2.f32 %v4815_v21  ;;  %v4659_v37 = vrot.slane %v4658_v6, 2  ;;  %v4665_v1 = vmax.f32 %v4663_v2, %v4664_v16  ;;  %v4666_v11 = vsel %vm2596_vm2, %v12954_v5, -inf  ;;  %v4217_v0 = vpop.f32.mrb[71].mxu0 }
 0x4a3   : > { %15778 = vst [vmem:[#allocation18_spill] sm:$0xff] %v12970_v12  ;;  %10640 = vpow2.f32 %v4817_v24  ;;  %v12975_v43 = vadd.f32 %v4434_v9, %v12957_v4  ;;  %v12978_v59 = vadd.f32 %v10068_v15, %v12814_v19  ;;  %v12982_v26 = vadd.f32 %v12884_v47, %v12970_v12  ;;  %v12996_v24 = vpop.permute.xlu0 %4463 }
 0x4a4   : > { %10642 = vpow2.f32 %v4819_v3  ;;  %v4660_v32 = vmax.f32 %v4658_v6, %v4659_v37  ;;  %v4667_v56 = vmax.f32 %v4665_v1, %v4666_v11  ;;  %v4668_v33 = vsel %vm2596_vm2, %v12965_v8, -inf }
 0x4a5   : > { %15779 = vst [vmem:[#allocation17_spill] sm:$0xff] %v12978_v59  ;;  %10644 = vpow2.f32 %v4821_v50  ;;  %v12987_v34 = vadd.f32 %v4439_v35, %v12978_v59  ;;  %v12990_v9 = vadd.f32 %v4217_v0, %v12814_v19  ;;  %v4670_v21 = vsel %vm2596_vm2, %v12982_v26, -inf }
 0x4a6   : > { %10646 = vpow2.f32 %v4823_v14  ;;  %v4661_v60 = vrot.slane %v4660_v32, 1  ;;  %v4669_v31 = vmax.f32 %v4667_v56, %v4668_v33  ;;  %v10071_v47 = vpop.f32.mrb[72].mxu0  ;;  %v4680_v14 = vsel %vm2596_vm2, %v12975_v43, -inf }
 0x4a7   : > { %15780 = vst [vmem:[#allocation20_spill] sm:$0xff] %v12990_v9  ;;  %v4681_v3 = vsel %vm2596_vm2, %v12987_v34, -inf  ;;  %v13002_v35 = vadd.f32 %v12905_v13, %v12990_v9  ;;  %v13005_v6 = vadd.f32 %v10071_v47, %v12814_v19  ;;  %v4230_v2 = vpop.f32.mrb[73].mxu0 }
 0x4a8   : > { %v4662_v50 = vmax.f32 %v4660_v32, %v4661_v60  ;;  %v4671_v16 = vmax.f32 %v4669_v31, %v4670_v21  ;;  %v13010_v25 = vadd.f32 %v4230_v2, %v12814_v19  ;;  %v10072_v37 = vpop.f32.mrb[74].mxu0  ;;  %v4682_v1 = vmax.f32 %v4680_v14, %v4681_v3  ;;  %v13027_v2 = vpop.permute.xlu1 %4468 }
 0x4a9   : > { %15781 = vst [vmem:[#allocation19_spill] sm:$0xff] %v13005_v6  ;;  %v4672_v15 = vsel %vm2596_vm2, %v13002_v35, -inf  ;;  %v4233_v11 = vpop.f32.mrb[75].mxu0  ;;  %v13023_v47 = vadd.f32 %v4454_v45, %v13005_v6 }
 0x4aa   : > { %15782 = vst [vmem:[#allocation21_spill] sm:$0xff] %v13010_v25  ;;  %v4771_v13 = vsub.f32 %v12880_v62, %v4662_v50  ;;  %v4772_v0 = vsub.f32 %v12872_v38, %v4662_v50  ;;  %v4773_v56 = vsub.f32 %v12897_v42, %v4662_v50  ;;  %v4774_v32 = vsub.f32 %v12913_v29, %v4662_v50 }
 0x4ab   : > { %v13018_v33 = vpop.eup %10636  ;;  %v4775_v60 = vsub.f32 %v12908_v20, %v4662_v50  ;;  %v4776_v31 = vsub.f32 %v12916_v54, %v4662_v50  ;;  %v4673_v21 = vmax.f32 %v4671_v16, %v4672_v15  ;;  %v13033_v29 = vadd.f32 %v12933_v53, %v13010_v25  ;;  %v4474_v54 = vpop.permute.xlu0 %4473 }
 0x4ac   : > { %v13025_v3 = vpop.eup %10638  ;;  %v4909_v38 = vsel %vm2596_vm2, %v13018_v33, 0.0  ;;  %v4825_v62 = vmul.f32 1.442695, %v4771_v13  ;;  %v4827_v42 = vmul.f32 1.442695, %v4772_v0  ;;  %v13042_v13 = vadd.f32 %v10072_v37, %v12814_v19 }
 0x4ad   : > { %v13035_v20 = vpop.eup %10640  ;;  %v4910_v45 = vsel %vm2596_vm2, %v13025_v3, 0.0  ;;  %v4829_v50 = vmul.f32 1.442695, %v4773_v56  ;;  %v4831_v14 = vmul.f32 1.442695, %v4774_v32  ;;  %v4674_v16 = vrot.slane %v4673_v21, 4 }
 0x4ae   : > { %v13039_v15 = vpop.eup %10642  ;;  %v4911_v41 = vadd.f32 %v4910_v45, %v4909_v38  ;;  %10648 = vpow2.f32 %v4825_v62  ;;  %v4833_v57 = vmul.f32 1.442695, %v4775_v60  ;;  %15783 = vst [vmem:[#allocation22_spill] sm:$0xff] %v13042_v13  ;;  %v10075_v0 = vpop.f32.mrb[76].mxu0  ;;  %v4912_v28 = vsel %vm2596_vm2, %v13035_v20, 0.0 }
 0x4af   : > { %v13044_v53 = vpop.eup %10644  ;;  %v4914_v51 = vsel %vm2596_vm2, %v13039_v15, 0.0  ;;  %10650 = vpow2.f32 %v4827_v42  ;;  %v4675_v56 = vmax.f32 %v4673_v21, %v4674_v16  ;;  %v4246_v32 = vpop.f32.mrb[77].mxu0  ;;  %v4835_v60 = vmul.f32 1.442695, %v4776_v31 }
 0x4b0   : > { %v13050_v6 = vpop.eup %10646  ;;  %v4913_v38 = vadd.f32 %v4912_v28, %v4911_v41  ;;  %10652 = vpow2.f32 %v4829_v50  ;;  %v4683_v37 = vsel %vm2596_vm2, %v13033_v29, -inf  ;;  %v10076_v62 = vpop.f32.mrb[78].mxu0  ;;  %v4916_v45 = vsel %vm2596_vm2, %v13044_v53, 0.0 }
 0x4b1   : > { %v4918_v25 = vsel %vm2596_vm2, %v13050_v6, 0.0  ;;  %10654 = vpow2.f32 %v4831_v14  ;;  %v4676_v9 = vrot.slane %v4675_v56, 2  ;;  %v4249_v42 = vpop.f32.mrb[79].mxu0  ;;  %v4479_v21 = vpop.permute.xlu1 %4478  ;;  %v13058_v59 = vmax.f32 %v4682_v1, %v4683_v37 }
 0x4b2   : > { %v4915_v16 = vadd.f32 %v4914_v51, %v4913_v38  ;;  %10656 = vpow2.f32 %v4833_v57  ;;  %v13061_v41 = vadd.f32 %v4233_v11, %v12814_v19  ;;  %v13063_v28 = vpop.permute.xlu0 %4483  ;;  %v13067_v50 = vadd.f32 %v12992_v22, %v13042_v13 }
 0x4b3   : > { %v4677_v31 = vmax.f32 %v4675_v56, %v4676_v9  ;;  %v13070_v12 = vadd.f32 %v10075_v0, %v12814_v19  ;;  %v13073_v14 = vadd.f32 %v4246_v32, %v12814_v19  ;;  %10658 = vpow2.f32 %v4835_v60 }
 0x4b4   : > { %15784 = vst [vmem:[#allocation23_spill] sm:$0xff] %v13061_v41  ;;  %v4917_v51 = vadd.f32 %v4916_v45, %v4915_v16  ;;  %v13077_v57 = vadd.f32 %v12959_v27, %v13061_v41  ;;  %v13080_v1 = vadd.f32 %v10076_v62, %v12814_v19  ;;  %v13090_v0 = vadd.f32 %v4249_v42, %v12814_v19 }
 0x4b5   : > { %15785 = vst [vmem:[#allocation24_spill] sm:$0xff] %v13070_v12  ;;  %15786 = vst [vmem:[#allocation25_spill] sm:$0xff] %v13073_v14  ;;  %v4678_v9 = vrot.slane %v4677_v31, 1  ;;  %v13083_v11 = vadd.f32 %v4474_v54, %v13070_v12  ;;  %v13087_v22 = vadd.f32 %v12996_v24, %v13073_v14  ;;  %v4687_v32 = vsel %vm2596_vm2, %v13023_v47, -inf  ;;  %v13108_v42 = vpop.permute.xlu1 %4488 }
 0x4b6   : > { %15787 = vst [vmem:[#allocation26_spill] sm:$0xff] %v13080_v1  ;;  %15788 = vst [vmem:[#allocation27_spill] sm:$0xff] %v13090_v0  ;;  %v4919_v56 = vadd.f32 %v4918_v25, %v4917_v51  ;;  %v4685_v27 = vsel %vm2596_vm2, %v13077_v57, -inf  ;;  %v13097_v38 = vadd.f32 %v4479_v21, %v13080_v1  ;;  %v10079_v60 = vpop.f32.mrb[80].mxu0  ;;  %v4689_v37 = vsel %vm2596_vm2, %v13067_v50, -inf }
 0x4b7   : > { %v4679_v54 = vmax.f32 %v4677_v31, %v4678_v9  ;;  %v4686_v24 = vmax.f32 %v13058_v59, %v4685_v27  ;;  %v13104_v62 = vsel %vm2596_vm2, %v13083_v11, -inf  ;;  %v4262_v25 = vpop.f32.mrb[81].mxu0  ;;  %v4697_v21 = vsel %vm2596_vm2, %v13087_v22, -inf  ;;  %v4494_v27 = vpop.permute.xlu0 %4493 }
 0x4b8   : > { %v13106_v45 = vpop.eup %10648  ;;  %v4920_v16 = vrot.slane %v4919_v56, 4  ;;  %v13114_v31 = vsel %vm2596_vm2, %v13097_v38, -inf  ;;  %v13118_v59 = vadd.f32 %v13027_v2, %v13090_v0  ;;  %v10080_v51 = vpop.f32.mrb[82].mxu0 }
 0x4b9   : > { %v13120_v9 = vpop.eup %10650  ;;  %v4926_v1 = vsel %vm2596_vm2, %v13106_v45, 0.0  ;;  %v4777_v12 = vsub.f32 %v12937_v63, %v4679_v54  ;;  %v4778_v14 = vsub.f32 %v12944_v39, %v4679_v54  ;;  %v4779_v13 = vsub.f32 %v12954_v5, %v4679_v54  ;;  %v4265_v41 = vpop.f32.mrb[83].mxu0 }
 0x4ba   : > { %v13127_v4 = vpop.eup %10652  ;;  %v4921_v49 = vadd.f32 %v4920_v16, %v4919_v56  ;;  %v4927_v2 = vsel %vm2596_vm2, %v13120_v9, 0.0  ;;  %v4780_v0 = vsub.f32 %v12965_v8, %v4679_v54  ;;  %v4781_v55 = vsub.f32 %v12982_v26, %v4679_v54 }
 0x4bb   : > { %v13133_v61 = vpop.eup %10654  ;;  %v4928_v48 = vadd.f32 %v4927_v2, %v4926_v1  ;;  %v4782_v63 = vsub.f32 %v13002_v35, %v4679_v54  ;;  %v4837_v23 = vmul.f32 1.442695, %v4777_v12  ;;  %v13137_v39 = vadd.f32 %v10079_v60, %v12814_v19  ;;  %v4499_v12 = vpop.permute.xlu1 %4498 }
 0x4bc   : > { %v13139_v5 = vpop.eup %10656  ;;  %v4922_v7 = vrot.slane %v4921_v49, 2  ;;  %v4929_v56 = vsel %vm2596_vm2, %v13127_v4, 0.0  ;;  %v4839_v16 = vmul.f32 1.442695, %v4778_v14  ;;  %v4841_v52 = vmul.f32 1.442695, %v4779_v13  ;;  %v4504_v30 = vpop.permute.xlu0 %4503 }
 0x4bd   : > { %15789 = vst [vmem:[#allocation28_spill] sm:$0xff] %v13137_v39  ;;  %v4930_v8 = vadd.f32 %v4929_v56, %v4928_v48  ;;  %v4931_v26 = vsel %vm2596_vm2, %v13133_v61, 0.0  ;;  %10660 = vpow2.f32 %v4837_v23  ;;  %v4843_v1 = vmul.f32 1.442695, %v4780_v0  ;;  %v13145_v2 = vpop.eup %10658 }
 0x4be   : > { %v4923_v35 = vadd.f32 %v4922_v7, %v4921_v49  ;;  %v4933_v60 = vsel %vm2596_vm2, %v13139_v5, 0.0  ;;  %10662 = vpow2.f32 %v4839_v16  ;;  %v4845_v54 = vmul.f32 1.442695, %v4781_v55  ;;  %v10083_v36 = vpop.f32.mrb[84].mxu0 }
 0x4bf   : > { %v4932_v10 = vadd.f32 %v4931_v26, %v4930_v8  ;;  %10664 = vpow2.f32 %v4841_v52  ;;  %v4847_v13 = vmul.f32 1.442695, %v4782_v63  ;;  %v4688_v48 = vmax.f32 %v4686_v24, %v4687_v32  ;;  %v4278_v14 = vpop.f32.mrb[85].mxu0 }
 0x4c0   : > { %v4924_v56 = vrot.slane %v4923_v35, 1  ;;  %10666 = vpow2.f32 %v4843_v1  ;;  %v4698_v23 = vsel %vm2596_vm2, %v13118_v59, -inf  ;;  %v13152_v0 = vadd.f32 %v4494_v27, %v13137_v39  ;;  %v10084_v7 = vpop.f32.mrb[86].mxu0 }
 0x4c1   : > { %v4934_v49 = vadd.f32 %v4933_v60, %v4932_v10  ;;  %10668 = vpow2.f32 %v4845_v54  ;;  %v4690_v16 = vmax.f32 %v4688_v48, %v4689_v37  ;;  %v4699_v55 = vmax.f32 %v4697_v21, %v4698_v23  ;;  %v13154_v40 = vpop.f32.mrb[87].mxu0  ;;  %v13165_v10 = vpop.permute.xlu1 %4508 }
 0x4c2   : > { %v4925_v8 = vadd.f32 %v4924_v56, %v4923_v35  ;;  %v4935_v52 = vsel %vm2596_vm2, %v13145_v2, 0.0  ;;  %10670 = vpow2.f32 %v4847_v13  ;;  %v13159_v32 = vadd.f32 %v4262_v25, %v12814_v19  ;;  %v4514_v35 = vpop.permute.xlu0 %4513 }
 0x4c3   : > { %v4936_v24 = vadd.f32 %v4935_v52, %v4934_v49  ;;  %v4691_v63 = vrot.slane %v4690_v16, 4  ;;  %v4701_v27 = vmax.f32 %v4699_v55, %v13104_v62  ;;  %v13163_v26 = vadd.f32 %v10080_v51, %v12814_v19 }
 0x4c4   : > { %15790 = vst [vmem:[#allocation30_spill] sm:$0xff] %v13159_v32  ;;  %v4714_v37 = vsel %vm2596_vm2, %v13152_v0, -inf  ;;  %v13171_v21 = vadd.f32 %v13063_v28, %v13159_v32  ;;  %v13174_v1 = vadd.f32 %v4265_v41, %v12814_v19  ;;  %v13177_v25 = vadd.f32 %v10083_v36, %v12814_v19 }
 0x4c5   : > { %15791 = vst [vmem:[#allocation29_spill] sm:$0xff] %v13163_v26  ;;  %v4937_v62 = vrot.slane %v4936_v24, 4  ;;  %v4692_v60 = vmax.f32 %v4690_v16, %v4691_v63  ;;  %v4703_v51 = vmax.f32 %v4701_v27, %v13114_v31  ;;  %v13181_v54 = vadd.f32 %v4499_v12, %v13163_v26 }
 0x4c6   : > { %15792 = vst [vmem:[#allocation32_spill] sm:$0xff] %v13174_v1  ;;  %15793 = vst [vmem:[#allocation31_spill] sm:$0xff] %v13177_v25  ;;  %v4704_v13 = vsel %vm2596_vm2, %v13171_v21, -inf  ;;  %v13187_v28 = vadd.f32 %v13108_v42, %v13174_v1  ;;  %v13190_v41 = vadd.f32 %v4514_v35, %v13177_v25  ;;  %v13193_v36 = vadd.f32 %v4278_v14, %v12814_v19  ;;  %v13195_v48 = vpop.f32.mrb[88].mxu0  ;;  %v4524_v46 = vpop.permute.xlu0 %4523 }
 0x4c7   : > { %v13197_v56 = vpop.eup %10660  ;;  %v4938_v31 = vadd.f32 %v4937_v62, %v4936_v24  ;;  %v4693_v12 = vrot.slane %v4692_v60, 2  ;;  %v4705_v23 = vmax.f32 %v4703_v51, %v4704_v13  ;;  %v4715_v49 = vsel %vm2596_vm2, %v13181_v54, -inf  ;;  %v13201_v16 = vpop.f32.mrb[89].mxu0 }
 0x4c8   : > { %15794 = vst [vmem:[#allocation34_spill] sm:$0xff] %v13193_v36  ;;  %15795 = vst [vmem:[#allocation33_spill] sm:$0xff] %v13197_v56  ;;  %v13203_v42 = vpop.eup %10662  ;;  %10672 = vrcp.f32 %v4925_v8  ;;  %v4943_v55 = vsel %vm2596_vm2, %v13197_v56, 0.0  ;;  %v4716_v14 = vmax.f32 %v4714_v37, %v4715_v49  ;;  %v4706_v52 = vsel %vm2596_vm2, %v13187_v28, -inf  ;;  %v10088_v63 = vpop.f32.mrb[90].mxu0 }
 0x4c9   : > { %15796 = vst [vmem:[#allocation35_spill] sm:$0xff] %v13203_v42  ;;  %v13209_v27 = vpop.eup %10664  ;;  %v4939_v24 = vrot.slane %v4938_v31, 2  ;;  %v4944_v35 = vsel %vm2596_vm2, %v13203_v42, 0.0  ;;  %v4694_v62 = vmax.f32 %v4692_v60, %v4693_v12  ;;  %v4707_v51 = vmax.f32 %v4705_v23, %v4706_v52  ;;  %v13213_v13 = vpop.f32.mrb[91].mxu0 }
 0x4ca   : > { %v13215_v25 = vpop.eup %10666  ;;  %v4519_v8 = vpop.permute.xlu1 %4518  ;;  %v4945_v1 = vadd.f32 %v4944_v35, %v4943_v55  ;;  %v13219_v37 = vsel %vm2596_vm2, %v13190_v41, -inf  ;;  %v13222_v49 = vadd.f32 %v4504_v30, %v13193_v36  ;;  %v13225_v26 = vadd.f32 %v10084_v7, %v12814_v19 }
 0x4cb   : > { %v13227_v32 = vpop.eup %10668  ;;  %v4940_v60 = vadd.f32 %v4939_v24, %v4938_v31  ;;  %v4946_v12 = vsel %vm2596_vm2, %v13209_v27, 0.0  ;;  %v4695_v23 = vrot.slane %v4694_v62, 1  ;;  %v4708_v52 = vrot.slane %v4707_v51, 4 }
 0x4cc   : > { %15797 = vst [vmem:[#allocation36_spill] sm:$0xff] %v13225_v26  ;;  %15798 = vst [vmem:[#allocation37_spill] sm:$0xff] %v13227_v32  ;;  %v13231_v39 = vpop.eup %10670  ;;  %v4947_v55 = vadd.f32 %v4946_v12, %v4945_v1  ;;  %v4948_v35 = vsel %vm2596_vm2, %v13215_v25, 0.0  ;;  %v4950_v30 = vsel %vm2596_vm2, %v13227_v32, 0.0  ;;  %v4717_v7 = vsel %vm2596_vm2, %v13222_v49, -inf }
 0x4cd   : > { %15799 = vst [vmem:[#allocation38_spill] sm:$0xff] %v13231_v39  ;;  %v4941_v36 = vrot.slane %v4940_v60, 1  ;;  %v4952_v31 = vsel %vm2596_vm2, %v13231_v39, 0.0  ;;  %v4696_v24 = vmax.f32 %v4694_v62, %v4695_v23  ;;  %v13242_v18 = vadd.f32 %v4519_v8, %v13225_v26 }
 0x4ce   : > { %v4949_v17 = vadd.f32 %v4948_v35, %v4947_v55  ;;  %v4709_v1 = vmax.f32 %v4707_v51, %v4708_v52  ;;  %v4718_v12 = vmax.f32 %v4716_v14, %v4717_v7  ;;  %v13246_v58 = vadd.f32 %v13154_v40, %v12814_v19  ;;  %v10091_v44 = vpop.f32.mrb[92].mxu0  ;;  %v13251_v23 = vpop.permute.xlu1 %4528 }
 0x4cf   : > { %v4942_v32 = vadd.f32 %v4941_v36, %v4940_v60  ;;  %v4783_v42 = vsub.f32 %v12975_v43, %v4696_v24  ;;  %v4784_v56 = vsub.f32 %v12987_v34, %v4696_v24  ;;  %v4785_v39 = vsub.f32 %v13033_v29, %v4696_v24  ;;  %v4310_v62 = vpop.f32.mrb[93].mxu0 }
 0x4d0   : > { %15800 = vst [vmem:[#allocation40_spill] sm:$0xff] %v13246_v58  ;;  %v4951_v8 = vadd.f32 %v4950_v30, %v4949_v17  ;;  %v4786_v55 = vsub.f32 %v13077_v57, %v4696_v24  ;;  %v4787_v14 = vsub.f32 %v13023_v47, %v4696_v24  ;;  %v4788_v51 = vsub.f32 %v13067_v50, %v4696_v24  ;;  %v13256_v40 = vpop.f32.mrb[94].mxu0 }
 0x4d1   : > { %10674 = vrcp.f32 %v4942_v32  ;;  %v4849_v36 = vmul.f32 1.442695, %v4783_v42  ;;  %v4851_v60 = vmul.f32 1.442695, %v4784_v56  ;;  %v4853_v43 = vmul.f32 1.442695, %v4785_v39  ;;  %v4534_v32 = vpop.permute.xlu0 %4533 }
 0x4d2   : > { %v13258_v52 = vpop.eup %10672  ;;  %v4953_v34 = vadd.f32 %v4952_v31, %v4951_v8  ;;  %v4855_v29 = vmul.f32 1.442695, %v4786_v55  ;;  %v4857_v35 = vmul.f32 1.442695, %v4787_v14  ;;  %v4859_v7 = vmul.f32 1.442695, %v4788_v51  ;;  %v4539_v31 = vpop.permute.xlu1 %4538 }
 0x4d3   : > { %10676 = vpow2.f32 %v4849_v36  ;;  %v4710_v17 = vrot.slane %v4709_v1, 2  ;;  %v13262_v57 = vadd.f32 %v13165_v10, %v13246_v58  ;;  %v13266_v47 = vadd.f32 %v13195_v48, %v12814_v19  ;;  %v13268_v50 = vpop.f32.mrb[95].mxu0 }
 0x4d4   : > { %v4954_v39 = vrot.slane %v4953_v34, 4  ;;  %10678 = vpow2.f32 %v4851_v60  ;;  %v13272_v56 = vadd.f32 %v13201_v16, %v12814_v19  ;;  %v13275_v42 = vadd.f32 %v10088_v63, %v12814_v19 }
 0x4d5   : > { %15801 = vst [vmem:[#allocation42_spill] sm:$0xff] %v13266_v47  ;;  %10680 = vpow2.f32 %v4853_v43  ;;  %v4711_v30 = vmax.f32 %v4709_v1, %v4710_v17  ;;  %v4719_v10 = vsel %vm2596_vm2, %v13262_v57, -inf  ;;  %v13280_v48 = vadd.f32 %v4534_v32, %v13266_v47 }
 0x4d6   : > { %15802 = vst [vmem:[#allocation45_spill] sm:$0xff] %v13272_v56  ;;  %15803 = vst [vmem:[#allocation44_spill] sm:$0xff] %v13275_v42  ;;  %v4955_v24 = vadd.f32 %v4954_v39, %v4953_v34  ;;  %10682 = vpow2.f32 %v4855_v29  ;;  %v4720_v8 = vmax.f32 %v4718_v12, %v4719_v10  ;;  %v13283_v55 = vadd.f32 %v4524_v46, %v13272_v56  ;;  %v13285_v16 = vpop.f32.mrb[96].mxu0  ;;  %v4544_v10 = vpop.permute.xlu0 %4543 }
 0x4d7   : > { %10684 = vpow2.f32 %v4857_v35  ;;  %v4712_v63 = vrot.slane %v4711_v30, 1  ;;  %v4723_v1 = vsel %vm2596_vm2, %v13242_v18, -inf  ;;  %v13290_v14 = vadd.f32 %v4539_v31, %v13275_v42  ;;  %v13292_v51 = vpop.f32.mrb[97].mxu0 }
 0x4d8   : > { %v4956_v36 = vrot.slane %v4955_v24, 2  ;;  %10686 = vpow2.f32 %v4859_v7  ;;  %v4722_v60 = vmax.f32 %v4720_v8, %v13219_v37  ;;  %v4734_v46 = vsel %vm2596_vm2, %v13280_v48, -inf  ;;  %v13297_v12 = vpop.f32.mrb[98].mxu0 }
 0x4d9   : > { %v4713_v43 = vmax.f32 %v4711_v30, %v4712_v63  ;;  %v4731_v34 = vsel %vm2596_vm2, %v13283_v55, -inf  ;;  %v13303_v29 = vsel %vm2596_vm2, %v13290_v14, -inf  ;;  %v13307_v35 = vadd.f32 %v13213_v13, %v12814_v19  ;;  %v13309_v7 = vpop.f32.mrb[99].mxu0 }
 0x4da   : > { %v4957_v37 = vadd.f32 %v4956_v36, %v4955_v24  ;;  %v4724_v17 = vmax.f32 %v4722_v60, %v4723_v1  ;;  %v13312_v32 = vadd.f32 %v10091_v44, %v12814_v19  ;;  %v13315_v39 = vadd.f32 %v4310_v62, %v12814_v19 }
 0x4db   : > { %15804 = vst [vmem:[#allocation47_spill] sm:$0xff] %v13307_v35  ;;  %v13317_v30 = vpop.eup %10674  ;;  %v4789_v31 = vsub.f32 %v13087_v22, %v4713_v43  ;;  %v4790_v8 = vsub.f32 %v13118_v59, %v4713_v43  ;;  %v4791_v13 = vsub.f32 %v13083_v11, %v4713_v43  ;;  %v4792_v63 = vsub.f32 %v13097_v38, %v4713_v43  ;;  %v4549_v38 = vpop.permute.xlu1 %4548 }
 0x4dc   : > { %15805 = vst [vmem:[#allocation48_spill] sm:$0xff] %v13315_v39  ;;  %v4958_v42 = vrot.slane %v4957_v37, 1  ;;  %v4793_v24 = vsub.f32 %v13171_v21, %v4713_v43  ;;  %v4794_v44 = vsub.f32 %v13187_v28, %v4713_v43  ;;  %v4725_v1 = vrot.slane %v4724_v17, 4 }
 0x4dd   : > { %v13325_v36 = vpop.eup %10676  ;;  %v4861_v62 = vmul.f32 1.442695, %v4789_v31  ;;  %v4863_v60 = vmul.f32 1.442695, %v4790_v8  ;;  %v13329_v47 = vadd.f32 %v13251_v23, %v13307_v35  ;;  %v13333_v22 = vadd.f32 %v13256_v40, %v12814_v19 }
 0x4de   : > { %v13335_v11 = vpop.eup %10678  ;;  %v4959_v59 = vadd.f32 %v4958_v42, %v4957_v37  ;;  %v4960_v21 = vsel %vm2596_vm2, %v13325_v36, 0.0  ;;  %v4865_v28 = vmul.f32 1.442695, %v4791_v13  ;;  %v4867_v43 = vmul.f32 1.442695, %v4792_v63  ;;  %v4554_v13 = vpop.permute.xlu0 %4553 }
 0x4df   : > { %15806 = vst [vmem:[#allocation50_spill] sm:$0xff] %v13333_v22  ;;  %15807 = vst [vmem:[#allocation51_spill] sm:$0xff] %v13335_v11  ;;  %v13339_v56 = vpop.eup %10680  ;;  %v4961_v31 = vsel %vm2596_vm2, %v13335_v11, 0.0  ;;  %10688 = vpow2.f32 %v4861_v62  ;;  %v4869_v23 = vmul.f32 1.442695, %v4793_v24  ;;  %v4726_v8 = vmax.f32 %v4724_v17, %v4725_v1 }
 0x4e0   : > { %v13343_v35 = vpop.eup %10682  ;;  %10690 = vrcp.f32 %v4959_v59  ;;  %v4962_v40 = vadd.f32 %v4961_v31, %v4960_v21  ;;  %v4871_v26 = vmul.f32 1.442695, %v4794_v44  ;;  %v4732_v42 = vsel %vm2596_vm2, %v13329_v47, -inf  ;;  %v4559_v31 = vpop.permute.xlu1 %4558 }
 0x4e1   : > { %v13347_v37 = vpop.eup %10684  ;;  %v4963_v63 = vsel %vm2596_vm2, %v13339_v56, 0.0  ;;  %10692 = vpow2.f32 %v4863_v60  ;;  %v4727_v58 = vrot.slane %v4726_v8, 2  ;;  %v4733_v11 = vmax.f32 %v4731_v34, %v4732_v42 }
 0x4e2   : > { %v13351_v62 = vpop.eup %10686  ;;  %v4964_v17 = vadd.f32 %v4963_v63, %v4962_v40  ;;  %v4965_v24 = vsel %vm2596_vm2, %v13343_v35, 0.0  ;;  %10694 = vpow2.f32 %v4865_v28  ;;  %v13356_v44 = vadd.f32 %v4554_v13, %v13312_v32 }
 0x4e3   : > { %v4967_v1 = vsel %vm2596_vm2, %v13347_v37, 0.0  ;;  %10696 = vpow2.f32 %v4867_v43  ;;  %v4728_v59 = vmax.f32 %v4726_v8, %v4727_v58  ;;  %v4735_v21 = vmax.f32 %v4733_v11, %v4734_v46 }
 0x4e4   : > { %v4966_v60 = vadd.f32 %v4965_v24, %v4964_v17  ;;  %v4969_v34 = vsel %vm2596_vm2, %v13351_v62, 0.0  ;;  %10698 = vpow2.f32 %v4869_v23  ;;  %v13363_v40 = vadd.f32 %v4544_v10, %v13315_v39 }
 0x4e5   : > { %10700 = vpow2.f32 %v4871_v26  ;;  %v4729_v28 = vrot.slane %v4728_v59, 1  ;;  %v4737_v42 = vmax.f32 %v4735_v21, %v13303_v29  ;;  %v13367_v13 = vadd.f32 %v4559_v31, %v13333_v22 }
 0x4e6   : > { %v4968_v63 = vadd.f32 %v4967_v1, %v4966_v60  ;;  %v13371_v58 = vsel %vm2596_vm2, %v13356_v44, -inf  ;;  %v4738_v46 = vsel %vm2596_vm2, %v13363_v40, -inf  ;;  %v13377_v11 = vadd.f32 %v13268_v50, %v12814_v19 }
 0x4e7   : > { %v4730_v10 = vmax.f32 %v4728_v59, %v4729_v28  ;;  %v4739_v26 = vmax.f32 %v4737_v42, %v4738_v46  ;;  %v5048_v29 = vmul.f32 %v13258_v52, %v13035_v20  ;;  %v5049_v43 = vmul.f32 %v13258_v52, %v13039_v15 }
 0x4e8   : > { %15808 = vst [vmem:[#allocation52_spill] sm:$0xff] %v13377_v11  ;;  %v4970_v23 = vadd.f32 %v4969_v34, %v4968_v63  ;;  %v13385_v8 = vsel %vm2596_vm2, %v13367_v13, -inf  ;;  %v13388_v17 = vadd.f32 %v4549_v38, %v13377_v11  ;;  %v5046_v50 = vmul.f32 %v13258_v52, %v13018_v33 }
 0x4e9   : > { %v13392_v24 = vpop.eup %10688  ;;  %v4795_v1 = vsub.f32 %v13152_v0, %v4730_v10  ;;  %v4796_v20 = vsub.f32 %v13181_v54, %v4730_v10  ;;  %v4797_v59 = vsub.f32 %v13222_v49, %v4730_v10  ;;  %v4798_v15 = vsub.f32 %v13262_v57, %v4730_v10  ;;  %v4564_v49 = vpop.permute.xlu0 %4563 }
 0x4ea   : > { %v13398_v21 = vpop.eup %10690  ;;  %v4971_v31 = vrot.slane %v4970_v23, 4  ;;  %v4977_v38 = vsel %vm2596_vm2, %v13392_v24, 0.0  ;;  %v4799_v60 = vsub.f32 %v13190_v41, %v4730_v10  ;;  %v4800_v33 = vsub.f32 %v13242_v18, %v4730_v10 }
 0x4eb   : > { %v13404_v34 = vpop.eup %10692  ;;  %v4873_v28 = vmul.f32 1.442695, %v4795_v1  ;;  %v4875_v0 = vmul.f32 1.442695, %v4796_v20  ;;  %v4877_v42 = vmul.f32 1.442695, %v4797_v59  ;;  %v5102_v54 = vpack.c.bf16 %v5049_v43, %v5048_v29  ;;  %v4569_v59 = vpop.permute.xlu1 %4568 }
 0x4ec   : > { %v13406_v63 = vpop.eup %10694  ;;  %v4972_v57 = vadd.f32 %v4971_v31, %v4970_v23  ;;  %v4978_v46 = vsel %vm2596_vm2, %v13404_v34, 0.0  ;;  %v4879_v11 = vmul.f32 1.442695, %v4798_v15  ;;  %v4881_v22 = vmul.f32 1.442695, %v4799_v60 }
 0x4ed   : > { %v13410_v39 = vpop.eup %10696  ;;  %v4979_v41 = vadd.f32 %v4978_v46, %v4977_v38  ;;  %v4980_v18 = vsel %vm2596_vm2, %v13406_v63, 0.0  ;;  %10702 = vpow2.f32 %v4873_v28  ;;  %v4883_v10 = vmul.f32 1.442695, %v4800_v33  ;;  %5151 = vrot.lane.b32.xlu1 %v5102_v54, %s10999_s18 }
 0x4ee   : > { %v13415_v29 = vpop.eup %10698  ;;  %v4973_v43 = vrot.slane %v4972_v57, 2  ;;  %v4982_v23 = vsel %vm2596_vm2, %v13410_v39, 0.0  ;;  %10704 = vpow2.f32 %v4875_v0  ;;  %v4740_v1 = vsel %vm2596_vm2, %v13388_v17, -inf }
 0x4ef   : > { %v13421_v20 = vpop.eup %10700  ;;  %v4981_v15 = vadd.f32 %v4980_v18, %v4979_v41  ;;  %v4984_v31 = vsel %vm2596_vm2, %v13415_v29, 0.0  ;;  %10706 = vpow2.f32 %v4877_v42  ;;  %v4741_v38 = vmax.f32 %v4739_v26, %v4740_v1  ;;  %v4574_v41 = vpop.permute.xlu0 %4573 }
 0x4f0   : > { %v4974_v60 = vadd.f32 %v4973_v43, %v4972_v57  ;;  %v4986_v33 = vsel %vm2596_vm2, %v13421_v20, 0.0  ;;  %10708 = vpow2.f32 %v4879_v11  ;;  %v5047_v28 = vmul.f32 %v13258_v52, %v13025_v3 }
 0x4f1   : > { %v4983_v0 = vadd.f32 %v4982_v23, %v4981_v15  ;;  %10710 = vpow2.f32 %v4881_v22  ;;  %v4742_v54 = vrot.slane %v4741_v38, 4  ;;  %v13431_v46 = vadd.f32 %v13285_v16, %v12814_v19 }
 0x4f2   : > { %v4975_v18 = vrot.slane %v4974_v60, 1  ;;  %10712 = vpow2.f32 %v4883_v10  ;;  %v5101_v42 = vpack.c.bf16 %v5047_v28, %v5046_v50  ;;  %v5050_v26 = vmul.f32 %v13258_v52, %v13044_v53  ;;  %v4579_v10 = vpop.permute.xlu1 %4578 }
 0x4f3   : > { %v4985_v57 = vadd.f32 %v4984_v31, %v4983_v0  ;;  %v4743_v43 = vmax.f32 %v4741_v38, %v4742_v54  ;;  %v13436_v11 = vadd.f32 %v4574_v41, %v13431_v46  ;;  %v5051_v3 = vmul.f32 %v13258_v52, %v13050_v6 }
 0x4f4   : > { %v4976_v22 = vadd.f32 %v4975_v18, %v4974_v60  ;;  %5149 = vrot.lane.b32.xlu0 %v5101_v42, %s10999_s18  ;;  %v13443_v16 = vadd.f32 %v13292_v51, %v12814_v19  ;;  %v13447_v50 = vadd.f32 %v13297_v12, %v12814_v19  ;;  %v13451_v53 = vadd.f32 %v13309_v7, %v12814_v19 }
 0x4f5   : > { %v4987_v23 = vadd.f32 %v4986_v33, %v4985_v57  ;;  %v4750_v6 = vmax.f32 %v13371_v58, %v13385_v8  ;;  %v4744_v52 = vrot.slane %v4743_v43, 2  ;;  %v4755_v1 = vsel %vm2596_vm2, %v13436_v11, -inf }
 0x4f6   : > { %v5103_v15 = vpack.c.bf16 %v5051_v3, %v5050_v26  ;;  %v13458_v51 = vadd.f32 %v4564_v49, %v13443_v16  ;;  %v13461_v12 = vadd.f32 %v4579_v10, %v13447_v50  ;;  %v13464_v31 = vadd.f32 %v4569_v59, %v13451_v53 }
 0x4f7   : > { %v13466_v19 = vpop.eup %10702  ;;  %v4988_v7 = vrot.slane %v4987_v23, 4  ;;  %v4745_v38 = vmax.f32 %v4743_v43, %v4744_v52  ;;  %v5055_v58 = vmul.f32 %v13317_v30, %v13127_v4  ;;  %v5056_v8 = vmul.f32 %v13317_v30, %v13133_v61 }
 0x4f8   : > { %v13472_v60 = vpop.eup %10704  ;;  %10714 = vrcp.f32 %v4976_v22  ;;  %v4994_v49 = vsel %vm2596_vm2, %v13466_v19, 0.0  ;;  %5153 = vrot.lane.b32.xlu0 %v5103_v15, %s10999_s18  ;;  %v4751_v59 = vsel %vm2596_vm2, %v13458_v51, -inf  ;;  %v4753_v33 = vsel %vm2596_vm2, %v13464_v31, -inf }
 0x4f9   : > { %v13481_v28 = vpop.eup %10706  ;;  %v4989_v4 = vadd.f32 %v4988_v7, %v4987_v23  ;;  %v4995_v61 = vsel %vm2596_vm2, %v13472_v60, 0.0  ;;  %v4746_v0 = vrot.slane %v4745_v38, 1  ;;  %v4752_v54 = vmax.f32 %v4750_v6, %v4751_v59 }
 0x4fa   : > { %v13485_v41 = vpop.eup %10708  ;;  %v4996_v18 = vadd.f32 %v4995_v61, %v4994_v49  ;;  %v4997_v42 = vsel %vm2596_vm2, %v13481_v28, 0.0  ;;  %v4757_v26 = vsel %vm2596_vm2, %v13461_v12, -inf  ;;  %v5105_v57 = vpack.c.bf16 %v5056_v8, %v5055_v58 }
 0x4fb   : > { %v13491_v43 = vpop.eup %10710  ;;  %v4990_v3 = vrot.slane %v4989_v4, 2  ;;  %v4999_v22 = vsel %vm2596_vm2, %v13485_v41, 0.0  ;;  %v4747_v10 = vmax.f32 %v4745_v38, %v4746_v0  ;;  %v5053_v23 = vmul.f32 %v13317_v30, %v13106_v45 }
 0x4fc   : > { %v13497_v6 = vpop.eup %10712  ;;  %v4998_v52 = vadd.f32 %v4997_v42, %v4996_v18  ;;  %v5001_v15 = vsel %vm2596_vm2, %v13491_v43, 0.0  ;;  %v4754_v7 = vmax.f32 %v4752_v54, %v4753_v33  ;;  %5157 = vrot.lane.b32.xlu0 %v5105_v57, %s10999_s18  ;;  %v5054_v58 = vmul.f32 %v13317_v30, %v13120_v9 }
 0x4fd   : > { %v4991_v8 = vadd.f32 %v4990_v3, %v4989_v4  ;;  %v4801_v49 = vsub.f32 %v13283_v55, %v4747_v10  ;;  %v4802_v38 = vsub.f32 %v13329_v47, %v4747_v10  ;;  %v5057_v45 = vmul.f32 %v13317_v30, %v13139_v5 }
 0x4fe   : > { %v5000_v59 = vadd.f32 %v4999_v22, %v4998_v52  ;;  %v4803_v61 = vsub.f32 %v13280_v48, %v4747_v10  ;;  %v4804_v0 = vsub.f32 %v13290_v14, %v4747_v10  ;;  %v4805_v33 = vsub.f32 %v13363_v40, %v4747_v10 }
 0x4ff   : > { %v4992_v54 = vrot.slane %v4991_v8, 1  ;;  %v4806_v18 = vsub.f32 %v13388_v17, %v4747_v10  ;;  %v4885_v42 = vmul.f32 1.442695, %v4801_v49  ;;  %v4887_v9 = vmul.f32 1.442695, %v4802_v38 }
 0x500   : > { %v5002_v4 = vadd.f32 %v5001_v15, %v5000_v59  ;;  %v5003_v55 = vsel %vm2596_vm2, %v13497_v6, 0.0  ;;  %v4889_v47 = vmul.f32 1.442695, %v4803_v61  ;;  %v4891_v57 = vmul.f32 1.442695, %v4804_v0  ;;  %v15811_v59 = vld [vmem:[#allocation37_spill] sm:$0xff] }
 0x501   : > { %v4993_v3 = vadd.f32 %v4992_v54, %v4991_v8  ;;  %10716 = vpow2.f32 %v4885_v42  ;;  %v4893_v5 = vmul.f32 1.442695, %v4805_v33  ;;  %v4756_v22 = vmax.f32 %v4754_v7, %v4755_v1  ;;  %v15809_v7 = vld [vmem:[#allocation33_spill] sm:$0xff]  ;;  %v15812_v0 = vld [vmem:[#allocation38_spill] sm:$0xff]  ;;  %v13534_v42 = vld [vmem:[%s15437_s5 + $0x30] sm:$0x7] }
 0x502   : > { %v10715_v48 = vpop.eup %10714  ;;  %v5004_v52 = vadd.f32 %v5003_v55, %v5002_v4  ;;  %10718 = vpow2.f32 %v4887_v9  ;;  %v5104_v14 = vpack.c.bf16 %v5054_v58, %v5053_v23  ;;  %v5058_v40 = vmul.f32 %v13317_v30, %v13145_v2  ;;  %v15810_v58 = vld [vmem:[#allocation35_spill] sm:$0xff]  ;;  %10375 = vmatprep.subr.msk.bf16.mxu1 %vm6017_vm3, %v13534_v42 }
 0x503   : > { %10720 = vrcp.f32 %v4993_v3  ;;  %v4895_v17 = vmul.f32 1.442695, %v4806_v18  ;;  %v4758_v10 = vmax.f32 %v4756_v22, %v4757_v26  ;;  %v5062_v15 = vmul.f32 %v13398_v21, %v13209_v27 }
 0x504   : > { %v5005_v49 = vrot.slane %v5004_v52, 4  ;;  %10722 = vpow2.f32 %v4889_v47  ;;  %5155 = vrot.lane.b32.xlu1 %v5104_v14, %s10999_s18  ;;  %v5063_v1 = vmul.f32 %v13398_v21, %v13215_v25  ;;  %v5060_v8 = vmul.f32 %v13398_v21, %v15809_v7 }
 0x505   : > { %10724 = vpow2.f32 %v4891_v57  ;;  %v4759_v23 = vrot.slane %v4758_v10, 4  ;;  %v5061_v2 = vmul.f32 %v13398_v21, %v15810_v58  ;;  %v5106_v26 = vpack.c.bf16 %v5058_v40, %v5057_v45 }
 0x506   : > { %v5006_v30 = vadd.f32 %v5005_v49, %v5004_v52  ;;  %10726 = vpow2.f32 %v4893_v5  ;;  %v5064_v61 = vmul.f32 %v13398_v21, %v15811_v59  ;;  %v5065_v33 = vmul.f32 %v13398_v21, %v15812_v0  ;;  %v15813_v21 = vld [vmem:[#allocation51_spill] sm:$0xff] }
 0x507   : > { %v4760_v38 = vmax.f32 %v4758_v10, %v4759_v23  ;;  %v5107_v27 = vpack.c.bf16 %v5061_v2, %v5060_v8  ;;  %10728 = vpow2.f32 %v4895_v17  ;;  %v5108_v54 = vpack.c.bf16 %v5063_v1, %v5062_v15 }
 0x508   : > { %v5007_v25 = vrot.slane %v5006_v30, 2  ;;  %5159 = vrot.lane.b32.xlu1 %v5106_v26, %s10999_s18  ;;  %v5067_v18 = vmul.f32 %v10715_v48, %v13325_v36  ;;  %v5069_v9 = vmul.f32 %v10715_v48, %v13339_v56  ;;  %v5070_v4 = vmul.f32 %v10715_v48, %v13343_v35 }
 0x509   : > { %v4761_v45 = vrot.slane %v4760_v38, 2  ;;  %5161 = vrot.lane.b32.xlu0 %v5107_v27, %s10999_s18  ;;  %v5068_v55 = vmul.f32 %v10715_v48, %v15813_v21  ;;  %v5071_v57 = vmul.f32 %v10715_v48, %v13347_v37  ;;  %v5072_v3 = vmul.f32 %v10715_v48, %v13351_v62 }
 0x50a   : > { %v5008_v47 = vadd.f32 %v5007_v25, %v5006_v30  ;;  %v5109_v22 = vpack.c.bf16 %v5065_v33, %v5064_v61  ;;  %v5111_v40 = vpack.c.bf16 %v5070_v4, %v5069_v9 }
 0x50b   : > { %v13542_v36 = vpop.eup %10716  ;;  %v4762_v5 = vmax.f32 %v4760_v38, %v4761_v45  ;;  %v5110_v14 = vpack.c.bf16 %v5068_v55, %v5067_v18  ;;  %v5112_v49 = vpack.c.bf16 %v5072_v3, %v5071_v57 }
 0x50c   : > { %v13546_v52 = vpop.eup %10718  ;;  %v5009_v56 = vrot.slane %v5008_v47, 1  ;;  %v5011_v35 = vsel %vm2596_vm2, %v13542_v36, 0.0  ;;  %5163 = vrot.lane.b32.xlu1 %v5108_v54, %s10999_s18 }
 0x50d   : > { %v10721_v37 = vpop.eup %10720  ;;  %v5012_v62 = vsel %vm2596_vm2, %v13546_v52, 0.0  ;;  %v4763_v48 = vrot.slane %v4762_v5, 1  ;;  %5165 = vrot.lane.b32.xlu0 %v5109_v22, %s10999_s18 }
 0x50e   : > { %v13554_v17 = vpop.eup %10722  ;;  %v5010_v10 = vadd.f32 %v5009_v56, %v5008_v47  ;;  %v5013_v15 = vadd.f32 %v5012_v62, %v5011_v35  ;;  %v5076_v23 = vmul.f32 %v10721_v37, %v13406_v63  ;;  %v5077_v58 = vmul.f32 %v10721_v37, %v13410_v39 }
 0x50f   : > { %v13556_v1 = vpop.eup %10724  ;;  %v5014_v7 = vsel %vm2596_vm2, %v13554_v17, 0.0  ;;  %v4764_v8 = vmax.f32 %v4762_v5, %v4763_v48  ;;  %v5074_v26 = vmul.f32 %v10721_v37, %v13392_v24  ;;  %v5075_v38 = vmul.f32 %v10721_v37, %v13404_v34 }
 0x510   : > { %v13562_v2 = vpop.eup %10726  ;;  %10730 = vrcp.f32 %v5010_v10  ;;  %v5015_v30 = vadd.f32 %v5014_v7, %v5013_v15  ;;  %5167 = vrot.lane.b32.xlu1 %v5110_v14, %s10999_s18  ;;  %v5016_v27 = vsel %vm2596_vm2, %v13556_v1, 0.0  ;;  %v5078_v21 = vmul.f32 %v10721_v37, %v13415_v29 }
 0x511   : > { %v4807_v59 = vsub.f32 %v13356_v44, %v4764_v8  ;;  %v4808_v61 = vsub.f32 %v13367_v13, %v4764_v8  ;;  %v4809_v63 = vsub.f32 %v13458_v51, %v4764_v8  ;;  %5169 = vrot.lane.b32.xlu0 %v5111_v40, %s10999_s18  ;;  %v13573_v39 = vpop.eup %10728  ;;  %v5018_v33 = vsel %vm2596_vm2, %v13562_v2, 0.0 }
 0x512   : > { %v5017_v0 = vadd.f32 %v5016_v27, %v5015_v30  ;;  %v4810_v24 = vsub.f32 %v13464_v31, %v4764_v8  ;;  %v4811_v34 = vsub.f32 %v13436_v11, %v4764_v8  ;;  %v5114_v44 = vpack.c.bf16 %v5077_v58, %v5076_v23 }
 0x513   : > { %v4897_v25 = vmul.f32 1.442695, %v4807_v59  ;;  %v4899_v54 = vmul.f32 1.442695, %v4808_v61  ;;  %v4901_v18 = vmul.f32 1.442695, %v4809_v63  ;;  %v4812_v13 = vsub.f32 %v13461_v12, %v4764_v8 }
 0x514   : > { %v5019_v45 = vadd.f32 %v5018_v33, %v5017_v0  ;;  %v4903_v51 = vmul.f32 1.442695, %v4810_v24  ;;  %5171 = vrot.lane.b32.xlu1 %v5112_v49, %s10999_s18  ;;  %v5113_v9 = vpack.c.bf16 %v5075_v38, %v5074_v26  ;;  %v5020_v4 = vsel %vm2596_vm2, %v13573_v39, 0.0 }
 0x515   : > { %10732 = vpow2.f32 %v4897_v25  ;;  %v5079_v31 = vmul.f32 %v10721_v37, %v13421_v20  ;;  %v4905_v55 = vmul.f32 1.442695, %v4811_v34  ;;  %v4907_v12 = vmul.f32 1.442695, %v4812_v13 }
 0x516   : > { %v5021_v11 = vadd.f32 %v5020_v4, %v5019_v45  ;;  %10734 = vpow2.f32 %v4899_v54  ;;  %5173 = vrot.lane.b32.xlu0 %v5113_v9, %s10999_s18 }
 0x517   : > { %10736 = vpow2.f32 %v4901_v18  ;;  %v5115_v57 = vpack.c.bf16 %v5079_v31, %v5078_v21 }
 0x518   : > { %v5022_v47 = vrot.slane %v5021_v11, 4  ;;  %10738 = vpow2.f32 %v4903_v51  ;;  %5175 = vrot.lane.b32.xlu1 %v5114_v44, %s10999_s18 }
 0x519   : > { %10740 = vpow2.f32 %v4905_v55 }
 0x51a   : > { %v10731_v3 = vpop.eup %10730  ;;  %v5023_v5 = vadd.f32 %v5022_v47, %v5021_v11  ;;  %5177 = vrot.lane.b32.xlu0 %v5115_v57, %s10999_s18  ;;  %10742 = vpow2.f32 %v4907_v12 }
 0x51b   : > { %v5083_v29 = vmul.f32 %v10731_v3, %v13481_v28  ;;  %v5084_v20 = vmul.f32 %v10731_v3, %v13485_v41  ;;  %v5081_v22 = vmul.f32 %v10731_v3, %v13466_v19  ;;  %v5082_v56 = vmul.f32 %v10731_v3, %v13472_v60 }
 0x51c   : > { %v5024_v35 = vrot.slane %v5023_v5, 2  ;;  %v5085_v62 = vmul.f32 %v10731_v3, %v13491_v43  ;;  %v5086_v48 = vmul.f32 %v10731_v3, %v13497_v6 }
 0x51d   : > { %v5117_v14 = vpack.c.bf16 %v5084_v20, %v5083_v29  ;;  %v5116_v37 = vpack.c.bf16 %v5082_v56, %v5081_v22  ;;  %v6019_v29 = vsel %vm6017_vm3, %v13534_v42, 0  ;;  %v15814_v22 = vmov 0.0  }
 0x51e   : > { %v5025_v40 = vadd.f32 %v5024_v35, %v5023_v5  ;;  %v5118_v49 = vpack.c.bf16 %v5086_v48, %v5085_v62 }
 0x51f   : > { %v10733_v10 = vpop.eup %10732  ;;  %5181 = vrot.lane.b32.xlu0 %v5117_v14, %s10999_s18  ;;  %5179 = vrot.lane.b32.xlu1 %v5116_v37, %s10999_s18 }
 0x520   : > { %v10735_v28 = vpop.eup %10734  ;;  %v5026_v41 = vrot.slane %v5025_v40, 1  ;;  %v5028_v19 = vsel %vm2596_vm2, %v10733_v10, 0.0 }
 0x521   : > { %v10737_v15 = vpop.eup %10736  ;;  %v5029_v60 = vsel %vm2596_vm2, %v10735_v28, 0.0 }
 0x522   : > { %v10739_v7 = vpop.eup %10738  ;;  %v5027_v8 = vadd.f32 %v5026_v41, %v5025_v40  ;;  %v5030_v23 = vadd.f32 %v5029_v60, %v5028_v19  ;;  %v5031_v43 = vsel %vm2596_vm2, %v10737_v15, 0.0 }
 0x523   : > { %5183 = vrot.lane.b32.xlu1 %v5118_v49, %s10999_s18  ;;  %v10741_v6 = vpop.eup %10740  ;;  %v5033_v30 = vsel %vm2596_vm2, %v10739_v7, 0.0 }
 0x524   : > { %10744 = vrcp.f32 %v5027_v8  ;;  %v5032_v58 = vadd.f32 %v5031_v43, %v5030_v23  ;;  %v10743_v26 = vpop.eup %10742  ;;  %v5035_v27 = vsel %vm2596_vm2, %v10741_v6, 0.0 }
 0x525   : > { %v5037_v61 = vsel %vm2596_vm2, %v10743_v26, 0.0 }
 0x526   : > { %v5034_v38 = vadd.f32 %v5033_v30, %v5032_v58  ;;  %v10470_v58 = vld [vmem:[%s11568_s15] sm:$0xff]  }
 0x528   : > { %v5036_v59 = vadd.f32 %v5035_v27, %v5034_v38  ;;  %v10472_v38 = vld [vmem:[%s11568_s15 + $0x10] sm:$0xff]   ;;  %v10473_v27 = vld [vmem:[%s11568_s15 + $0x18] sm:$0xff]  }
 0x52a   : > { %v5038_v63 = vadd.f32 %v5037_v61, %v5036_v59  ;;  %v10474_v59 = vld [vmem:[%s11568_s15 + $0x20] sm:$0xff]   ;;  %v10475_v61 = vld [vmem:[%s11568_s15 + $0x28] sm:$0xff]  }
 0x52c   : > { %v5039_v0 = vrot.slane %v5038_v63, 4 }
 0x52e   : > { %v10745_v33 = vpop.eup %10744  ;;  %v5040_v24 = vadd.f32 %v5039_v0, %v5038_v63  ;;  %v10476_v63 = vld [vmem:[%s11568_s15 + $0x30] sm:$0xff]   ;;  %v10477_v0 = vld [vmem:[%s11568_s15 + $0x38] sm:$0xff]  }
 0x52f   : > { %v5090_v34 = vmul.f32 %v10745_v33, %v13554_v17  ;;  %v5091_v25 = vmul.f32 %v10745_v33, %v13556_v1  ;;  %v5088_v54 = vmul.f32 %v10745_v33, %v13542_v36  ;;  %v5089_v18 = vmul.f32 %v10745_v33, %v13546_v52 }
 0x530   : > { %v5041_v44 = vrot.slane %v5040_v24, 2  ;;  %v5092_v51 = vmul.f32 %v10745_v33, %v13562_v2  ;;  %v5093_v9 = vmul.f32 %v10745_v33, %v13573_v39  ;;  %v10478_v33 = vld [vmem:[%s11568_s15 + $0x40] sm:$0xff]  }
 0x531   : > { %v5120_v45 = vpack.c.bf16 %v5091_v25, %v5090_v34  ;;  %v5119_v13 = vpack.c.bf16 %v5089_v18, %v5088_v54  ;;  %v10480_v34 = vld [vmem:[%s11568_s15 + $0x50] sm:$0xff]   ;;  %v10481_v25 = vld [vmem:[%s11568_s15 + $0x58] sm:$0xff]   ;;  %v10482_v54 = vld [vmem:[%s11568_s15 + $0x60] sm:$0xff]  }
 0x532   : > { %v5042_v4 = vadd.f32 %v5041_v44, %v5040_v24  ;;  %v5121_v17 = vpack.c.bf16 %v5093_v9, %v5092_v51  ;;  %v10479_v24 = vld [vmem:[%s11568_s15 + $0x48] sm:$0xff]   ;;  %v10484_v44 = vld [vmem:[%s11568_s15 + $0x70] sm:$0xff]  }
 0x533   : > { %5187 = vrot.lane.b32.xlu1 %v5120_v45, %s10999_s18  ;;  %5185 = vrot.lane.b32.xlu0 %v5119_v13, %s10999_s18  ;;  %v10483_v18 = vld [vmem:[%s11568_s15 + $0x68] sm:$0xff]   ;;  %v10485_v45 = vld [vmem:[%s11568_s15 + $0x78] sm:$0xff]  }
 0x534   : > { %v5043_v21 = vrot.slane %v5042_v4, 1  ;;  %v10486_v13 = vld [vmem:[%s11568_s15 + $0x80] sm:$0xff]   ;;  %v10487_v51 = vld [vmem:[%s11568_s15 + $0x88] sm:$0xff]   ;;  %v10488_v9 = vld [vmem:[%s11568_s15 + $0x90] sm:$0xff]  }
 0x536   : > { %v5044_v31 = vadd.f32 %v5043_v21, %v5042_v4  ;;  %v10489_v4 = vld [vmem:[%s11568_s15 + $0x98] sm:$0xff]   ;;  %v10490_v21 = vld [vmem:[%s11568_s15 + $0xa0] sm:$0xff]  }
 0x537   : > { %5189 = vrot.lane.b32.xlu0 %v5121_v17, %s10999_s18  ;;  %v10491_v17 = vld [vmem:[%s11568_s15 + $0xa8] sm:$0xff]  }
 0x538   : > { %10746 = vrcp.f32 %v5044_v31  ;;  %v10492_v31 = vld [vmem:[%s11568_s15 + $0xb0] sm:$0xff]  }
 0x542   : > { %v10747_v36 = vpop.eup %10746 }
 0x543   : > { %v5097_v52 = vmul.f32 %v10747_v36, %v10737_v15  ;;  %v5098_v1 = vmul.f32 %v10747_v36, %v10739_v7  ;;  %v5095_v11 = vmul.f32 %v10747_v36, %v10733_v10  ;;  %v5096_v55 = vmul.f32 %v10747_v36, %v10735_v28 }
 0x544   : > { %v5099_v12 = vmul.f32 %v10747_v36, %v10741_v6  ;;  %v5100_v39 = vmul.f32 %v10747_v36, %v10743_v26  ;;  %v10471_v26 = vld [vmem:[%s11568_s15 + $0x8] sm:$0xff]   ;;  %v10493_v36 = vld [vmem:[%s11568_s15 + $0xb8] sm:$0xff]  }
 0x545   : > { %v5123_v47 = vpack.c.bf16 %v5098_v1, %v5097_v52  ;;  %v5122_v2 = vpack.c.bf16 %v5096_v55, %v5095_v11  ;;  %v10494_v52 = vld [vmem:[%s15437_s5 + $0x4c] sm:$0xff]   ;;  %v10495_v55 = vld [vmem:[%s15437_s5 + $0x54] sm:$0xff]  }
 0x546   : > { %v5124_v57 = vpack.c.bf16 %v5100_v39, %v5099_v12  ;;  %10148 = vmatpush3.bf16.msra.mxu0 %v10494_v52 }
 0x547   : > { %5193 = vrot.lane.b32.xlu0 %v5123_v47, %s10999_s18  ;;  %5191 = vrot.lane.b32.xlu1 %v5122_v2, %s10999_s18  ;;  %v15815_v47 = vld [vmem:[#allocation60_spill] sm:$0xff] }
 0x548   : > { %10149 = vmatprep.subr.bf16.mxu0 %v15814_v22 }
 0x54a   : > { %10150 = vmatpush3.bf16.msra.mxu0 %v10495_v55 }
 0x54b   : > { %5195 = vrot.lane.b32.xlu1 %v5124_v57, %s10999_s18  ;;  %v15816_v57 = vld [vmem:[#allocation58_spill] sm:$0xff] }
 0x55f   : > { %v5152_v3 = vpop.permute.xlu1 %5151 }
 0x566   : > { %v5150_v5 = vpop.permute.xlu0 %5149 }
 0x567   : > { %10099 = vmatprep.mubr.msk.bf16.mxu1 %vm2006_vm1, %v5150_v5  ;;  %v15817_v5 = vld [vmem:[#allocation41_spill] sm:$0xff] }
 0x568   : > { %10100 = vmatmul.mubr.msk.bf16.vlgmr.msra.gmra.mrb[56].mxu1 %vm2006_vm1, %v5152_v3 }
 0x569   : > { %10156 = vmatpush3.bf16.msra.mxu1 %v6019_v29 }
 0x56a   : > { %v5154_v20 = vpop.permute.xlu0 %5153  ;;  %10255 = vmatprep.subr.bf16.mxu1 %v15814_v22 }
 0x56b   : > { %10103 = vmatprep.mubr.msk.bf16.mxu1 %vm2006_vm1, %v5154_v20  ;;  %v10972_v20 = vld [vmem:[%s15437_s5 + $0x38] sm:$0x3] }
 0x56c   : > { %10376 = vmatprep.subr.msk.bf16.mxu0 %vm2079_vm0, %v10972_v20 }
 0x56e   : > { %v5158_v56 = vpop.permute.xlu0 %5157 }
 0x576   : > { %v5156_v35 = vpop.permute.xlu1 %5155 }
 0x577   : > { %10104 = vmatmul.mubr.msk.bf16.gmra.mrb[60].mxu1 %vm2006_vm1, %v5156_v35  ;;  %v15818_v35 = vld [vmem:[#allocation39_spill] sm:$0xff] }
 0x578   : > { %10107 = vmatprep.mubr.msk.bf16.mxu1 %vm2006_vm1, %v5158_v56 }
 0x57a   : > { %v5160_v37 = vpop.permute.xlu1 %5159 }
 0x57b   : > { %v5162_v14 = vpop.permute.xlu0 %5161 }
 0x57e   : > { %v5164_v62 = vpop.permute.xlu1 %5163 }
 0x57f   : > { %10108 = vmatmul.mubr.msk.bf16.gmra.mrb[64].mxu1 %vm2006_vm1, %v5160_v37  ;;  %v5166_v42 = vpop.permute.xlu0 %5165 }
 0x580   : > { %10111 = vmatprep.mubr.msk.bf16.mxu1 %vm2006_vm1, %v5162_v14 }
 0x582   : > { %v5168_v48 = vpop.permute.xlu1 %5167 }
 0x583   : > { %v5170_v40 = vpop.permute.xlu0 %5169 }
 0x586   : > { %v5172_v28 = vpop.permute.xlu1 %5171 }
 0x587   : > { %10112 = vmatmul.mubr.msk.bf16.gmra.mrb[68].mxu1 %vm2006_vm1, %v5164_v62 }
 0x588   : > { %10115 = vmatprep.mubr.msk.bf16.mxu1 %vm2006_vm1, %v5166_v42  ;;  %v5174_v10 = vpop.permute.xlu0 %5173 }
 0x58a   : > { %v5176_v19 = vpop.permute.xlu1 %5175 }
 0x58c   : > { %v5178_v41 = vpop.permute.xlu0 %5177 }
 0x58f   : > { %10116 = vmatmul.mubr.msk.bf16.gmra.mrb[72].mxu1 %vm2006_vm1, %v5168_v48 }
 0x590   : > { %10119 = vmatprep.mubr.msk.bf16.mxu1 %vm2006_vm1, %v5170_v40 }
 0x591   : > { %v5180_v15 = vpop.permute.xlu1 %5179  ;;  %v5182_v60 = vpop.permute.xlu0 %5181 }
 0x595   : > { %v5184_v7 = vpop.permute.xlu1 %5183 }
 0x597   : > { %10120 = vmatmul.mubr.msk.bf16.gmra.mrb[76].mxu1 %vm2006_vm1, %v5172_v28 }
 0x598   : > { %10123 = vmatprep.mubr.msk.bf16.mxu1 %vm2006_vm1, %v5174_v10 }
 0x59f   : > { %10124 = vmatmul.mubr.msk.bf16.gmra.mrb[80].mxu1 %vm2006_vm1, %v5176_v19 }
 0x5a0   : > { %10127 = vmatprep.mubr.msk.bf16.mxu1 %vm2006_vm1, %v5178_v41  ;;  %v15819_v41 = vld [vmem:[#allocation49_spill] sm:$0xff] }
 0x5a5   : > { %v5186_v49 = vpop.permute.xlu0 %5185  ;;  %v5188_v23 = vpop.permute.xlu1 %5187 }
 0x5a7   : > { %10128 = vmatmul.mubr.msk.bf16.gmra.mrb[84].mxu1 %vm2006_vm1, %v5180_v15 }
 0x5a8   : > { %10131 = vmatprep.mubr.msk.bf16.mxu1 %vm2006_vm1, %v5182_v60  ;;  %v15820_v60 = vld [vmem:[#allocation43_spill] sm:$0xff] }
 0x5a9   : > { %v5190_v8 = vpop.permute.xlu0 %5189 }
 0x5af   : > { %10132 = vmatmul.mubr.msk.bf16.gmra.mrb[88].mxu1 %vm2006_vm1, %v5184_v7 }
 0x5b0   : > { %10135 = vmatprep.mubr.msk.bf16.mxu1 %vm2006_vm1, %v5186_v49 }
 0x5b7   : > { %10136 = vmatmul.mubr.msk.bf16.gmra.mrb[92].mxu1 %vm2006_vm1, %v5188_v23 }
 0x5b8   : > { %10139 = vmatprep.mubr.msk.bf16.mxu1 %vm2006_vm1, %v5190_v8  ;;  %v15821_v8 = vld [vmem:[#allocation46_spill] sm:$0xff] }
 0x5b9   : > { %v5192_v43 = vpop.permute.xlu1 %5191  ;;  %v5194_v6 = vpop.permute.xlu0 %5193 }
 0x5bd   : > { %v5196_v30 = vpop.permute.xlu1 %5195 }
 0x5bf   : > { %10140 = vmatmul.mubr.msk.bf16.gmra.mrb[96].mxu1 %vm2006_vm1, %v5192_v43 }
 0x5c0   : > { %10143 = vmatprep.mubr.msk.bf16.mxu1 %vm2006_vm1, %v5194_v6 }
 0x5c7   : > { %10144 = vmatmul.mubr.msk.bf16.gmra.mrb[100].mxu1 %vm2006_vm1, %v5196_v30 }
 0x5c8   : > { %10157 = vmatprep.mubr.msk.bf16.mxu1 %vm1596_vm5, %v10470_v58  ;;  %v15822_v58 = vld [vmem:[#allocation8_spill] sm:$0xff] }
 0x5cf   : > { %10158 = vmatmul.mubr.msk.bf16.vlgmr.msra.gmra.mrb[104].mxu1 %vm1596_vm5, %v10471_v26 }
 0x5d0   : > { %10161 = vmatprep.mubr.msk.bf16.mxu1 %vm1596_vm5, %v10472_v38 }
 0x5d7   : > { %10162 = vmatmul.mubr.msk.bf16.gmra.mrb[108].mxu1 %vm1596_vm5, %v10473_v27 }
 0x5d8   : > { %10165 = vmatprep.mubr.msk.bf16.mxu1 %vm1596_vm5, %v10474_v59 }
 0x5df   : > { %10166 = vmatmul.mubr.msk.bf16.gmra.mrb[112].mxu1 %vm1596_vm5, %v10475_v61 }
 0x5e0   : > { %10169 = vmatprep.mubr.msk.bf16.mxu1 %vm1596_vm5, %v10476_v63 }
 0x5e7   : > { %10170 = vmatmul.mubr.msk.bf16.gmra.mrb[116].mxu1 %vm1596_vm5, %v10477_v0 }
 0x5e8   : > { %10173 = vmatprep.mubr.msk.bf16.mxu1 %vm1596_vm5, %v10478_v33 }
 0x5ef   : > { %10174 = vmatmul.mubr.msk.bf16.gmra.mrb[120].mxu1 %vm1596_vm5, %v10479_v24 }
 0x5f0   : > { %10177 = vmatprep.mubr.msk.bf16.mxu1 %vm1596_vm5, %v10480_v34  ;;  %v15823_v34 = vld [vmem:[#allocation10_spill] sm:$0xff] }
 0x5f7   : > { %10178 = vmatmul.mubr.msk.bf16.gmra.mrb[124].mxu1 %vm1596_vm5, %v10481_v25 }
 0x5f8   : > { %10181 = vmatprep.mubr.msk.bf16.mxu1 %vm1596_vm5, %v10482_v54 }
 0x5ff   : > { %10182 = vmatmul.mubr.msk.bf16.gmra.mrb[128].mxu1 %vm1596_vm5, %v10483_v18 }
 0x600   : > { %10185 = vmatprep.mubr.msk.bf16.mxu1 %vm1596_vm5, %v10484_v44 }
 0x607   : > { %10186 = vmatmul.mubr.msk.bf16.gmra.mrb[132].mxu1 %vm1596_vm5, %v10485_v45  ;;  %v15824_v45 = vld [vmem:[#allocation7_spill] sm:$0xff] }
 0x608   : > { %10189 = vmatprep.mubr.msk.bf16.mxu1 %vm1596_vm5, %v10486_v13 }
 0x60f   : > { %10190 = vmatmul.mubr.msk.bf16.gmra.mrb[136].mxu1 %vm1596_vm5, %v10487_v51 }
 0x610   : > { %10193 = vmatprep.mubr.msk.bf16.mxu1 %vm1596_vm5, %v10488_v9  ;;  %v15825_v9 = vld [vmem:[#allocation12_spill] sm:$0xff] }
 0x617   : > { %10194 = vmatmul.mubr.msk.bf16.gmra.mrb[140].mxu1 %vm1596_vm5, %v10489_v4 }
 0x618   : > { %10197 = vmatprep.mubr.msk.bf16.mxu1 %vm1596_vm5, %v10490_v21 }
 0x61f   : > { %10198 = vmatmul.mubr.msk.bf16.gmra.mrb[144].mxu1 %vm1596_vm5, %v10491_v17  ;;  %v15826_v17 = vld [vmem:[#allocation9_spill] sm:$0xff] }
 0x620   : > { %10201 = vmatprep.mubr.msk.bf16.mxu1 %vm1596_vm5, %v10492_v31 }
 0x627   : > { %10202 = vmatmul.mubr.msk.bf16.gmra.mrb[148].mxu1 %vm1596_vm5, %v10493_v36 }
 0x628   : > { %10259 = vmatprep.mubr.msk.bf16.mxu1 %vm11001_vm4, %v15814_v22 }
 0x63b   : > { %v10101_v1 = vpop.f32.mrb[56].mxu1 }
 0x63c   : > { %v5303_v11 = vpop.f32.mrb[57].mxu1  ;;  %v5496_v3 = vmul.f32 %v10101_v1, %v15816_v57 }
 0x63d   : > { %v5494_v2 = vmul.f32 %v5303_v11, %v15815_v47  ;;  %v10102_v12 = vpop.f32.mrb[58].mxu1 }
 0x63e   : > { %v5306_v39 = vpop.f32.mrb[59].mxu1  ;;  %v5497_v14 = vmul.f32 %v10102_v12, %v15818_v35  ;;  %v5545_v62 = vsel %vm3513_vm8, %v5496_v3, 0.0 }
 0x63f   : > { %v5495_v29 = vmul.f32 %v5306_v39, %v15817_v5  ;;  %v5542_v56 = vsel %vm3513_vm8, %v5494_v2, 0.0  ;;  %v15827_v39 = vld [vmem:[#allocation11_spill] sm:$0xff] }
 0x640   : > { %v5547_v40 = vsel %vm3513_vm8, %v5497_v14, 0.0  ;;  %v15829_v14 = vld [vmem:[#allocation14_spill] sm:$0xff] }
 0x641   : > { %v5543_v37 = vsel %vm3513_vm8, %v5495_v29, 0.0 }
 0x642   : > { %v5544_v42 = vadd.f32 %v5543_v37, %v5542_v56  ;;  %v15828_v56 = vld [vmem:[#allocation13_spill] sm:$0xff] }
 0x644   : > { %v5546_v48 = vadd.f32 %v5545_v62, %v5544_v42 }
 0x646   : > { %v5548_v10 = vadd.f32 %v5547_v40, %v5546_v48  ;;  %v15830_v48 = vld [vmem:[#allocation16_spill] sm:$0xff] }
 0x64a   : > { %v10105_v28 = vpop.f32.mrb[60].mxu1 }
 0x64b   : > { %v5500_v19 = vmul.f32 %v10105_v28, %v15819_v41  ;;  %v5319_v15 = vpop.f32.mrb[61].mxu1 }
 0x64c   : > { %v5498_v49 = vmul.f32 %v5319_v15, %v15820_v60  ;;  %v10106_v7 = vpop.f32.mrb[62].mxu1 }
 0x64d   : > { %v5501_v23 = vmul.f32 %v10106_v7, %v15821_v8  ;;  %v5322_v43 = vpop.f32.mrb[63].mxu1  ;;  %v5559_v26 = vsel %vm3513_vm8, %v5500_v19, 0.0  ;;  %v15831_v8 = vld [vmem:[#allocation15_spill] sm:$0xff] }
 0x64e   : > { %v5549_v6 = vsel %vm3513_vm8, %v5498_v49, 0.0  ;;  %v5499_v30 = vmul.f32 %v5322_v43, %v15822_v58  ;;  %v15832_v58 = vld [vmem:[#allocation18_spill] sm:$0xff] }
 0x64f   : > { %v5550_v38 = vadd.f32 %v5549_v6, %v5548_v10  ;;  %v5560_v27 = vsel %vm3513_vm8, %v5501_v23, 0.0 }
 0x650   : > { %v5561_v59 = vadd.f32 %v5560_v27, %v5559_v26  ;;  %v5551_v61 = vsel %vm3513_vm8, %v5499_v30, 0.0 }
 0x651   : > { %v5552_v63 = vadd.f32 %v5551_v61, %v5550_v38  ;;  %v15833_v61 = vld [vmem:[#allocation17_spill] sm:$0xff] }
 0x652   : > { %v10109_v0 = vpop.f32.mrb[64].mxu1 }
 0x653   : > { %v5553_v33 = vrot.slane %v5552_v63, 4  ;;  %v5335_v24 = vpop.f32.mrb[65].mxu1  ;;  %v5504_v13 = vmul.f32 %v10109_v0, %v15824_v45 }
 0x654   : > { %v5502_v25 = vmul.f32 %v5335_v24, %v15823_v34  ;;  %v10110_v54 = vpop.f32.mrb[66].mxu1  ;;  %v15834_v24 = vld [vmem:[#allocation20_spill] sm:$0xff] }
 0x655   : > { %v5554_v18 = vadd.f32 %v5553_v33, %v5552_v63  ;;  %v5338_v44 = vpop.f32.mrb[67].mxu1  ;;  %v5505_v31 = vmul.f32 %v10110_v54, %v15826_v17  ;;  %v5566_v11 = vsel %vm3513_vm8, %v5504_v13, 0.0 }
 0x656   : > { %v5562_v51 = vsel %vm3513_vm8, %v5502_v25, 0.0  ;;  %v5503_v4 = vmul.f32 %v5338_v44, %v15825_v9 }
 0x657   : > { %v5563_v21 = vadd.f32 %v5562_v51, %v5561_v59  ;;  %v5555_v52 = vrot.slane %v5554_v18, 2  ;;  %v5568_v12 = vsel %vm3513_vm8, %v5505_v31, 0.0 }
 0x658   : > { %v5564_v36 = vsel %vm3513_vm8, %v5503_v4, 0.0 }
 0x659   : > { %v5565_v1 = vadd.f32 %v5564_v36, %v5563_v21  ;;  %v5556_v5 = vadd.f32 %v5555_v52, %v5554_v18  ;;  %v15835_v52 = vld [vmem:[#allocation21_spill] sm:$0xff] }
 0x65a   : > { %v10113_v55 = vpop.f32.mrb[68].mxu1 }
 0x65b   : > { %v5567_v47 = vadd.f32 %v5566_v11, %v5565_v1  ;;  %v5351_v2 = vpop.f32.mrb[69].mxu1  ;;  %v5508_v35 = vmul.f32 %v10113_v55, %v15828_v56  ;;  %v5557_v28 = vrot.slane %v5556_v5, 1 }
 0x65c   : > { %v5506_v57 = vmul.f32 %v5351_v2, %v15827_v39  ;;  %v10114_v3 = vpop.f32.mrb[70].mxu1  ;;  %v15836_v39 = vld [vmem:[#allocation19_spill] sm:$0xff] }
 0x65d   : > { %v5569_v29 = vadd.f32 %v5568_v12, %v5567_v47  ;;  %v5354_v20 = vpop.f32.mrb[71].mxu1  ;;  %v5509_v40 = vmul.f32 %v10114_v3, %v15830_v48  ;;  %v5579_v15 = vsel %vm3513_vm8, %v5508_v35, 0.0  ;;  %v5558_v38 = vadd.f32 %v5557_v28, %v5556_v5  ;;  %v15837_v5 = vld [vmem:[#allocation23_spill] sm:$0xff] }
 0x65e   : > { %v5507_v37 = vmul.f32 %v5354_v20, %v15829_v14  ;;  %v5576_v62 = vsel %vm3513_vm8, %v5506_v57, 0.0  ;;  %v15838_v14 = vld [vmem:[#allocation22_spill] sm:$0xff] }
 0x65f   : > { %v5570_v42 = vrot.slane %v5569_v29, 4  ;;  %v5581_v6 = vsel %vm3513_vm8, %v5509_v40, 0.0  ;;  %v5682_v51 = vpack.c.bf16 %v5558_v38, %v5558_v38 }
 0x660   : > { %v5577_v10 = vsel %vm3513_vm8, %v5507_v37, 0.0 }
 0x661   : > { %v5571_v41 = vadd.f32 %v5570_v42, %v5569_v29  ;;  %v5578_v19 = vadd.f32 %v5577_v10, %v5576_v62  ;;  %v5698_v55 = vunpack.c.l.b16 %v5682_v51 }
 0x662   : > { %v10117_v60 = vpop.f32.mrb[72].mxu1 }
 0x663   : > { %v5572_v49 = vrot.slane %v5571_v41, 2  ;;  %v5580_v7 = vadd.f32 %v5579_v15, %v5578_v19  ;;  %v5512_v23 = vmul.f32 %v10117_v60, %v15831_v8  ;;  %v5367_v43 = vpop.f32.mrb[73].mxu1  ;;  %v15839_v60 = vld [vmem:[#allocation25_spill] sm:$0xff] }
 0x664   : > { %v5510_v30 = vmul.f32 %v5367_v43, %v15832_v58  ;;  %v10118_v26 = vpop.f32.mrb[74].mxu1 }
 0x665   : > { %v5573_v27 = vadd.f32 %v5572_v49, %v5571_v41  ;;  %v5582_v59 = vadd.f32 %v5581_v6, %v5580_v7  ;;  %v5513_v63 = vmul.f32 %v10118_v26, %v15833_v61  ;;  %v5370_v0 = vpop.f32.mrb[75].mxu1  ;;  %v5593_v54 = vsel %vm3513_vm8, %v5512_v23, 0.0  ;;  %v15840_v6 = vld [vmem:[#allocation24_spill] sm:$0xff]  ;;  %v15842_v61 = vld [vmem:[#allocation26_spill] sm:$0xff] }
 0x666   : > { %v5583_v33 = vsel %vm3513_vm8, %v5510_v30, 0.0  ;;  %v5511_v34 = vmul.f32 %v5370_v0, %v15834_v24  ;;  %v15841_v30 = vld [vmem:[#allocation27_spill] sm:$0xff] }
 0x667   : > { %v5574_v25 = vrot.slane %v5573_v27, 1  ;;  %v5584_v18 = vadd.f32 %v5583_v33, %v5582_v59  ;;  %v5594_v44 = vsel %vm3513_vm8, %v5513_v63, 0.0 }
 0x668   : > { %v5595_v45 = vadd.f32 %v5594_v44, %v5593_v54  ;;  %v5585_v13 = vsel %vm3513_vm8, %v5511_v34, 0.0 }
 0x669   : > { %v5575_v9 = vadd.f32 %v5574_v25, %v5573_v27  ;;  %v5586_v4 = vadd.f32 %v5585_v13, %v5584_v18  ;;  %v15843_v13 = vld [vmem:[#allocation28_spill] sm:$0xff] }
 0x66a   : > { %v10121_v21 = vpop.f32.mrb[76].mxu1 }
 0x66b   : > { %v5683_v17 = vpack.c.bf16 %v5575_v9, %v5575_v9  ;;  %v5587_v31 = vrot.slane %v5586_v4, 4  ;;  %v5383_v36 = vpop.f32.mrb[77].mxu1  ;;  %v5516_v57 = vmul.f32 %v10121_v21, %v15836_v39  ;;  %v15844_v21 = vld [vmem:[#allocation30_spill] sm:$0xff] }
 0x66c   : > { %v5514_v1 = vmul.f32 %v5383_v36, %v15835_v52  ;;  %v10122_v11 = vpop.f32.mrb[78].mxu1 }
 0x66d   : > { %v5699_v47 = vunpack.c.l.b16 %v5683_v17  ;;  %v5588_v2 = vadd.f32 %v5587_v31, %v5586_v4  ;;  %v5386_v12 = vpop.f32.mrb[79].mxu1  ;;  %v5517_v37 = vmul.f32 %v10122_v11, %v15838_v14  ;;  %v5600_v40 = vsel %vm3513_vm8, %v5516_v57, 0.0 }
 0x66e   : > { %v5596_v3 = vsel %vm3513_vm8, %v5514_v1, 0.0  ;;  %v5515_v29 = vmul.f32 %v5386_v12, %v15837_v5  ;;  %v15845_v1 = vld [vmem:[#allocation29_spill] sm:$0xff] }
 0x66f   : > { %v5589_v20 = vrot.slane %v5588_v2, 2  ;;  %v5706_v56 = vsel %vm3678_vm9, %v5699_v47, %v5698_v55  ;;  %v5597_v35 = vadd.f32 %v5596_v3, %v5595_v45  ;;  %v5602_v15 = vsel %vm3513_vm8, %v5517_v37, 0.0 }
 0x670   : > { %v5598_v42 = vsel %vm3513_vm8, %v5515_v29, 0.0 }
 0x671   : > { %v5590_v62 = vadd.f32 %v5589_v20, %v5588_v2  ;;  %v5599_v48 = vadd.f32 %v5598_v42, %v5597_v35  ;;  %v15846_v2 = vld [vmem:[#allocation32_spill] sm:$0xff] }
 0x672   : > { %v10125_v10 = vpop.f32.mrb[80].mxu1 }
 0x673   : > { %v5591_v28 = vrot.slane %v5590_v62, 1  ;;  %v5601_v41 = vadd.f32 %v5600_v40, %v5599_v48  ;;  %v5399_v19 = vpop.f32.mrb[81].mxu1  ;;  %v5520_v58 = vmul.f32 %v10125_v10, %v15840_v6  ;;  %v15847_v48 = vld [vmem:[#allocation34_spill] sm:$0xff] }
 0x674   : > { %v5518_v49 = vmul.f32 %v5399_v19, %v15839_v60  ;;  %v10126_v7 = vpop.f32.mrb[82].mxu1 }
 0x675   : > { %v5592_v8 = vadd.f32 %v5591_v28, %v5590_v62  ;;  %v5603_v23 = vadd.f32 %v5602_v15, %v5601_v41  ;;  %v5402_v43 = vpop.f32.mrb[83].mxu1  ;;  %v5521_v63 = vmul.f32 %v10126_v7, %v15842_v61  ;;  %v5613_v25 = vsel %vm3513_vm8, %v5520_v58, 0.0  ;;  %v15848_v15 = vld [vmem:[#allocation31_spill] sm:$0xff]  ;;  %v15849_v7 = vld [vmem:[#allocation40_spill] sm:$0xff] }
 0x676   : > { %v5519_v26 = vmul.f32 %v5402_v43, %v15841_v30  ;;  %v5610_v59 = vsel %vm3513_vm8, %v5518_v49, 0.0  ;;  %v15850_v58 = vld [vmem:[#allocation36_spill] sm:$0xff] }
 0x677   : > { %v5684_v38 = vpack.c.bf16 %v5592_v8, %v5592_v8  ;;  %v5604_v27 = vrot.slane %v5603_v23, 4  ;;  %v5615_v4 = vsel %vm3513_vm8, %v5521_v63, 0.0 }
 0x678   : > { %v5611_v0 = vsel %vm3513_vm8, %v5519_v26, 0.0 }
 0x679   : > { %v5700_v33 = vunpack.c.l.b16 %v5684_v38  ;;  %v5605_v24 = vadd.f32 %v5604_v27, %v5603_v23  ;;  %v5612_v34 = vadd.f32 %v5611_v0, %v5610_v59 }
 0x67a   : > { %v10129_v54 = vpop.f32.mrb[84].mxu1 }
 0x67b   : > { %v5707_v18 = vsel %vm3680_vm10, %v5700_v33, %v5706_v56  ;;  %v5606_v44 = vrot.slane %v5605_v24, 2  ;;  %v5614_v45 = vadd.f32 %v5613_v25, %v5612_v34  ;;  %v5524_v51 = vmul.f32 %v10129_v54, %v15843_v13  ;;  %v5415_v9 = vpop.f32.mrb[85].mxu1  ;;  %v15851_v34 = vld [vmem:[#allocation45_spill] sm:$0xff]  ;;  %v15852_v13 = vld [vmem:[#allocation42_spill] sm:$0xff] }
 0x67c   : > { %v5522_v17 = vmul.f32 %v5415_v9, %v15844_v21  ;;  %v10130_v31 = vpop.f32.mrb[86].mxu1  ;;  %v15853_v9 = vld [vmem:[#allocation47_spill] sm:$0xff] }
 0x67d   : > { %v5607_v36 = vadd.f32 %v5606_v44, %v5605_v24  ;;  %v5616_v52 = vadd.f32 %v5615_v4, %v5614_v45  ;;  %v5525_v11 = vmul.f32 %v10130_v31, %v15845_v1  ;;  %v5418_v55 = vpop.f32.mrb[87].mxu1  ;;  %v5627_v57 = vsel %vm3513_vm8, %v5524_v51, 0.0 }
 0x67e   : > { %v5617_v47 = vsel %vm3513_vm8, %v5522_v17, 0.0  ;;  %v5523_v12 = vmul.f32 %v5418_v55, %v15846_v2 }
 0x67f   : > { %v5608_v39 = vrot.slane %v5607_v36, 1  ;;  %v5618_v3 = vadd.f32 %v5617_v47, %v5616_v52  ;;  %v5628_v5 = vsel %vm3513_vm8, %v5525_v11, 0.0 }
 0x680   : > { %v5629_v29 = vadd.f32 %v5628_v5, %v5627_v57  ;;  %v5619_v20 = vsel %vm3513_vm8, %v5523_v12, 0.0 }
 0x681   : > { %v5609_v56 = vadd.f32 %v5608_v39, %v5607_v36  ;;  %v5620_v35 = vadd.f32 %v5619_v20, %v5618_v3  ;;  %v15854_v36 = vld [vmem:[#allocation44_spill] sm:$0xff] }
 0x682   : > { %v10133_v14 = vpop.f32.mrb[88].mxu1 }
 0x683   : > { %v5685_v37 = vpack.c.bf16 %v5609_v56, %v5609_v56  ;;  %v5621_v42 = vrot.slane %v5620_v35, 4  ;;  %v5431_v62 = vpop.f32.mrb[89].mxu1  ;;  %v5528_v60 = vmul.f32 %v10133_v14, %v15848_v15  ;;  %v15855_v56 = vld [vmem:[#allocation48_spill] sm:$0xff] }
 0x684   : > { %v5526_v40 = vmul.f32 %v5431_v62, %v15847_v48  ;;  %v10134_v10 = vpop.f32.mrb[90].mxu1  ;;  %v15856_v62 = vld [vmem:[#allocation50_spill] sm:$0xff] }
 0x685   : > { %v5701_v28 = vunpack.c.l.b16 %v5685_v37  ;;  %v5622_v41 = vadd.f32 %v5621_v42, %v5620_v35  ;;  %v5434_v19 = vpop.f32.mrb[91].mxu1  ;;  %v5529_v30 = vmul.f32 %v10134_v10, %v15850_v58  ;;  %v5634_v59 = vsel %vm3513_vm8, %v5528_v60, 0.0 }
 0x686   : > { %v5630_v49 = vsel %vm3513_vm8, %v5526_v40, 0.0  ;;  %v5527_v8 = vmul.f32 %v5434_v19, %v15849_v7 }
 0x687   : > { %v5623_v23 = vrot.slane %v5622_v41, 2  ;;  %v5708_v43 = vsel %vm3682_vm11, %v5701_v28, %v5707_v18  ;;  %v5631_v6 = vadd.f32 %v5630_v49, %v5629_v29  ;;  %v5636_v24 = vsel %vm3513_vm8, %v5529_v30, 0.0  ;;  %v15857_v28 = vld [vmem:[#allocation52_spill] sm:$0xff] }
 0x688   : > { %v5632_v26 = vsel %vm3513_vm8, %v5527_v8, 0.0 }
 0x689   : > { %v5624_v38 = vadd.f32 %v5623_v23, %v5622_v41  ;;  %v5633_v27 = vadd.f32 %v5632_v26, %v5631_v6 }
 0x68a   : > { %v10137_v61 = vpop.f32.mrb[92].mxu1 }
 0x68b   : > { %v5625_v63 = vrot.slane %v5624_v38, 1  ;;  %v5635_v0 = vadd.f32 %v5634_v59, %v5633_v27  ;;  %v5447_v33 = vpop.f32.mrb[93].mxu1  ;;  %v5532_v51 = vmul.f32 %v10137_v61, %v15852_v13 }
 0x68c   : > { %v5530_v25 = vmul.f32 %v5447_v33, %v15851_v34  ;;  %v10138_v54 = vpop.f32.mrb[94].mxu1 }
 0x68d   : > { %v5626_v44 = vadd.f32 %v5625_v63, %v5624_v38  ;;  %v5637_v18 = vadd.f32 %v5636_v24, %v5635_v0  ;;  %v5450_v45 = vpop.f32.mrb[95].mxu1  ;;  %v5533_v52 = vmul.f32 %v10138_v54, %v15854_v36  ;;  %v5647_v2 = vsel %vm3513_vm8, %v5532_v51, 0.0 }
 0x68e   : > { %v5531_v4 = vmul.f32 %v5450_v45, %v15853_v9  ;;  %v5644_v31 = vsel %vm3513_vm8, %v5530_v25, 0.0 }
 0x68f   : > { %v5686_v21 = vpack.c.bf16 %v5626_v44, %v5626_v44  ;;  %v5638_v17 = vrot.slane %v5637_v18, 4  ;;  %v5649_v20 = vsel %vm3513_vm8, %v5533_v52, 0.0 }
 0x690   : > { %v5645_v1 = vsel %vm3513_vm8, %v5531_v4, 0.0 }
 0x691   : > { %v5702_v11 = vunpack.c.l.b16 %v5686_v21  ;;  %v5639_v55 = vadd.f32 %v5638_v17, %v5637_v18  ;;  %v5646_v47 = vadd.f32 %v5645_v1, %v5644_v31 }
 0x692   : > { %v10141_v12 = vpop.f32.mrb[96].mxu1 }
 0x693   : > { %v5709_v39 = vsel %vm3684_vm12, %v5702_v11, %v5708_v43  ;;  %v5640_v57 = vrot.slane %v5639_v55, 2  ;;  %v5648_v3 = vadd.f32 %v5647_v2, %v5646_v47  ;;  %v5536_v5 = vmul.f32 %v10141_v12, %v13312_v32  ;;  %v5463_v29 = vpop.f32.mrb[97].mxu1  ;;  %v5819_v43 = vld [vmem:[%s15437_s5 + $0x30] sm:$0x8]  ;;  %v15862_v2 = vld [vmem:[#allocation5_spill] sm:$0xff] }
 0x694   : > { %v5534_v35 = vmul.f32 %v5463_v29, %v15855_v56  ;;  %v10142_v14 = vpop.f32.mrb[98].mxu1  ;;  %v5820_v59 = vunpack.c.l.bf16 %v5819_v43  ;;  %v1770_v12 = vadd.s32 40, %v15862_v2 }
 0x695   : > { %v5641_v37 = vadd.f32 %v5640_v57, %v5639_v55  ;;  %v5650_v42 = vadd.f32 %v5649_v20, %v5648_v3  ;;  %v5537_v48 = vmul.f32 %v10142_v14, %v15856_v62  ;;  %v5466_v40 = vpop.f32.mrb[99].mxu1  ;;  %v5661_v15 = vsel %vm3513_vm8, %v5536_v5, 0.0 }
 0x696   : > { %v5651_v10 = vsel %vm3513_vm8, %v5534_v35, 0.0  ;;  %v5535_v41 = vmul.f32 %v5466_v40, %v15857_v28  ;;  %vm1776_vm6 = vcmp.lt.s32.totalorder %v1770_v12, 45 }
 0x697   : > { %v5642_v19 = vrot.slane %v5641_v37, 1  ;;  %v5652_v60 = vadd.f32 %v5651_v10, %v5650_v42  ;;  %v5662_v32 = vsel %vm3513_vm8, %v5537_v48, 0.0 }
 0x698   : > { %v5663_v49 = vadd.f32 %v5662_v32, %v5661_v15  ;;  %v5653_v7 = vsel %vm3513_vm8, %v5535_v41, 0.0 }
 0x699   : > { %v5643_v8 = vadd.f32 %v5642_v19, %v5641_v37  ;;  %v5654_v23 = vadd.f32 %v5653_v7, %v5652_v60  ;;  %v11002_v60 = vmov -1e+09  }
 0x69a   : > { %v10145_v6 = vpop.f32.mrb[100].mxu1  ;;  %v13835_v32 = vsel %vm1776_vm6, 0.0, %v11002_v60 }
 0x69b   : > { %v5687_v58 = vpack.c.bf16 %v5643_v8, %v5643_v8  ;;  %v5655_v30 = vrot.slane %v5654_v23, 4  ;;  %v5479_v26 = vpop.f32.mrb[101].mxu1  ;;  %v5540_v33 = vmul.f32 %v10145_v6, %v13431_v46  ;;  %15865 = vst [vmem:[#allocation63_spill] sm:$0xff] %v13835_v32 }
 0x69c   : > { %v5538_v38 = vmul.f32 %v5479_v26, %v13443_v16  ;;  %v10146_v27 = vpop.f32.mrb[102].mxu1  ;;  %v15858_v16 = vld [vmem:[#allocation6_spill] sm:$0xff] }
 0x69d   : > { %v5703_v61 = vunpack.c.l.b16 %v5687_v58  ;;  %v5656_v63 = vadd.f32 %v5655_v30, %v5654_v23  ;;  %v5482_v0 = vpop.f32.mrb[103].mxu1  ;;  %v5541_v18 = vmul.f32 %v10146_v27, %v13447_v50  ;;  %v13806_v13 = vrot.slane %v5820_v59, %v15858_v16 }
 0x69e   : > { %v5664_v24 = vsel %vm3513_vm8, %v5538_v38, 0.0  ;;  %v5539_v34 = vmul.f32 %v5482_v0, %v13451_v53  ;;  %v5668_v4 = vsel %vm3513_vm8, %v5540_v33, 0.0 }
 0x69f   : > { %v5657_v25 = vrot.slane %v5656_v63, 2  ;;  %v5710_v54 = vsel %vm3686_vm13, %v5703_v61, %v5709_v39  ;;  %v5665_v44 = vadd.f32 %v5664_v24, %v5663_v49  ;;  %v5670_v53 = vsel %vm3513_vm8, %v5541_v18, 0.0 }
 0x6a0   : > { %v5666_v45 = vsel %vm3513_vm8, %v5539_v34, 0.0 }
 0x6a1   : > { %v5658_v51 = vadd.f32 %v5657_v25, %v5656_v63  ;;  %v5667_v9 = vadd.f32 %v5666_v45, %v5665_v44 }
 0x6a2   : > { %v10159_v46 = vpop.f32.mrb[104].mxu1 }
 0x6a3   : > { %v5659_v21 = vrot.slane %v5658_v51, 1  ;;  %v5669_v17 = vadd.f32 %v5668_v4, %v5667_v9  ;;  %v6055_v31 = vpop.f32.mrb[105].mxu1  ;;  %v13814_v55 = vadd.f32 %v10159_v46, %v13806_v13 }
 0x6a4   : > { %v13811_v36 = vadd.f32 %v6055_v31, %v13806_v13  ;;  %v10160_v52 = vpop.f32.mrb[106].mxu1 }
 0x6a5   : > { %v5660_v50 = vadd.f32 %v5659_v21, %v5658_v51  ;;  %v5671_v1 = vadd.f32 %v5670_v53, %v5669_v17  ;;  %v6058_v11 = vpop.f32.mrb[107].mxu1  ;;  %15860 = vst [vmem:[#allocation54_spill] sm:$0xff] %v13814_v55  ;;  %v13823_v5 = vadd.f32 %v10160_v52, %v13806_v13  ;;  %v6297_v14 = vsel %vm2596_vm2, %v13814_v55, -inf }
 0x6a6   : > { %15859 = vst [vmem:[#allocation53_spill] sm:$0xff] %v13811_v36  ;;  %v13817_v47 = vadd.f32 %v6058_v11, %v13806_v13  ;;  %v6294_v3 = vsel %vm2596_vm2, %v13811_v36, -inf }
 0x6a7   : > { %v5688_v39 = vpack.c.bf16 %v5660_v50, %v5660_v50  ;;  %v5672_v57 = vrot.slane %v5671_v1, 4  ;;  %15863 = vst [vmem:[#allocation59_spill] sm:$0xff] %v13823_v5  ;;  %v6299_v10 = vsel %vm2596_vm2, %v13823_v5, -inf }
 0x6a8   : > { %15861 = vst [vmem:[#allocation57_spill] sm:$0xff] %v13817_v47  ;;  %v6295_v29 = vsel %vm2596_vm2, %v13817_v47, -inf }
 0x6a9   : > { %v5704_v20 = vunpack.c.l.b16 %v5688_v39  ;;  %v5673_v56 = vadd.f32 %v5672_v57, %v5671_v1  ;;  %v6296_v35 = vmax.f32 %v6294_v3, %v6295_v29  ;;  %v15873_v29 = vld [vmem:[#allocation55_spill] sm:$0xff] }
 0x6aa   : > { %v10163_v37 = vpop.f32.mrb[108].mxu1 }
 0x6ab   : > { %v5711_v42 = vsel %vm3688_vm14, %v5704_v20, %v5710_v54  ;;  %v5674_v62 = vrot.slane %v5673_v56, 2  ;;  %v6298_v48 = vmax.f32 %v6296_v35, %v6297_v14  ;;  %v6071_v40 = vpop.f32.mrb[109].mxu1  ;;  %v13846_v6 = vadd.f32 %v10163_v37, %v13806_v13 }
 0x6ac   : > { %v13833_v28 = vadd.f32 %v6071_v40, %v13806_v13  ;;  %v10164_v41 = vpop.f32.mrb[110].mxu1 }
 0x6ad   : > { %v5675_v19 = vadd.f32 %v5674_v62, %v5673_v56  ;;  %v6300_v15 = vmax.f32 %v6298_v48, %v6299_v10  ;;  %v6074_v49 = vpop.f32.mrb[111].mxu1  ;;  %v13840_v8 = vadd.f32 %v10164_v41, %v13806_v13  ;;  %15868 = vst [vmem:[#allocation35_spill] sm:$0xff] %v13846_v6  ;;  %v6311_v33 = vsel %vm2596_vm2, %v13846_v6, -inf }
 0x6ae   : > { %15864 = vst [vmem:[#allocation61_spill] sm:$0xff] %v13833_v28  ;;  %v6301_v7 = vsel %vm2596_vm2, %v13833_v28, -inf  ;;  %v13843_v23 = vadd.f32 %v6074_v49, %v13806_v13 }
 0x6af   : > { %15866 = vst [vmem:[#allocation62_spill] sm:$0xff] %v13840_v8  ;;  %v5676_v43 = vrot.slane %v5675_v19, 1  ;;  %v6302_v26 = vmax.f32 %v6300_v15, %v6301_v7  ;;  %v6312_v38 = vsel %vm2596_vm2, %v13840_v8, -inf }
 0x6b0   : > { %15867 = vst [vmem:[#allocation33_spill] sm:$0xff] %v13843_v23  ;;  %v13850_v58 = vadd.f32 %v13843_v23, %v13835_v32  ;;  %v6313_v54 = vmax.f32 %v6311_v33, %v6312_v38 }
 0x6b1   : > { %v5677_v30 = vadd.f32 %v5676_v43, %v5675_v19 }
 0x6b2   : > { %v6303_v27 = vsel %vm2596_vm2, %v13850_v58, -inf  ;;  %v10167_v59 = vpop.f32.mrb[112].mxu1 }
 0x6b3   : > { %v5689_v61 = vpack.c.bf16 %v5677_v30, %v5677_v30  ;;  %v6304_v63 = vmax.f32 %v6302_v26, %v6303_v27  ;;  %v6087_v0 = vpop.f32.mrb[113].mxu1  ;;  %v13865_v51 = vadd.f32 %v10167_v59, %v13806_v13 }
 0x6b4   : > { %v13859_v24 = vadd.f32 %v6087_v0, %v13806_v13  ;;  %v10168_v34 = vpop.f32.mrb[114].mxu1 }
 0x6b5   : > { %v5705_v25 = vunpack.c.l.b16 %v5689_v61  ;;  %v6305_v44 = vrot.slane %v6304_v63, 4  ;;  %v13862_v18 = vadd.f32 %v10168_v34, %v13806_v13  ;;  %v6090_v45 = vpop.f32.mrb[115].mxu1  ;;  %15871 = vst [vmem:[#allocation51_spill] sm:$0xff] %v13865_v51  ;;  %v6318_v11 = vsel %vm2596_vm2, %v13865_v51, -inf }
 0x6b6   : > { %15869 = vst [vmem:[#allocation37_spill] sm:$0xff] %v13859_v24  ;;  %v6314_v9 = vsel %vm2596_vm2, %v13859_v24, -inf  ;;  %v13870_v4 = vadd.f32 %v6090_v45, %v13806_v13 }
 0x6b7   : > { %15870 = vst [vmem:[#allocation38_spill] sm:$0xff] %v13862_v18  ;;  %v6306_v46 = vmax.f32 %v6304_v63, %v6305_v44  ;;  %v6315_v21 = vmax.f32 %v6313_v54, %v6314_v9  ;;  %v5712_v17 = vsel %vm3690_vm15, %v5705_v25, %v5711_v42  ;;  %v13875_v31 = vadd.f32 %v13862_v18, %v13835_v32 }
 0x6b8   : > { %15872 = vst [vmem:[#allocation60_spill] sm:$0xff] %v13870_v4  ;;  %v6316_v53 = vsel %vm2596_vm2, %v13870_v4, -inf  ;;  %v5713_v52 = vpack.c.b16 %v5712_v17, %v5712_v17 }
 0x6b9   : > { %v6307_v50 = vrot.slane %v6306_v46, 2  ;;  %v6317_v1 = vmax.f32 %v6315_v21, %v6316_v53  ;;  %v6320_v20 = vsel %vm2596_vm2, %v13875_v31, -inf }
 0x6ba   : > { %10152 = vmatmul.mubr.msk.bf16.vlgmr.msra.gmra.mrb[100].mxu0 %vm3513_vm8, %v5713_v52  ;;  %v10171_v12 = vpop.f32.mrb[116].mxu1 }
 0x6bb   : > { %v6308_v39 = vmax.f32 %v6306_v46, %v6307_v50  ;;  %v6319_v57 = vmax.f32 %v6317_v1, %v6318_v11  ;;  %v6103_v3 = vpop.f32.mrb[117].mxu1  ;;  %10206 = vmatpush3.bf16.msra.mxu0 %v15873_v29  ;;  %v13886_v56 = vadd.f32 %v10171_v12, %v13806_v13 }
 0x6bc   : > { %v13889_v35 = vadd.f32 %v6103_v3, %v13806_v13  ;;  %v10172_v14 = vpop.f32.mrb[118].mxu1 }
 0x6bd   : > { %15874 = vst [vmem:[#allocation58_spill] sm:$0xff] %v13886_v56  ;;  %v6309_v37 = vrot.slane %v6308_v39, 1  ;;  %v6321_v42 = vmax.f32 %v6319_v57, %v6320_v20  ;;  %v6106_v62 = vpop.f32.mrb[119].mxu1  ;;  %v6331_v41 = vsel %vm2596_vm2, %v13886_v56, -inf  ;;  %v13906_v38 = vadd.f32 %v10172_v14, %v13806_v13 }
 0x6be   : > { %15875 = vst [vmem:[#allocation41_spill] sm:$0xff] %v13889_v35  ;;  %v13892_v48 = vadd.f32 %v6106_v62, %v13806_v13  ;;  %v6328_v19 = vsel %vm2596_vm2, %v13889_v35, -inf }
 0x6bf   : > { %v6310_v40 = vmax.f32 %v6308_v39, %v6309_v37  ;;  %v6322_v10 = vrot.slane %v6321_v42, 4  ;;  %15877 = vst [vmem:[#allocation49_spill] sm:$0xff] %v13906_v38  ;;  %v6333_v9 = vsel %vm2596_vm2, %v13906_v38, -inf }
 0x6c0   : > { %15876 = vst [vmem:[#allocation39_spill] sm:$0xff] %v13892_v48  ;;  %v6329_v15 = vsel %vm2596_vm2, %v13892_v48, -inf }
 0x6c1   : > { %v6430_v60 = vsub.f32 %v13811_v36, %v6310_v40  ;;  %v6431_v49 = vsub.f32 %v13817_v47, %v6310_v40  ;;  %v6432_v7 = vsub.f32 %v13814_v55, %v6310_v40  ;;  %v6433_v43 = vsub.f32 %v13823_v5, %v6310_v40 }
 0x6c2   : > { %v6434_v30 = vsub.f32 %v13833_v28, %v6310_v40  ;;  %v6323_v26 = vmax.f32 %v6321_v42, %v6322_v10  ;;  %v6330_v27 = vmax.f32 %v6328_v19, %v6329_v15  ;;  %v10175_v59 = vpop.f32.mrb[120].mxu1  ;;  %v6435_v61 = vsub.f32 %v13850_v58, %v6310_v40 }
 0x6c3   : > { %v6478_v63 = vmul.f32 1.442695, %v6430_v60  ;;  %v6480_v0 = vmul.f32 1.442695, %v6431_v49  ;;  %v6482_v33 = vmul.f32 1.442695, %v6432_v7  ;;  %v13923_v39 = vadd.f32 %v10175_v59, %v13806_v13 }
 0x6c4   : > { %v6484_v34 = vmul.f32 1.442695, %v6433_v43  ;;  %v6332_v25 = vmax.f32 %v6330_v27, %v6331_v41  ;;  %v6486_v54 = vmul.f32 1.442695, %v6434_v30  ;;  %v6324_v44 = vrot.slane %v6323_v26, 2  ;;  %v6119_v45 = vpop.f32.mrb[121].mxu1 }
 0x6c5   : > { %10748 = vpow2.f32 %v6478_v63  ;;  %v13912_v46 = vadd.f32 %v6119_v45, %v13806_v13  ;;  %v10176_v21 = vpop.f32.mrb[122].mxu1  ;;  %v6488_v17 = vmul.f32 1.442695, %v6435_v61  ;;  %15881 = vst [vmem:[#allocation10_spill] sm:$0xff] %v13923_v39  ;;  %v6345_v30 = vsel %vm2596_vm2, %v13923_v39, -inf }
 0x6c6   : > { %10750 = vpow2.f32 %v6480_v0  ;;  %v6325_v58 = vmax.f32 %v6323_v26, %v6324_v44  ;;  %v6334_v53 = vmax.f32 %v6332_v25, %v6333_v9  ;;  %v6122_v52 = vpop.f32.mrb[123].mxu1  ;;  %v13917_v1 = vadd.f32 %v10176_v21, %v13806_v13 }
 0x6c7   : > { %15878 = vst [vmem:[#allocation43_spill] sm:$0xff] %v13912_v46  ;;  %10752 = vpow2.f32 %v6482_v33  ;;  %v6335_v50 = vsel %vm2596_vm2, %v13912_v46, -inf  ;;  %v13920_v11 = vadd.f32 %v6122_v52, %v13806_v13 }
 0x6c8   : > { %10754 = vpow2.f32 %v6484_v34  ;;  %15879 = vst [vmem:[#allocation46_spill] sm:$0xff] %v13917_v1  ;;  %v6326_v12 = vrot.slane %v6325_v58, 1  ;;  %v6336_v14 = vmax.f32 %v6334_v53, %v6335_v50  ;;  %v6346_v42 = vsel %vm2596_vm2, %v13917_v1, -inf }
 0x6c9   : > { %15880 = vst [vmem:[#allocation8_spill] sm:$0xff] %v13920_v11  ;;  %10756 = vpow2.f32 %v6486_v54  ;;  %v13927_v57 = vadd.f32 %v13920_v11, %v13835_v32  ;;  %v6347_v0 = vmax.f32 %v6345_v30, %v6346_v42 }
 0x6ca   : > { %v10179_v3 = vpop.f32.mrb[124].mxu1  ;;  %v6327_v20 = vmax.f32 %v6325_v58, %v6326_v12  ;;  %10758 = vpow2.f32 %v6488_v17 }
 0x6cb   : > { %v6135_v37 = vpop.f32.mrb[125].mxu1  ;;  %v6337_v62 = vsel %vm2596_vm2, %v13927_v57, -inf }
 0x6cc   : > { %v13934_v40 = vadd.f32 %v6135_v37, %v13806_v13  ;;  %v10180_v10 = vpop.f32.mrb[126].mxu1  ;;  %v6436_v41 = vsub.f32 %v13846_v6, %v6327_v20  ;;  %v6437_v19 = vsub.f32 %v13840_v8, %v6327_v20  ;;  %v6438_v15 = vsub.f32 %v13859_v24, %v6327_v20 }
 0x6cd   : > { %v6439_v60 = vsub.f32 %v13870_v4, %v6327_v20  ;;  %v6138_v49 = vpop.f32.mrb[127].mxu1  ;;  %v6440_v7 = vsub.f32 %v13865_v51, %v6327_v20  ;;  %v6441_v43 = vsub.f32 %v13875_v31, %v6327_v20  ;;  %v6338_v26 = vmax.f32 %v6336_v14, %v6337_v62 }
 0x6ce   : > { %15882 = vst [vmem:[#allocation7_spill] sm:$0xff] %v13934_v40  ;;  %v6490_v59 = vmul.f32 1.442695, %v6436_v41  ;;  %v6492_v61 = vmul.f32 1.442695, %v6437_v19  ;;  %v13951_v44 = vadd.f32 %v10180_v10, %v13806_v13  ;;  %v6348_v21 = vsel %vm2596_vm2, %v13934_v40, -inf }
 0x6cf   : > { %v13944_v27 = vpop.eup %10748  ;;  %v6494_v63 = vmul.f32 1.442695, %v6438_v15  ;;  %v6496_v25 = vmul.f32 1.442695, %v6439_v60  ;;  %v6339_v54 = vrot.slane %v6338_v26, 4  ;;  %v13968_v37 = vadd.f32 %v10179_v3, %v13806_v13 }
 0x6d0   : > { %v13946_v33 = vpop.eup %10750  ;;  %v6574_v34 = vsel %vm2596_vm2, %v13944_v27, 0.0  ;;  %15883 = vst [vmem:[#allocation12_spill] sm:$0xff] %v13951_v44  ;;  %10760 = vpow2.f32 %v6490_v59  ;;  %v6498_v9 = vmul.f32 1.442695, %v6440_v7  ;;  %v6500_v53 = vmul.f32 1.442695, %v6441_v43 }
 0x6d1   : > { %v13953_v31 = vpop.eup %10752  ;;  %v6575_v45 = vsel %vm2596_vm2, %v13946_v33, 0.0  ;;  %10762 = vpow2.f32 %v6492_v61  ;;  %v6340_v52 = vmax.f32 %v6338_v26, %v6339_v54  ;;  %15884 = vst [vmem:[#allocation9_spill] sm:$0xff] %v13968_v37  ;;  %v6349_v41 = vmax.f32 %v6347_v0, %v6348_v21 }
 0x6d2   : > { %v13959_v17 = vpop.eup %10754  ;;  %v6576_v58 = vadd.f32 %v6575_v45, %v6574_v34  ;;  %v10183_v50 = vpop.f32.mrb[128].mxu1  ;;  %v6577_v20 = vsel %vm2596_vm2, %v13953_v31, 0.0  ;;  %10764 = vpow2.f32 %v6494_v63  ;;  %v13974_v60 = vadd.f32 %v13951_v44, %v13835_v32 }
 0x6d3   : > { %v13961_v12 = vpop.eup %10756  ;;  %v6579_v14 = vsel %vm2596_vm2, %v13959_v17, 0.0  ;;  %v6151_v42 = vpop.f32.mrb[129].mxu1  ;;  %10766 = vpow2.f32 %v6496_v25  ;;  %v6341_v10 = vrot.slane %v6340_v52, 2  ;;  %v13977_v7 = vadd.f32 %v6138_v49, %v13806_v13 }
 0x6d4   : > { %v6578_v62 = vadd.f32 %v6577_v20, %v6576_v58  ;;  %v10184_v19 = vpop.f32.mrb[130].mxu1  ;;  %v6581_v15 = vsel %vm2596_vm2, %v13961_v12, 0.0  ;;  %10768 = vpow2.f32 %v6498_v9  ;;  %v13979_v3 = vpop.eup %10758  ;;  %v13982_v59 = vadd.f32 %v10183_v50, %v13806_v13 }
 0x6d5   : > { %15885 = vst [vmem:[#allocation11_spill] sm:$0xff] %v13977_v7  ;;  %v6154_v43 = vpop.f32.mrb[131].mxu1  ;;  %10770 = vpow2.f32 %v6500_v53  ;;  %v6342_v26 = vmax.f32 %v6340_v52, %v6341_v10  ;;  %v6350_v61 = vsel %vm2596_vm2, %v13977_v7, -inf  ;;  %v13987_v63 = vadd.f32 %v6151_v42, %v13806_v13 }
 0x6d6   : > { %v6580_v30 = vadd.f32 %v6579_v14, %v6578_v62  ;;  %15886 = vst [vmem:[#allocation13_spill] sm:$0xff] %v13982_v59  ;;  %v13990_v0 = vadd.f32 %v10184_v19, %v13806_v13  ;;  %v13993_v49 = vadd.f32 %v6154_v43, %v13806_v13  ;;  %v6351_v54 = vmax.f32 %v6349_v41, %v6350_v61 }
 0x6d7   : > { %15887 = vst [vmem:[#allocation14_spill] sm:$0xff] %v13987_v63  ;;  %v6343_v25 = vrot.slane %v6342_v26, 1  ;;  %v6583_v45 = vsel %vm2596_vm2, %v13979_v3, 0.0  ;;  %v6352_v9 = vsel %vm2596_vm2, %v13968_v37, -inf  ;;  %v6354_v52 = vsel %vm2596_vm2, %v13974_v60, -inf }
 0x6d8   : > { %15888 = vst [vmem:[#allocation16_spill] sm:$0xff] %v13990_v0  ;;  %15889 = vst [vmem:[#allocation15_spill] sm:$0xff] %v13993_v49  ;;  %v6582_v34 = vadd.f32 %v6581_v15, %v6580_v30  ;;  %v6363_v21 = vsel %vm2596_vm2, %v13993_v49, -inf  ;;  %v6362_v50 = vsel %vm2596_vm2, %v13987_v63, -inf  ;;  %v6353_v42 = vmax.f32 %v6351_v54, %v6352_v9 }
 0x6d9   : > { %v6344_v53 = vmax.f32 %v6342_v26, %v6343_v25  ;;  %v6365_v62 = vsel %vm2596_vm2, %v13982_v59, -inf  ;;  %v14011_v10 = vsel %vm2596_vm2, %v13990_v0, -inf  ;;  %v6364_v41 = vmax.f32 %v6362_v50, %v6363_v21 }
 0x6da   : > { %v6584_v58 = vadd.f32 %v6583_v45, %v6582_v34  ;;  %v10187_v20 = vpop.f32.mrb[132].mxu1  ;;  %v14005_v14 = vpop.eup %10760 }
 0x6db   : > { %v6167_v19 = vpop.f32.mrb[133].mxu1  ;;  %v14013_v15 = vpop.eup %10762  ;;  %v6591_v30 = vsel %vm2596_vm2, %v14005_v14, 0.0  ;;  %v6442_v26 = vsub.f32 %v13889_v35, %v6344_v53  ;;  %v6443_v61 = vsub.f32 %v13892_v48, %v6344_v53  ;;  %v6444_v45 = vsub.f32 %v13886_v56, %v6344_v53 }
 0x6dc   : > { %v6585_v43 = vrot.slane %v6584_v58, 4  ;;  %v10188_v34 = vpop.f32.mrb[134].mxu1  ;;  %v14019_v25 = vpop.eup %10764  ;;  %v6592_v54 = vsel %vm2596_vm2, %v14013_v15, 0.0  ;;  %v6445_v9 = vsub.f32 %v13906_v38, %v6344_v53  ;;  %v6446_v21 = vsub.f32 %v13912_v46, %v6344_v53 }
 0x6dd   : > { %v6170_v50 = vpop.f32.mrb[135].mxu1  ;;  %v14026_v2 = vpop.eup %10766  ;;  %v6593_v16 = vadd.f32 %v6592_v54, %v6591_v30  ;;  %v6447_v44 = vsub.f32 %v13927_v57, %v6344_v53  ;;  %v14030_v11 = vadd.f32 %v10187_v20, %v13806_v13  ;;  %v6594_v35 = vsel %vm2596_vm2, %v14019_v25, 0.0 }
 0x6de   : > { %v6586_v29 = vadd.f32 %v6585_v43, %v6584_v58  ;;  %v14032_v48 = vpop.eup %10768  ;;  %v6502_v56 = vmul.f32 1.442695, %v6442_v26  ;;  %v6504_v18 = vmul.f32 1.442695, %v6443_v61  ;;  %v6355_v38 = vmax.f32 %v6353_v42, %v6354_v52 }
 0x6df   : > { %v14036_v4 = vpop.eup %10770  ;;  %v6595_v51 = vadd.f32 %v6594_v35, %v6593_v16  ;;  %v6596_v58 = vsel %vm2596_vm2, %v14026_v2, 0.0  ;;  %v6506_v43 = vmul.f32 1.442695, %v6444_v45  ;;  %v6598_v57 = vsel %vm2596_vm2, %v14032_v48, 0.0 }
 0x6e0   : > { %15890 = vst [vmem:[#allocation18_spill] sm:$0xff] %v14036_v4  ;;  %v6587_v46 = vrot.slane %v6586_v29, 2  ;;  %10772 = vpow2.f32 %v6502_v56  ;;  %v6508_v53 = vmul.f32 1.442695, %v6445_v9  ;;  %v6510_v20 = vmul.f32 1.442695, %v6446_v21 }
 0x6e1   : > { %v6597_v54 = vadd.f32 %v6596_v58, %v6595_v51  ;;  %10774 = vpow2.f32 %v6504_v18  ;;  %v6512_v26 = vmul.f32 1.442695, %v6447_v44  ;;  %v6600_v52 = vsel %vm2596_vm2, %v14036_v4, 0.0 }
 0x6e2   : > { %v6588_v30 = vadd.f32 %v6587_v46, %v6586_v29  ;;  %v10191_v61 = vpop.f32.mrb[136].mxu1  ;;  %10776 = vpow2.f32 %v6506_v43  ;;  %v6356_v16 = vrot.slane %v6355_v38, 4  ;;  %v6366_v35 = vmax.f32 %v6364_v41, %v6365_v62 }
 0x6e3   : > { %v6183_v42 = vpop.f32.mrb[137].mxu1  ;;  %v6599_v45 = vadd.f32 %v6598_v57, %v6597_v54  ;;  %10778 = vpow2.f32 %v6508_v53  ;;  %v14045_v23 = vadd.f32 %v6167_v19, %v13806_v13  ;;  %v14049_v51 = vadd.f32 %v10188_v34, %v13806_v13 }
 0x6e4   : > { %v6589_v24 = vrot.slane %v6588_v30, 1  ;;  %v10192_v56 = vpop.f32.mrb[138].mxu1  ;;  %10780 = vpow2.f32 %v6510_v20  ;;  %v6357_v29 = vmax.f32 %v6355_v38, %v6356_v16  ;;  %v6368_v18 = vmax.f32 %v6366_v35, %v14011_v10 }
 0x6e5   : > { %15891 = vst [vmem:[#allocation17_spill] sm:$0xff] %v14045_v23  ;;  %v6186_v46 = vpop.f32.mrb[139].mxu1  ;;  %v6601_v9 = vadd.f32 %v6600_v52, %v6599_v45  ;;  %10782 = vpow2.f32 %v6512_v26  ;;  %v6369_v62 = vsel %vm2596_vm2, %v14045_v23, -inf  ;;  %v6379_v19 = vsel %vm2596_vm2, %v14030_v11, -inf }
 0x6e6   : > { %v6590_v44 = vadd.f32 %v6589_v24, %v6588_v30  ;;  %v6358_v41 = vrot.slane %v6357_v29, 2  ;;  %v6380_v21 = vsel %vm2596_vm2, %v14049_v51, -inf  ;;  %v14058_v38 = vadd.f32 %v6170_v50, %v13806_v13 }
 0x6e7   : > { %v6602_v10 = vrot.slane %v6601_v9, 4  ;;  %v6370_v34 = vmax.f32 %v6368_v18, %v6369_v62  ;;  %v14061_v24 = vadd.f32 %v10191_v61, %v13806_v13  ;;  %v14068_v57 = vadd.f32 %v6183_v42, %v13806_v13 }
 0x6e8   : > { %15892 = vst [vmem:[#allocation20_spill] sm:$0xff] %v14058_v38  ;;  %10784 = vrcp.f32 %v6590_v44  ;;  %v6359_v58 = vmax.f32 %v6357_v29, %v6358_v41  ;;  %v14065_v43 = vadd.f32 %v14058_v38, %v13835_v32  ;;  %v14071_v53 = vadd.f32 %v10192_v56, %v13806_v13 }
 0x6e9   : > { %v6603_v20 = vadd.f32 %v6602_v10, %v6601_v9  ;;  %v6381_v50 = vmax.f32 %v6379_v19, %v6380_v21  ;;  %v14075_v30 = vsel %vm2596_vm2, %v14061_v24, -inf  ;;  %v14078_v54 = vadd.f32 %v6186_v46, %v13806_v13 }
 0x6ea   : > { %15893 = vst [vmem:[#allocation21_spill] sm:$0xff] %v14071_v53  ;;  %v10195_v26 = vpop.f32.mrb[140].mxu1  ;;  %v14080_v61 = vpop.eup %10772  ;;  %v6360_v52 = vrot.slane %v6359_v58, 1  ;;  %v6371_v16 = vsel %vm2596_vm2, %v14065_v43, -inf  ;;  %v6382_v35 = vsel %vm2596_vm2, %v14068_v57, -inf  ;;  %v14088_v42 = vadd.f32 %v14071_v53, %v13835_v32 }
 0x6eb   : > { %15894 = vst [vmem:[#allocation19_spill] sm:$0xff] %v14080_v61  ;;  %v6199_v45 = vpop.f32.mrb[141].mxu1  ;;  %v14090_v56 = vpop.eup %10774  ;;  %v6604_v29 = vrot.slane %v6603_v20, 2  ;;  %v6608_v18 = vsel %vm2596_vm2, %v14080_v61, 0.0  ;;  %v6372_v46 = vmax.f32 %v6370_v34, %v6371_v16  ;;  %v6383_v44 = vmax.f32 %v6381_v50, %v6382_v35 }
 0x6ec   : > { %15895 = vst [vmem:[#allocation23_spill] sm:$0xff] %v14090_v56  ;;  %v10196_v9 = vpop.f32.mrb[142].mxu1  ;;  %v14094_v62 = vpop.eup %10776  ;;  %v6609_v41 = vsel %vm2596_vm2, %v14090_v56, 0.0  ;;  %v6361_v19 = vmax.f32 %v6359_v58, %v6360_v52  ;;  %v6388_v21 = vsel %vm2596_vm2, %v14088_v42, -inf  ;;  %v6384_v10 = vsel %vm2596_vm2, %v14078_v54, -inf }
 0x6ed   : > { %15896 = vst [vmem:[#allocation22_spill] sm:$0xff] %v14094_v62  ;;  %v6202_v53 = vpop.f32.mrb[143].mxu1  ;;  %v14102_v38 = vpop.eup %10778  ;;  %v6605_v8 = vadd.f32 %v6604_v29, %v6603_v20  ;;  %v6610_v28 = vadd.f32 %v6609_v41, %v6608_v18  ;;  %v6611_v34 = vsel %vm2596_vm2, %v14094_v62, 0.0  ;;  %v6373_v50 = vrot.slane %v6372_v46, 4 }
 0x6ee   : > { %15897 = vst [vmem:[#allocation25_spill] sm:$0xff] %v14102_v38  ;;  %v14106_v16 = vpop.eup %10780  ;;  %v6613_v58 = vsel %vm2596_vm2, %v14102_v38, 0.0  ;;  %v6448_v52 = vsub.f32 %v13923_v39, %v6361_v19  ;;  %v6449_v35 = vsub.f32 %v13917_v1, %v6361_v19  ;;  %v6450_v6 = vsub.f32 %v13934_v40, %v6361_v19 }
 0x6ef   : > { %15898 = vst [vmem:[#allocation24_spill] sm:$0xff] %v14106_v16  ;;  %v14113_v5 = vpop.eup %10782  ;;  %v6606_v47 = vrot.slane %v6605_v8, 1  ;;  %v6612_v20 = vadd.f32 %v6611_v34, %v6610_v28  ;;  %v6615_v29 = vsel %vm2596_vm2, %v14106_v16, 0.0  ;;  %v6451_v18 = vsub.f32 %v13977_v7, %v6361_v19 }
 0x6f0   : > { %15899 = vst [vmem:[#allocation27_spill] sm:$0xff] %v14113_v5  ;;  %v6617_v41 = vsel %vm2596_vm2, %v14113_v5, 0.0  ;;  %v6452_v55 = vsub.f32 %v13968_v37, %v6361_v19  ;;  %v6453_v39 = vsub.f32 %v13974_v60, %v6361_v19  ;;  %v6514_v36 = vmul.f32 1.442695, %v6448_v52 }
 0x6f1   : > { %v6607_v40 = vadd.f32 %v6606_v47, %v6605_v8  ;;  %v6614_v22 = vadd.f32 %v6613_v58, %v6612_v20  ;;  %v6516_v56 = vmul.f32 1.442695, %v6449_v35  ;;  %v6518_v61 = vmul.f32 1.442695, %v6450_v6 }
 0x6f2   : > { %v14122_v1 = vpop.eup %10784  ;;  %v10199_v28 = vpop.f32.mrb[144].mxu1  ;;  %10786 = vpow2.f32 %v6514_v36  ;;  %v6520_v34 = vmul.f32 1.442695, %v6451_v18  ;;  %v6522_v16 = vmul.f32 1.442695, %v6452_v55  ;;  %v6374_v62 = vmax.f32 %v6372_v46, %v6373_v50 }
 0x6f3   : > { %v6524_v38 = vmul.f32 1.442695, %v6453_v39  ;;  %10788 = vrcp.f32 %v6607_v40  ;;  %v6616_v7 = vadd.f32 %v6615_v29, %v6614_v22  ;;  %v6385_v5 = vmax.f32 %v6383_v44, %v6384_v10  ;;  %v6215_v4 = vpop.f32.mrb[145].mxu1 }
 0x6f4   : > { %10790 = vpow2.f32 %v6516_v56  ;;  %v14125_v60 = vadd.f32 %v10195_v26, %v13806_v13  ;;  %v14128_v19 = vadd.f32 %v6199_v45, %v13806_v13  ;;  %v14131_v47 = vadd.f32 %v10196_v9, %v13806_v13  ;;  %v10200_v8 = vpop.f32.mrb[146].mxu1 }
 0x6f5   : > { %v6618_v36 = vadd.f32 %v6617_v41, %v6616_v7  ;;  %10792 = vpow2.f32 %v6518_v61  ;;  %v6375_v55 = vrot.slane %v6374_v62, 2  ;;  %v6387_v6 = vmax.f32 %v6385_v5, %v14075_v30  ;;  %v6218_v22 = vpop.f32.mrb[147].mxu1 }
 0x6f6   : > { %10794 = vpow2.f32 %v6520_v34  ;;  %v14136_v39 = vsel %vm2596_vm2, %v14125_v60, -inf  ;;  %v14140_v40 = vsel %vm2596_vm2, %v14128_v19, -inf  ;;  %v14144_v26 = vsel %vm2596_vm2, %v14131_v47, -inf }
 0x6f7   : > { %v6619_v45 = vrot.slane %v6618_v36, 4  ;;  %10796 = vpow2.f32 %v6522_v16  ;;  %v6376_v7 = vmax.f32 %v6374_v62, %v6375_v55  ;;  %v6389_v61 = vmax.f32 %v6387_v6, %v6388_v21 }
 0x6f8   : > { %10798 = vpow2.f32 %v6524_v38  ;;  %v14147_v5 = vadd.f32 %v6202_v53, %v13806_v13  ;;  %v14150_v30 = vadd.f32 %v10199_v28, %v13806_v13  ;;  %v14153_v56 = vadd.f32 %v6215_v4, %v13806_v13 }
 0x6f9   : > { %v6620_v46 = vadd.f32 %v6619_v45, %v6618_v36  ;;  %v6377_v44 = vrot.slane %v6376_v7, 1  ;;  %v6390_v9 = vrot.slane %v6389_v61, 4  ;;  %v14156_v10 = vadd.f32 %v10200_v8, %v13806_v13 }
 0x6fa   : > { %v14158_v50 = vpop.f32.mrb[148].mxu1  ;;  %v6397_v38 = vsel %vm2596_vm2, %v14147_v5, -inf  ;;  %v14164_v53 = vsel %vm2596_vm2, %v14150_v30, -inf  ;;  %v14168_v62 = vsel %vm2596_vm2, %v14153_v56, -inf  ;;  %v14171_v4 = vadd.f32 %v6218_v22, %v13806_v13 }
 0x6fb   : > { %15900 = vst [vmem:[#allocation26_spill] sm:$0xff] %v14156_v10  ;;  %v14173_v21 = vpop.f32.mrb[149].mxu1  ;;  %v6621_v16 = vrot.slane %v6620_v46, 2  ;;  %v6378_v58 = vmax.f32 %v6376_v7, %v6377_v44  ;;  %v6391_v52 = vmax.f32 %v6389_v61, %v6390_v9  ;;  %v6398_v35 = vmax.f32 %v14140_v40, %v6397_v38 }
 0x6fc   : > { %15901 = vst [vmem:[#allocation28_spill] sm:$0xff] %v14171_v4  ;;  %v14176_v20 = vpop.f32.mrb[150].mxu1  ;;  %v14178_v29 = vpop.eup %10786  ;;  %v14182_v18 = vsel %vm2596_vm2, %v14156_v10, -inf  ;;  %v14186_v41 = vadd.f32 %v14171_v4, %v13835_v32  ;;  %v6713_v28 = vmul.f32 %v14122_v1, %v13953_v31  ;;  %v6714_v34 = vmul.f32 %v14122_v1, %v13959_v17 }
 0x6fd   : > { %v14192_v8 = vpop.f32.mrb[151].mxu1  ;;  %v14194_v36 = vpop.eup %10788  ;;  %v6622_v55 = vadd.f32 %v6621_v16, %v6620_v46  ;;  %v6625_v6 = vsel %vm2596_vm2, %v14178_v29, 0.0  ;;  %v6454_v22 = vsub.f32 %v13987_v63, %v6378_v58  ;;  %v6455_v40 = vsub.f32 %v13993_v49, %v6378_v58  ;;  %v14209_v46 = vld [vmem:[%s15437_s5 + $0x34] sm:$0x7] }
 0x6fe   : > { %v14200_v45 = vpop.eup %10790  ;;  %v6456_v7 = vsub.f32 %v13982_v59, %v6378_v58  ;;  %v6457_v31 = vsub.f32 %v13990_v0, %v6378_v58  ;;  %v6458_v17 = vsub.f32 %v14045_v23, %v6378_v58  ;;  %v6459_v61 = vsub.f32 %v14065_v43, %v6378_v58  ;;  %15902 = vst [vmem:[#allocation30_spill] sm:$0xff] %v14209_v46 }
 0x6ff   : > { %v14211_v44 = vpop.eup %10792  ;;  %v6623_v9 = vrot.slane %v6622_v55, 1  ;;  %v6626_v38 = vsel %vm2596_vm2, %v14200_v45, 0.0  ;;  %v6526_v16 = vmul.f32 1.442695, %v6454_v22  ;;  %v6528_v4 = vmul.f32 1.442695, %v6455_v40  ;;  %10377 = vmatprep.subr.msk.bf16.mxu0 %vm6017_vm3, %v14209_v46 }
 0x700   : > { %v14217_v0 = vpop.eup %10794  ;;  %v6627_v23 = vadd.f32 %v6626_v38, %v6625_v6  ;;  %v6628_v43 = vsel %vm2596_vm2, %v14211_v44, 0.0  ;;  %v6530_v58 = vmul.f32 1.442695, %v6456_v7  ;;  %v6532_v49 = vmul.f32 1.442695, %v6457_v31 }
 0x701   : > { %v14221_v59 = vpop.eup %10796  ;;  %v6624_v63 = vadd.f32 %v6623_v9, %v6622_v55  ;;  %v6630_v37 = vsel %vm2596_vm2, %v14217_v0, 0.0  ;;  %10800 = vpow2.f32 %v6526_v16  ;;  %v6534_v22 = vmul.f32 1.442695, %v6458_v17 }
 0x702   : > { %v14225_v40 = vpop.eup %10798  ;;  %v6629_v10 = vadd.f32 %v6628_v43, %v6627_v23  ;;  %v6632_v46 = vsel %vm2596_vm2, %v14221_v59, 0.0  ;;  %10802 = vpow2.f32 %v6528_v4  ;;  %v6536_v6 = vmul.f32 1.442695, %v6459_v61 }
 0x703   : > { %10804 = vrcp.f32 %v6624_v63  ;;  %v6634_v7 = vsel %vm2596_vm2, %v14225_v40, 0.0  ;;  %v6392_v31 = vrot.slane %v6391_v52, 2  ;;  %v6400_v55 = vmax.f32 %v6398_v35, %v14136_v39 }
 0x704   : > { %v6631_v9 = vadd.f32 %v6630_v37, %v6629_v10  ;;  %10806 = vpow2.f32 %v6530_v58  ;;  %v6415_v17 = vmax.f32 %v14164_v53, %v14182_v18  ;;  %v6405_v23 = vsel %vm2596_vm2, %v14186_v41, -inf }
 0x705   : > { %10808 = vpow2.f32 %v6532_v49  ;;  %v6393_v38 = vmax.f32 %v6391_v52, %v6392_v31  ;;  %v6402_v4 = vmax.f32 %v6400_v55, %v14144_v26  ;;  %v6767_v61 = vpack.c.bf16 %v6714_v34, %v6713_v28 }
 0x706   : > { %v6633_v63 = vadd.f32 %v6632_v46, %v6631_v9  ;;  %10810 = vpow2.f32 %v6534_v22  ;;  %v6711_v16 = vmul.f32 %v14122_v1, %v13944_v27  ;;  %v6712_v37 = vmul.f32 %v14122_v1, %v13946_v33 }
 0x707   : > { %10812 = vpow2.f32 %v6536_v6  ;;  %v6394_v39 = vrot.slane %v6393_v38, 1  ;;  %v6404_v10 = vmax.f32 %v6402_v4, %v14168_v62  ;;  %6816 = vrot.lane.b32.xlu1 %v6767_v61, %s10999_s18  ;;  %v14245_v49 = vadd.f32 %v14158_v50, %v13806_v13 }
 0x708   : > { %v6635_v26 = vadd.f32 %v6634_v7, %v6633_v63  ;;  %v6766_v52 = vpack.c.bf16 %v6712_v37, %v6711_v16  ;;  %v6715_v35 = vmul.f32 %v14122_v1, %v13961_v12  ;;  %v6716_v27 = vmul.f32 %v14122_v1, %v13979_v3 }
 0x709   : > { %v6395_v28 = vmax.f32 %v6393_v38, %v6394_v39  ;;  %v6406_v33 = vmax.f32 %v6404_v10, %v6405_v23  ;;  %v14253_v34 = vsel %vm2596_vm2, %v14245_v49, -inf  ;;  %v14257_v62 = vadd.f32 %v14173_v21, %v13806_v13 }
 0x70a   : > { %v6636_v50 = vrot.slane %v6635_v26, 4  ;;  %6814 = vrot.lane.b32.xlu0 %v6766_v52, %s10999_s18  ;;  %v6768_v46 = vpack.c.bf16 %v6716_v27, %v6715_v35  ;;  %v14262_v12 = vadd.f32 %v14176_v20, %v13806_v13  ;;  %v14266_v1 = vadd.f32 %v14192_v8, %v13806_v13 }
 0x70b   : > { %v14268_v3 = vpop.eup %10800  ;;  %v6460_v43 = vsub.f32 %v14030_v11, %v6395_v28  ;;  %v6461_v58 = vsub.f32 %v14049_v51, %v6395_v28  ;;  %v6462_v21 = vsub.f32 %v14068_v57, %v6395_v28  ;;  %v6463_v22 = vsub.f32 %v14078_v54, %v6395_v28 }
 0x70c   : > { %v14274_v6 = vpop.eup %10802  ;;  %v6637_v7 = vadd.f32 %v6636_v50, %v6635_v26  ;;  %v6642_v20 = vsel %vm2596_vm2, %v14268_v3, 0.0  ;;  %v6464_v31 = vsub.f32 %v14061_v24, %v6395_v28  ;;  %v6465_v13 = vsub.f32 %v14088_v42, %v6395_v28 }
 0x70d   : > { %v14280_v8 = vpop.eup %10804  ;;  %v6643_v55 = vsel %vm2596_vm2, %v14274_v6, 0.0  ;;  %v6538_v9 = vmul.f32 1.442695, %v6460_v43  ;;  %v6540_v23 = vmul.f32 1.442695, %v6461_v58  ;;  %v6407_v38 = vrot.slane %v6406_v33, 4 }
 0x70e   : > { %v14284_v4 = vpop.eup %10806  ;;  %v6638_v61 = vrot.slane %v6637_v7, 2  ;;  %v6644_v63 = vadd.f32 %v6643_v55, %v6642_v20  ;;  %v6542_v16 = vmul.f32 1.442695, %v6462_v21  ;;  %v6544_v37 = vmul.f32 1.442695, %v6463_v22  ;;  %6818 = vrot.lane.b32.xlu0 %v6768_v46, %s10999_s18 }
 0x70f   : > { %v14287_v39 = vpop.eup %10808  ;;  %v6645_v42 = vsel %vm2596_vm2, %v14284_v4, 0.0  ;;  %10814 = vpow2.f32 %v6538_v9  ;;  %v6546_v10 = vmul.f32 1.442695, %v6464_v31  ;;  %v6548_v26 = vmul.f32 1.442695, %v6465_v13 }
 0x710   : > { %v14291_v52 = vpop.eup %10810  ;;  %v6639_v35 = vadd.f32 %v6638_v61, %v6637_v7  ;;  %v6646_v27 = vadd.f32 %v6645_v42, %v6644_v63  ;;  %v6647_v28 = vsel %vm2596_vm2, %v14287_v39, 0.0  ;;  %10816 = vpow2.f32 %v6540_v23 }
 0x711   : > { %v14295_v50 = vpop.eup %10812  ;;  %v6649_v46 = vsel %vm2596_vm2, %v14291_v52, 0.0  ;;  %10818 = vpow2.f32 %v6542_v16  ;;  %v6408_v43 = vmax.f32 %v6406_v33, %v6407_v38  ;;  %v6416_v58 = vsel %vm2596_vm2, %v14257_v62, -inf }
 0x712   : > { %v6640_v21 = vrot.slane %v6639_v35, 1  ;;  %v6648_v22 = vadd.f32 %v6647_v28, %v6646_v27  ;;  %v6651_v7 = vsel %vm2596_vm2, %v14295_v50, 0.0  ;;  %10820 = vpow2.f32 %v6544_v37  ;;  %v15904_v28 = vld [vmem:[#allocation22_spill] sm:$0xff] }
 0x713   : > { %10822 = vpow2.f32 %v6546_v10  ;;  %v6409_v20 = vrot.slane %v6408_v43, 2  ;;  %v6417_v31 = vmax.f32 %v6415_v17, %v6416_v58  ;;  %v14308_v13 = vadd.f32 %v14262_v12, %v13835_v32 }
 0x714   : > { %v6641_v33 = vadd.f32 %v6640_v21, %v6639_v35  ;;  %v6650_v55 = vadd.f32 %v6649_v46, %v6648_v22  ;;  %10824 = vpow2.f32 %v6548_v26  ;;  %v6418_v9 = vsel %vm2596_vm2, %v14266_v1, -inf }
 0x715   : > { %v6410_v23 = vmax.f32 %v6408_v43, %v6409_v20  ;;  %v6422_v38 = vsel %vm2596_vm2, %v14308_v13, -inf  ;;  %v6419_v61 = vmax.f32 %v6417_v31, %v6418_v9  ;;  %v6718_v63 = vmul.f32 %v14194_v36, %v14005_v14  ;;  %v15903_v14 = vld [vmem:[#allocation18_spill] sm:$0xff] }
 0x716   : > { %10826 = vrcp.f32 %v6641_v33  ;;  %v6652_v53 = vadd.f32 %v6651_v7, %v6650_v55  ;;  %v6719_v18 = vmul.f32 %v14194_v36, %v14013_v15  ;;  %v6720_v17 = vmul.f32 %v14194_v36, %v14019_v25  ;;  %v15906_v7 = vld [vmem:[#allocation19_spill] sm:$0xff] }
 0x717   : > { %v6411_v16 = vrot.slane %v6410_v23, 1  ;;  %v6421_v37 = vmax.f32 %v6419_v61, %v14253_v34  ;;  %v6721_v42 = vmul.f32 %v14194_v36, %v14026_v2  ;;  %v6722_v10 = vmul.f32 %v14194_v36, %v14032_v48  ;;  %v15905_v34 = vld [vmem:[#allocation25_spill] sm:$0xff] }
 0x718   : > { %v6653_v26 = vrot.slane %v6652_v53, 4  ;;  %v6769_v35 = vpack.c.bf16 %v6719_v18, %v6718_v63  ;;  %v6723_v27 = vmul.f32 %v14194_v36, %v15903_v14  ;;  %v6727_v15 = vmul.f32 %v14280_v8, %v15904_v28 }
 0x719   : > { %v14329_v46 = vpop.eup %10814  ;;  %v6412_v25 = vmax.f32 %v6410_v23, %v6411_v16  ;;  %v6423_v43 = vmax.f32 %v6421_v37, %v6422_v38  ;;  %v6770_v58 = vpack.c.bf16 %v6721_v42, %v6720_v17  ;;  %v6728_v21 = vmul.f32 %v14280_v8, %v15905_v34 }
 0x71a   : > { %v14333_v2 = vpop.eup %10816  ;;  %v6654_v22 = vadd.f32 %v6653_v26, %v6652_v53  ;;  %v6659_v48 = vsel %vm2596_vm2, %v14329_v46, 0.0  ;;  %6820 = vrot.lane.b32.xlu1 %v6769_v35, %s10999_s18  ;;  %v6771_v36 = vpack.c.bf16 %v6723_v27, %v6722_v10  ;;  %v6725_v20 = vmul.f32 %v14280_v8, %v15906_v7 }
 0x71b   : > { %v14340_v31 = vpop.eup %10818  ;;  %v6660_v33 = vsel %vm2596_vm2, %v14333_v2, 0.0  ;;  %v6466_v55 = vsub.f32 %v14128_v19, %v6412_v25  ;;  %v6467_v9 = vsub.f32 %v14147_v5, %v6412_v25  ;;  %v6468_v23 = vsub.f32 %v14125_v60, %v6412_v25  ;;  %6822 = vrot.lane.b32.xlu0 %v6770_v58, %s10999_s18 }
 0x71c   : > { %v14348_v38 = vpop.eup %10820  ;;  %v6655_v61 = vrot.slane %v6654_v22, 2  ;;  %v6661_v63 = vadd.f32 %v6660_v33, %v6659_v48  ;;  %v6662_v53 = vsel %vm2596_vm2, %v14340_v31, 0.0  ;;  %v6469_v18 = vsub.f32 %v14131_v47, %v6412_v25 }
 0x71d   : > { %v14353_v17 = vpop.eup %10822  ;;  %v6664_v16 = vsel %vm2596_vm2, %v14348_v38, 0.0  ;;  %v6470_v37 = vsub.f32 %v14153_v56, %v6412_v25  ;;  %v6471_v42 = vsub.f32 %v14186_v41, %v6412_v25  ;;  %v6550_v10 = vmul.f32 1.442695, %v6466_v55 }
 0x71e   : > { %v14359_v26 = vpop.eup %10824  ;;  %v6656_v35 = vadd.f32 %v6655_v61, %v6654_v22  ;;  %v6663_v14 = vadd.f32 %v6662_v53, %v6661_v63  ;;  %v6666_v27 = vsel %vm2596_vm2, %v14353_v17, 0.0  ;;  %v6552_v28 = vmul.f32 1.442695, %v6467_v9  ;;  %6824 = vrot.lane.b32.xlu1 %v6771_v36, %s10999_s18  ;;  %v15907_v9 = vld [vmem:[#allocation23_spill] sm:$0xff] }
 0x71f   : > { %v6668_v58 = vsel %vm2596_vm2, %v14359_v26, 0.0  ;;  %10828 = vpow2.f32 %v6550_v10  ;;  %v6554_v34 = vmul.f32 1.442695, %v6468_v23  ;;  %v6556_v48 = vmul.f32 1.442695, %v6469_v18  ;;  %v15908_v23 = vld [vmem:[#allocation24_spill] sm:$0xff] }
 0x720   : > { %v10827_v7 = vpop.eup %10826  ;;  %v6657_v33 = vrot.slane %v6656_v35, 1  ;;  %v6665_v41 = vadd.f32 %v6664_v16, %v6663_v14  ;;  %10830 = vpow2.f32 %v6552_v28  ;;  %v6558_v25 = vmul.f32 1.442695, %v6470_v37  ;;  %v15909_v16 = vld [vmem:[#allocation27_spill] sm:$0xff] }
 0x721   : > { %10832 = vpow2.f32 %v6554_v34  ;;  %v6560_v22 = vmul.f32 1.442695, %v6471_v42  ;;  %v6424_v55 = vrot.slane %v6423_v43, 4  ;;  %v6773_v61 = vpack.c.bf16 %v6728_v21, %v6727_v15 }
 0x722   : > { %v6658_v63 = vadd.f32 %v6657_v33, %v6656_v35  ;;  %v6667_v53 = vadd.f32 %v6666_v27, %v6665_v41  ;;  %10834 = vpow2.f32 %v6556_v48  ;;  %v6726_v36 = vmul.f32 %v14280_v8, %v15907_v9  ;;  %v15910_v9 = vld [vmem:[#allocation26_spill] sm:$0xff] }
 0x723   : > { %10836 = vpow2.f32 %v6558_v25  ;;  %v6425_v32 = vmax.f32 %v6423_v43, %v6424_v55  ;;  %6828 = vrot.lane.b32.xlu1 %v6773_v61, %s10999_s18  ;;  %v6729_v18 = vmul.f32 %v14280_v8, %v15908_v23  ;;  %v6730_v37 = vmul.f32 %v14280_v8, %v15909_v16 }
 0x724   : > { %10838 = vrcp.f32 %v6658_v63  ;;  %v6669_v42 = vadd.f32 %v6668_v58, %v6667_v53  ;;  %v6772_v10 = vpack.c.bf16 %v6726_v36, %v6725_v20  ;;  %v6732_v15 = vmul.f32 %v10827_v7, %v14178_v29 }
 0x725   : > { %10840 = vpow2.f32 %v6560_v22  ;;  %v6426_v21 = vrot.slane %v6425_v32, 2  ;;  %v6733_v35 = vmul.f32 %v10827_v7, %v14200_v45  ;;  %v6734_v43 = vmul.f32 %v10827_v7, %v14211_v44 }
 0x726   : > { %v6670_v14 = vrot.slane %v6669_v42, 4  ;;  %6826 = vrot.lane.b32.xlu0 %v6772_v10, %s10999_s18  ;;  %v6735_v27 = vmul.f32 %v10827_v7, %v14217_v0  ;;  %v6736_v8 = vmul.f32 %v10827_v7, %v14221_v59  ;;  %v6737_v58 = vmul.f32 %v10827_v7, %v14225_v40 }
 0x727   : > { %v6427_v28 = vmax.f32 %v6425_v32, %v6426_v21  ;;  %v6775_v34 = vpack.c.bf16 %v6733_v35, %v6732_v15  ;;  %v6774_v48 = vpack.c.bf16 %v6730_v37, %v6729_v18 }
 0x728   : > { %v6671_v20 = vadd.f32 %v6670_v14, %v6669_v42  ;;  %v6776_v32 = vpack.c.bf16 %v6735_v27, %v6734_v43  ;;  %v6777_v7 = vpack.c.bf16 %v6737_v58, %v6736_v8 }
 0x729   : > { %v14380_v29 = vpop.eup %10828  ;;  %v6428_v33 = vrot.slane %v6427_v28, 1  ;;  %6832 = vrot.lane.b32.xlu1 %v6775_v34, %s10999_s18 }
 0x72a   : > { %v14383_v45 = vpop.eup %10830  ;;  %v6672_v41 = vrot.slane %v6671_v20, 2  ;;  %v6676_v44 = vsel %vm2596_vm2, %v14380_v29, 0.0  ;;  %6830 = vrot.lane.b32.xlu0 %v6774_v48, %s10999_s18 }
 0x72b   : > { %v14388_v0 = vpop.eup %10832  ;;  %v6677_v59 = vsel %vm2596_vm2, %v14383_v45, 0.0  ;;  %v6429_v40 = vmax.f32 %v6427_v28, %v6428_v33 }
 0x72c   : > { %v14392_v25 = vpop.eup %10834  ;;  %v6673_v22 = vadd.f32 %v6672_v41, %v6671_v20  ;;  %v6678_v55 = vadd.f32 %v6677_v59, %v6676_v44  ;;  %v6679_v63 = vsel %vm2596_vm2, %v14388_v0, 0.0 }
 0x72d   : > { %v14394_v61 = vpop.eup %10836  ;;  %v6472_v53 = vsub.f32 %v14150_v30, %v6429_v40  ;;  %v6473_v36 = vsub.f32 %v15910_v9, %v6429_v40  ;;  %v6474_v23 = vsub.f32 %v14257_v62, %v6429_v40  ;;  %6836 = vrot.lane.b32.xlu1 %v6777_v7, %s10999_s18  ;;  %v6475_v42 = vsub.f32 %v14266_v1, %v6429_v40 }
 0x72e   : > { %v10839_v18 = vpop.eup %10838  ;;  %v6674_v16 = vrot.slane %v6673_v22, 1  ;;  %v6680_v37 = vadd.f32 %v6679_v63, %v6678_v55  ;;  %6834 = vrot.lane.b32.xlu0 %v6776_v32, %s10999_s18  ;;  %v6681_v15 = vsel %vm2596_vm2, %v14392_v25, 0.0  ;;  %v6476_v21 = vsub.f32 %v14245_v49, %v6429_v40 }
 0x72f   : > { %v14404_v10 = vpop.eup %10840  ;;  %v6562_v35 = vmul.f32 1.442695, %v6472_v53  ;;  %v6564_v14 = vmul.f32 1.442695, %v6473_v36  ;;  %v6477_v28 = vsub.f32 %v14308_v13, %v6429_v40  ;;  %v6566_v34 = vmul.f32 1.442695, %v6474_v23 }
 0x730   : > { %v6675_v43 = vadd.f32 %v6674_v16, %v6673_v22  ;;  %v6682_v27 = vadd.f32 %v6681_v15, %v6680_v37  ;;  %v6683_v8 = vsel %vm2596_vm2, %v14394_v61, 0.0  ;;  %v6685_v58 = vsel %vm2596_vm2, %v14404_v10, 0.0 }
 0x731   : > { %10842 = vpow2.f32 %v6562_v35  ;;  %v6568_v20 = vmul.f32 1.442695, %v6475_v42  ;;  %v6741_v33 = vmul.f32 %v10839_v18, %v14284_v4  ;;  %v6742_v41 = vmul.f32 %v10839_v18, %v14287_v39 }
 0x732   : > { %10844 = vrcp.f32 %v6675_v43  ;;  %v6684_v48 = vadd.f32 %v6683_v8, %v6682_v27  ;;  %v6570_v44 = vmul.f32 1.442695, %v6476_v21  ;;  %v6739_v32 = vmul.f32 %v10839_v18, %v14268_v3 }
 0x733   : > { %10846 = vpow2.f32 %v6564_v14  ;;  %v6740_v13 = vmul.f32 %v10839_v18, %v14274_v6  ;;  %v6572_v40 = vmul.f32 1.442695, %v6477_v28  ;;  %v6779_v7 = vpack.c.bf16 %v6742_v41, %v6741_v33 }
 0x734   : > { %v6686_v59 = vadd.f32 %v6685_v58, %v6684_v48  ;;  %10848 = vpow2.f32 %v6566_v34  ;;  %v6743_v55 = vmul.f32 %v10839_v18, %v14291_v52  ;;  %v6744_v63 = vmul.f32 %v10839_v18, %v14295_v50 }
 0x735   : > { %10850 = vpow2.f32 %v6568_v20  ;;  %v6778_v22 = vpack.c.bf16 %v6740_v13, %v6739_v32  ;;  %6840 = vrot.lane.b32.xlu1 %v6779_v7, %s10999_s18 }
 0x736   : > { %v6687_v53 = vrot.slane %v6686_v59, 4  ;;  %10852 = vpow2.f32 %v6570_v44  ;;  %v6780_v3 = vpack.c.bf16 %v6744_v63, %v6743_v55 }
 0x737   : > { %6838 = vrot.lane.b32.xlu0 %v6778_v22, %s10999_s18  ;;  %10854 = vpow2.f32 %v6572_v40 }
 0x738   : > { %v6688_v4 = vadd.f32 %v6687_v53, %v6686_v59 }
 0x73a   : > { %v6689_v6 = vrot.slane %v6688_v4, 2 }
 0x73b   : > { %v10843_v39 = vpop.eup %10842  ;;  %6842 = vrot.lane.b32.xlu0 %v6780_v3, %s10999_s18 }
 0x73c   : > { %v10845_v36 = vpop.eup %10844  ;;  %v6690_v23 = vadd.f32 %v6689_v6, %v6688_v4  ;;  %v6693_v16 = vsel %vm2596_vm2, %v10843_v39, 0.0 }
 0x73d   : > { %v10847_v52 = vpop.eup %10846  ;;  %v6746_v50 = vmul.f32 %v10845_v36, %v14329_v46  ;;  %v6747_v18 = vmul.f32 %v10845_v36, %v14333_v2  ;;  %v6748_v37 = vmul.f32 %v10845_v36, %v14340_v31  ;;  %v6749_v42 = vmul.f32 %v10845_v36, %v14348_v38 }
 0x73e   : > { %v10849_v15 = vpop.eup %10848  ;;  %v6691_v21 = vrot.slane %v6690_v23, 1  ;;  %v6694_v35 = vsel %vm2596_vm2, %v10847_v52, 0.0  ;;  %v6750_v14 = vmul.f32 %v10845_v36, %v14353_v17  ;;  %v6751_v8 = vmul.f32 %v10845_v36, %v14359_v26 }
 0x73f   : > { %v10851_v43 = vpop.eup %10850  ;;  %v6695_v27 = vadd.f32 %v6694_v35, %v6693_v16  ;;  %v6781_v28 = vpack.c.bf16 %v6747_v18, %v6746_v50  ;;  %v6782_v34 = vpack.c.bf16 %v6749_v42, %v6748_v37  ;;  %v6696_v46 = vsel %vm2596_vm2, %v10849_v15, 0.0 }
 0x740   : > { %v6692_v58 = vadd.f32 %v6691_v21, %v6690_v23  ;;  %v10853_v2 = vpop.eup %10852  ;;  %v6698_v31 = vsel %vm2596_vm2, %v10851_v43, 0.0  ;;  %v6783_v48 = vpack.c.bf16 %v6751_v8, %v6750_v14  ;;  %v15913_v8 = vld [vmem:[#allocation56_spill] sm:$0xff] }
 0x741   : > { %v6697_v20 = vadd.f32 %v6696_v46, %v6695_v27  ;;  %6844 = vrot.lane.b32.xlu1 %v6781_v28, %s10999_s18  ;;  %6846 = vrot.lane.b32.xlu0 %v6782_v34, %s10999_s18  ;;  %v10855_v38 = vpop.eup %10854  ;;  %v6700_v33 = vsel %vm2596_vm2, %v10853_v2, 0.0  ;;  %v15911_v27 = vld [vmem:[#allocation30_spill] sm:$0xff] }
 0x742   : > { %10856 = vrcp.f32 %v6692_v58  ;;  %v6702_v26 = vsel %vm2596_vm2, %v10855_v38, 0.0  ;;  %v7684_v28 = vsel %vm6017_vm3, %v15911_v27, 0  ;;  %v10513_v27 = vld [vmem:[%s11568_s15 + $0x148] sm:$0xff]  }
 0x743   : > { %v6699_v17 = vadd.f32 %v6698_v31, %v6697_v20 }
 0x745   : > { %v6701_v41 = vadd.f32 %v6700_v33, %v6699_v17  ;;  %6848 = vrot.lane.b32.xlu1 %v6783_v48, %s10999_s18 }
 0x747   : > { %v6703_v44 = vadd.f32 %v6702_v26, %v6701_v41 }
 0x749   : > { %v6704_v32 = vrot.slane %v6703_v44, 4 }
 0x74b   : > { %v6705_v13 = vadd.f32 %v6704_v32, %v6703_v44 }
 0x74c   : > { %v10857_v59 = vpop.eup %10856 }
 0x74d   : > { %v6706_v40 = vrot.slane %v6705_v13, 2  ;;  %v6755_v7 = vmul.f32 %v10857_v59, %v14388_v0  ;;  %v6756_v22 = vmul.f32 %v10857_v59, %v14392_v25  ;;  %v6753_v55 = vmul.f32 %v10857_v59, %v14380_v29 }
 0x74e   : > { %v6754_v63 = vmul.f32 %v10857_v59, %v14383_v45  ;;  %v6757_v6 = vmul.f32 %v10857_v59, %v14394_v61  ;;  %v6758_v36 = vmul.f32 %v10857_v59, %v14404_v10 }
 0x74f   : > { %v6707_v53 = vadd.f32 %v6706_v40, %v6705_v13  ;;  %v6785_v4 = vpack.c.bf16 %v6756_v22, %v6755_v7 }
 0x750   : > { %v6784_v3 = vpack.c.bf16 %v6754_v63, %v6753_v55  ;;  %v6786_v0 = vpack.c.bf16 %v6758_v36, %v6757_v6  ;;  %v10497_v36 = vld [vmem:[%s11568_s15 + $0xc8] sm:$0xff]  }
 0x751   : > { %v6708_v23 = vrot.slane %v6707_v53, 1  ;;  %6852 = vrot.lane.b32.xlu1 %v6785_v4, %s10999_s18 }
 0x752   : > { %6850 = vrot.lane.b32.xlu0 %v6784_v3, %s10999_s18  ;;  %v10496_v3 = vld [vmem:[%s11568_s15 + $0xc0] sm:$0xff]  }
 0x753   : > { %v6709_v16 = vadd.f32 %v6708_v23, %v6707_v53  ;;  %v10498_v23 = vld [vmem:[%s11568_s15 + $0xd0] sm:$0xff]  }
 0x755   : > { %10858 = vrcp.f32 %v6709_v16  ;;  %v10499_v16 = vld [vmem:[%s11568_s15 + $0xd8] sm:$0xff]  }
 0x756   : > { %6854 = vrot.lane.b32.xlu0 %v6786_v0, %s10999_s18  ;;  %v10500_v0 = vld [vmem:[%s11568_s15 + $0xe0] sm:$0xff]  }
 0x75f   : > { %v10859_v29 = vpop.eup %10858 }
 0x760   : > { %v6760_v25 = vmul.f32 %v10859_v29, %v10843_v39  ;;  %v6761_v45 = vmul.f32 %v10859_v29, %v10847_v52  ;;  %v6762_v50 = vmul.f32 %v10859_v29, %v10849_v15  ;;  %v6763_v18 = vmul.f32 %v10859_v29, %v10851_v43 }
 0x761   : > { %v6764_v61 = vmul.f32 %v10859_v29, %v10853_v2  ;;  %v6765_v21 = vmul.f32 %v10859_v29, %v10855_v38  ;;  %v15912_v52 = vmov 0.0   ;;  %v10501_v29 = vld [vmem:[%s11568_s15 + $0xe8] sm:$0xff]  }
 0x762   : > { %v6787_v37 = vpack.c.bf16 %v6761_v45, %v6760_v25  ;;  %v6788_v42 = vpack.c.bf16 %v6763_v18, %v6762_v50  ;;  %v10502_v25 = vld [vmem:[%s11568_s15 + $0xf0] sm:$0xff]   ;;  %v10503_v45 = vld [vmem:[%s11568_s15 + $0xf8] sm:$0xff]   ;;  %v10504_v50 = vld [vmem:[%s11568_s15 + $0x100] sm:$0xff]  }
 0x763   : > { %v6789_v10 = vpack.c.bf16 %v6765_v21, %v6764_v61  ;;  %v10505_v18 = vld [vmem:[%s11568_s15 + $0x108] sm:$0xff]   ;;  %v10508_v61 = vld [vmem:[%s11568_s15 + $0x120] sm:$0xff]  }
 0x764   : > { %6856 = vrot.lane.b32.xlu1 %v6787_v37, %s10999_s18  ;;  %6858 = vrot.lane.b32.xlu0 %v6788_v42, %s10999_s18  ;;  %v10506_v37 = vld [vmem:[%s11568_s15 + $0x110] sm:$0xff]   ;;  %v10507_v42 = vld [vmem:[%s11568_s15 + $0x118] sm:$0xff]  }
 0x765   : > { %v10509_v21 = vld [vmem:[%s11568_s15 + $0x128] sm:$0xff]  }
 0x768   : > { %6860 = vrot.lane.b32.xlu1 %v6789_v10, %s10999_s18  ;;  %v10510_v10 = vld [vmem:[%s11568_s15 + $0x130] sm:$0xff]  }
 0x779   : > { %v6817_v35 = vpop.permute.xlu1 %6816 }
 0x77c   : > { %v6815_v14 = vpop.permute.xlu0 %6814 }
 0x77d   : > { %10207 = vmatprep.mubr.msk.bf16.mxu0 %vm2006_vm1, %v6815_v14  ;;  %v10512_v14 = vld [vmem:[%s11568_s15 + $0x140] sm:$0xff]  }
 0x77e   : > { %10208 = vmatmul.mubr.msk.bf16.vlgmr.msra.gmra.mrb[104].mxu0 %vm2006_vm1, %v6817_v35  ;;  %v10511_v35 = vld [vmem:[%s11568_s15 + $0x138] sm:$0xff]  }
 0x77f   : > { %10264 = vmatpush3.bf16.msra.mxu0 %v7684_v28  ;;  %v10514_v28 = vld [vmem:[%s11568_s15 + $0x150] sm:$0xff]  }
 0x780   : > { %v6819_v39 = vpop.permute.xlu0 %6818  ;;  %10363 = vmatprep.subr.bf16.mxu0 %v15912_v52 }
 0x781   : > { %10211 = vmatprep.mubr.msk.bf16.mxu0 %vm2006_vm1, %v6819_v39  ;;  %v10515_v39 = vld [vmem:[%s11568_s15 + $0x158] sm:$0xff]  }
 0x78c   : > { %v6821_v15 = vpop.permute.xlu1 %6820 }
 0x78d   : > { %v5763_v43 = vpop.f32.mrb[100].mxu0  ;;  %v6823_v34 = vpop.permute.xlu0 %6822  ;;  %10212 = vmatmul.mubr.msk.bf16.gmra.mrb[108].mxu0 %vm2006_vm1, %v6821_v15  ;;  %v10516_v15 = vld [vmem:[%s11568_s15 + $0x160] sm:$0xff]  }
 0x78e   : > { %v14458_v58 = vadd.f32 %v5763_v43, %v15913_v8  ;;  %v10153_v46 = vpop.f32.mrb[101].mxu0  ;;  %10215 = vmatprep.mubr.msk.bf16.mxu0 %vm2006_vm1, %v6823_v34  ;;  %v10517_v43 = vld [vmem:[%s11568_s15 + $0x168] sm:$0xff]   ;;  %v10518_v34 = vld [vmem:[%s11568_s15 + $0x170] sm:$0xff]   ;;  %v10519_v8 = vld [vmem:[%s11568_s15 + $0x178] sm:$0xff]  }
 0x78f   : > { %v5766_v2 = vpop.f32.mrb[102].mxu0  ;;  %v10520_v46 = vld [vmem:[%s15437_s5 + $0x5c] sm:$0xff]  }
 0x790   : > { %15914 = vst [vmem:[#allocation29_spill] sm:$0xff] %v14458_v58  ;;  %v10154_v20 = vpop.f32.mrb[103].mxu0  ;;  %v6825_v31 = vpop.permute.xlu1 %6824  ;;  %10256 = vmatpush3.bf16.msra.mxu1 %v10520_v46 }
 0x791   : > { %10257 = vmatprep.subr.bf16.mxu1 %v15912_v52 }
 0x795   : > { %10216 = vmatmul.mubr.msk.bf16.gmra.mrb[112].mxu0 %vm2006_vm1, %v6825_v31  ;;  %v6829_v17 = vpop.permute.xlu1 %6828  ;;  %v15915_v31 = vld [vmem:[#allocation53_spill] sm:$0xff] }
 0x798   : > { %v6827_v38 = vpop.permute.xlu0 %6826 }
 0x799   : > { %10219 = vmatprep.mubr.msk.bf16.mxu0 %vm2006_vm1, %v6827_v38 }
 0x79b   : > { %v6833_v33 = vpop.permute.xlu1 %6832 }
 0x79c   : > { %v6831_v48 = vpop.permute.xlu0 %6830 }
 0x79d   : > { %10220 = vmatmul.mubr.msk.bf16.gmra.mrb[116].mxu0 %vm2006_vm1, %v6829_v17 }
 0x79e   : > { %10223 = vmatprep.mubr.msk.bf16.mxu0 %vm2006_vm1, %v6831_v48 }
 0x79f   : > { %v6837_v44 = vpop.permute.xlu1 %6836 }
 0x7a0   : > { %v6835_v41 = vpop.permute.xlu0 %6834 }
 0x7a5   : > { %10224 = vmatmul.mubr.msk.bf16.gmra.mrb[120].mxu0 %vm2006_vm1, %v6833_v33  ;;  %v10521_v33 = vld [vmem:[%s15437_s5 + $0x64] sm:$0xff]  }
 0x7a6   : > { %10227 = vmatprep.mubr.msk.bf16.mxu0 %vm2006_vm1, %v6835_v41  ;;  %v15916_v41 = vld [vmem:[#allocation54_spill] sm:$0xff]  ;;  %10258 = vmatpush3.bf16.msra.mxu1 %v10521_v33 }
 0x7a7   : > { %v6841_v13 = vpop.permute.xlu1 %6840 }
 0x7a9   : > { %v6839_v26 = vpop.permute.xlu0 %6838 }
 0x7ad   : > { %10228 = vmatmul.mubr.msk.bf16.gmra.mrb[124].mxu0 %vm2006_vm1, %v6837_v44  ;;  %v6843_v32 = vpop.permute.xlu0 %6842  ;;  %v15917_v44 = vld [vmem:[#allocation57_spill] sm:$0xff] }
 0x7ae   : > { %10231 = vmatprep.mubr.msk.bf16.mxu0 %vm2006_vm1, %v6839_v26 }
 0x7b3   : > { %v6845_v59 = vpop.permute.xlu1 %6844  ;;  %v6847_v40 = vpop.permute.xlu0 %6846 }
 0x7b5   : > { %10232 = vmatmul.mubr.msk.bf16.gmra.mrb[128].mxu0 %vm2006_vm1, %v6841_v13 }
 0x7b6   : > { %10235 = vmatprep.mubr.msk.bf16.mxu0 %vm2006_vm1, %v6843_v32 }
 0x7b7   : > { %v6849_v7 = vpop.permute.xlu1 %6848 }
 0x7bd   : > { %10236 = vmatmul.mubr.msk.bf16.gmra.mrb[132].mxu0 %vm2006_vm1, %v6845_v59  ;;  %v15918_v59 = vld [vmem:[#allocation59_spill] sm:$0xff] }
 0x7be   : > { %10239 = vmatprep.mubr.msk.bf16.mxu0 %vm2006_vm1, %v6847_v40 }
 0x7c3   : > { %v6853_v63 = vpop.permute.xlu1 %6852 }
 0x7c4   : > { %v6851_v22 = vpop.permute.xlu0 %6850 }
 0x7c5   : > { %10240 = vmatmul.mubr.msk.bf16.gmra.mrb[136].mxu0 %vm2006_vm1, %v6849_v7 }
 0x7c6   : > { %10243 = vmatprep.mubr.msk.bf16.mxu0 %vm2006_vm1, %v6851_v22  ;;  %v10973_v22 = vld [vmem:[%s15437_s5 + $0x38] sm:$0x3] }
 0x7c7   : > { %10378 = vmatprep.subr.msk.bf16.mxu1 %vm2079_vm0, %v10973_v22 }
 0x7c8   : > { %v6855_v55 = vpop.permute.xlu0 %6854 }
 0x7cd   : > { %10244 = vmatmul.mubr.msk.bf16.gmra.mrb[140].mxu0 %vm2006_vm1, %v6853_v63 }
 0x7ce   : > { %10247 = vmatprep.mubr.msk.bf16.mxu0 %vm2006_vm1, %v6855_v55 }
 0x7d6   : > { %v6857_v53 = vpop.permute.xlu1 %6856  ;;  %v6859_v4 = vpop.permute.xlu0 %6858 }
 0x7d7   : > { %10248 = vmatmul.mubr.msk.bf16.gmra.mrb[144].mxu0 %vm2006_vm1, %v6857_v53 }
 0x7d8   : > { %10251 = vmatprep.mubr.msk.bf16.mxu0 %vm2006_vm1, %v6859_v4 }
 0x7da   : > { %v6861_v6 = vpop.permute.xlu1 %6860 }
 0x7df   : > { %10252 = vmatmul.mubr.msk.bf16.gmra.mrb[148].mxu0 %vm2006_vm1, %v6861_v6 }
 0x7e0   : > { %10265 = vmatprep.mubr.msk.bf16.mxu0 %vm1596_vm5, %v10496_v3 }
 0x7e7   : > { %10266 = vmatmul.mubr.msk.bf16.vlgmr.msra.gmra.mrb[152].mxu0 %vm1596_vm5, %v10497_v36  ;;  %v15919_v36 = vld [vmem:[#allocation35_spill] sm:$0xff] }
 0x7e8   : > { %10269 = vmatprep.mubr.msk.bf16.mxu0 %vm1596_vm5, %v10498_v23 }
 0x7ef   : > { %10270 = vmatmul.mubr.msk.bf16.gmra.mrb[156].mxu0 %vm1596_vm5, %v10499_v16 }
 0x7f0   : > { %10273 = vmatprep.mubr.msk.bf16.mxu0 %vm1596_vm5, %v10500_v0  ;;  %v15920_v0 = vld [vmem:[#allocation61_spill] sm:$0xff] }
 0x7f7   : > { %10274 = vmatmul.mubr.msk.bf16.gmra.mrb[160].mxu0 %vm1596_vm5, %v10501_v29 }
 0x7f8   : > { %10277 = vmatprep.mubr.msk.bf16.mxu0 %vm1596_vm5, %v10502_v25 }
 0x7ff   : > { %10278 = vmatmul.mubr.msk.bf16.gmra.mrb[164].mxu0 %vm1596_vm5, %v10503_v45  ;;  %v15921_v45 = vld [vmem:[#allocation62_spill] sm:$0xff] }
 0x800   : > { %10281 = vmatprep.mubr.msk.bf16.mxu0 %vm1596_vm5, %v10504_v50 }
 0x807   : > { %10282 = vmatmul.mubr.msk.bf16.gmra.mrb[168].mxu0 %vm1596_vm5, %v10505_v18 }
 0x808   : > { %10285 = vmatprep.mubr.msk.bf16.mxu0 %vm1596_vm5, %v10506_v37 }
 0x80f   : > { %10286 = vmatmul.mubr.msk.bf16.gmra.mrb[172].mxu0 %vm1596_vm5, %v10507_v42  ;;  %v15922_v42 = vld [vmem:[#allocation33_spill] sm:$0xff] }
 0x810   : > { %10289 = vmatprep.mubr.msk.bf16.mxu0 %vm1596_vm5, %v10508_v61 }
 0x817   : > { %10290 = vmatmul.mubr.msk.bf16.gmra.mrb[176].mxu0 %vm1596_vm5, %v10509_v21 }
 0x818   : > { %10293 = vmatprep.mubr.msk.bf16.mxu0 %vm1596_vm5, %v10510_v10 }
 0x81f   : > { %10294 = vmatmul.mubr.msk.bf16.gmra.mrb[180].mxu0 %vm1596_vm5, %v10511_v35 }
 0x820   : > { %10297 = vmatprep.mubr.msk.bf16.mxu0 %vm1596_vm5, %v10512_v14 }
 0x827   : > { %10298 = vmatmul.mubr.msk.bf16.gmra.mrb[184].mxu0 %vm1596_vm5, %v10513_v27 }
 0x828   : > { %10301 = vmatprep.mubr.msk.bf16.mxu0 %vm1596_vm5, %v10514_v28 }
 0x82f   : > { %10302 = vmatmul.mubr.msk.bf16.gmra.mrb[188].mxu0 %vm1596_vm5, %v10515_v39 }
 0x830   : > { %10305 = vmatprep.mubr.msk.bf16.mxu0 %vm1596_vm5, %v10516_v15 }
 0x837   : > { %10306 = vmatmul.mubr.msk.bf16.gmra.mrb[192].mxu0 %vm1596_vm5, %v10517_v43 }
 0x838   : > { %10309 = vmatprep.mubr.msk.bf16.mxu0 %vm1596_vm5, %v10518_v34  ;;  %v15923_v34 = vld [vmem:[#allocation37_spill] sm:$0xff] }
 0x83f   : > { %10310 = vmatmul.mubr.msk.bf16.gmra.mrb[196].mxu0 %vm1596_vm5, %v10519_v8 }
 0x840   : > { %10367 = vmatprep.mubr.msk.bf16.mxu0 %vm11001_vm4, %v15912_v52 }
 0x851   : > { %v10209_v2 = vpop.f32.mrb[104].mxu0 }
 0x852   : > { %v6968_v20 = vpop.f32.mrb[105].mxu0  ;;  %v7161_v26 = vmul.f32 %v10209_v2, %v15916_v41 }
 0x853   : > { %v7159_v38 = vmul.f32 %v6968_v20, %v15915_v31  ;;  %v10210_v17 = vpop.f32.mrb[106].mxu0  ;;  %v15924_v31 = vld [vmem:[#allocation51_spill] sm:$0xff] }
 0x854   : > { %v6971_v48 = vpop.f32.mrb[107].mxu0  ;;  %v7162_v40 = vmul.f32 %v10210_v17, %v15918_v59  ;;  %v7210_v63 = vsel %vm3513_vm8, %v7161_v26, 0.0  ;;  %v15926_v26 = vld [vmem:[#allocation38_spill] sm:$0xff] }
 0x855   : > { %v7160_v32 = vmul.f32 %v6971_v48, %v15917_v44  ;;  %v7207_v13 = vsel %vm3513_vm8, %v7159_v38, 0.0  ;;  %v15925_v48 = vld [vmem:[#allocation60_spill] sm:$0xff] }
 0x856   : > { %v7212_v4 = vsel %vm3513_vm8, %v7162_v40, 0.0 }
 0x857   : > { %v7208_v7 = vsel %vm3513_vm8, %v7160_v32, 0.0 }
 0x858   : > { %v7209_v55 = vadd.f32 %v7208_v7, %v7207_v13 }
 0x85a   : > { %v7211_v53 = vadd.f32 %v7210_v63, %v7209_v55 }
 0x85c   : > { %v7213_v3 = vadd.f32 %v7212_v4, %v7211_v53  ;;  %v15927_v53 = vld [vmem:[#allocation41_spill] sm:$0xff] }
 0x860   : > { %v10213_v6 = vpop.f32.mrb[108].mxu0 }
 0x861   : > { %v7165_v23 = vmul.f32 %v10213_v6, %v15919_v36  ;;  %v6984_v16 = vpop.f32.mrb[109].mxu0 }
 0x862   : > { %v7163_v29 = vmul.f32 %v6984_v16, %v15920_v0  ;;  %v10214_v25 = vpop.f32.mrb[110].mxu0  ;;  %v15928_v16 = vld [vmem:[#allocation58_spill] sm:$0xff] }
 0x863   : > { %v7166_v50 = vmul.f32 %v10214_v25, %v15921_v45  ;;  %v6987_v18 = vpop.f32.mrb[111].mxu0  ;;  %v7224_v21 = vsel %vm3513_vm8, %v7165_v23, 0.0 }
 0x864   : > { %v7214_v37 = vsel %vm3513_vm8, %v7163_v29, 0.0  ;;  %v7164_v61 = vmul.f32 %v6987_v18, %v15922_v42  ;;  %v15929_v29 = vld [vmem:[#allocation39_spill] sm:$0xff]  ;;  %v15930_v18 = vld [vmem:[#allocation49_spill] sm:$0xff] }
 0x865   : > { %v7215_v10 = vadd.f32 %v7214_v37, %v7213_v3  ;;  %v7225_v35 = vsel %vm3513_vm8, %v7166_v50, 0.0 }
 0x866   : > { %v7226_v14 = vadd.f32 %v7225_v35, %v7224_v21  ;;  %v7216_v27 = vsel %vm3513_vm8, %v7164_v61, 0.0 }
 0x867   : > { %v7217_v28 = vadd.f32 %v7216_v27, %v7215_v10 }
 0x868   : > { %v10217_v39 = vpop.f32.mrb[112].mxu0 }
 0x869   : > { %v7218_v15 = vrot.slane %v7217_v28, 4  ;;  %v7000_v43 = vpop.f32.mrb[113].mxu0  ;;  %v7169_v38 = vmul.f32 %v10217_v39, %v15924_v31  ;;  %v15931_v39 = vld [vmem:[#allocation10_spill] sm:$0xff] }
 0x86a   : > { %v7167_v8 = vmul.f32 %v7000_v43, %v15923_v34  ;;  %v10218_v46 = vpop.f32.mrb[114].mxu0 }
 0x86b   : > { %v7219_v2 = vadd.f32 %v7218_v15, %v7217_v28  ;;  %v7003_v20 = vpop.f32.mrb[115].mxu0  ;;  %v7170_v44 = vmul.f32 %v10218_v46, %v15926_v26  ;;  %v7231_v40 = vsel %vm3513_vm8, %v7169_v38, 0.0  ;;  %v15934_v26 = vld [vmem:[#allocation8_spill] sm:$0xff] }
 0x86c   : > { %v7227_v17 = vsel %vm3513_vm8, %v7167_v8, 0.0  ;;  %v7168_v33 = vmul.f32 %v7003_v20, %v15925_v48  ;;  %v15932_v8 = vld [vmem:[#allocation43_spill] sm:$0xff] }
 0x86d   : > { %v7228_v41 = vadd.f32 %v7227_v17, %v7226_v14  ;;  %v7220_v13 = vrot.slane %v7219_v2, 2  ;;  %v7233_v63 = vsel %vm3513_vm8, %v7170_v44, 0.0  ;;  %v15933_v17 = vld [vmem:[#allocation46_spill] sm:$0xff] }
 0x86e   : > { %v7229_v32 = vsel %vm3513_vm8, %v7168_v33, 0.0 }
 0x86f   : > { %v7230_v59 = vadd.f32 %v7229_v32, %v7228_v41  ;;  %v7221_v6 = vadd.f32 %v7220_v13, %v7219_v2 }
 0x870   : > { %v10221_v7 = vpop.f32.mrb[116].mxu0 }
 0x871   : > { %v7232_v22 = vadd.f32 %v7231_v40, %v7230_v59  ;;  %v7016_v55 = vpop.f32.mrb[117].mxu0  ;;  %v7173_v0 = vmul.f32 %v10221_v7, %v15928_v16  ;;  %v7222_v61 = vrot.slane %v7221_v6, 1 }
 0x872   : > { %v7171_v4 = vmul.f32 %v7016_v55, %v15927_v53  ;;  %v10222_v3 = vpop.f32.mrb[118].mxu0 }
 0x873   : > { %v7234_v36 = vadd.f32 %v7233_v63, %v7232_v22  ;;  %v7019_v23 = vpop.f32.mrb[119].mxu0  ;;  %v7174_v37 = vmul.f32 %v10222_v3, %v15930_v18  ;;  %v7244_v35 = vsel %vm3513_vm8, %v7173_v0, 0.0  ;;  %v7223_v20 = vadd.f32 %v7222_v61, %v7221_v6  ;;  %v15936_v18 = vld [vmem:[#allocation9_spill] sm:$0xff]  ;;  %v15937_v61 = vld [vmem:[#allocation11_spill] sm:$0xff] }
 0x874   : > { %v7172_v25 = vmul.f32 %v7019_v23, %v15929_v29  ;;  %v7241_v50 = vsel %vm3513_vm8, %v7171_v4, 0.0  ;;  %v15935_v23 = vld [vmem:[#allocation7_spill] sm:$0xff] }
 0x875   : > { %v7235_v45 = vrot.slane %v7234_v36, 4  ;;  %v7246_v34 = vsel %vm3513_vm8, %v7174_v37, 0.0  ;;  %v7347_v55 = vpack.c.bf16 %v7223_v20, %v7223_v20 }
 0x876   : > { %v7242_v42 = vsel %vm3513_vm8, %v7172_v25, 0.0 }
 0x877   : > { %v7236_v21 = vadd.f32 %v7235_v45, %v7234_v36  ;;  %v7243_v10 = vadd.f32 %v7242_v42, %v7241_v50  ;;  %v7363_v29 = vunpack.c.l.b16 %v7347_v55  ;;  %v15942_v55 = vld [vmem:[#allocation16_spill] sm:$0xff] }
 0x878   : > { %v10225_v14 = vpop.f32.mrb[120].mxu0 }
 0x879   : > { %v7237_v27 = vrot.slane %v7236_v21, 2  ;;  %v7245_v28 = vadd.f32 %v7244_v35, %v7243_v10  ;;  %v7177_v15 = vmul.f32 %v10225_v14, %v15931_v39  ;;  %v7032_v43 = vpop.f32.mrb[121].mxu0 }
 0x87a   : > { %v7175_v46 = vmul.f32 %v7032_v43, %v15932_v8  ;;  %v10226_v2 = vpop.f32.mrb[122].mxu0 }
 0x87b   : > { %v7238_v31 = vadd.f32 %v7237_v27, %v7236_v21  ;;  %v7247_v38 = vadd.f32 %v7246_v34, %v7245_v28  ;;  %v7178_v48 = vmul.f32 %v10226_v2, %v15933_v17  ;;  %v7035_v33 = vpop.f32.mrb[123].mxu0  ;;  %v7258_v13 = vsel %vm3513_vm8, %v7177_v15, 0.0  ;;  %v15938_v27 = vld [vmem:[#allocation12_spill] sm:$0xff] }
 0x87c   : > { %v7248_v41 = vsel %vm3513_vm8, %v7175_v46, 0.0  ;;  %v7176_v44 = vmul.f32 %v7035_v33, %v15934_v26 }
 0x87d   : > { %v7239_v32 = vrot.slane %v7238_v31, 1  ;;  %v7249_v59 = vadd.f32 %v7248_v41, %v7247_v38  ;;  %v7259_v40 = vsel %vm3513_vm8, %v7178_v48, 0.0  ;;  %v15939_v38 = vld [vmem:[#allocation14_spill] sm:$0xff] }
 0x87e   : > { %v7260_v7 = vadd.f32 %v7259_v40, %v7258_v13  ;;  %v7250_v22 = vsel %vm3513_vm8, %v7176_v44, 0.0  ;;  %v15940_v44 = vld [vmem:[#allocation13_spill] sm:$0xff]  ;;  %v15941_v13 = vld [vmem:[#allocation15_spill] sm:$0xff] }
 0x87f   : > { %v7240_v63 = vadd.f32 %v7239_v32, %v7238_v31  ;;  %v7251_v53 = vadd.f32 %v7250_v22, %v7249_v59 }
 0x880   : > { %v10229_v4 = vpop.f32.mrb[124].mxu0 }
 0x881   : > { %v7348_v3 = vpack.c.bf16 %v7240_v63, %v7240_v63  ;;  %v7252_v6 = vrot.slane %v7251_v53, 4  ;;  %v7048_v36 = vpop.f32.mrb[125].mxu0  ;;  %v7181_v37 = vmul.f32 %v10229_v4, %v15936_v18  ;;  %v15943_v18 = vld [vmem:[#allocation17_spill] sm:$0xff] }
 0x882   : > { %v7179_v16 = vmul.f32 %v7048_v36, %v15935_v23  ;;  %v10230_v0 = vpop.f32.mrb[126].mxu0 }
 0x883   : > { %v7364_v25 = vunpack.c.l.b16 %v7348_v3  ;;  %v7253_v45 = vadd.f32 %v7252_v6, %v7251_v53  ;;  %v7051_v50 = vpop.f32.mrb[127].mxu0  ;;  %v7182_v28 = vmul.f32 %v10230_v0, %v15938_v27  ;;  %v7265_v34 = vsel %vm3513_vm8, %v7181_v37, 0.0 }
 0x884   : > { %v7261_v42 = vsel %vm3513_vm8, %v7179_v16, 0.0  ;;  %v7180_v21 = vmul.f32 %v7051_v50, %v15937_v61 }
 0x885   : > { %v7254_v10 = vrot.slane %v7253_v45, 2  ;;  %v7371_v35 = vsel %vm3678_vm9, %v7364_v25, %v7363_v29  ;;  %v7262_v14 = vadd.f32 %v7261_v42, %v7260_v7  ;;  %v7267_v31 = vsel %vm3513_vm8, %v7182_v28, 0.0  ;;  %v15944_v28 = vld [vmem:[#allocation20_spill] sm:$0xff] }
 0x886   : > { %v7263_v39 = vsel %vm3513_vm8, %v7180_v21, 0.0 }
 0x887   : > { %v7255_v15 = vadd.f32 %v7254_v10, %v7253_v45  ;;  %v7264_v43 = vadd.f32 %v7263_v39, %v7262_v14 }
 0x888   : > { %v10233_v8 = vpop.f32.mrb[128].mxu0 }
 0x889   : > { %v7256_v46 = vrot.slane %v7255_v15, 1  ;;  %v7266_v2 = vadd.f32 %v7265_v34, %v7264_v43  ;;  %v7064_v20 = vpop.f32.mrb[129].mxu0  ;;  %v7185_v32 = vmul.f32 %v10233_v8, %v15940_v44 }
 0x88a   : > { %v7183_v17 = vmul.f32 %v7064_v20, %v15939_v38  ;;  %v10234_v48 = vpop.f32.mrb[130].mxu0 }
 0x88b   : > { %v7257_v33 = vadd.f32 %v7256_v46, %v7255_v15  ;;  %v7268_v41 = vadd.f32 %v7267_v31, %v7266_v2  ;;  %v7067_v26 = vpop.f32.mrb[131].mxu0  ;;  %v7186_v63 = vmul.f32 %v10234_v48, %v15942_v55  ;;  %v7278_v36 = vsel %vm3513_vm8, %v7185_v32, 0.0 }
 0x88c   : > { %v7184_v59 = vmul.f32 %v7067_v26, %v15941_v13  ;;  %v7275_v22 = vsel %vm3513_vm8, %v7183_v17, 0.0 }
 0x88d   : > { %v7349_v40 = vpack.c.bf16 %v7257_v33, %v7257_v33  ;;  %v7269_v7 = vrot.slane %v7268_v41, 4  ;;  %v7280_v50 = vsel %vm3513_vm8, %v7186_v63, 0.0 }
 0x88e   : > { %v7276_v53 = vsel %vm3513_vm8, %v7184_v59, 0.0 }
 0x88f   : > { %v7365_v4 = vunpack.c.l.b16 %v7349_v40  ;;  %v7270_v3 = vadd.f32 %v7269_v7, %v7268_v41  ;;  %v7277_v6 = vadd.f32 %v7276_v53, %v7275_v22  ;;  %v15945_v22 = vld [vmem:[#allocation21_spill] sm:$0xff] }
 0x890   : > { %v10237_v23 = vpop.f32.mrb[132].mxu0 }
 0x891   : > { %v7372_v16 = vsel %vm3680_vm10, %v7365_v4, %v7371_v35  ;;  %v7271_v0 = vrot.slane %v7270_v3, 2  ;;  %v7279_v29 = vadd.f32 %v7278_v36, %v7277_v6  ;;  %v7189_v25 = vmul.f32 %v10237_v23, %v14030_v11  ;;  %v7080_v45 = vpop.f32.mrb[133].mxu0 }
 0x892   : > { %v7187_v37 = vmul.f32 %v7080_v45, %v15943_v18  ;;  %v10238_v42 = vpop.f32.mrb[134].mxu0 }
 0x893   : > { %v7272_v61 = vadd.f32 %v7271_v0, %v7270_v3  ;;  %v7281_v21 = vadd.f32 %v7280_v50, %v7279_v29  ;;  %v7190_v10 = vmul.f32 %v10238_v42, %v14049_v51  ;;  %v7083_v14 = vpop.f32.mrb[135].mxu0  ;;  %v7292_v15 = vsel %vm3513_vm8, %v7189_v25, 0.0 }
 0x894   : > { %v7282_v27 = vsel %vm3513_vm8, %v7187_v37, 0.0  ;;  %v7188_v39 = vmul.f32 %v7083_v14, %v15944_v28 }
 0x895   : > { %v7273_v35 = vrot.slane %v7272_v61, 1  ;;  %v7283_v43 = vadd.f32 %v7282_v27, %v7281_v21  ;;  %v7293_v11 = vsel %vm3513_vm8, %v7190_v10, 0.0 }
 0x896   : > { %v7294_v34 = vadd.f32 %v7293_v11, %v7292_v15  ;;  %v7284_v8 = vsel %vm3513_vm8, %v7188_v39, 0.0 }
 0x897   : > { %v7274_v46 = vadd.f32 %v7273_v35, %v7272_v61  ;;  %v7285_v2 = vadd.f32 %v7284_v8, %v7283_v43 }
 0x898   : > { %v10241_v20 = vpop.f32.mrb[136].mxu0 }
 0x899   : > { %v7350_v31 = vpack.c.bf16 %v7274_v46, %v7274_v46  ;;  %v7286_v38 = vrot.slane %v7285_v2, 4  ;;  %v7096_v51 = vpop.f32.mrb[137].mxu0  ;;  %v7193_v44 = vmul.f32 %v10241_v20, %v14061_v24 }
 0x89a   : > { %v7191_v17 = vmul.f32 %v7096_v51, %v14068_v57  ;;  %v10242_v48 = vpop.f32.mrb[138].mxu0 }
 0x89b   : > { %v7366_v33 = vunpack.c.l.b16 %v7350_v31  ;;  %v7287_v41 = vadd.f32 %v7286_v38, %v7285_v2  ;;  %v7099_v26 = vpop.f32.mrb[139].mxu0  ;;  %v7194_v55 = vmul.f32 %v10242_v48, %v15945_v22  ;;  %v7299_v4 = vsel %vm3513_vm8, %v7193_v44, 0.0  ;;  %v15946_v38 = vld [vmem:[#allocation28_spill] sm:$0xff] }
 0x89c   : > { %v7295_v32 = vsel %vm3513_vm8, %v7191_v17, 0.0  ;;  %v7192_v13 = vmul.f32 %v7099_v26, %v14078_v54 }
 0x89d   : > { %v7288_v59 = vrot.slane %v7287_v41, 2  ;;  %v7373_v40 = vsel %vm3682_vm11, %v7366_v33, %v7372_v16  ;;  %v7296_v7 = vadd.f32 %v7295_v32, %v7294_v34  ;;  %v7301_v23 = vsel %vm3513_vm8, %v7194_v55, 0.0 }
 0x89e   : > { %v7297_v63 = vsel %vm3513_vm8, %v7192_v13, 0.0 }
 0x89f   : > { %v7289_v53 = vadd.f32 %v7288_v59, %v7287_v41  ;;  %v7298_v57 = vadd.f32 %v7297_v63, %v7296_v7 }
 0x8a0   : > { %v10245_v3 = vpop.f32.mrb[140].mxu0 }
 0x8a1   : > { %v7290_v6 = vrot.slane %v7289_v53, 1  ;;  %v7300_v36 = vadd.f32 %v7299_v4, %v7298_v57  ;;  %v7112_v24 = vpop.f32.mrb[141].mxu0  ;;  %v7197_v45 = vmul.f32 %v10245_v3, %v14125_v60 }
 0x8a2   : > { %v7195_v54 = vmul.f32 %v7112_v24, %v14128_v19  ;;  %v10246_v0 = vpop.f32.mrb[142].mxu0 }
 0x8a3   : > { %v7291_v29 = vadd.f32 %v7290_v6, %v7289_v53  ;;  %v7302_v16 = vadd.f32 %v7301_v23, %v7300_v36  ;;  %v7115_v25 = vpop.f32.mrb[143].mxu0  ;;  %v7198_v61 = vmul.f32 %v10246_v0, %v14131_v47  ;;  %v7312_v19 = vsel %vm3513_vm8, %v7197_v45, 0.0  ;;  %v15947_v0 = vld [vmem:[#allocation6_spill] sm:$0xff] }
 0x8a4   : > { %v7196_v50 = vmul.f32 %v7115_v25, %v14147_v5  ;;  %v7309_v42 = vsel %vm3513_vm8, %v7195_v54, 0.0 }
 0x8a5   : > { %v7351_v18 = vpack.c.bf16 %v7291_v29, %v7291_v29  ;;  %v7303_v37 = vrot.slane %v7302_v16, 4  ;;  %v7314_v60 = vsel %vm3513_vm8, %v7198_v61, 0.0 }
 0x8a6   : > { %v7310_v21 = vsel %vm3513_vm8, %v7196_v50, 0.0 }
 0x8a7   : > { %v7367_v10 = vunpack.c.l.b16 %v7351_v18  ;;  %v7304_v14 = vadd.f32 %v7303_v37, %v7302_v16  ;;  %v7311_v27 = vadd.f32 %v7310_v21, %v7309_v42 }
 0x8a9   : > { %v7374_v28 = vsel %vm3684_vm12, %v7367_v10, %v7373_v40  ;;  %v7305_v39 = vrot.slane %v7304_v14, 2  ;;  %v7313_v35 = vadd.f32 %v7312_v19, %v7311_v27 }
 0x8aa   : > { %v10249_v5 = vpop.f32.mrb[144].mxu0 }
 0x8ab   : > { %v7306_v15 = vadd.f32 %v7305_v39, %v7304_v14  ;;  %v7201_v43 = vmul.f32 %v10249_v5, %v14150_v30  ;;  %v7128_v11 = vpop.f32.mrb[145].mxu0  ;;  %v7315_v34 = vadd.f32 %v7314_v60, %v7313_v35 }
 0x8ac   : > { %v7199_v47 = vmul.f32 %v7128_v11, %v14153_v56  ;;  %v10250_v8 = vpop.f32.mrb[146].mxu0 }
 0x8ad   : > { %v7307_v46 = vrot.slane %v7306_v15, 1  ;;  %v7202_v2 = vmul.f32 %v10250_v8, %v15910_v9  ;;  %v7131_v20 = vpop.f32.mrb[147].mxu0  ;;  %v7326_v48 = vsel %vm3513_vm8, %v7201_v43, 0.0  ;;  %v7485_v9 = vld [vmem:[%s15437_s5 + $0x34] sm:$0x8] }
 0x8ae   : > { %v7316_v31 = vsel %vm3513_vm8, %v7199_v47, 0.0  ;;  %v7200_v51 = vmul.f32 %v7131_v20, %v15946_v38  ;;  %v7486_v55 = vunpack.c.l.bf16 %v7485_v9 }
 0x8af   : > { %v7308_v17 = vadd.f32 %v7307_v46, %v7306_v15  ;;  %v7317_v33 = vadd.f32 %v7316_v31, %v7315_v34  ;;  %v7327_v41 = vsel %vm3513_vm8, %v7202_v2, 0.0 }
 0x8b0   : > { %v7328_v30 = vadd.f32 %v7327_v41, %v7326_v48  ;;  %v7318_v26 = vsel %vm3513_vm8, %v7200_v51, 0.0 }
 0x8b1   : > { %v7352_v44 = vpack.c.bf16 %v7308_v17, %v7308_v17  ;;  %v7319_v56 = vadd.f32 %v7318_v26, %v7317_v33 }
 0x8b2   : > { %v10253_v32 = vpop.f32.mrb[148].mxu0 }
 0x8b3   : > { %v7368_v13 = vunpack.c.l.b16 %v7352_v44  ;;  %v7320_v59 = vrot.slane %v7319_v56, 4  ;;  %v7144_v40 = vpop.f32.mrb[149].mxu0  ;;  %v7205_v4 = vmul.f32 %v10253_v32, %v14245_v49  ;;  %v15956_v44 = vld [vmem:[#allocation63_spill] sm:$0xff] }
 0x8b4   : > { %v7203_v7 = vmul.f32 %v7144_v40, %v14257_v62  ;;  %v10254_v22 = vpop.f32.mrb[150].mxu0  ;;  %v14644_v62 = vrot.slane %v7486_v55, %v15947_v0 }
 0x8b5   : > { %v7321_v63 = vadd.f32 %v7320_v59, %v7319_v56  ;;  %v7375_v53 = vsel %vm3686_vm13, %v7368_v13, %v7374_v28  ;;  %v7147_v57 = vpop.f32.mrb[151].mxu0  ;;  %v7206_v23 = vmul.f32 %v10254_v22, %v14262_v12  ;;  %v7333_v25 = vsel %vm3513_vm8, %v7205_v4, 0.0 }
 0x8b6   : > { %v7329_v3 = vsel %vm3513_vm8, %v7203_v7, 0.0  ;;  %v7204_v6 = vmul.f32 %v7147_v57, %v14266_v1 }
 0x8b7   : > { %v7322_v36 = vrot.slane %v7321_v63, 2  ;;  %v7330_v24 = vadd.f32 %v7329_v3, %v7328_v30  ;;  %v7335_v37 = vsel %vm3513_vm8, %v7206_v23, 0.0 }
 0x8b8   : > { %v7331_v54 = vsel %vm3513_vm8, %v7204_v6, 0.0 }
 0x8b9   : > { %v7323_v29 = vadd.f32 %v7322_v36, %v7321_v63  ;;  %v7332_v16 = vadd.f32 %v7331_v54, %v7330_v24 }
 0x8ba   : > { %v10267_v45 = vpop.f32.mrb[152].mxu0 }
 0x8bb   : > { %v7324_v50 = vrot.slane %v7323_v29, 1  ;;  %v7334_v49 = vadd.f32 %v7333_v25, %v7332_v16  ;;  %v7720_v18 = vpop.f32.mrb[153].mxu0  ;;  %v14652_v10 = vadd.f32 %v10267_v45, %v14644_v62 }
 0x8bc   : > { %v14649_v1 = vadd.f32 %v7720_v18, %v14644_v62  ;;  %v10268_v42 = vpop.f32.mrb[154].mxu0 }
 0x8bd   : > { %v7325_v12 = vadd.f32 %v7324_v50, %v7323_v29  ;;  %v7336_v61 = vadd.f32 %v7335_v37, %v7334_v49  ;;  %v7723_v21 = vpop.f32.mrb[155].mxu0  ;;  %15949 = vst [vmem:[#allocation34_spill] sm:$0xff] %v14652_v10  ;;  %v14660_v39 = vadd.f32 %v10268_v42, %v14644_v62  ;;  %v7962_v43 = vsel %vm2596_vm2, %v14652_v10, -inf }
 0x8be   : > { %15948 = vst [vmem:[#allocation32_spill] sm:$0xff] %v14649_v1  ;;  %v14655_v14 = vadd.f32 %v7723_v21, %v14644_v62  ;;  %v7959_v28 = vsel %vm2596_vm2, %v14649_v1, -inf }
 0x8bf   : > { %v7353_v27 = vpack.c.bf16 %v7325_v12, %v7325_v12  ;;  %v7337_v19 = vrot.slane %v7336_v61, 4  ;;  %15951 = vst [vmem:[#allocation40_spill] sm:$0xff] %v14660_v39  ;;  %v7964_v2 = vsel %vm2596_vm2, %v14660_v39, -inf }
 0x8c0   : > { %15950 = vst [vmem:[#allocation31_spill] sm:$0xff] %v14655_v14  ;;  %v7960_v35 = vsel %vm2596_vm2, %v14655_v14, -inf }
 0x8c1   : > { %v7369_v60 = vunpack.c.l.b16 %v7353_v27  ;;  %v7338_v5 = vadd.f32 %v7337_v19, %v7336_v61  ;;  %v7961_v15 = vmax.f32 %v7959_v28, %v7960_v35  ;;  %v15961_v19 = vld [vmem:[#allocation55_spill] sm:$0xff] }
 0x8c2   : > { %v10271_v11 = vpop.f32.mrb[156].mxu0 }
 0x8c3   : > { %v7376_v34 = vsel %vm3688_vm14, %v7369_v60, %v7375_v53  ;;  %v7339_v47 = vrot.slane %v7338_v5, 2  ;;  %v7963_v8 = vmax.f32 %v7961_v15, %v7962_v43  ;;  %v7736_v46 = vpop.f32.mrb[157].mxu0  ;;  %v14681_v26 = vadd.f32 %v10271_v11, %v14644_v62 }
 0x8c4   : > { %v14670_v20 = vadd.f32 %v7736_v46, %v14644_v62  ;;  %v10272_v31 = vpop.f32.mrb[158].mxu0 }
 0x8c5   : > { %v7340_v38 = vadd.f32 %v7339_v47, %v7338_v5  ;;  %v7965_v51 = vmax.f32 %v7963_v8, %v7964_v2  ;;  %v7739_v17 = vpop.f32.mrb[159].mxu0  ;;  %v14675_v33 = vadd.f32 %v10272_v31, %v14644_v62  ;;  %15955 = vst [vmem:[#allocation47_spill] sm:$0xff] %v14681_v26  ;;  %v7976_v63 = vsel %vm2596_vm2, %v14681_v26, -inf }
 0x8c6   : > { %15952 = vst [vmem:[#allocation36_spill] sm:$0xff] %v14670_v20  ;;  %v7966_v48 = vsel %vm2596_vm2, %v14670_v20, -inf  ;;  %v14678_v41 = vadd.f32 %v7739_v17, %v14644_v62 }
 0x8c7   : > { %15953 = vst [vmem:[#allocation45_spill] sm:$0xff] %v14675_v33  ;;  %v7341_v30 = vrot.slane %v7340_v38, 1  ;;  %v7967_v32 = vmax.f32 %v7965_v51, %v7966_v48  ;;  %v7977_v13 = vsel %vm2596_vm2, %v14675_v33, -inf }
 0x8c8   : > { %15954 = vst [vmem:[#allocation42_spill] sm:$0xff] %v14678_v41  ;;  %v14685_v56 = vadd.f32 %v14678_v41, %v15956_v44  ;;  %v7978_v3 = vmax.f32 %v7976_v63, %v7977_v13 }
 0x8c9   : > { %v7342_v9 = vadd.f32 %v7341_v30, %v7340_v38 }
 0x8ca   : > { %v7968_v59 = vsel %vm2596_vm2, %v14685_v56, -inf  ;;  %v10275_v40 = vpop.f32.mrb[160].mxu0 }
 0x8cb   : > { %v7354_v7 = vpack.c.bf16 %v7342_v9, %v7342_v9  ;;  %v7969_v22 = vmax.f32 %v7967_v32, %v7968_v59  ;;  %v7752_v55 = vpop.f32.mrb[161].mxu0  ;;  %v14700_v23 = vadd.f32 %v10275_v40, %v14644_v62 }
 0x8cc   : > { %v14694_v53 = vadd.f32 %v7752_v55, %v14644_v62  ;;  %v10276_v57 = vpop.f32.mrb[162].mxu0 }
 0x8cd   : > { %v7370_v4 = vunpack.c.l.b16 %v7354_v7  ;;  %v7970_v6 = vrot.slane %v7969_v22, 4  ;;  %v14697_v36 = vadd.f32 %v10276_v57, %v14644_v62  ;;  %v7755_v24 = vpop.f32.mrb[163].mxu0  ;;  %15959 = vst [vmem:[#allocation50_spill] sm:$0xff] %v14700_v23  ;;  %v7983_v42 = vsel %vm2596_vm2, %v14700_v23, -inf }
 0x8ce   : > { %15957 = vst [vmem:[#allocation44_spill] sm:$0xff] %v14694_v53  ;;  %v7979_v54 = vsel %vm2596_vm2, %v14694_v53, -inf  ;;  %v14705_v0 = vadd.f32 %v7755_v24, %v14644_v62 }
 0x8cf   : > { %15958 = vst [vmem:[#allocation48_spill] sm:$0xff] %v14697_v36  ;;  %v7971_v29 = vmax.f32 %v7969_v22, %v7970_v6  ;;  %v7980_v16 = vmax.f32 %v7978_v3, %v7979_v54  ;;  %v7377_v25 = vsel %vm3690_vm15, %v7370_v4, %v7376_v34  ;;  %v14710_v45 = vadd.f32 %v14697_v36, %v15956_v44 }
 0x8d0   : > { %15960 = vst [vmem:[#allocation52_spill] sm:$0xff] %v14705_v0  ;;  %v7981_v50 = vsel %vm2596_vm2, %v14705_v0, -inf  ;;  %v7378_v49 = vpack.c.b16 %v7377_v25, %v7377_v25 }
 0x8d1   : > { %v7972_v18 = vrot.slane %v7971_v29, 2  ;;  %v7982_v37 = vmax.f32 %v7980_v16, %v7981_v50  ;;  %v7985_v28 = vsel %vm2596_vm2, %v14710_v45, -inf }
 0x8d2   : > { %10260 = vmatmul.mubr.msk.bf16.vlgmr.msra.gmra.mrb[152].mxu1 %vm3513_vm8, %v7378_v49  ;;  %v10279_v12 = vpop.f32.mrb[164].mxu0 }
 0x8d3   : > { %v7973_v61 = vmax.f32 %v7971_v29, %v7972_v18  ;;  %v7984_v21 = vmax.f32 %v7982_v37, %v7983_v42  ;;  %v7768_v27 = vpop.f32.mrb[165].mxu0  ;;  %10314 = vmatpush3.bf16.msra.mxu1 %v15961_v19  ;;  %v14721_v35 = vadd.f32 %v10279_v12, %v14644_v62 }
 0x8d4   : > { %v14724_v60 = vadd.f32 %v7768_v27, %v14644_v62  ;;  %v10280_v5 = vpop.f32.mrb[166].mxu0 }
 0x8d5   : > { %15962 = vst [vmem:[#allocation18_spill] sm:$0xff] %v14721_v35  ;;  %v7974_v15 = vrot.slane %v7973_v61, 1  ;;  %v7986_v43 = vmax.f32 %v7984_v21, %v7985_v28  ;;  %v7771_v11 = vpop.f32.mrb[167].mxu0  ;;  %v7996_v46 = vsel %vm2596_vm2, %v14721_v35, -inf  ;;  %v14741_v32 = vadd.f32 %v10280_v5, %v14644_v62 }
 0x8d6   : > { %15963 = vst [vmem:[#allocation22_spill] sm:$0xff] %v14724_v60  ;;  %v14727_v34 = vadd.f32 %v7771_v11, %v14644_v62  ;;  %v7993_v2 = vsel %vm2596_vm2, %v14724_v60, -inf }
 0x8d7   : > { %v7975_v47 = vmax.f32 %v7973_v61, %v7974_v15  ;;  %v7987_v8 = vrot.slane %v7986_v43, 4  ;;  %15965 = vst [vmem:[#allocation19_spill] sm:$0xff] %v14741_v32  ;;  %v7998_v24 = vsel %vm2596_vm2, %v14741_v32, -inf }
 0x8d8   : > { %15964 = vst [vmem:[#allocation25_spill] sm:$0xff] %v14727_v34  ;;  %v7994_v31 = vsel %vm2596_vm2, %v14727_v34, -inf }
 0x8d9   : > { %v8095_v38 = vsub.f32 %v14649_v1, %v7975_v47  ;;  %v8096_v51 = vsub.f32 %v14655_v14, %v7975_v47  ;;  %v8097_v17 = vsub.f32 %v14652_v10, %v7975_v47  ;;  %v8098_v48 = vsub.f32 %v14660_v39, %v7975_v47 }
 0x8da   : > { %v8099_v30 = vsub.f32 %v14670_v20, %v7975_v47  ;;  %v7988_v9 = vmax.f32 %v7986_v43, %v7987_v8  ;;  %v7995_v13 = vmax.f32 %v7993_v2, %v7994_v31  ;;  %v10283_v59 = vpop.f32.mrb[168].mxu0  ;;  %v8100_v40 = vsub.f32 %v14685_v56, %v7975_v47 }
 0x8db   : > { %v8143_v7 = vmul.f32 1.442695, %v8095_v38  ;;  %v8145_v22 = vmul.f32 1.442695, %v8096_v51  ;;  %v8147_v55 = vmul.f32 1.442695, %v8097_v17  ;;  %v14758_v12 = vadd.f32 %v10283_v59, %v14644_v62 }
 0x8dc   : > { %v8149_v63 = vmul.f32 1.442695, %v8098_v48  ;;  %v7997_v57 = vmax.f32 %v7995_v13, %v7996_v46  ;;  %v8151_v4 = vmul.f32 1.442695, %v8099_v30  ;;  %v7989_v3 = vrot.slane %v7988_v9, 2  ;;  %v7784_v6 = vpop.f32.mrb[169].mxu0 }
 0x8dd   : > { %10860 = vpow2.f32 %v8143_v7  ;;  %v14747_v54 = vadd.f32 %v7784_v6, %v14644_v62  ;;  %v10284_v29 = vpop.f32.mrb[170].mxu0  ;;  %v8153_v16 = vmul.f32 1.442695, %v8100_v40  ;;  %15969 = vst [vmem:[#allocation26_spill] sm:$0xff] %v14758_v12  ;;  %v8010_v17 = vsel %vm2596_vm2, %v14758_v12, -inf }
 0x8de   : > { %10862 = vpow2.f32 %v8145_v22  ;;  %v7990_v56 = vmax.f32 %v7988_v9, %v7989_v3  ;;  %v7999_v25 = vmax.f32 %v7997_v57, %v7998_v24  ;;  %v7787_v50 = vpop.f32.mrb[171].mxu0  ;;  %v14752_v18 = vadd.f32 %v10284_v29, %v14644_v62 }
 0x8df   : > { %15966 = vst [vmem:[#allocation23_spill] sm:$0xff] %v14747_v54  ;;  %10864 = vpow2.f32 %v8147_v55  ;;  %v8000_v49 = vsel %vm2596_vm2, %v14747_v54, -inf  ;;  %v14755_v37 = vadd.f32 %v7787_v50, %v14644_v62 }
 0x8e0   : > { %10866 = vpow2.f32 %v8149_v63  ;;  %15967 = vst [vmem:[#allocation24_spill] sm:$0xff] %v14752_v18  ;;  %v7991_v42 = vrot.slane %v7990_v56, 1  ;;  %v8001_v19 = vmax.f32 %v7999_v25, %v8000_v49  ;;  %v8011_v5 = vsel %vm2596_vm2, %v14752_v18, -inf }
 0x8e1   : > { %15968 = vst [vmem:[#allocation27_spill] sm:$0xff] %v14755_v37  ;;  %10868 = vpow2.f32 %v8151_v4  ;;  %v14762_v61 = vadd.f32 %v14755_v37, %v15956_v44  ;;  %v8012_v40 = vmax.f32 %v8010_v17, %v8011_v5 }
 0x8e2   : > { %v10287_v21 = vpop.f32.mrb[172].mxu0  ;;  %v7992_v27 = vmax.f32 %v7990_v56, %v7991_v42  ;;  %10870 = vpow2.f32 %v8153_v16 }
 0x8e3   : > { %v7800_v28 = vpop.f32.mrb[173].mxu0  ;;  %v8002_v15 = vsel %vm2596_vm2, %v14762_v61, -inf }
 0x8e4   : > { %v14769_v43 = vadd.f32 %v7800_v28, %v14644_v62  ;;  %v10288_v11 = vpop.f32.mrb[174].mxu0  ;;  %v8101_v47 = vsub.f32 %v14681_v26, %v7992_v27  ;;  %v8102_v8 = vsub.f32 %v14675_v33, %v7992_v27  ;;  %v8103_v46 = vsub.f32 %v14694_v53, %v7992_v27 }
 0x8e5   : > { %v8104_v2 = vsub.f32 %v14705_v0, %v7992_v27  ;;  %v7803_v31 = vpop.f32.mrb[175].mxu0  ;;  %v8105_v38 = vsub.f32 %v14700_v23, %v7992_v27  ;;  %v8106_v51 = vsub.f32 %v14710_v45, %v7992_v27  ;;  %v8003_v48 = vmax.f32 %v8001_v19, %v8002_v15 }
 0x8e6   : > { %15970 = vst [vmem:[#allocation30_spill] sm:$0xff] %v14769_v43  ;;  %v8155_v9 = vmul.f32 1.442695, %v8101_v47  ;;  %v8157_v13 = vmul.f32 1.442695, %v8102_v8  ;;  %v14786_v57 = vadd.f32 %v10288_v11, %v14644_v62  ;;  %v8013_v6 = vsel %vm2596_vm2, %v14769_v43, -inf }
 0x8e7   : > { %v14779_v30 = vpop.eup %10860  ;;  %v8159_v59 = vmul.f32 1.442695, %v8103_v46  ;;  %v8161_v55 = vmul.f32 1.442695, %v8104_v2  ;;  %v8004_v63 = vrot.slane %v8003_v48, 4  ;;  %v14803_v27 = vadd.f32 %v10287_v21, %v14644_v62 }
 0x8e8   : > { %v14781_v7 = vpop.eup %10862  ;;  %v8239_v22 = vsel %vm2596_vm2, %v14779_v30, 0.0  ;;  %15971 = vst [vmem:[#allocation56_spill] sm:$0xff] %v14786_v57  ;;  %10872 = vpow2.f32 %v8155_v9  ;;  %v8163_v3 = vmul.f32 1.442695, %v8105_v38  ;;  %v8165_v16 = vmul.f32 1.442695, %v8106_v51 }
 0x8e9   : > { %v14788_v45 = vpop.eup %10864  ;;  %v8240_v4 = vsel %vm2596_vm2, %v14781_v7, 0.0  ;;  %10874 = vpow2.f32 %v8157_v13  ;;  %v8005_v56 = vmax.f32 %v8003_v48, %v8004_v63  ;;  %15972 = vst [vmem:[#allocation53_spill] sm:$0xff] %v14803_v27  ;;  %v8014_v15 = vmax.f32 %v8012_v40, %v8013_v6 }
 0x8ea   : > { %v14794_v24 = vpop.eup %10866  ;;  %v8241_v29 = vadd.f32 %v8240_v4, %v8239_v22  ;;  %v10291_v25 = vpop.f32.mrb[176].mxu0  ;;  %v8242_v49 = vsel %vm2596_vm2, %v14788_v45, 0.0  ;;  %10876 = vpow2.f32 %v8159_v59  ;;  %v14809_v8 = vadd.f32 %v14786_v57, %v15956_v44 }
 0x8eb   : > { %v14796_v50 = vpop.eup %10868  ;;  %v8244_v42 = vsel %vm2596_vm2, %v14794_v24, 0.0  ;;  %v7816_v19 = vpop.f32.mrb[177].mxu0  ;;  %10878 = vpow2.f32 %v8161_v55  ;;  %v8006_v5 = vrot.slane %v8005_v56, 2  ;;  %v14812_v46 = vadd.f32 %v7803_v31, %v14644_v62 }
 0x8ec   : > { %v8243_v28 = vadd.f32 %v8242_v49, %v8241_v29  ;;  %v10292_v11 = vpop.f32.mrb[178].mxu0  ;;  %v8246_v47 = vsel %vm2596_vm2, %v14796_v50, 0.0  ;;  %10880 = vpow2.f32 %v8163_v3  ;;  %v14814_v21 = vpop.eup %10870  ;;  %v14817_v17 = vadd.f32 %v10291_v25, %v14644_v62 }
 0x8ed   : > { %15973 = vst [vmem:[#allocation54_spill] sm:$0xff] %v14812_v46  ;;  %v7819_v2 = vpop.f32.mrb[179].mxu0  ;;  %10882 = vpow2.f32 %v8165_v16  ;;  %v8007_v51 = vmax.f32 %v8005_v56, %v8006_v5  ;;  %v8015_v48 = vsel %vm2596_vm2, %v14812_v46, -inf  ;;  %v14822_v9 = vadd.f32 %v7816_v19, %v14644_v62 }
 0x8ee   : > { %v8245_v38 = vadd.f32 %v8244_v42, %v8243_v28  ;;  %15974 = vst [vmem:[#allocation57_spill] sm:$0xff] %v14817_v17  ;;  %v14825_v13 = vadd.f32 %v10292_v11, %v14644_v62  ;;  %v14828_v31 = vadd.f32 %v7819_v2, %v14644_v62  ;;  %v8016_v22 = vmax.f32 %v8014_v15, %v8015_v48 }
 0x8ef   : > { %15975 = vst [vmem:[#allocation59_spill] sm:$0xff] %v14822_v9  ;;  %v8008_v40 = vrot.slane %v8007_v51, 1  ;;  %v8248_v55 = vsel %vm2596_vm2, %v14814_v21, 0.0  ;;  %v8017_v63 = vsel %vm2596_vm2, %v14803_v27, -inf  ;;  %v8019_v29 = vsel %vm2596_vm2, %v14809_v8, -inf }
 0x8f0   : > { %15976 = vst [vmem:[#allocation35_spill] sm:$0xff] %v14825_v13  ;;  %15977 = vst [vmem:[#allocation61_spill] sm:$0xff] %v14828_v31  ;;  %v8247_v59 = vadd.f32 %v8246_v47, %v8245_v38  ;;  %v8028_v4 = vsel %vm2596_vm2, %v14828_v31, -inf  ;;  %v8027_v16 = vsel %vm2596_vm2, %v14822_v9, -inf  ;;  %v8018_v49 = vmax.f32 %v8016_v22, %v8017_v63 }
 0x8f1   : > { %v8009_v6 = vmax.f32 %v8007_v51, %v8008_v40  ;;  %v8030_v42 = vsel %vm2596_vm2, %v14817_v17, -inf  ;;  %v14846_v19 = vsel %vm2596_vm2, %v14825_v13, -inf  ;;  %v8029_v28 = vmax.f32 %v8027_v16, %v8028_v4 }
 0x8f2   : > { %v8249_v3 = vadd.f32 %v8248_v55, %v8247_v59  ;;  %v10295_v56 = vpop.f32.mrb[180].mxu0  ;;  %v14840_v25 = vpop.eup %10872 }
 0x8f3   : > { %v7832_v5 = vpop.f32.mrb[181].mxu0  ;;  %v14848_v15 = vpop.eup %10874  ;;  %v8256_v47 = vsel %vm2596_vm2, %v14840_v25, 0.0  ;;  %v8107_v2 = vsub.f32 %v14724_v60, %v8009_v6  ;;  %v8108_v38 = vsub.f32 %v14727_v34, %v8009_v6  ;;  %v8109_v40 = vsub.f32 %v14721_v35, %v8009_v6 }
 0x8f4   : > { %v8250_v11 = vrot.slane %v8249_v3, 4  ;;  %v10296_v51 = vpop.f32.mrb[182].mxu0  ;;  %v14854_v48 = vpop.eup %10876  ;;  %v8257_v59 = vsel %vm2596_vm2, %v14848_v15, 0.0  ;;  %v8110_v22 = vsub.f32 %v14741_v32, %v8009_v6  ;;  %v8111_v55 = vsub.f32 %v14747_v54, %v8009_v6 }
 0x8f5   : > { %v7835_v63 = vpop.f32.mrb[183].mxu0  ;;  %v14861_v4 = vpop.eup %10878  ;;  %v8258_v57 = vadd.f32 %v8257_v59, %v8256_v47  ;;  %v8112_v37 = vsub.f32 %v14762_v61, %v8009_v6  ;;  %v14865_v34 = vadd.f32 %v10295_v56, %v14644_v62  ;;  %v8259_v36 = vsel %vm2596_vm2, %v14854_v48, 0.0 }
 0x8f6   : > { %v8251_v16 = vadd.f32 %v8250_v11, %v8249_v3  ;;  %v14867_v60 = vpop.eup %10880  ;;  %v8167_v35 = vmul.f32 1.442695, %v8107_v2  ;;  %v8169_v0 = vmul.f32 1.442695, %v8108_v38  ;;  %v8020_v32 = vmax.f32 %v8018_v49, %v8019_v29 }
 0x8f7   : > { %v14871_v23 = vpop.eup %10882  ;;  %v8260_v53 = vadd.f32 %v8259_v36, %v8258_v57  ;;  %v8261_v3 = vsel %vm2596_vm2, %v14861_v4, 0.0  ;;  %v8171_v11 = vmul.f32 1.442695, %v8109_v40  ;;  %v8263_v61 = vsel %vm2596_vm2, %v14867_v60, 0.0 }
 0x8f8   : > { %15978 = vst [vmem:[#allocation62_spill] sm:$0xff] %v14871_v23  ;;  %v8252_v54 = vrot.slane %v8251_v16, 2  ;;  %10884 = vpow2.f32 %v8167_v35  ;;  %v8173_v6 = vmul.f32 1.442695, %v8110_v22  ;;  %v8175_v56 = vmul.f32 1.442695, %v8111_v55 }
 0x8f9   : > { %v8262_v59 = vadd.f32 %v8261_v3, %v8260_v53  ;;  %10886 = vpow2.f32 %v8169_v0  ;;  %v8177_v2 = vmul.f32 1.442695, %v8112_v37  ;;  %v8265_v29 = vsel %vm2596_vm2, %v14871_v23, 0.0 }
 0x8fa   : > { %v8253_v47 = vadd.f32 %v8252_v54, %v8251_v16  ;;  %v10299_v38 = vpop.f32.mrb[184].mxu0  ;;  %10888 = vpow2.f32 %v8171_v11  ;;  %v8021_v36 = vrot.slane %v8020_v32, 4  ;;  %v8031_v57 = vmax.f32 %v8029_v28, %v8030_v42 }
 0x8fb   : > { %v7848_v49 = vpop.f32.mrb[185].mxu0  ;;  %v8264_v40 = vadd.f32 %v8263_v61, %v8262_v59  ;;  %10890 = vpow2.f32 %v8173_v6  ;;  %v14880_v33 = vadd.f32 %v7832_v5, %v14644_v62  ;;  %v14884_v0 = vadd.f32 %v10296_v51, %v14644_v62 }
 0x8fc   : > { %v8254_v41 = vrot.slane %v8253_v47, 1  ;;  %v10300_v35 = vpop.f32.mrb[186].mxu0  ;;  %10892 = vpow2.f32 %v8175_v56  ;;  %v8022_v54 = vmax.f32 %v8020_v32, %v8021_v36  ;;  %v8033_v53 = vmax.f32 %v8031_v57, %v14846_v19 }
 0x8fd   : > { %15979 = vst [vmem:[#allocation33_spill] sm:$0xff] %v14880_v33  ;;  %v7851_v37 = vpop.f32.mrb[187].mxu0  ;;  %v8266_v55 = vadd.f32 %v8265_v29, %v8264_v40  ;;  %10894 = vpow2.f32 %v8177_v2  ;;  %v8034_v42 = vsel %vm2596_vm2, %v14880_v33, -inf  ;;  %v8044_v5 = vsel %vm2596_vm2, %v14865_v34, -inf }
 0x8fe   : > { %v8255_v22 = vadd.f32 %v8254_v41, %v8253_v47  ;;  %v8023_v28 = vrot.slane %v8022_v54, 2  ;;  %v8045_v16 = vsel %vm2596_vm2, %v14884_v0, -inf  ;;  %v14893_v32 = vadd.f32 %v7835_v63, %v14644_v62 }
 0x8ff   : > { %v8267_v19 = vrot.slane %v8266_v55, 4  ;;  %v8035_v51 = vmax.f32 %v8033_v53, %v8034_v42  ;;  %v14896_v41 = vadd.f32 %v10299_v38, %v14644_v62  ;;  %v14903_v61 = vadd.f32 %v7848_v49, %v14644_v62 }
 0x900   : > { %15980 = vst [vmem:[#allocation37_spill] sm:$0xff] %v14893_v32  ;;  %10896 = vrcp.f32 %v8255_v22  ;;  %v8024_v3 = vmax.f32 %v8022_v54, %v8023_v28  ;;  %v14900_v11 = vadd.f32 %v14893_v32, %v15956_v44  ;;  %v14906_v6 = vadd.f32 %v10300_v35, %v14644_v62 }
 0x901   : > { %v8268_v56 = vadd.f32 %v8267_v19, %v8266_v55  ;;  %v8046_v63 = vmax.f32 %v8044_v5, %v8045_v16  ;;  %v14910_v47 = vsel %vm2596_vm2, %v14896_v41, -inf  ;;  %v14913_v59 = vadd.f32 %v7851_v37, %v14644_v62 }
 0x902   : > { %15981 = vst [vmem:[#allocation51_spill] sm:$0xff] %v14906_v6  ;;  %v10303_v2 = vpop.f32.mrb[188].mxu0  ;;  %v14915_v38 = vpop.eup %10884  ;;  %v8025_v29 = vrot.slane %v8024_v3, 1  ;;  %v8036_v36 = vsel %vm2596_vm2, %v14900_v11, -inf  ;;  %v8047_v57 = vsel %vm2596_vm2, %v14903_v61, -inf  ;;  %v14923_v49 = vadd.f32 %v14906_v6, %v15956_v44 }
 0x903   : > { %15982 = vst [vmem:[#allocation60_spill] sm:$0xff] %v14915_v38  ;;  %v7864_v40 = vpop.f32.mrb[189].mxu0  ;;  %v14925_v35 = vpop.eup %10886  ;;  %v8269_v54 = vrot.slane %v8268_v56, 2  ;;  %v8273_v53 = vsel %vm2596_vm2, %v14915_v38, 0.0  ;;  %v8037_v37 = vmax.f32 %v8035_v51, %v8036_v36  ;;  %v8048_v22 = vmax.f32 %v8046_v63, %v8047_v57 }
 0x904   : > { %15983 = vst [vmem:[#allocation38_spill] sm:$0xff] %v14925_v35  ;;  %v10304_v55 = vpop.f32.mrb[190].mxu0  ;;  %v14929_v42 = vpop.eup %10888  ;;  %v8274_v28 = vsel %vm2596_vm2, %v14925_v35, 0.0  ;;  %v8026_v5 = vmax.f32 %v8024_v3, %v8025_v29  ;;  %v8053_v16 = vsel %vm2596_vm2, %v14923_v49, -inf  ;;  %v8049_v19 = vsel %vm2596_vm2, %v14913_v59, -inf }
 0x905   : > { %15984 = vst [vmem:[#allocation41_spill] sm:$0xff] %v14929_v42  ;;  %v7867_v6 = vpop.f32.mrb[191].mxu0  ;;  %v14937_v32 = vpop.eup %10890  ;;  %v8270_v20 = vadd.f32 %v8269_v54, %v8268_v56  ;;  %v8275_v26 = vadd.f32 %v8274_v28, %v8273_v53  ;;  %v8276_v51 = vsel %vm2596_vm2, %v14929_v42, 0.0  ;;  %v8038_v63 = vrot.slane %v8037_v37, 4 }
 0x906   : > { %15985 = vst [vmem:[#allocation58_spill] sm:$0xff] %v14937_v32  ;;  %v14941_v36 = vpop.eup %10892  ;;  %v8278_v3 = vsel %vm2596_vm2, %v14937_v32, 0.0  ;;  %v8113_v29 = vsub.f32 %v14758_v12, %v8026_v5  ;;  %v8114_v57 = vsub.f32 %v14752_v18, %v8026_v5  ;;  %v8115_v39 = vsub.f32 %v14769_v43, %v8026_v5 }
 0x907   : > { %15986 = vst [vmem:[#allocation39_spill] sm:$0xff] %v14941_v36  ;;  %v14948_v14 = vpop.eup %10894  ;;  %v8271_v10 = vrot.slane %v8270_v20, 1  ;;  %v8277_v56 = vadd.f32 %v8276_v51, %v8275_v26  ;;  %v8280_v54 = vsel %vm2596_vm2, %v14941_v36, 0.0  ;;  %v8116_v53 = vsub.f32 %v14812_v46, %v8026_v5 }
 0x908   : > { %15987 = vst [vmem:[#allocation49_spill] sm:$0xff] %v14948_v14  ;;  %v8282_v28 = vsel %vm2596_vm2, %v14948_v14, 0.0  ;;  %v8117_v1 = vsub.f32 %v14803_v27, %v8026_v5  ;;  %v8118_v12 = vsub.f32 %v14809_v8, %v8026_v5  ;;  %v8179_v52 = vmul.f32 1.442695, %v8113_v29 }
 0x909   : > { %v8272_v43 = vadd.f32 %v8271_v10, %v8270_v20  ;;  %v8279_v58 = vadd.f32 %v8278_v3, %v8277_v56  ;;  %v8181_v35 = vmul.f32 1.442695, %v8114_v57  ;;  %v8183_v38 = vmul.f32 1.442695, %v8115_v39 }
 0x90a   : > { %v14957_v18 = vpop.eup %10896  ;;  %v10307_v26 = vpop.f32.mrb[192].mxu0  ;;  %10898 = vpow2.f32 %v8179_v52  ;;  %v8185_v51 = vmul.f32 1.442695, %v8116_v53  ;;  %v8187_v36 = vmul.f32 1.442695, %v8117_v1  ;;  %v8039_v42 = vmax.f32 %v8037_v37, %v8038_v63 }
 0x90b   : > { %v8189_v32 = vmul.f32 1.442695, %v8118_v12  ;;  %10900 = vrcp.f32 %v8272_v43  ;;  %v8281_v46 = vadd.f32 %v8280_v54, %v8279_v58  ;;  %v8050_v14 = vmax.f32 %v8048_v22, %v8049_v19  ;;  %v7880_v23 = vpop.f32.mrb[193].mxu0 }
 0x90c   : > { %10902 = vpow2.f32 %v8181_v35  ;;  %v14960_v8 = vadd.f32 %v10303_v2, %v14644_v62  ;;  %v14963_v5 = vadd.f32 %v7864_v40, %v14644_v62  ;;  %v14966_v10 = vadd.f32 %v10304_v55, %v14644_v62  ;;  %v10308_v39 = vpop.f32.mrb[194].mxu0 }
 0x90d   : > { %v8283_v52 = vadd.f32 %v8282_v28, %v8281_v46  ;;  %10904 = vpow2.f32 %v8183_v38  ;;  %v8040_v1 = vrot.slane %v8039_v42, 2  ;;  %v8052_v20 = vmax.f32 %v8050_v14, %v14910_v47  ;;  %v7883_v58 = vpop.f32.mrb[195].mxu0 }
 0x90e   : > { %10906 = vpow2.f32 %v8185_v51  ;;  %v14971_v12 = vsel %vm2596_vm2, %v14960_v8, -inf  ;;  %v14975_v43 = vsel %vm2596_vm2, %v14963_v5, -inf  ;;  %v14979_v2 = vsel %vm2596_vm2, %v14966_v10, -inf }
 0x90f   : > { %v8284_v40 = vrot.slane %v8283_v52, 4  ;;  %10908 = vpow2.f32 %v8187_v36  ;;  %v8041_v46 = vmax.f32 %v8039_v42, %v8040_v1  ;;  %v8054_v38 = vmax.f32 %v8052_v20, %v8053_v16 }
 0x910   : > { %10910 = vpow2.f32 %v8189_v32  ;;  %v14982_v14 = vadd.f32 %v7867_v6, %v14644_v62  ;;  %v14985_v47 = vadd.f32 %v10307_v26, %v14644_v62  ;;  %v14988_v35 = vadd.f32 %v7880_v23, %v14644_v62 }
 0x911   : > { %v8285_v37 = vadd.f32 %v8284_v40, %v8283_v52  ;;  %v8042_v22 = vrot.slane %v8041_v46, 1  ;;  %v8055_v55 = vrot.slane %v8054_v38, 4  ;;  %v14991_v19 = vadd.f32 %v10308_v39, %v14644_v62 }
 0x912   : > { %v14993_v63 = vpop.f32.mrb[196].mxu0  ;;  %v8062_v32 = vsel %vm2596_vm2, %v14982_v14, -inf  ;;  %v14999_v6 = vsel %vm2596_vm2, %v14985_v47, -inf  ;;  %v8068_v42 = vsel %vm2596_vm2, %v14988_v35, -inf  ;;  %v15004_v23 = vadd.f32 %v7883_v58, %v14644_v62 }
 0x913   : > { %15988 = vst [vmem:[#allocation10_spill] sm:$0xff] %v14991_v19  ;;  %v15006_v16 = vpop.f32.mrb[197].mxu0  ;;  %v8286_v36 = vrot.slane %v8285_v37, 2  ;;  %v8043_v3 = vmax.f32 %v8041_v46, %v8042_v22  ;;  %v8056_v29 = vmax.f32 %v8054_v38, %v8055_v55  ;;  %v8063_v57 = vmax.f32 %v14975_v43, %v8062_v32 }
 0x914   : > { %15989 = vst [vmem:[#allocation43_spill] sm:$0xff] %v15004_v23  ;;  %v15009_v56 = vpop.f32.mrb[198].mxu0  ;;  %v15011_v54 = vpop.eup %10898  ;;  %v15015_v53 = vsel %vm2596_vm2, %v14991_v19, -inf  ;;  %v15019_v28 = vadd.f32 %v15004_v23, %v15956_v44  ;;  %v8378_v26 = vmul.f32 %v14957_v18, %v14788_v45  ;;  %v8379_v51 = vmul.f32 %v14957_v18, %v14794_v24 }
 0x915   : > { %v15025_v39 = vpop.f32.mrb[199].mxu0  ;;  %v15027_v52 = vpop.eup %10900  ;;  %v8287_v1 = vadd.f32 %v8286_v36, %v8285_v37  ;;  %v8290_v20 = vsel %vm2596_vm2, %v15011_v54, 0.0  ;;  %v8119_v58 = vsub.f32 %v14822_v9, %v8043_v3  ;;  %v8120_v43 = vsub.f32 %v14828_v31, %v8043_v3 }
 0x916   : > { %v15033_v40 = vpop.eup %10902  ;;  %v8121_v46 = vsub.f32 %v14817_v17, %v8043_v3  ;;  %v8122_v45 = vsub.f32 %v14825_v13, %v8043_v3  ;;  %v8123_v24 = vsub.f32 %v14880_v33, %v8043_v3  ;;  %v8124_v38 = vsub.f32 %v14900_v11, %v8043_v3 }
 0x917   : > { %v15039_v22 = vpop.eup %10904  ;;  %v8288_v37 = vrot.slane %v8287_v1, 1  ;;  %v8291_v55 = vsel %vm2596_vm2, %v15033_v40, 0.0  ;;  %v8191_v32 = vmul.f32 1.442695, %v8119_v58  ;;  %v8193_v36 = vmul.f32 1.442695, %v8120_v43 }
 0x918   : > { %v15043_v23 = vpop.eup %10906  ;;  %v8292_v31 = vadd.f32 %v8291_v55, %v8290_v20  ;;  %v8293_v17 = vsel %vm2596_vm2, %v15039_v22, 0.0  ;;  %v8195_v9 = vmul.f32 1.442695, %v8121_v46  ;;  %v8197_v13 = vmul.f32 1.442695, %v8122_v45 }
 0x919   : > { %v15047_v27 = vpop.eup %10908  ;;  %v8289_v33 = vadd.f32 %v8288_v37, %v8287_v1  ;;  %v8295_v11 = vsel %vm2596_vm2, %v15043_v23, 0.0  ;;  %10912 = vpow2.f32 %v8191_v32  ;;  %v8199_v3 = vmul.f32 1.442695, %v8123_v24 }
 0x91a   : > { %v15051_v19 = vpop.eup %10910  ;;  %v8294_v58 = vadd.f32 %v8293_v17, %v8292_v31  ;;  %v8297_v43 = vsel %vm2596_vm2, %v15047_v27, 0.0  ;;  %10914 = vpow2.f32 %v8193_v36  ;;  %v8201_v20 = vmul.f32 1.442695, %v8124_v38 }
 0x91b   : > { %10916 = vrcp.f32 %v8289_v33  ;;  %v8299_v46 = vsel %vm2596_vm2, %v15051_v19, 0.0  ;;  %v8057_v45 = vrot.slane %v8056_v29, 2  ;;  %v8065_v1 = vmax.f32 %v8063_v57, %v14971_v12 }
 0x91c   : > { %v8296_v37 = vadd.f32 %v8295_v11, %v8294_v58  ;;  %10918 = vpow2.f32 %v8195_v9  ;;  %v8080_v24 = vmax.f32 %v14999_v6, %v15015_v53  ;;  %v8070_v17 = vsel %vm2596_vm2, %v15019_v28, -inf }
 0x91d   : > { %10920 = vpow2.f32 %v8197_v13  ;;  %v8058_v31 = vmax.f32 %v8056_v29, %v8057_v45  ;;  %v8067_v55 = vmax.f32 %v8065_v1, %v14979_v2  ;;  %v8432_v38 = vpack.c.bf16 %v8379_v51, %v8378_v26 }
 0x91e   : > { %v8298_v33 = vadd.f32 %v8297_v43, %v8296_v37  ;;  %10922 = vpow2.f32 %v8199_v3  ;;  %v8376_v32 = vmul.f32 %v14957_v18, %v14779_v30  ;;  %v8377_v12 = vmul.f32 %v14957_v18, %v14781_v7 }
 0x91f   : > { %10924 = vpow2.f32 %v8201_v20  ;;  %v8059_v9 = vrot.slane %v8058_v31, 1  ;;  %v8069_v57 = vmax.f32 %v8067_v55, %v8068_v42  ;;  %8481 = vrot.lane.b32.xlu1 %v8432_v38, %s10999_s18  ;;  %v15070_v13 = vadd.f32 %v14993_v63, %v14644_v62 }
 0x920   : > { %v8300_v29 = vadd.f32 %v8299_v46, %v8298_v33  ;;  %v8431_v2 = vpack.c.bf16 %v8377_v12, %v8376_v32  ;;  %v8380_v26 = vmul.f32 %v14957_v18, %v14796_v50  ;;  %v8381_v30 = vmul.f32 %v14957_v18, %v14814_v21 }
 0x921   : > { %v8060_v51 = vmax.f32 %v8058_v31, %v8059_v9  ;;  %v8071_v36 = vmax.f32 %v8069_v57, %v8070_v17  ;;  %v15078_v7 = vsel %vm2596_vm2, %v15070_v13, -inf  ;;  %v15082_v42 = vadd.f32 %v15006_v16, %v14644_v62 }
 0x922   : > { %v8301_v63 = vrot.slane %v8300_v29, 4  ;;  %8479 = vrot.lane.b32.xlu0 %v8431_v2, %s10999_s18  ;;  %v8433_v11 = vpack.c.bf16 %v8381_v30, %v8380_v26  ;;  %v15087_v50 = vadd.f32 %v15009_v56, %v14644_v62  ;;  %v15091_v18 = vadd.f32 %v15025_v39, %v14644_v62 }
 0x923   : > { %v15093_v21 = vpop.eup %10912  ;;  %v8125_v3 = vsub.f32 %v14865_v34, %v8060_v51  ;;  %v8126_v58 = vsub.f32 %v14884_v0, %v8060_v51  ;;  %v8127_v16 = vsub.f32 %v14903_v61, %v8060_v51  ;;  %v8128_v43 = vsub.f32 %v14913_v59, %v8060_v51 }
 0x924   : > { %v15099_v20 = vpop.eup %10914  ;;  %v8302_v46 = vadd.f32 %v8301_v63, %v8300_v29  ;;  %v8307_v56 = vsel %vm2596_vm2, %v15093_v21, 0.0  ;;  %v8129_v45 = vsub.f32 %v14896_v41, %v8060_v51  ;;  %v8130_v62 = vsub.f32 %v14923_v49, %v8060_v51 }
 0x925   : > { %v15105_v39 = vpop.eup %10916  ;;  %v8308_v1 = vsel %vm2596_vm2, %v15099_v20, 0.0  ;;  %v8203_v37 = vmul.f32 1.442695, %v8125_v3  ;;  %v8205_v17 = vmul.f32 1.442695, %v8126_v58  ;;  %v8072_v31 = vrot.slane %v8071_v36, 4 }
 0x926   : > { %v15109_v55 = vpop.eup %10918  ;;  %v8303_v38 = vrot.slane %v8302_v46, 2  ;;  %v8309_v33 = vadd.f32 %v8308_v1, %v8307_v56  ;;  %v8207_v32 = vmul.f32 1.442695, %v8127_v16  ;;  %v8209_v12 = vmul.f32 1.442695, %v8128_v43  ;;  %8483 = vrot.lane.b32.xlu0 %v8433_v11, %s10999_s18 }
 0x927   : > { %v15112_v9 = vpop.eup %10920  ;;  %v8310_v49 = vsel %vm2596_vm2, %v15109_v55, 0.0  ;;  %10926 = vpow2.f32 %v8203_v37  ;;  %v8211_v57 = vmul.f32 1.442695, %v8129_v45  ;;  %v8213_v29 = vmul.f32 1.442695, %v8130_v62 }
 0x928   : > { %v15116_v2 = vpop.eup %10922  ;;  %v8304_v26 = vadd.f32 %v8303_v38, %v8302_v46  ;;  %v8311_v30 = vadd.f32 %v8310_v49, %v8309_v33  ;;  %v8312_v51 = vsel %vm2596_vm2, %v15112_v9, 0.0  ;;  %10928 = vpow2.f32 %v8205_v17 }
 0x929   : > { %v15120_v63 = vpop.eup %10924  ;;  %v8314_v11 = vsel %vm2596_vm2, %v15116_v2, 0.0  ;;  %10930 = vpow2.f32 %v8207_v32  ;;  %v8073_v3 = vmax.f32 %v8071_v36, %v8072_v31  ;;  %v8081_v58 = vsel %vm2596_vm2, %v15082_v42, -inf }
 0x92a   : > { %v8305_v16 = vrot.slane %v8304_v26, 1  ;;  %v8313_v43 = vadd.f32 %v8312_v51, %v8311_v30  ;;  %v8316_v46 = vsel %vm2596_vm2, %v15120_v63, 0.0  ;;  %10932 = vpow2.f32 %v8209_v12  ;;  %v15991_v30 = vld [vmem:[#allocation41_spill] sm:$0xff] }
 0x92b   : > { %10934 = vpow2.f32 %v8211_v57  ;;  %v8074_v56 = vrot.slane %v8073_v3, 2  ;;  %v8082_v45 = vmax.f32 %v8080_v24, %v8081_v58  ;;  %v15133_v62 = vadd.f32 %v15087_v50, %v15956_v44 }
 0x92c   : > { %v8306_v36 = vadd.f32 %v8305_v16, %v8304_v26  ;;  %v8315_v1 = vadd.f32 %v8314_v11, %v8313_v43  ;;  %10936 = vpow2.f32 %v8213_v29  ;;  %v8083_v37 = vsel %vm2596_vm2, %v15091_v18, -inf  ;;  %v15993_v43 = vld [vmem:[#allocation60_spill] sm:$0xff] }
 0x92d   : > { %v8075_v17 = vmax.f32 %v8073_v3, %v8074_v56  ;;  %v8087_v31 = vsel %vm2596_vm2, %v15133_v62, -inf  ;;  %v8084_v38 = vmax.f32 %v8082_v45, %v8083_v37  ;;  %v8383_v33 = vmul.f32 %v15027_v52, %v14840_v25  ;;  %v15990_v25 = vld [vmem:[#allocation62_spill] sm:$0xff] }
 0x92e   : > { %10938 = vrcp.f32 %v8306_v36  ;;  %v8317_v6 = vadd.f32 %v8316_v46, %v8315_v1  ;;  %v8384_v44 = vmul.f32 %v15027_v52, %v14848_v15  ;;  %v8385_v53 = vmul.f32 %v15027_v52, %v14854_v48 }
 0x92f   : > { %v8076_v24 = vrot.slane %v8075_v17, 1  ;;  %v8086_v32 = vmax.f32 %v8084_v38, %v15078_v7  ;;  %v8386_v12 = vmul.f32 %v15027_v52, %v14861_v4  ;;  %v8387_v49 = vmul.f32 %v15027_v52, %v14867_v60  ;;  %v15992_v7 = vld [vmem:[#allocation58_spill] sm:$0xff] }
 0x930   : > { %v8318_v57 = vrot.slane %v8317_v6, 4  ;;  %v8434_v29 = vpack.c.bf16 %v8384_v44, %v8383_v33  ;;  %v8388_v26 = vmul.f32 %v15027_v52, %v15990_v25  ;;  %v8392_v15 = vmul.f32 %v15105_v39, %v15991_v30 }
 0x931   : > { %v15154_v51 = vpop.eup %10926  ;;  %v8077_v48 = vmax.f32 %v8075_v17, %v8076_v24  ;;  %v8088_v11 = vmax.f32 %v8086_v32, %v8087_v31  ;;  %v8435_v3 = vpack.c.bf16 %v8386_v12, %v8385_v53  ;;  %v8393_v58 = vmul.f32 %v15105_v39, %v15992_v7 }
 0x932   : > { %v15158_v4 = vpop.eup %10928  ;;  %v8319_v16 = vadd.f32 %v8318_v57, %v8317_v6  ;;  %v8324_v60 = vsel %vm2596_vm2, %v15154_v51, 0.0  ;;  %8485 = vrot.lane.b32.xlu1 %v8434_v29, %s10999_s18  ;;  %v8436_v52 = vpack.c.bf16 %v8388_v26, %v8387_v49  ;;  %v8390_v46 = vmul.f32 %v15105_v39, %v15993_v43 }
 0x933   : > { %v15165_v56 = vpop.eup %10930  ;;  %v8325_v45 = vsel %vm2596_vm2, %v15158_v4, 0.0  ;;  %v8131_v36 = vsub.f32 %v14963_v5, %v8077_v48  ;;  %v8132_v1 = vsub.f32 %v14982_v14, %v8077_v48  ;;  %v8133_v37 = vsub.f32 %v14960_v8, %v8077_v48  ;;  %8487 = vrot.lane.b32.xlu0 %v8435_v3, %s10999_s18 }
 0x934   : > { %v15173_v17 = vpop.eup %10932  ;;  %v8320_v31 = vrot.slane %v8319_v16, 2  ;;  %v8326_v38 = vadd.f32 %v8325_v45, %v8324_v60  ;;  %v8327_v33 = vsel %vm2596_vm2, %v15165_v56, 0.0  ;;  %v8134_v6 = vsub.f32 %v14966_v10, %v8077_v48 }
 0x935   : > { %v15178_v44 = vpop.eup %10934  ;;  %v8329_v53 = vsel %vm2596_vm2, %v15173_v17, 0.0  ;;  %v8135_v24 = vsub.f32 %v14988_v35, %v8077_v48  ;;  %v8136_v32 = vsub.f32 %v15019_v28, %v8077_v48  ;;  %v8215_v12 = vmul.f32 1.442695, %v8131_v36 }
 0x936   : > { %v15184_v49 = vpop.eup %10936  ;;  %v8321_v57 = vadd.f32 %v8320_v31, %v8319_v16  ;;  %v8328_v29 = vadd.f32 %v8327_v33, %v8326_v38  ;;  %v8331_v25 = vsel %vm2596_vm2, %v15178_v44, 0.0  ;;  %v8217_v26 = vmul.f32 1.442695, %v8132_v1  ;;  %8489 = vrot.lane.b32.xlu1 %v8436_v52, %s10999_s18  ;;  %v15994_v1 = vld [vmem:[#allocation38_spill] sm:$0xff] }
 0x937   : > { %v8333_v30 = vsel %vm2596_vm2, %v15184_v49, 0.0  ;;  %10940 = vpow2.f32 %v8215_v12  ;;  %v8219_v3 = vmul.f32 1.442695, %v8133_v37  ;;  %v8221_v7 = vmul.f32 1.442695, %v8134_v6  ;;  %v15995_v37 = vld [vmem:[#allocation39_spill] sm:$0xff] }
 0x938   : > { %v10939_v60 = vpop.eup %10938  ;;  %v8322_v43 = vrot.slane %v8321_v57, 1  ;;  %v8330_v28 = vadd.f32 %v8329_v53, %v8328_v29  ;;  %10942 = vpow2.f32 %v8217_v26  ;;  %v8223_v48 = vmul.f32 1.442695, %v8135_v24  ;;  %v15996_v53 = vld [vmem:[#allocation49_spill] sm:$0xff] }
 0x939   : > { %10944 = vpow2.f32 %v8219_v3  ;;  %v8225_v16 = vmul.f32 1.442695, %v8136_v32  ;;  %v8089_v45 = vrot.slane %v8088_v11, 4  ;;  %v8438_v36 = vpack.c.bf16 %v8393_v58, %v8392_v15 }
 0x93a   : > { %v8323_v31 = vadd.f32 %v8322_v43, %v8321_v57  ;;  %v8332_v38 = vadd.f32 %v8331_v25, %v8330_v28  ;;  %10946 = vpow2.f32 %v8221_v7  ;;  %v8391_v52 = vmul.f32 %v15105_v39, %v15994_v1 }
 0x93b   : > { %10948 = vpow2.f32 %v8223_v48  ;;  %v8090_v33 = vmax.f32 %v8088_v11, %v8089_v45  ;;  %8493 = vrot.lane.b32.xlu1 %v8438_v36, %s10999_s18  ;;  %v8394_v6 = vmul.f32 %v15105_v39, %v15995_v37  ;;  %v8395_v24 = vmul.f32 %v15105_v39, %v15996_v53 }
 0x93c   : > { %10950 = vrcp.f32 %v8323_v31  ;;  %v8334_v32 = vadd.f32 %v8333_v30, %v8332_v38  ;;  %v8437_v12 = vpack.c.bf16 %v8391_v52, %v8390_v46  ;;  %v8397_v15 = vmul.f32 %v10939_v60, %v15011_v54  ;;  %v15997_v52 = vld [vmem:[#allocation10_spill] sm:$0xff] }
 0x93d   : > { %10952 = vpow2.f32 %v8225_v16  ;;  %v8091_v58 = vrot.slane %v8090_v33, 2  ;;  %v8398_v57 = vmul.f32 %v10939_v60, %v15033_v40  ;;  %v8399_v11 = vmul.f32 %v10939_v60, %v15039_v22 }
 0x93e   : > { %v8335_v29 = vrot.slane %v8334_v32, 4  ;;  %8491 = vrot.lane.b32.xlu0 %v8437_v12, %s10999_s18  ;;  %v8400_v25 = vmul.f32 %v10939_v60, %v15043_v23  ;;  %v8401_v39 = vmul.f32 %v10939_v60, %v15047_v27  ;;  %v8402_v30 = vmul.f32 %v10939_v60, %v15051_v19 }
 0x93f   : > { %v8092_v26 = vmax.f32 %v8090_v33, %v8091_v58  ;;  %v8440_v3 = vpack.c.bf16 %v8398_v57, %v8397_v15  ;;  %v8439_v7 = vpack.c.bf16 %v8395_v24, %v8394_v6 }
 0x940   : > { %v8336_v46 = vadd.f32 %v8335_v29, %v8334_v32  ;;  %v8441_v23 = vpack.c.bf16 %v8400_v25, %v8399_v11  ;;  %v8442_v60 = vpack.c.bf16 %v8402_v30, %v8401_v39 }
 0x941   : > { %v15205_v54 = vpop.eup %10940  ;;  %v8093_v43 = vrot.slane %v8092_v26, 1  ;;  %8497 = vrot.lane.b32.xlu1 %v8440_v3, %s10999_s18 }
 0x942   : > { %v15208_v40 = vpop.eup %10942  ;;  %v8337_v28 = vrot.slane %v8336_v46, 2  ;;  %v8341_v22 = vsel %vm2596_vm2, %v15205_v54, 0.0  ;;  %8495 = vrot.lane.b32.xlu0 %v8439_v7, %s10999_s18 }
 0x943   : > { %v15213_v48 = vpop.eup %10944  ;;  %v8342_v27 = vsel %vm2596_vm2, %v15208_v40, 0.0  ;;  %v8094_v19 = vmax.f32 %v8092_v26, %v8093_v43 }
 0x944   : > { %v15217_v16 = vpop.eup %10946  ;;  %v8338_v45 = vadd.f32 %v8337_v28, %v8336_v46  ;;  %v8343_v36 = vadd.f32 %v8342_v27, %v8341_v22  ;;  %v8344_v38 = vsel %vm2596_vm2, %v15213_v48, 0.0 }
 0x945   : > { %v15219_v31 = vpop.eup %10948  ;;  %v8137_v1 = vsub.f32 %v14985_v47, %v8094_v19  ;;  %v8138_v33 = vsub.f32 %v15997_v52, %v8094_v19  ;;  %v8139_v37 = vsub.f32 %v15082_v42, %v8094_v19  ;;  %8501 = vrot.lane.b32.xlu1 %v8442_v60, %s10999_s18  ;;  %v8140_v32 = vsub.f32 %v15091_v18, %v8094_v19 }
 0x946   : > { %v10951_v6 = vpop.eup %10950  ;;  %v8339_v53 = vrot.slane %v8338_v45, 1  ;;  %v8345_v24 = vadd.f32 %v8344_v38, %v8343_v36  ;;  %8499 = vrot.lane.b32.xlu0 %v8441_v23, %s10999_s18  ;;  %v8346_v15 = vsel %vm2596_vm2, %v15217_v16, 0.0  ;;  %v8141_v58 = vsub.f32 %v15070_v13, %v8094_v19 }
 0x947   : > { %v15229_v12 = vpop.eup %10952  ;;  %v8227_v57 = vmul.f32 1.442695, %v8137_v1  ;;  %v8229_v29 = vmul.f32 1.442695, %v8138_v33  ;;  %v8142_v26 = vsub.f32 %v15133_v62, %v8094_v19  ;;  %v8231_v3 = vmul.f32 1.442695, %v8139_v37 }
 0x948   : > { %v8340_v11 = vadd.f32 %v8339_v53, %v8338_v45  ;;  %v8347_v25 = vadd.f32 %v8346_v15, %v8345_v24  ;;  %v8348_v39 = vsel %vm2596_vm2, %v15219_v31, 0.0  ;;  %v8350_v30 = vsel %vm2596_vm2, %v15229_v12, 0.0 }
 0x949   : > { %10954 = vpow2.f32 %v8227_v57  ;;  %v8233_v46 = vmul.f32 1.442695, %v8140_v32  ;;  %v8406_v43 = vmul.f32 %v10951_v6, %v15109_v55  ;;  %v8407_v28 = vmul.f32 %v10951_v6, %v15112_v9 }
 0x94a   : > { %10956 = vrcp.f32 %v8340_v11  ;;  %v8349_v7 = vadd.f32 %v8348_v39, %v8347_v25  ;;  %v8235_v22 = vmul.f32 1.442695, %v8141_v58  ;;  %v8404_v23 = vmul.f32 %v10951_v6, %v15093_v21 }
 0x94b   : > { %10958 = vpow2.f32 %v8229_v29  ;;  %v8405_v62 = vmul.f32 %v10951_v6, %v15099_v20  ;;  %v8237_v19 = vmul.f32 1.442695, %v8142_v26  ;;  %v8444_v60 = vpack.c.bf16 %v8407_v28, %v8406_v43 }
 0x94c   : > { %v8351_v27 = vadd.f32 %v8350_v30, %v8349_v7  ;;  %10960 = vpow2.f32 %v8231_v3  ;;  %v8408_v36 = vmul.f32 %v10951_v6, %v15116_v2  ;;  %v8409_v38 = vmul.f32 %v10951_v6, %v15120_v63 }
 0x94d   : > { %10962 = vpow2.f32 %v8233_v46  ;;  %v8443_v45 = vpack.c.bf16 %v8405_v62, %v8404_v23  ;;  %8505 = vrot.lane.b32.xlu1 %v8444_v60, %s10999_s18 }
 0x94e   : > { %v8352_v1 = vrot.slane %v8351_v27, 4  ;;  %10964 = vpow2.f32 %v8235_v22  ;;  %v8445_v21 = vpack.c.bf16 %v8409_v38, %v8408_v36 }
 0x94f   : > { %8503 = vrot.lane.b32.xlu0 %v8443_v45, %s10999_s18  ;;  %10966 = vpow2.f32 %v8237_v19 }
 0x950   : > { %v8353_v55 = vadd.f32 %v8352_v1, %v8351_v27 }
 0x952   : > { %v8354_v20 = vrot.slane %v8353_v55, 2 }
 0x953   : > { %v10955_v9 = vpop.eup %10954  ;;  %8507 = vrot.lane.b32.xlu0 %v8445_v21, %s10999_s18 }
 0x954   : > { %v10957_v33 = vpop.eup %10956  ;;  %v8355_v37 = vadd.f32 %v8354_v20, %v8353_v55  ;;  %v8358_v53 = vsel %vm2596_vm2, %v10955_v9, 0.0 }
 0x955   : > { %v10959_v2 = vpop.eup %10958  ;;  %v8411_v63 = vmul.f32 %v10957_v33, %v15154_v51  ;;  %v8412_v6 = vmul.f32 %v10957_v33, %v15158_v4  ;;  %v8413_v24 = vmul.f32 %v10957_v33, %v15165_v56  ;;  %v8414_v32 = vmul.f32 %v10957_v33, %v15173_v17 }
 0x956   : > { %v10961_v15 = vpop.eup %10960  ;;  %v8356_v58 = vrot.slane %v8355_v37, 1  ;;  %v8359_v57 = vsel %vm2596_vm2, %v10959_v2, 0.0  ;;  %v8415_v29 = vmul.f32 %v10957_v33, %v15178_v44  ;;  %v8416_v39 = vmul.f32 %v10957_v33, %v15184_v49 }
 0x957   : > { %v10963_v11 = vpop.eup %10962  ;;  %v8360_v25 = vadd.f32 %v8359_v57, %v8358_v53  ;;  %v8446_v26 = vpack.c.bf16 %v8412_v6, %v8411_v63  ;;  %v8447_v3 = vpack.c.bf16 %v8414_v32, %v8413_v24  ;;  %v8361_v51 = vsel %vm2596_vm2, %v10961_v15, 0.0 }
 0x958   : > { %v8357_v30 = vadd.f32 %v8356_v58, %v8355_v37  ;;  %v10965_v4 = vpop.eup %10964  ;;  %v8363_v56 = vsel %vm2596_vm2, %v10963_v11, 0.0  ;;  %v8448_v7 = vpack.c.bf16 %v8416_v39, %v8415_v29 }
 0x959   : > { %v8362_v46 = vadd.f32 %v8361_v51, %v8360_v25  ;;  %8509 = vrot.lane.b32.xlu1 %v8446_v26, %s10999_s18  ;;  %8511 = vrot.lane.b32.xlu0 %v8447_v3, %s10999_s18  ;;  %v10967_v17 = vpop.eup %10966  ;;  %v8365_v43 = vsel %vm2596_vm2, %v10965_v4, 0.0  ;;  %v15998_v25 = vld [vmem:[#allocation29_spill] sm:$0xff] }
 0x95a   : > { %10968 = vrcp.f32 %v8357_v30  ;;  %v8367_v49 = vsel %vm2596_vm2, %v10967_v17, 0.0 }
 0x95b   : > { %v8364_v44 = vadd.f32 %v8363_v56, %v8362_v46 }
 0x95d   : > { %v8366_v28 = vadd.f32 %v8365_v43, %v8364_v44  ;;  %8513 = vrot.lane.b32.xlu1 %v8448_v7, %s10999_s18 }
 0x95f   : > { %v8368_v22 = vadd.f32 %v8367_v49, %v8366_v28 }
 0x961   : > { %v8369_v23 = vrot.slane %v8368_v22, 4 }
 0x963   : > { %v8370_v62 = vadd.f32 %v8369_v23, %v8368_v22 }
 0x964   : > { %v10969_v27 = vpop.eup %10968 }
 0x965   : > { %v8371_v19 = vrot.slane %v8370_v62, 2  ;;  %v8420_v60 = vmul.f32 %v10969_v27, %v15213_v48  ;;  %v8421_v45 = vmul.f32 %v10969_v27, %v15217_v16  ;;  %v8418_v36 = vmul.f32 %v10969_v27, %v15205_v54 }
 0x966   : > { %v8419_v38 = vmul.f32 %v10969_v27, %v15208_v40  ;;  %v8422_v20 = vmul.f32 %v10969_v27, %v15219_v31  ;;  %v8423_v33 = vmul.f32 %v10969_v27, %v15229_v12 }
 0x967   : > { %v8372_v1 = vadd.f32 %v8371_v19, %v8370_v62  ;;  %v8450_v55 = vpack.c.bf16 %v8421_v45, %v8420_v60 }
 0x968   : > { %v8449_v21 = vpack.c.bf16 %v8419_v38, %v8418_v36  ;;  %v8451_v48 = vpack.c.bf16 %v8423_v33, %v8422_v20 }
 0x969   : > { %v8373_v37 = vrot.slane %v8372_v1, 1  ;;  %8517 = vrot.lane.b32.xlu1 %v8450_v55, %s10999_s18  ;;  %v15999_v55 = vmov 0.0  }
 0x96a   : > { %8515 = vrot.lane.b32.xlu0 %v8449_v21, %s10999_s18  ;;  %v10523_v21 = vld [vmem:[%s15437_s5 + $0x74] sm:$0xff]  }
 0x96b   : > { %v8374_v53 = vadd.f32 %v8373_v37, %v8372_v1  ;;  %v10522_v1 = vld [vmem:[%s15437_s5 + $0x6c] sm:$0xff]   ;;  %v16000_v37 = vld [vmem:[#allocation32_spill] sm:$0xff] }
 0x96c   : > { %10364 = vmatpush3.bf16.msra.mxu0 %v10522_v1 }
 0x96d   : > { %10970 = vrcp.f32 %v8374_v53  ;;  %10365 = vmatprep.subr.bf16.mxu0 %v15999_v55 }
 0x96e   : > { %8519 = vrot.lane.b32.xlu0 %v8451_v48, %s10999_s18 }
 0x970   : > { %10366 = vmatpush3.bf16.msra.mxu0 %v10523_v21  ;;  %v16009_v21 = vld [vmem:[#allocation50_spill] sm:$0xff] }
 0x977   : > { %v10971_v54 = vpop.eup %10970 }
 0x978   : > { %v8425_v16 = vmul.f32 %v10971_v54, %v10955_v9  ;;  %v8426_v40 = vmul.f32 %v10971_v54, %v10959_v2  ;;  %v8427_v63 = vmul.f32 %v10971_v54, %v10961_v15  ;;  %v8428_v6 = vmul.f32 %v10971_v54, %v10963_v11 }
 0x979   : > { %v8429_v31 = vmul.f32 %v10971_v54, %v10965_v4  ;;  %v8430_v58 = vmul.f32 %v10971_v54, %v10967_v17 }
 0x97a   : > { %v8452_v24 = vpack.c.bf16 %v8426_v40, %v8425_v16  ;;  %v8453_v32 = vpack.c.bf16 %v8428_v6, %v8427_v63  ;;  %v16001_v16 = vld [vmem:[#allocation34_spill] sm:$0xff]  ;;  %v16002_v63 = vld [vmem:[#allocation31_spill] sm:$0xff] }
 0x97b   : > { %v8454_v12 = vpack.c.bf16 %v8430_v58, %v8429_v31 }
 0x97c   : > { %8521 = vrot.lane.b32.xlu1 %v8452_v24, %s10999_s18  ;;  %8523 = vrot.lane.b32.xlu0 %v8453_v32, %s10999_s18  ;;  %v16003_v32 = vld [vmem:[#allocation40_spill] sm:$0xff] }
 0x980   : > { %8525 = vrot.lane.b32.xlu1 %v8454_v12, %s10999_s18 }
 0x991   : > { %v8482_v57 = vpop.permute.xlu1 %8481 }
 0x994   : > { %v8480_v29 = vpop.permute.xlu0 %8479 }
 0x995   : > { %10315 = vmatprep.mubr.msk.bf16.mxu1 %vm2006_vm1, %v8480_v29 }
 0x996   : > { %10316 = vmatmul.mubr.msk.bf16.vlgmr.msra.gmra.mrb[156].mxu1 %vm2006_vm1, %v8482_v57 }
 0x998   : > { %v8484_v9 = vpop.permute.xlu0 %8483 }
 0x999   : > { %10319 = vmatprep.mubr.msk.bf16.mxu1 %vm2006_vm1, %v8484_v9 }
 0x9a4   : > { %v8486_v2 = vpop.permute.xlu1 %8485 }
 0x9a5   : > { %v7428_v15 = vpop.f32.mrb[152].mxu1  ;;  %v8488_v11 = vpop.permute.xlu0 %8487  ;;  %10320 = vmatmul.mubr.msk.bf16.gmra.mrb[160].mxu1 %vm2006_vm1, %v8486_v2 }
 0x9a6   : > { %v15280_v26 = vadd.f32 %v7428_v15, %v15998_v25  ;;  %v10261_v3 = vpop.f32.mrb[153].mxu1  ;;  %10323 = vmatprep.mubr.msk.bf16.mxu1 %vm2006_vm1, %v8488_v11  ;;  %v16004_v11 = vld [vmem:[#allocation47_spill] sm:$0xff] }
 0x9a7   : > { %v7431_v39 = vpop.f32.mrb[154].mxu1 }
 0x9a8   : > { %v10262_v30 = vpop.f32.mrb[155].mxu1  ;;  %v8490_v51 = vpop.permute.xlu1 %8489  ;;  %v16005_v39 = vld [vmem:[#allocation36_spill] sm:$0xff] }
 0x9ad   : > { %10324 = vmatmul.mubr.msk.bf16.gmra.mrb[164].mxu1 %vm2006_vm1, %v8490_v51  ;;  %v8494_v46 = vpop.permute.xlu1 %8493 }
 0x9b0   : > { %v8492_v4 = vpop.permute.xlu0 %8491 }
 0x9b1   : > { %10327 = vmatprep.mubr.msk.bf16.mxu1 %vm2006_vm1, %v8492_v4  ;;  %v16006_v4 = vld [vmem:[#allocation45_spill] sm:$0xff] }
 0x9b3   : > { %v8498_v17 = vpop.permute.xlu1 %8497 }
 0x9b4   : > { %v8496_v56 = vpop.permute.xlu0 %8495 }
 0x9b5   : > { %10328 = vmatmul.mubr.msk.bf16.gmra.mrb[168].mxu1 %vm2006_vm1, %v8494_v46 }
 0x9b6   : > { %10331 = vmatprep.mubr.msk.bf16.mxu1 %vm2006_vm1, %v8496_v56 }
 0x9b7   : > { %v8502_v43 = vpop.permute.xlu1 %8501 }
 0x9b8   : > { %v8500_v44 = vpop.permute.xlu0 %8499 }
 0x9bd   : > { %10332 = vmatmul.mubr.msk.bf16.gmra.mrb[172].mxu1 %vm2006_vm1, %v8498_v17 }
 0x9be   : > { %10335 = vmatprep.mubr.msk.bf16.mxu1 %vm2006_vm1, %v8500_v44  ;;  %v16007_v44 = vld [vmem:[#allocation42_spill] sm:$0xff] }
 0x9bf   : > { %v8506_v49 = vpop.permute.xlu1 %8505 }
 0x9c1   : > { %v8504_v7 = vpop.permute.xlu0 %8503 }
 0x9c5   : > { %10336 = vmatmul.mubr.msk.bf16.gmra.mrb[176].mxu1 %vm2006_vm1, %v8502_v43  ;;  %v8508_v28 = vpop.permute.xlu0 %8507 }
 0x9c6   : > { %10339 = vmatprep.mubr.msk.bf16.mxu1 %vm2006_vm1, %v8504_v7 }
 0x9cb   : > { %v8510_v22 = vpop.permute.xlu1 %8509  ;;  %v8512_v23 = vpop.permute.xlu0 %8511 }
 0x9cd   : > { %10340 = vmatmul.mubr.msk.bf16.gmra.mrb[180].mxu1 %vm2006_vm1, %v8506_v49 }
 0x9ce   : > { %10343 = vmatprep.mubr.msk.bf16.mxu1 %vm2006_vm1, %v8508_v28 }
 0x9cf   : > { %v8514_v62 = vpop.permute.xlu1 %8513 }
 0x9d5   : > { %10344 = vmatmul.mubr.msk.bf16.gmra.mrb[184].mxu1 %vm2006_vm1, %v8510_v22 }
 0x9d6   : > { %10347 = vmatprep.mubr.msk.bf16.mxu1 %vm2006_vm1, %v8512_v23 }
 0x9db   : > { %v8518_v60 = vpop.permute.xlu1 %8517 }
 0x9dc   : > { %v8516_v27 = vpop.permute.xlu0 %8515 }
 0x9dd   : > { %10348 = vmatmul.mubr.msk.bf16.gmra.mrb[188].mxu1 %vm2006_vm1, %v8514_v62 }
 0x9de   : > { %10351 = vmatprep.mubr.msk.bf16.mxu1 %vm2006_vm1, %v8516_v27 }
 0x9e0   : > { %v8520_v19 = vpop.permute.xlu0 %8519 }
 0x9e5   : > { %10352 = vmatmul.mubr.msk.bf16.gmra.mrb[192].mxu1 %vm2006_vm1, %v8518_v60 }
 0x9e6   : > { %10355 = vmatprep.mubr.msk.bf16.mxu1 %vm2006_vm1, %v8520_v19 }
 0x9ee   : > { %v8522_v45 = vpop.permute.xlu1 %8521  ;;  %v8524_v36 = vpop.permute.xlu0 %8523 }
 0x9ef   : > { %10356 = vmatmul.mubr.msk.bf16.gmra.mrb[196].mxu1 %vm2006_vm1, %v8522_v45  ;;  %v16008_v45 = vld [vmem:[#allocation44_spill] sm:$0xff] }
 0x9f0   : > { %10359 = vmatprep.mubr.msk.bf16.mxu1 %vm2006_vm1, %v8524_v36 }
 0x9f2   : > { %v8526_v38 = vpop.permute.xlu1 %8525 }
 0x9f7   : > { %10360 = vmatmul.mubr.msk.bf16.gmra.mrb[200].mxu1 %vm2006_vm1, %v8526_v38 }
 0xa69   : > { %v10317_v20 = vpop.f32.mrb[156].mxu1 }
 0xa6a   : > { %v8633_v33 = vpop.f32.mrb[157].mxu1  ;;  %v8826_v40 = vmul.f32 %v10317_v20, %v16001_v16 }
 0xa6b   : > { %v8824_v53 = vmul.f32 %v8633_v33, %v16000_v37  ;;  %v10318_v48 = vpop.f32.mrb[158].mxu1  ;;  %v16010_v37 = vld [vmem:[#allocation52_spill] sm:$0xff] }
 0xa6c   : > { %v8636_v54 = vpop.f32.mrb[159].mxu1  ;;  %v8827_v31 = vmul.f32 %v10318_v48, %v16003_v32  ;;  %v8875_v57 = vsel %vm3513_vm8, %v8826_v40, 0.0 }
 0xa6d   : > { %v8825_v6 = vmul.f32 %v8636_v54, %v16002_v63  ;;  %v8872_v24 = vsel %vm3513_vm8, %v8824_v53, 0.0  ;;  %v16011_v54 = vld [vmem:[#allocation48_spill] sm:$0xff] }
 0xa6e   : > { %v8877_v9 = vsel %vm3513_vm8, %v8827_v31, 0.0 }
 0xa6f   : > { %v8873_v58 = vsel %vm3513_vm8, %v8825_v6, 0.0 }
 0xa70   : > { %v8874_v12 = vadd.f32 %v8873_v58, %v8872_v24 }
 0xa72   : > { %v8876_v29 = vadd.f32 %v8875_v57, %v8874_v12  ;;  %v16012_v57 = vld [vmem:[#allocation22_spill] sm:$0xff] }
 0xa74   : > { %v8878_v2 = vadd.f32 %v8877_v9, %v8876_v29 }
 0xa78   : > { %v10321_v15 = vpop.f32.mrb[160].mxu1 }
 0xa79   : > { %v8830_v25 = vmul.f32 %v10321_v15, %v16004_v11  ;;  %v8649_v3 = vpop.f32.mrb[161].mxu1 }
 0xa7a   : > { %v8828_v30 = vmul.f32 %v8649_v3, %v16005_v39  ;;  %v10322_v51 = vpop.f32.mrb[162].mxu1  ;;  %v16014_v39 = vld [vmem:[#allocation25_spill] sm:$0xff] }
 0xa7b   : > { %v8831_v46 = vmul.f32 %v10322_v51, %v16006_v4  ;;  %v8652_v56 = vpop.f32.mrb[163].mxu1  ;;  %v8889_v43 = vsel %vm3513_vm8, %v8830_v25, 0.0  ;;  %v16013_v25 = vld [vmem:[#allocation18_spill] sm:$0xff] }
 0xa7c   : > { %v8879_v17 = vsel %vm3513_vm8, %v8828_v30, 0.0  ;;  %v8829_v7 = vmul.f32 %v8652_v56, %v16007_v44 }
 0xa7d   : > { %v8880_v28 = vadd.f32 %v8879_v17, %v8878_v2  ;;  %v8890_v49 = vsel %vm3513_vm8, %v8831_v46, 0.0  ;;  %v16015_v46 = vld [vmem:[#allocation19_spill] sm:$0xff] }
 0xa7e   : > { %v8891_v22 = vadd.f32 %v8890_v49, %v8889_v43  ;;  %v8881_v23 = vsel %vm3513_vm8, %v8829_v7, 0.0 }
 0xa7f   : > { %v8882_v62 = vadd.f32 %v8881_v23, %v8880_v28 }
 0xa80   : > { %v10325_v27 = vpop.f32.mrb[164].mxu1 }
 0xa81   : > { %v8883_v19 = vrot.slane %v8882_v62, 4  ;;  %v8665_v60 = vpop.f32.mrb[165].mxu1  ;;  %v8834_v20 = vmul.f32 %v10325_v27, %v16009_v21 }
 0xa82   : > { %v8832_v36 = vmul.f32 %v8665_v60, %v16008_v45  ;;  %v10326_v38 = vpop.f32.mrb[166].mxu1  ;;  %v16017_v45 = vld [vmem:[#allocation23_spill] sm:$0xff] }
 0xa83   : > { %v8884_v1 = vadd.f32 %v8883_v19, %v8882_v62  ;;  %v8668_v55 = vpop.f32.mrb[167].mxu1  ;;  %v8835_v16 = vmul.f32 %v10326_v38, %v16011_v54  ;;  %v8896_v24 = vsel %vm3513_vm8, %v8834_v20, 0.0  ;;  %v16016_v62 = vld [vmem:[#allocation26_spill] sm:$0xff]  ;;  %v16018_v20 = vld [vmem:[#allocation24_spill] sm:$0xff] }
 0xa84   : > { %v8892_v33 = vsel %vm3513_vm8, %v8832_v36, 0.0  ;;  %v8833_v53 = vmul.f32 %v8668_v55, %v16010_v37 }
 0xa85   : > { %v8893_v48 = vadd.f32 %v8892_v33, %v8891_v22  ;;  %v8885_v63 = vrot.slane %v8884_v1, 2  ;;  %v8898_v12 = vsel %vm3513_vm8, %v8835_v16, 0.0 }
 0xa86   : > { %v8894_v40 = vsel %vm3513_vm8, %v8833_v53, 0.0 }
 0xa87   : > { %v8895_v6 = vadd.f32 %v8894_v40, %v8893_v48  ;;  %v8886_v2 = vadd.f32 %v8885_v63, %v8884_v1  ;;  %v16019_v48 = vld [vmem:[#allocation27_spill] sm:$0xff] }
 0xa88   : > { %v10329_v32 = vpop.f32.mrb[168].mxu1 }
 0xa89   : > { %v8897_v31 = vadd.f32 %v8896_v24, %v8895_v6  ;;  %v8681_v58 = vpop.f32.mrb[169].mxu1  ;;  %v8838_v3 = vmul.f32 %v10329_v32, %v16013_v25  ;;  %v8887_v44 = vrot.slane %v8886_v2, 1 }
 0xa8a   : > { %v8836_v29 = vmul.f32 %v8681_v58, %v16012_v57  ;;  %v10330_v9 = vpop.f32.mrb[170].mxu1 }
 0xa8b   : > { %v8899_v15 = vadd.f32 %v8898_v12, %v8897_v31  ;;  %v8684_v11 = vpop.f32.mrb[171].mxu1  ;;  %v8839_v56 = vmul.f32 %v10330_v9, %v16015_v46  ;;  %v8909_v28 = vsel %vm3513_vm8, %v8838_v3, 0.0  ;;  %v8888_v1 = vadd.f32 %v8887_v44, %v8886_v2 }
 0xa8c   : > { %v8837_v30 = vmul.f32 %v8684_v11, %v16014_v39  ;;  %v8906_v4 = vsel %vm3513_vm8, %v8836_v29, 0.0 }
 0xa8d   : > { %v8900_v51 = vrot.slane %v8899_v15, 4  ;;  %v8911_v60 = vsel %vm3513_vm8, %v8839_v56, 0.0  ;;  %v9012_v31 = vpack.c.bf16 %v8888_v1, %v8888_v1 }
 0xa8e   : > { %v8907_v17 = vsel %vm3513_vm8, %v8837_v30, 0.0 }
 0xa8f   : > { %v8901_v7 = vadd.f32 %v8900_v51, %v8899_v15  ;;  %v8908_v43 = vadd.f32 %v8907_v17, %v8906_v4  ;;  %v16020_v15 = vld [vmem:[#allocation30_spill] sm:$0xff]  ;;  %v9028_v3 = vunpack.c.l.b16 %v9012_v31  ;;  %v16021_v4 = vld [vmem:[#allocation53_spill] sm:$0xff] }
 0xa90   : > { %v10333_v49 = vpop.f32.mrb[172].mxu1  ;;  %v16022_v17 = vld [vmem:[#allocation54_spill] sm:$0xff] }
 0xa91   : > { %v8902_v22 = vrot.slane %v8901_v7, 2  ;;  %v8910_v23 = vadd.f32 %v8909_v28, %v8908_v43  ;;  %v8842_v27 = vmul.f32 %v10333_v49, %v16016_v62  ;;  %v8697_v19 = vpop.f32.mrb[173].mxu1  ;;  %v16023_v49 = vld [vmem:[#allocation56_spill] sm:$0xff] }
 0xa92   : > { %v8840_v36 = vmul.f32 %v8697_v19, %v16017_v45  ;;  %v10334_v38 = vpop.f32.mrb[174].mxu1 }
 0xa93   : > { %v8903_v55 = vadd.f32 %v8902_v22, %v8901_v7  ;;  %v8912_v21 = vadd.f32 %v8911_v60, %v8910_v23  ;;  %v8843_v33 = vmul.f32 %v10334_v38, %v16018_v20  ;;  %v8700_v37 = vpop.f32.mrb[175].mxu1  ;;  %v8923_v40 = vsel %vm3513_vm8, %v8842_v27, 0.0 }
 0xa94   : > { %v8913_v53 = vsel %vm3513_vm8, %v8840_v36, 0.0  ;;  %v8841_v54 = vmul.f32 %v8700_v37, %v16019_v48  ;;  %v16025_v48 = vld [vmem:[#allocation57_spill] sm:$0xff] }
 0xa95   : > { %v8904_v16 = vrot.slane %v8903_v55, 1  ;;  %v8914_v63 = vadd.f32 %v8913_v53, %v8912_v21  ;;  %v8924_v6 = vsel %vm3513_vm8, %v8843_v33, 0.0 }
 0xa96   : > { %v8925_v24 = vadd.f32 %v8924_v6, %v8923_v40  ;;  %v8915_v32 = vsel %vm3513_vm8, %v8841_v54, 0.0 }
 0xa97   : > { %v8905_v58 = vadd.f32 %v8904_v16, %v8903_v55  ;;  %v8916_v12 = vadd.f32 %v8915_v32, %v8914_v63  ;;  %v16024_v55 = vld [vmem:[#allocation59_spill] sm:$0xff]  ;;  %v16026_v16 = vld [vmem:[#allocation61_spill] sm:$0xff] }
 0xa98   : > { %v10337_v57 = vpop.f32.mrb[176].mxu1  ;;  %v16027_v32 = vld [vmem:[#allocation35_spill] sm:$0xff] }
 0xa99   : > { %v9013_v29 = vpack.c.bf16 %v8905_v58, %v8905_v58  ;;  %v8917_v9 = vrot.slane %v8916_v12, 4  ;;  %v8713_v2 = vpop.f32.mrb[177].mxu1  ;;  %v8846_v46 = vmul.f32 %v10337_v57, %v16021_v4 }
 0xa9a   : > { %v8844_v11 = vmul.f32 %v8713_v2, %v16020_v15  ;;  %v10338_v25 = vpop.f32.mrb[178].mxu1 }
 0xa9b   : > { %v9029_v39 = vunpack.c.l.b16 %v9013_v29  ;;  %v8918_v30 = vadd.f32 %v8917_v9, %v8916_v12  ;;  %v8716_v51 = vpop.f32.mrb[179].mxu1  ;;  %v8847_v22 = vmul.f32 %v10338_v25, %v16023_v49  ;;  %v8930_v19 = vsel %vm3513_vm8, %v8846_v46, 0.0  ;;  %v16029_v49 = vld [vmem:[#allocation37_spill] sm:$0xff] }
 0xa9c   : > { %v8926_v56 = vsel %vm3513_vm8, %v8844_v11, 0.0  ;;  %v8845_v44 = vmul.f32 %v8716_v51, %v16022_v17  ;;  %v16028_v51 = vld [vmem:[#allocation33_spill] sm:$0xff] }
 0xa9d   : > { %v8919_v7 = vrot.slane %v8918_v30, 2  ;;  %v9036_v43 = vsel %vm3678_vm9, %v9029_v39, %v9028_v3  ;;  %v8927_v28 = vadd.f32 %v8926_v56, %v8925_v24  ;;  %v8932_v1 = vsel %vm3513_vm8, %v8847_v22, 0.0 }
 0xa9e   : > { %v8928_v23 = vsel %vm3513_vm8, %v8845_v44, 0.0 }
 0xa9f   : > { %v8920_v62 = vadd.f32 %v8919_v7, %v8918_v30  ;;  %v8929_v27 = vadd.f32 %v8928_v23, %v8927_v28 }
 0xaa0   : > { %v10341_v60 = vpop.f32.mrb[180].mxu1 }
 0xaa1   : > { %v8921_v45 = vrot.slane %v8920_v62, 1  ;;  %v8931_v36 = vadd.f32 %v8930_v19, %v8929_v27  ;;  %v8729_v38 = vpop.f32.mrb[181].mxu1  ;;  %v8850_v54 = vmul.f32 %v10341_v60, %v16025_v48 }
 0xaa2   : > { %v8848_v21 = vmul.f32 %v8729_v38, %v16024_v55  ;;  %v10342_v20 = vpop.f32.mrb[182].mxu1 }
 0xaa3   : > { %v8922_v33 = vadd.f32 %v8921_v45, %v8920_v62  ;;  %v8933_v37 = vadd.f32 %v8932_v1, %v8931_v36  ;;  %v8732_v53 = vpop.f32.mrb[183].mxu1  ;;  %v8851_v31 = vmul.f32 %v10342_v20, %v16027_v32  ;;  %v8943_v9 = vsel %vm3513_vm8, %v8850_v54, 0.0 }
 0xaa4   : > { %v8849_v40 = vmul.f32 %v8732_v53, %v16026_v16  ;;  %v8940_v24 = vsel %vm3513_vm8, %v8848_v21, 0.0 }
 0xaa5   : > { %v9014_v63 = vpack.c.bf16 %v8922_v33, %v8922_v33  ;;  %v8934_v6 = vrot.slane %v8933_v37, 4  ;;  %v8945_v30 = vsel %vm3513_vm8, %v8851_v31, 0.0 }
 0xaa6   : > { %v8941_v58 = vsel %vm3513_vm8, %v8849_v40, 0.0 }
 0xaa7   : > { %v9030_v12 = vunpack.c.l.b16 %v9014_v63  ;;  %v8935_v57 = vadd.f32 %v8934_v6, %v8933_v37  ;;  %v8942_v29 = vadd.f32 %v8941_v58, %v8940_v24  ;;  %v16030_v6 = vld [vmem:[#allocation51_spill] sm:$0xff] }
 0xaa8   : > { %v10345_v2 = vpop.f32.mrb[184].mxu1 }
 0xaa9   : > { %v9037_v15 = vsel %vm3680_vm10, %v9030_v12, %v9036_v43  ;;  %v8936_v11 = vrot.slane %v8935_v57, 2  ;;  %v8944_v25 = vadd.f32 %v8943_v9, %v8942_v29  ;;  %v8854_v3 = vmul.f32 %v10345_v2, %v14865_v34  ;;  %v8745_v39 = vpop.f32.mrb[185].mxu1 }
 0xaaa   : > { %v8852_v4 = vmul.f32 %v8745_v39, %v16028_v51  ;;  %v10346_v46 = vpop.f32.mrb[186].mxu1 }
 0xaab   : > { %v8937_v56 = vadd.f32 %v8936_v11, %v8935_v57  ;;  %v8946_v17 = vadd.f32 %v8945_v30, %v8944_v25  ;;  %v8855_v44 = vmul.f32 %v10346_v46, %v14884_v0  ;;  %v8748_v7 = vpop.f32.mrb[187].mxu1  ;;  %v8957_v23 = vsel %vm3513_vm8, %v8854_v3, 0.0 }
 0xaac   : > { %v8947_v28 = vsel %vm3513_vm8, %v8852_v4, 0.0  ;;  %v8853_v22 = vmul.f32 %v8748_v7, %v16029_v49 }
 0xaad   : > { %v8938_v43 = vrot.slane %v8937_v56, 1  ;;  %v8948_v62 = vadd.f32 %v8947_v28, %v8946_v17  ;;  %v8958_v34 = vsel %vm3513_vm8, %v8855_v44, 0.0 }
 0xaae   : > { %v8959_v27 = vadd.f32 %v8958_v34, %v8957_v23  ;;  %v8949_v19 = vsel %vm3513_vm8, %v8853_v22, 0.0 }
 0xaaf   : > { %v8939_v60 = vadd.f32 %v8938_v43, %v8937_v56  ;;  %v8950_v45 = vadd.f32 %v8949_v19, %v8948_v62 }
 0xab0   : > { %v10349_v36 = vpop.f32.mrb[188].mxu1 }
 0xab1   : > { %v9015_v38 = vpack.c.bf16 %v8939_v60, %v8939_v60  ;;  %v8951_v1 = vrot.slane %v8950_v45, 4  ;;  %v8761_v0 = vpop.f32.mrb[189].mxu1  ;;  %v8858_v53 = vmul.f32 %v10349_v36, %v14896_v41 }
 0xab2   : > { %v8856_v55 = vmul.f32 %v8761_v0, %v14903_v61  ;;  %v10350_v21 = vpop.f32.mrb[190].mxu1 }
 0xab3   : > { %v9031_v20 = vunpack.c.l.b16 %v9015_v38  ;;  %v8952_v33 = vadd.f32 %v8951_v1, %v8950_v45  ;;  %v8764_v37 = vpop.f32.mrb[191].mxu1  ;;  %v8859_v24 = vmul.f32 %v10350_v21, %v16030_v6  ;;  %v8964_v58 = vsel %vm3513_vm8, %v8858_v53, 0.0  ;;  %v16031_v38 = vld [vmem:[#allocation43_spill] sm:$0xff] }
 0xab4   : > { %v8960_v48 = vsel %vm3513_vm8, %v8856_v55, 0.0  ;;  %v8857_v54 = vmul.f32 %v8764_v37, %v14913_v59 }
 0xab5   : > { %v8953_v16 = vrot.slane %v8952_v33, 2  ;;  %v9038_v40 = vsel %vm3682_vm11, %v9031_v20, %v9037_v15  ;;  %v8961_v63 = vadd.f32 %v8960_v48, %v8959_v27  ;;  %v8966_v9 = vsel %vm3513_vm8, %v8859_v24, 0.0 }
 0xab6   : > { %v8962_v32 = vsel %vm3513_vm8, %v8857_v54, 0.0 }
 0xab7   : > { %v8954_v31 = vadd.f32 %v8953_v16, %v8952_v33  ;;  %v8963_v61 = vadd.f32 %v8962_v32, %v8961_v63 }
 0xab8   : > { %v10353_v12 = vpop.f32.mrb[192].mxu1 }
 0xab9   : > { %v8955_v57 = vrot.slane %v8954_v31, 1  ;;  %v8965_v29 = vadd.f32 %v8964_v58, %v8963_v61  ;;  %v8777_v41 = vpop.f32.mrb[193].mxu1  ;;  %v8862_v3 = vmul.f32 %v10353_v12, %v14960_v8 }
 0xaba   : > { %v8860_v59 = vmul.f32 %v8777_v41, %v14963_v5  ;;  %v10354_v2 = vpop.f32.mrb[194].mxu1 }
 0xabb   : > { %v8956_v11 = vadd.f32 %v8955_v57, %v8954_v31  ;;  %v8967_v15 = vadd.f32 %v8966_v9, %v8965_v29  ;;  %v8780_v25 = vpop.f32.mrb[195].mxu1  ;;  %v8863_v46 = vmul.f32 %v10354_v2, %v14966_v10  ;;  %v8977_v5 = vsel %vm3513_vm8, %v8862_v3, 0.0 }
 0xabc   : > { %v8861_v39 = vmul.f32 %v8780_v25, %v14982_v14  ;;  %v8974_v4 = vsel %vm3513_vm8, %v8860_v59, 0.0 }
 0xabd   : > { %v9016_v30 = vpack.c.bf16 %v8956_v11, %v8956_v11  ;;  %v8968_v51 = vrot.slane %v8967_v15, 4  ;;  %v8979_v8 = vsel %vm3513_vm8, %v8863_v46, 0.0 }
 0xabe   : > { %v8975_v56 = vsel %vm3513_vm8, %v8861_v39, 0.0 }
 0xabf   : > { %v9032_v17 = vunpack.c.l.b16 %v9016_v30  ;;  %v8969_v44 = vadd.f32 %v8968_v51, %v8967_v15  ;;  %v8976_v7 = vadd.f32 %v8975_v56, %v8974_v4 }
 0xac1   : > { %v9039_v28 = vsel %vm3684_vm12, %v9032_v17, %v9038_v40  ;;  %v8970_v49 = vrot.slane %v8969_v44, 2  ;;  %v8978_v22 = vadd.f32 %v8977_v5, %v8976_v7  ;;  %v9100_v5 = vld [vmem:[%s15437_s5 + $0x7c] sm:$0x1] }
 0xac2   : > { %v10357_v14 = vpop.f32.mrb[196].mxu1 }
 0xac3   : > { %v8971_v43 = vadd.f32 %v8970_v49, %v8969_v44  ;;  %v8866_v23 = vmul.f32 %v10357_v14, %v14985_v47  ;;  %v8793_v62 = vpop.f32.mrb[197].mxu1  ;;  %v8980_v34 = vadd.f32 %v8979_v8, %v8978_v22  ;;  %v16032_v49 = vld [vmem:[#allocation5_spill] sm:$0xff] }
 0xac4   : > { %v8864_v10 = vmul.f32 %v8793_v62, %v14988_v35  ;;  %v10358_v27 = vpop.f32.mrb[198].mxu1  ;;  %v9104_v22 = vsub.s32 0, %v16032_v49 }
 0xac5   : > { %v8972_v19 = vrot.slane %v8971_v43, 1  ;;  %v8867_v60 = vmul.f32 %v10358_v27, %v15997_v52  ;;  %v8796_v45 = vpop.f32.mrb[199].mxu1  ;;  %v8991_v55 = vsel %vm3513_vm8, %v8866_v23, 0.0 }
 0xac6   : > { %v8981_v36 = vsel %vm3513_vm8, %v8864_v10, 0.0  ;;  %v8865_v1 = vmul.f32 %v8796_v45, %v16031_v38 }
 0xac7   : > { %v8973_v0 = vadd.f32 %v8972_v19, %v8971_v43  ;;  %v8982_v21 = vadd.f32 %v8981_v36, %v8980_v34  ;;  %v8992_v20 = vsel %vm3513_vm8, %v8867_v60, 0.0 }
 0xac8   : > { %v8993_v47 = vadd.f32 %v8992_v20, %v8991_v55  ;;  %v8983_v33 = vsel %vm3513_vm8, %v8865_v1, 0.0 }
 0xac9   : > { %v9017_v37 = vpack.c.bf16 %v8973_v0, %v8973_v0  ;;  %v8984_v35 = vadd.f32 %v8983_v33, %v8982_v21 }
 0xaca   : > { %v10361_v53 = vpop.f32.mrb[200].mxu1 }
 0xacb   : > { %v9033_v48 = vunpack.c.l.b16 %v9017_v37  ;;  %v8985_v54 = vrot.slane %v8984_v35, 4  ;;  %v8809_v52 = vpop.f32.mrb[201].mxu1  ;;  %v8870_v32 = vmul.f32 %v10361_v53, %v15070_v13 }
 0xacc   : > { %v8868_v16 = vmul.f32 %v8809_v52, %v15082_v42  ;;  %v10362_v40 = vpop.f32.mrb[202].mxu1 }
 0xacd   : > { %v8986_v63 = vadd.f32 %v8985_v54, %v8984_v35  ;;  %v9040_v6 = vsel %vm3686_vm13, %v9033_v48, %v9039_v28  ;;  %v8812_v24 = vpop.f32.mrb[203].mxu1  ;;  %v8871_v57 = vmul.f32 %v10362_v40, %v15087_v50  ;;  %v8998_v42 = vsel %vm3513_vm8, %v8870_v32, 0.0 }
 0xace   : > { %v8994_v31 = vsel %vm3513_vm8, %v8868_v16, 0.0  ;;  %v8869_v61 = vmul.f32 %v8812_v24, %v15091_v18  ;;  %v9101_v28 = vunpack.c.l.bf16 %v9100_v5 }
 0xacf   : > { %v8987_v58 = vrot.slane %v8986_v63, 2  ;;  %v8995_v12 = vadd.f32 %v8994_v31, %v8993_v47  ;;  %v9000_v11 = vsel %vm3513_vm8, %v8871_v57, 0.0 }
 0xad0   : > { %v8996_v29 = vsel %vm3513_vm8, %v8869_v61, 0.0  ;;  %v9105_v8 = vrot.slane %v9101_v28, %v9104_v22 }
 0xad1   : > { %v8988_v41 = vadd.f32 %v8987_v58, %v8986_v63  ;;  %v8997_v9 = vadd.f32 %v8996_v29, %v8995_v12 }
 0xad3   : > { %v8989_v59 = vrot.slane %v8988_v41, 1  ;;  %v8999_v2 = vadd.f32 %v8998_v42, %v8997_v9 }
 0xad5   : > { %v8990_v15 = vadd.f32 %v8989_v59, %v8988_v41  ;;  %v9001_v13 = vadd.f32 %v9000_v11, %v8999_v2 }
 0xad7   : > { %v9018_v25 = vpack.c.bf16 %v8990_v15, %v8990_v15  ;;  %v9002_v3 = vrot.slane %v9001_v13, 4 }
 0xad9   : > { %v9034_v39 = vunpack.c.l.b16 %v9018_v25  ;;  %v9003_v18 = vadd.f32 %v9002_v3, %v9001_v13 }
 0xadb   : > { %v9041_v30 = vsel %vm3688_vm14, %v9034_v39, %v9040_v6  ;;  %v9004_v51 = vrot.slane %v9003_v18, 2 }
 0xadd   : > { %v9005_v50 = vadd.f32 %v9004_v51, %v9003_v18 }
 0xadf   : > { %v9006_v4 = vrot.slane %v9005_v50, 1 }
 0xae1   : > { %v9007_v46 = vadd.f32 %v9006_v4, %v9005_v50 }
 0xae3   : > { %v9019_v56 = vpack.c.bf16 %v9007_v46, %v9007_v46 }
 0xae5   : > { %v9035_v17 = vunpack.c.l.b16 %v9019_v56 }
 0xae7   : > { %v9042_v44 = vsel %vm3690_vm15, %v9035_v17, %v9041_v30 }
 0xae8   : > { %v9043_v7 = vpack.c.b16 %v9042_v44, %v9042_v44 }
 0xaea   : > { %10368 = vmatmul.mubr.msk.bf16.vlgmr.msra.gmra.mrb[200].mxu0 %vm3513_vm8, %v9043_v7 }
 0xbbd   : > { %v9093_v14 = vpop.f32.mrb[200].mxu0 }
 0xbbe   : > { %v9099_v43 = vadd.f32 %v9093_v14, %v15280_v26  ;;  %v10369_v23 = vpop.f32.mrb[201].mxu0 }
 0xbbf   : > { %v9096_v62 = vpop.f32.mrb[202].mxu0 }
 0xbc0   : > { %v9106_v34 = vadd.f32 %v9105_v8, %v9099_v43  ;;  %v10370_v10 = vpop.f32.mrb[203].mxu0 }
 0xbc2   : > { %9107 = vst [vmem:[%s1586_s27] sm:$0xff] %v9106_v34 }
 0xbc3 PF: > { %p13_p9 = scmp.ge.s32.totalorder %s11055_s25, 4   ;;  %s16033_s21 = smov %s10992_s22 }
 0xbc4   : > { %s16034_s22 = smov %s11064_s28  ;;  %s16035_s23 = smov %s11055_s25 }
 0xbc5   :  { %15 = sbr.rel (!%p13_p9) target bundleno = 2 (0x2), region = 224 }

</bundles_post_ra>
